<compile_context>
chip_gen: v6e
topology: v6e:2x2x1
jax: 0.10.0
libtpu: 0.0.40
codegen_flags: <defaults>
</compile_context>

<pallas_src>
import functools

import jax
import jax.numpy as jnp
from jax import lax
from jax.experimental import pallas as pl
from jax.experimental.pallas import tpu as pltpu


def _band_weights(w, out_w, padded_w):
    """Banded (Toeplitz-along-W) form of a conv weight, for MXU matmuls.

    w: (C_out, C_in, KH, KW) f32.  Returns band of shape
    (C_in*KH, padded_w, C_out*out_w) with
        band[ci*KH + kh, wp, co*out_w + wo] = w[co, ci, kh, wp - wo]
    when 0 <= wp - wo < KW, else 0, so that
        conv(x)[co, h, wo] = sum_{ci,kh} x_pad[ci, h+kh, :] @ band[ci*KH+kh, :, co*out_w+wo]
    (x_pad padded by (KW-1)//2 on each side, stride 1, "same" output).
    """
    c_out, c_in, kh_, kw_ = w.shape
    wp = jnp.arange(padded_w)[:, None]              # (Wp, 1)
    wo = jnp.arange(out_w)[None, :]                 # (1, Wo)
    kw_idx = wp - wo                                # (Wp, Wo)
    valid = (kw_idx >= 0) & (kw_idx < kw_)
    kw_c = jnp.clip(kw_idx, 0, kw_ - 1)
    wt = jnp.transpose(w, (1, 2, 0, 3)).astype(jnp.float32)   # (C_in, KH, C_out, KW)
    band = wt[:, :, :, kw_c]                                   # (C_in, KH, C_out, Wp, Wo)
    band = jnp.where(valid[None, None, None], band, 0.0)
    band = jnp.transpose(band, (0, 1, 3, 2, 4))                # (C_in, KH, Wp, C_out, Wo)
    return band.reshape(c_in * kh_, padded_w, c_out * out_w)


def _adaconv_kernel(x_ref, m_ref, bm_ref, bmb_ref, bx_ref, bxb_ref,
                    a2w_ref, a2b_ref, xo_ref, mo_ref, conv_ref,
                    *, in_ch, out_ch, mask_in_ch, mask_out_ch, n_feat,
                    K, H, W, B_blk):
    K2 = 2 * K - 1
    PU = (K - 1) // 2
    f32 = jnp.float32
    dot = functools.partial(jnp.dot, preferred_element_type=jnp.float32,
                            precision=lax.Precision.HIGHEST)

    # The halo ring of the conv-output scratch stays zero for the whole grid
    # step (nn.Unfold zero-pads the conv OUTPUT); the interior is overwritten
    # for every image.  Zeroed every grid step (each megacore owns its scratch).
    conv_ref[...] = jnp.zeros_like(conv_ref)

    for b in range(B_blk):
        xp = x_ref[b]          # (in_ch,      H+2*PU,   W+2*PU)
        mp = m_ref[b]          # (mask_in_ch, H+K2-1,   W+K2-1)

        # ---- 9x9 mask branch (adaptive-weight trunk + mask_transform) on the
        #      MXU: mask_in_ch*K2 banded matmuls, contraction over padded W.
        acc_m = None
        for j in range(mask_in_ch * K2):
            ic, kh = divmod(j, K2)
            d = dot(mp[ic, kh:kh + H, :], bm_ref[j])   # (H, (n_feat+mask_out_ch)*W)
            acc_m = d if acc_m is None else acc_m + d
        acc_m = acc_m + bmb_ref[...]                   # per-column bias

        # mask_transform output (packed in the trailing columns).
        for c in range(mask_out_ch):
            lo = (n_feat + c) * W
            mo_ref[b, c] = acc_m[:, lo:lo + W].astype(mo_ref.dtype)

        # LeakyReLU(0.01) on the adaptive-weight trunk, split per feature plane.
        h1b = acc_m[:, :n_feat * W]
        h1b = jnp.where(h1b > 0, h1b, 0.01 * h1b)
        h1 = [h1b[:, f * W:(f + 1) * W] for f in range(n_feat)]

        # ---- main KxK conv on the MXU (interior only), then zero-halo padded
        #      by writing into the pre-zeroed scratch.
        acc_x = None
        for j in range(in_ch * K):
            ic, kh = divmod(j, K)
            d = dot(xp[ic, kh:kh + H, :], bx_ref[j])   # (H, out_ch*W)
            acc_x = d if acc_x is None else acc_x + d
        acc_x = acc_x + bxb_ref[...]
        for oc in range(out_ch):
            conv_ref[oc, PU:PU + H, PU:PU + W] = acc_x[:, oc * W:(oc + 1) * W]

        # ---- fused 1x1 conv + adaptive combine: the K*K weight maps are never
        #      materialised; live set is ~n_feat + out_ch + 1 planes.
        out_acc = [None] * out_ch
        for k2 in range(K * K):
            kh, kw = divmod(k2, K)
            wm = jnp.full((H, W), a2b_ref[k2], f32)
            for f in range(n_feat):
                wm = wm + a2w_ref[k2 * n_feat + f] * h1[f]
            for oc in range(out_ch):
                contrib = wm * conv_ref[oc, kh:kh + H, kw:kw + W]
                out_acc[oc] = contrib if out_acc[oc] is None else out_acc[oc] + contrib
        for oc in range(out_ch):
            xo_ref[b, oc] = out_acc[oc].astype(xo_ref.dtype)


def adaconv_forward(x, mask, params, *, kernel_size=5):
    K = kernel_size
    assert K % 2 == 1, "odd kernel_size assumed (module default 5)"
    # stride=1 assumed (module default): see note at top of file.
    K2 = 2 * K - 1
    PU = (K - 1) // 2            # main-conv / unfold padding
    PM = K - 1                   # (2K-1)x(2K-1) mask-branch padding

    B, in_ch, H, W = x.shape
    _, mask_in_ch, _, _ = mask.shape
    out_ch = params['conv_b'].shape[0]
    mask_out_ch = params['mt_b'].shape[0]
    n_feat = params['aw1_b'].shape[0]

    x_pad = jnp.pad(x, ((0, 0), (0, 0), (PU, PU), (PU, PU))).astype(jnp.float32)
    m_pad = jnp.pad(mask, ((0, 0), (0, 0), (PM, PM), (PM, PM))).astype(jnp.float32)
    HX, WX = H + 2 * PU, W + 2 * PU
    HM, WM = H + 2 * PM, W + 2 * PM

    # Banded weight matrices + packed bias rows (weight preprocessing in JAX).
    w_cat = jnp.concatenate([params['aw1_w'], params['mt_w']], axis=0)
    band_m = _band_weights(w_cat.astype(jnp.float32), W, WM)
    bias_m = jnp.repeat(jnp.concatenate([params['aw1_b'], params['mt_b']]),
                        W).reshape(1, -1).astype(jnp.float32)
    band_x = _band_weights(params['conv_w'].astype(jnp.float32), W, WX)
    bias_x = jnp.repeat(params['conv_b'], W).reshape(1, -1).astype(jnp.float32)

    a2w = params['aw2_w'].reshape(-1).astype(jnp.float32)     # (K*K*n_feat,)
    a2b = params['aw2_b'].reshape(-1).astype(jnp.float32)     # (K*K,)

    # Keep >= 2 parallel grid steps (two v7x TensorCores) while amortising the
    # ~0.35us per-step overhead over several images when the batch allows it.
    B_blk = B // 2 if (B >= 4 and B % 2 == 0) else 1
    assert B % B_blk == 0
    grid = (B // B_blk,)

    ncols_m = (n_feat + mask_out_ch) * W
    ncols_x = out_ch * W

    kernel = functools.partial(
        _adaconv_kernel, in_ch=in_ch, out_ch=out_ch, mask_in_ch=mask_in_ch,
        mask_out_ch=mask_out_ch, n_feat=n_feat, K=K, H=H, W=W, B_blk=B_blk)

    smem = pl.BlockSpec(memory_space=pltpu.MemorySpace.SMEM)

    # Explicit VMEM budget: double-buffered activation blocks + resident banded
    # weights + conv scratch, with 4x headroom, capped well inside v7x's 64 MiB.
    block_bytes = 4 * (
        2 * B_blk * (in_ch * HX * WX + mask_in_ch * HM * WM
                     + out_ch * H * W + mask_out_ch * H * W)
        + 2 * (mask_in_ch * K2 * WM * ncols_m + in_ch * K * WX * ncols_x
               + ncols_m + ncols_x)
        + out_ch * HX * WX)
    vmem_limit = int(min(max(4 * block_bytes, 8 * 2**20), 48 * 2**20))

    return pl.pallas_call(
        kernel,
        out_shape=(jax.ShapeDtypeStruct((B, out_ch, H, W), jnp.float32),
                   jax.ShapeDtypeStruct((B, mask_out_ch, H, W), jnp.float32)),
        grid=grid,
        in_specs=[
            pl.BlockSpec((B_blk, in_ch, HX, WX), lambda i: (i, 0, 0, 0)),
            pl.BlockSpec((B_blk, mask_in_ch, HM, WM), lambda i: (i, 0, 0, 0)),
            pl.BlockSpec((mask_in_ch * K2, WM, ncols_m), lambda i: (0, 0, 0)),
            pl.BlockSpec((1, ncols_m), lambda i: (0, 0)),
            pl.BlockSpec((in_ch * K, WX, ncols_x), lambda i: (0, 0, 0)),
            pl.BlockSpec((1, ncols_x), lambda i: (0, 0)),
            smem, smem,
        ],
        out_specs=(
            pl.BlockSpec((B_blk, out_ch, H, W), lambda i: (i, 0, 0, 0)),
            pl.BlockSpec((B_blk, mask_out_ch, H, W), lambda i: (i, 0, 0, 0)),
        ),
        scratch_shapes=[pltpu.VMEM((out_ch, HX, WX), jnp.float32)],
        compiler_params=pltpu.CompilerParams(
            dimension_semantics=("parallel",),
            vmem_limit_bytes=vmem_limit),
    )(x_pad, m_pad, band_m, bias_m, band_x, bias_x, a2w, a2b)


def adaconv_reference(x, mask, params, *, kernel_size=5):
    """Pure-JAX reference mirroring the PyTorch forward."""
    K = kernel_size
    PU = (K - 1) // 2
    PM = K - 1
    dn = ('NCHW', 'OIHW', 'NCHW')
    prec = lax.Precision.HIGHEST

    def conv(inp, w, b, pad):
        o = lax.conv_general_dilated(inp, w, (1, 1), [(pad, pad), (pad, pad)],
                                     dimension_numbers=dn, precision=prec)
        return o + b[None, :, None, None]

    h = conv(mask, params['aw1_w'], params['aw1_b'], PM)
    h = jnp.where(h > 0, h, 0.01 * h)
    wmap = conv(h, params['aw2_w'], params['aw2_b'], 0)           # (B, K*K, H, W)
    xc = conv(x, params['conv_w'], params['conv_b'], PU)          # (B, out_ch, H, W)
    B, C, H, W = xc.shape
    xcp = jnp.pad(xc, ((0, 0), (0, 0), (PU, PU), (PU, PU)))
    out = jnp.zeros((B, C, H, W), xc.dtype)
    for kh in range(K):
        for kw in range(K):
            out = out + wmap[:, kh * K + kw][:, None] * xcp[:, :, kh:kh + H, kw:kw + W]
    mo = conv(mask, params['mt_w'], params['mt_b'], PM)
    return out, mo


if __name__ == "__main__":
    # Module defaults: in_ch=out_ch=mask_in_ch=mask_out_ch=1, kernel_size=5, n_feat=6
    B, in_ch, out_ch = 2, 1, 1
    mask_in_ch, mask_out_ch = 1, 1
    K, n_feat = 5, 6
    H = W = 16
    K2 = 2 * K - 1

    key = jax.random.PRNGKey(0)
    ks = jax.random.split(key, 10)
    params = {
        'conv_w': 0.1 * jax.random.normal(ks[0], (out_ch, in_ch, K, K), jnp.float32),
        'conv_b': 0.1 * jax.random.normal(ks[1], (out_ch,), jnp.float32),
        'aw1_w': 0.1 * jax.random.normal(ks[2], (n_feat, mask_in_ch, K2, K2), jnp.float32),
        'aw1_b': 0.1 * jax.random.normal(ks[3], (n_feat,), jnp.float32),
        'aw2_w': 0.1 * jax.random.normal(ks[4], (K * K, n_feat, 1, 1), jnp.float32),
        'aw2_b': 0.1 * jax.random.normal(ks[5], (K * K,), jnp.float32),
        'mt_w': 0.1 * jax.random.normal(ks[6], (mask_out_ch, mask_in_ch, K2, K2), jnp.float32),
        'mt_b': 0.1 * jax.random.normal(ks[7], (mask_out_ch,), jnp.float32),
    }
    x = jax.random.normal(ks[8], (B, in_ch, H, W), jnp.float32)
    mask = jax.random.normal(ks[9], (B, mask_in_ch, H, W), jnp.float32)

    out_x, out_m = adaconv_forward(x, mask, params, kernel_size=K)
    jax.block_until_ready((out_x, out_m))

    ref_x, ref_m = adaconv_reference(x, mask, params, kernel_size=K)
    dx = float(jnp.max(jnp.abs(out_x - ref_x)))
    dm = float(jnp.max(jnp.abs(out_m - ref_m)))
    assert dx < 2e-3 and dm < 2e-3, (dx, dm)
    print("KERNEL_OK")
</pallas_src>

<mosaic_0001>
module attributes {stable_mosaic.version = 11 : i64} {
  func.func @_adaconv_kernel(%arg0: i32, %arg1: memref<1x1x20x20xf32, #tpu.memory_space<vmem>>, %arg2: memref<1x1x24x24xf32, #tpu.memory_space<vmem>>, %arg3: memref<9x24x112xf32, #tpu.memory_space<vmem>>, %arg4: memref<1x112xf32, #tpu.memory_space<vmem>>, %arg5: memref<5x20x16xf32, #tpu.memory_space<vmem>>, %arg6: memref<1x16xf32, #tpu.memory_space<vmem>>, %arg7: memref<150xf32, #tpu.memory_space<smem>>, %arg8: memref<25xf32, #tpu.memory_space<smem>>, %arg9: memref<1x1x16x16xf32, #tpu.memory_space<vmem>>, %arg10: memref<1x1x16x16xf32, #tpu.memory_space<vmem>>, %arg11: memref<1x20x20xf32, #tpu.memory_space<vmem>>) attributes {dimension_semantics = [#tpu.dimension_semantics<parallel>], iteration_bounds = array<i64: 2>, scalar_prefetch = 0 : i64, scratch_operands = 1 : i64, tpu.core_type = #tpu.core_type<tc>, window_params = [{transform_indices = @transform_0, window_bounds = array<i64: 1, 1, 20, 20>}, {transform_indices = @transform_1, window_bounds = array<i64: 1, 1, 24, 24>}, {pipeline_mode = #tpu.pipeline_mode<synchronous>, transform_indices = @transform_2, window_bounds = array<i64: 9, 24, 112>}, {pipeline_mode = #tpu.pipeline_mode<synchronous>, transform_indices = @transform_3, window_bounds = array<i64: 1, 112>}, {pipeline_mode = #tpu.pipeline_mode<synchronous>, transform_indices = @transform_4, window_bounds = array<i64: 5, 20, 16>}, {pipeline_mode = #tpu.pipeline_mode<synchronous>, transform_indices = @transform_5, window_bounds = array<i64: 1, 16>}, {transform_indices = @transform_6, window_bounds = array<i64: 150>}, {transform_indices = @transform_7, window_bounds = array<i64: 25>}, {transform_indices = @transform_8, window_bounds = array<i64: 1, 1, 16, 16>}, {transform_indices = @transform_9, window_bounds = array<i64: 1, 1, 16, 16>}]} {
    %cst = arith.constant 0.000000e+00 : f32
    %0 = vector.broadcast %cst : f32 to vector<1x20x20xf32>
    %c0 = arith.constant 0 : index
    %c0_0 = arith.constant 0 : index
    %c0_1 = arith.constant 0 : index
    %1 = vector.load %arg11[%c0, %c0_0, %c0_1] : memref<1x20x20xf32, #tpu.memory_space<vmem>>, vector<1x20x20xf32>
    tpu.vector_store %arg11[%c0, %c0_0, %c0_1], %0 {strides = array<i32>} : memref<1x20x20xf32, #tpu.memory_space<vmem>>, vector<1x20x20xf32>,
    %c0_2 = arith.constant 0 : index
    %c0_3 = arith.constant 0 : index
    %c0_4 = arith.constant 0 : index
    %c0_5 = arith.constant 0 : index
    %2 = vector.load %arg1[%c0_2, %c0_3, %c0_4, %c0_5] : memref<1x1x20x20xf32, #tpu.memory_space<vmem>>, vector<1x1x20x20xf32>
    %3 = vector.shape_cast %2 : vector<1x1x20x20xf32> to vector<1x20x20xf32>
    %c0_6 = arith.constant 0 : index
    %c0_7 = arith.constant 0 : index
    %c0_8 = arith.constant 0 : index
    %c0_9 = arith.constant 0 : index
    %4 = vector.load %arg2[%c0_6, %c0_7, %c0_8, %c0_9] : memref<1x1x24x24xf32, #tpu.memory_space<vmem>>, vector<1x1x24x24xf32>
    %5 = vector.shape_cast %4 : vector<1x1x24x24xf32> to vector<1x24x24xf32>
    %6 = vector.extract_strided_slice %5 {offsets = [0, 0, 0], sizes = [1, 16, 24], strides = [1, 1, 1]} : vector<1x24x24xf32> to vector<1x16x24xf32>
    %7 = vector.shape_cast %6 : vector<1x16x24xf32> to vector<16x24xf32>
    %c0_10 = arith.constant 0 : index
    %c0_11 = arith.constant 0 : index
    %c0_12 = arith.constant 0 : index
    %8 = vector.load %arg3[%c0_10, %c0_11, %c0_12] : memref<9x24x112xf32, #tpu.memory_space<vmem>>, vector<1x24x112xf32>
    %9 = vector.shape_cast %8 : vector<1x24x112xf32> to vector<24x112xf32>
    %cst_13 = arith.constant dense<0.000000e+00> : vector<16x112xf32>
    %10 = tpu.matmul %7, %9, %cst_13 {dimension_numbers = #tpu.dot_dimension_numbers<[1], [0], [0], [1], [0, 0, 1, 1], [], []>, precision = #tpu.contract_precision<fp32>} : vector<16x24xf32>, vector<24x112xf32>, vector<16x112xf32> -> vector<16x112xf32>
    %11 = vector.extract_strided_slice %5 {offsets = [0, 1, 0], sizes = [1, 16, 24], strides = [1, 1, 1]} : vector<1x24x24xf32> to vector<1x16x24xf32>
    %12 = vector.shape_cast %11 : vector<1x16x24xf32> to vector<16x24xf32>
    %c1 = arith.constant 1 : index
    %c0_14 = arith.constant 0 : index
    %c0_15 = arith.constant 0 : index
    %13 = vector.load %arg3[%c1, %c0_14, %c0_15] : memref<9x24x112xf32, #tpu.memory_space<vmem>>, vector<1x24x112xf32>
    %14 = vector.shape_cast %13 : vector<1x24x112xf32> to vector<24x112xf32>
    %cst_16 = arith.constant dense<0.000000e+00> : vector<16x112xf32>
    %15 = tpu.matmul %12, %14, %cst_16 {dimension_numbers = #tpu.dot_dimension_numbers<[1], [0], [0], [1], [0, 0, 1, 1], [], []>, precision = #tpu.contract_precision<fp32>} : vector<16x24xf32>, vector<24x112xf32>, vector<16x112xf32> -> vector<16x112xf32>
    %16 = arith.addf %10, %15 : vector<16x112xf32>
    %17 = vector.extract_strided_slice %5 {offsets = [0, 2, 0], sizes = [1, 16, 24], strides = [1, 1, 1]} : vector<1x24x24xf32> to vector<1x16x24xf32>
    %18 = vector.shape_cast %17 : vector<1x16x24xf32> to vector<16x24xf32>
    %c2 = arith.constant 2 : index
    %c0_17 = arith.constant 0 : index
    %c0_18 = arith.constant 0 : index
    %19 = vector.load %arg3[%c2, %c0_17, %c0_18] : memref<9x24x112xf32, #tpu.memory_space<vmem>>, vector<1x24x112xf32>
    %20 = vector.shape_cast %19 : vector<1x24x112xf32> to vector<24x112xf32>
    %cst_19 = arith.constant dense<0.000000e+00> : vector<16x112xf32>
    %21 = tpu.matmul %18, %20, %cst_19 {dimension_numbers = #tpu.dot_dimension_numbers<[1], [0], [0], [1], [0, 0, 1, 1], [], []>, precision = #tpu.contract_precision<fp32>} : vector<16x24xf32>, vector<24x112xf32>, vector<16x112xf32> -> vector<16x112xf32>
    %22 = arith.addf %16, %21 : vector<16x112xf32>
    %23 = vector.extract_strided_slice %5 {offsets = [0, 3, 0], sizes = [1, 16, 24], strides = [1, 1, 1]} : vector<1x24x24xf32> to vector<1x16x24xf32>
    %24 = vector.shape_cast %23 : vector<1x16x24xf32> to vector<16x24xf32>
    %c3 = arith.constant 3 : index
    %c0_20 = arith.constant 0 : index
    %c0_21 = arith.constant 0 : index
    %25 = vector.load %arg3[%c3, %c0_20, %c0_21] : memref<9x24x112xf32, #tpu.memory_space<vmem>>, vector<1x24x112xf32>
    %26 = vector.shape_cast %25 : vector<1x24x112xf32> to vector<24x112xf32>
    %cst_22 = arith.constant dense<0.000000e+00> : vector<16x112xf32>
    %27 = tpu.matmul %24, %26, %cst_22 {dimension_numbers = #tpu.dot_dimension_numbers<[1], [0], [0], [1], [0, 0, 1, 1], [], []>, precision = #tpu.contract_precision<fp32>} : vector<16x24xf32>, vector<24x112xf32>, vector<16x112xf32> -> vector<16x112xf32>
    %28 = arith.addf %22, %27 : vector<16x112xf32>
    %29 = vector.extract_strided_slice %5 {offsets = [0, 4, 0], sizes = [1, 16, 24], strides = [1, 1, 1]} : vector<1x24x24xf32> to vector<1x16x24xf32>
    %30 = vector.shape_cast %29 : vector<1x16x24xf32> to vector<16x24xf32>
    %c4 = arith.constant 4 : index
    %c0_23 = arith.constant 0 : index
    %c0_24 = arith.constant 0 : index
    %31 = vector.load %arg3[%c4, %c0_23, %c0_24] : memref<9x24x112xf32, #tpu.memory_space<vmem>>, vector<1x24x112xf32>
    %32 = vector.shape_cast %31 : vector<1x24x112xf32> to vector<24x112xf32>
    %cst_25 = arith.constant dense<0.000000e+00> : vector<16x112xf32>
    %33 = tpu.matmul %30, %32, %cst_25 {dimension_numbers = #tpu.dot_dimension_numbers<[1], [0], [0], [1], [0, 0, 1, 1], [], []>, precision = #tpu.contract_precision<fp32>} : vector<16x24xf32>, vector<24x112xf32>, vector<16x112xf32> -> vector<16x112xf32>
    %34 = arith.addf %28, %33 : vector<16x112xf32>
    %35 = vector.extract_strided_slice %5 {offsets = [0, 5, 0], sizes = [1, 16, 24], strides = [1, 1, 1]} : vector<1x24x24xf32> to vector<1x16x24xf32>
    %36 = vector.shape_cast %35 : vector<1x16x24xf32> to vector<16x24xf32>
    %c5 = arith.constant 5 : index
    %c0_26 = arith.constant 0 : index
    %c0_27 = arith.constant 0 : index
    %37 = vector.load %arg3[%c5, %c0_26, %c0_27] : memref<9x24x112xf32, #tpu.memory_space<vmem>>, vector<1x24x112xf32>
    %38 = vector.shape_cast %37 : vector<1x24x112xf32> to vector<24x112xf32>
    %cst_28 = arith.constant dense<0.000000e+00> : vector<16x112xf32>
    %39 = tpu.matmul %36, %38, %cst_28 {dimension_numbers = #tpu.dot_dimension_numbers<[1], [0], [0], [1], [0, 0, 1, 1], [], []>, precision = #tpu.contract_precision<fp32>} : vector<16x24xf32>, vector<24x112xf32>, vector<16x112xf32> -> vector<16x112xf32>
    %40 = arith.addf %34, %39 : vector<16x112xf32>
    %41 = vector.extract_strided_slice %5 {offsets = [0, 6, 0], sizes = [1, 16, 24], strides = [1, 1, 1]} : vector<1x24x24xf32> to vector<1x16x24xf32>
    %42 = vector.shape_cast %41 : vector<1x16x24xf32> to vector<16x24xf32>
    %c6 = arith.constant 6 : index
    %c0_29 = arith.constant 0 : index
    %c0_30 = arith.constant 0 : index
    %43 = vector.load %arg3[%c6, %c0_29, %c0_30] : memref<9x24x112xf32, #tpu.memory_space<vmem>>, vector<1x24x112xf32>
    %44 = vector.shape_cast %43 : vector<1x24x112xf32> to vector<24x112xf32>
    %cst_31 = arith.constant dense<0.000000e+00> : vector<16x112xf32>
    %45 = tpu.matmul %42, %44, %cst_31 {dimension_numbers = #tpu.dot_dimension_numbers<[1], [0], [0], [1], [0, 0, 1, 1], [], []>, precision = #tpu.contract_precision<fp32>} : vector<16x24xf32>, vector<24x112xf32>, vector<16x112xf32> -> vector<16x112xf32>
    %46 = arith.addf %40, %45 : vector<16x112xf32>
    %47 = vector.extract_strided_slice %5 {offsets = [0, 7, 0], sizes = [1, 16, 24], strides = [1, 1, 1]} : vector<1x24x24xf32> to vector<1x16x24xf32>
    %48 = vector.shape_cast %47 : vector<1x16x24xf32> to vector<16x24xf32>
    %c7 = arith.constant 7 : index
    %c0_32 = arith.constant 0 : index
    %c0_33 = arith.constant 0 : index
    %49 = vector.load %arg3[%c7, %c0_32, %c0_33] : memref<9x24x112xf32, #tpu.memory_space<vmem>>, vector<1x24x112xf32>
    %50 = vector.shape_cast %49 : vector<1x24x112xf32> to vector<24x112xf32>
    %cst_34 = arith.constant dense<0.000000e+00> : vector<16x112xf32>
    %51 = tpu.matmul %48, %50, %cst_34 {dimension_numbers = #tpu.dot_dimension_numbers<[1], [0], [0], [1], [0, 0, 1, 1], [], []>, precision = #tpu.contract_precision<fp32>} : vector<16x24xf32>, vector<24x112xf32>, vector<16x112xf32> -> vector<16x112xf32>
    %52 = arith.addf %46, %51 : vector<16x112xf32>
    %53 = vector.extract_strided_slice %5 {offsets = [0, 8, 0], sizes = [1, 16, 24], strides = [1, 1, 1]} : vector<1x24x24xf32> to vector<1x16x24xf32>
    %54 = vector.shape_cast %53 : vector<1x16x24xf32> to vector<16x24xf32>
    %c8 = arith.constant 8 : index
    %c0_35 = arith.constant 0 : index
    %c0_36 = arith.constant 0 : index
    %55 = vector.load %arg3[%c8, %c0_35, %c0_36] : memref<9x24x112xf32, #tpu.memory_space<vmem>>, vector<1x24x112xf32>
    %56 = vector.shape_cast %55 : vector<1x24x112xf32> to vector<24x112xf32>
    %cst_37 = arith.constant dense<0.000000e+00> : vector<16x112xf32>
    %57 = tpu.matmul %54, %56, %cst_37 {dimension_numbers = #tpu.dot_dimension_numbers<[1], [0], [0], [1], [0, 0, 1, 1], [], []>, precision = #tpu.contract_precision<fp32>} : vector<16x24xf32>, vector<24x112xf32>, vector<16x112xf32> -> vector<16x112xf32>
    %58 = arith.addf %52, %57 : vector<16x112xf32>
    %c0_38 = arith.constant 0 : index
    %c0_39 = arith.constant 0 : index
    %59 = vector.load %arg4[%c0_38, %c0_39] : memref<1x112xf32, #tpu.memory_space<vmem>>, vector<1x112xf32>
    %60 = vector.broadcast %59 : vector<1x112xf32> to vector<16x112xf32>
    %61 = arith.addf %58, %60 : vector<16x112xf32>
    %62 = vector.extract_strided_slice %61 {offsets = [0, 96], sizes = [16, 16], strides = [1, 1]} : vector<16x112xf32> to vector<16x16xf32>
    %c0_40 = arith.constant 0 : index
    %c0_41 = arith.constant 0 : index
    %c0_42 = arith.constant 0 : index
    %c0_43 = arith.constant 0 : index
    %63 = vector.load %arg10[%c0_40, %c0_41, %c0_42, %c0_43] : memref<1x1x16x16xf32, #tpu.memory_space<vmem>>, vector<1x1x16x16xf32>
    %64 = vector.shape_cast %63 : vector<1x1x16x16xf32> to vector<16x16xf32>
    %65 = vector.shape_cast %62 : vector<16x16xf32> to vector<1x1x16x16xf32>
    tpu.vector_store %arg10[%c0_40, %c0_41, %c0_42, %c0_43], %65 {strides = array<i32>} : memref<1x1x16x16xf32, #tpu.memory_space<vmem>>, vector<1x1x16x16xf32>,
    %66 = vector.extract_strided_slice %61 {offsets = [0, 0], sizes = [16, 96], strides = [1, 1]} : vector<16x112xf32> to vector<16x96xf32>
    %cst_44 = arith.constant 0.000000e+00 : f32
    %67 = vector.broadcast %cst_44 : f32 to vector<16x96xf32>
    %68 = arith.cmpf ogt, %66, %67 : vector<16x96xf32>
    %cst_45 = arith.constant 0.00999999977 : f32
    %69 = vector.broadcast %cst_45 : f32 to vector<16x96xf32>
    %70 = arith.mulf %69, %66 : vector<16x96xf32>
    %71 = arith.select %68, %66, %70 : vector<16x96xi1>, vector<16x96xf32>
    %72 = vector.extract_strided_slice %71 {offsets = [0, 0], sizes = [16, 16], strides = [1, 1]} : vector<16x96xf32> to vector<16x16xf32>
    %73 = vector.extract_strided_slice %71 {offsets = [0, 16], sizes = [16, 16], strides = [1, 1]} : vector<16x96xf32> to vector<16x16xf32>
    %74 = vector.extract_strided_slice %71 {offsets = [0, 32], sizes = [16, 16], strides = [1, 1]} : vector<16x96xf32> to vector<16x16xf32>
    %75 = vector.extract_strided_slice %71 {offsets = [0, 48], sizes = [16, 16], strides = [1, 1]} : vector<16x96xf32> to vector<16x16xf32>
    %76 = vector.extract_strided_slice %71 {offsets = [0, 64], sizes = [16, 16], strides = [1, 1]} : vector<16x96xf32> to vector<16x16xf32>
    %77 = vector.extract_strided_slice %71 {offsets = [0, 80], sizes = [16, 16], strides = [1, 1]} : vector<16x96xf32> to vector<16x16xf32>
    %78 = vector.extract_strided_slice %3 {offsets = [0, 0, 0], sizes = [1, 16, 20], strides = [1, 1, 1]} : vector<1x20x20xf32> to vector<1x16x20xf32>
    %79 = vector.shape_cast %78 : vector<1x16x20xf32> to vector<16x20xf32>
    %c0_46 = arith.constant 0 : index
    %c0_47 = arith.constant 0 : index
    %c0_48 = arith.constant 0 : index
    %80 = vector.load %arg5[%c0_46, %c0_47, %c0_48] : memref<5x20x16xf32, #tpu.memory_space<vmem>>, vector<1x20x16xf32>
    %81 = vector.shape_cast %80 : vector<1x20x16xf32> to vector<20x16xf32>
    %cst_49 = arith.constant dense<0.000000e+00> : vector<16x16xf32>
    %82 = tpu.matmul %79, %81, %cst_49 {dimension_numbers = #tpu.dot_dimension_numbers<[1], [0], [0], [1], [0, 0, 1, 1], [], []>, precision = #tpu.contract_precision<fp32>} : vector<16x20xf32>, vector<20x16xf32>, vector<16x16xf32> -> vector<16x16xf32>
    %83 = vector.extract_strided_slice %3 {offsets = [0, 1, 0], sizes = [1, 16, 20], strides = [1, 1, 1]} : vector<1x20x20xf32> to vector<1x16x20xf32>
    %84 = vector.shape_cast %83 : vector<1x16x20xf32> to vector<16x20xf32>
    %c1_50 = arith.constant 1 : index
    %c0_51 = arith.constant 0 : index
    %c0_52 = arith.constant 0 : index
    %85 = vector.load %arg5[%c1_50, %c0_51, %c0_52] : memref<5x20x16xf32, #tpu.memory_space<vmem>>, vector<1x20x16xf32>
    %86 = vector.shape_cast %85 : vector<1x20x16xf32> to vector<20x16xf32>
    %cst_53 = arith.constant dense<0.000000e+00> : vector<16x16xf32>
    %87 = tpu.matmul %84, %86, %cst_53 {dimension_numbers = #tpu.dot_dimension_numbers<[1], [0], [0], [1], [0, 0, 1, 1], [], []>, precision = #tpu.contract_precision<fp32>} : vector<16x20xf32>, vector<20x16xf32>, vector<16x16xf32> -> vector<16x16xf32>
    %88 = arith.addf %82, %87 : vector<16x16xf32>
    %89 = vector.extract_strided_slice %3 {offsets = [0, 2, 0], sizes = [1, 16, 20], strides = [1, 1, 1]} : vector<1x20x20xf32> to vector<1x16x20xf32>
    %90 = vector.shape_cast %89 : vector<1x16x20xf32> to vector<16x20xf32>
    %c2_54 = arith.constant 2 : index
    %c0_55 = arith.constant 0 : index
    %c0_56 = arith.constant 0 : index
    %91 = vector.load %arg5[%c2_54, %c0_55, %c0_56] : memref<5x20x16xf32, #tpu.memory_space<vmem>>, vector<1x20x16xf32>
    %92 = vector.shape_cast %91 : vector<1x20x16xf32> to vector<20x16xf32>
    %cst_57 = arith.constant dense<0.000000e+00> : vector<16x16xf32>
    %93 = tpu.matmul %90, %92, %cst_57 {dimension_numbers = #tpu.dot_dimension_numbers<[1], [0], [0], [1], [0, 0, 1, 1], [], []>, precision = #tpu.contract_precision<fp32>} : vector<16x20xf32>, vector<20x16xf32>, vector<16x16xf32> -> vector<16x16xf32>
    %94 = arith.addf %88, %93 : vector<16x16xf32>
    %95 = vector.extract_strided_slice %3 {offsets = [0, 3, 0], sizes = [1, 16, 20], strides = [1, 1, 1]} : vector<1x20x20xf32> to vector<1x16x20xf32>
    %96 = vector.shape_cast %95 : vector<1x16x20xf32> to vector<16x20xf32>
    %c3_58 = arith.constant 3 : index
    %c0_59 = arith.constant 0 : index
    %c0_60 = arith.constant 0 : index
    %97 = vector.load %arg5[%c3_58, %c0_59, %c0_60] : memref<5x20x16xf32, #tpu.memory_space<vmem>>, vector<1x20x16xf32>
    %98 = vector.shape_cast %97 : vector<1x20x16xf32> to vector<20x16xf32>
    %cst_61 = arith.constant dense<0.000000e+00> : vector<16x16xf32>
    %99 = tpu.matmul %96, %98, %cst_61 {dimension_numbers = #tpu.dot_dimension_numbers<[1], [0], [0], [1], [0, 0, 1, 1], [], []>, precision = #tpu.contract_precision<fp32>} : vector<16x20xf32>, vector<20x16xf32>, vector<16x16xf32> -> vector<16x16xf32>
    %100 = arith.addf %94, %99 : vector<16x16xf32>
    %101 = vector.extract_strided_slice %3 {offsets = [0, 4, 0], sizes = [1, 16, 20], strides = [1, 1, 1]} : vector<1x20x20xf32> to vector<1x16x20xf32>
    %102 = vector.shape_cast %101 : vector<1x16x20xf32> to vector<16x20xf32>
    %c4_62 = arith.constant 4 : index
    %c0_63 = arith.constant 0 : index
    %c0_64 = arith.constant 0 : index
    %103 = vector.load %arg5[%c4_62, %c0_63, %c0_64] : memref<5x20x16xf32, #tpu.memory_space<vmem>>, vector<1x20x16xf32>
    %104 = vector.shape_cast %103 : vector<1x20x16xf32> to vector<20x16xf32>
    %cst_65 = arith.constant dense<0.000000e+00> : vector<16x16xf32>
    %105 = tpu.matmul %102, %104, %cst_65 {dimension_numbers = #tpu.dot_dimension_numbers<[1], [0], [0], [1], [0, 0, 1, 1], [], []>, precision = #tpu.contract_precision<fp32>} : vector<16x20xf32>, vector<20x16xf32>, vector<16x16xf32> -> vector<16x16xf32>
    %106 = arith.addf %100, %105 : vector<16x16xf32>
    %c0_66 = arith.constant 0 : index
    %c0_67 = arith.constant 0 : index
    %107 = vector.load %arg6[%c0_66, %c0_67] : memref<1x16xf32, #tpu.memory_space<vmem>>, vector<1x16xf32>
    %108 = vector.broadcast %107 : vector<1x16xf32> to vector<16x16xf32>
    %109 = arith.addf %106, %108 : vector<16x16xf32>
    %c0_68 = arith.constant 0 : index
    %c2_69 = arith.constant 2 : index
    %c2_70 = arith.constant 2 : index
    %110 = vector.load %arg11[%c0_68, %c2_69, %c2_70] : memref<1x20x20xf32, #tpu.memory_space<vmem>>, vector<1x16x16xf32>
    %111 = vector.shape_cast %110 : vector<1x16x16xf32> to vector<16x16xf32>
    %112 = vector.shape_cast %109 : vector<16x16xf32> to vector<1x16x16xf32>
    tpu.vector_store %arg11[%c0_68, %c2_69, %c2_70], %112 {strides = array<i32>} : memref<1x20x20xf32, #tpu.memory_space<vmem>>, vector<1x16x16xf32>,
    %c0_71 = arith.constant 0 : index
    %113 = memref.load %arg8[%c0_71] : memref<25xf32, #tpu.memory_space<smem>>
    %114 = vector.broadcast %113 : f32 to vector<16x16xf32>
    %c0_72 = arith.constant 0 : index
    %115 = memref.load %arg7[%c0_72] : memref<150xf32, #tpu.memory_space<smem>>
    %116 = vector.broadcast %115 : f32 to vector<16x16xf32>
    %117 = arith.mulf %116, %72 : vector<16x16xf32>
    %118 = arith.addf %114, %117 : vector<16x16xf32>
    %c1_73 = arith.constant 1 : index
    %119 = memref.load %arg7[%c1_73] : memref<150xf32, #tpu.memory_space<smem>>
    %120 = vector.broadcast %119 : f32 to vector<16x16xf32>
    %121 = arith.mulf %120, %73 : vector<16x16xf32>
    %122 = arith.addf %118, %121 : vector<16x16xf32>
    %c2_74 = arith.constant 2 : index
    %123 = memref.load %arg7[%c2_74] : memref<150xf32, #tpu.memory_space<smem>>
    %124 = vector.broadcast %123 : f32 to vector<16x16xf32>
    %125 = arith.mulf %124, %74 : vector<16x16xf32>
    %126 = arith.addf %122, %125 : vector<16x16xf32>
    %c3_75 = arith.constant 3 : index
    %127 = memref.load %arg7[%c3_75] : memref<150xf32, #tpu.memory_space<smem>>
    %128 = vector.broadcast %127 : f32 to vector<16x16xf32>
    %129 = arith.mulf %128, %75 : vector<16x16xf32>
    %130 = arith.addf %126, %129 : vector<16x16xf32>
    %c4_76 = arith.constant 4 : index
    %131 = memref.load %arg7[%c4_76] : memref<150xf32, #tpu.memory_space<smem>>
    %132 = vector.broadcast %131 : f32 to vector<16x16xf32>
    %133 = arith.mulf %132, %76 : vector<16x16xf32>
    %134 = arith.addf %130, %133 : vector<16x16xf32>
    %c5_77 = arith.constant 5 : index
    %135 = memref.load %arg7[%c5_77] : memref<150xf32, #tpu.memory_space<smem>>
    %136 = vector.broadcast %135 : f32 to vector<16x16xf32>
    %137 = arith.mulf %136, %77 : vector<16x16xf32>
    %138 = arith.addf %134, %137 : vector<16x16xf32>
    %c0_78 = arith.constant 0 : index
    %c0_79 = arith.constant 0 : index
    %c0_80 = arith.constant 0 : index
    %139 = vector.load %arg11[%c0_78, %c0_79, %c0_80] : memref<1x20x20xf32, #tpu.memory_space<vmem>>, vector<1x16x16xf32>
    %140 = vector.shape_cast %139 : vector<1x16x16xf32> to vector<16x16xf32>
    %141 = arith.mulf %138, %140 : vector<16x16xf32>
    %c1_81 = arith.constant 1 : index
    %142 = memref.load %arg8[%c1_81] : memref<25xf32, #tpu.memory_space<smem>>
    %143 = vector.broadcast %142 : f32 to vector<16x16xf32>
    %c6_82 = arith.constant 6 : index
    %144 = memref.load %arg7[%c6_82] : memref<150xf32, #tpu.memory_space<smem>>
    %145 = vector.broadcast %144 : f32 to vector<16x16xf32>
    %146 = arith.mulf %145, %72 : vector<16x16xf32>
    %147 = arith.addf %143, %146 : vector<16x16xf32>
    %c7_83 = arith.constant 7 : index
    %148 = memref.load %arg7[%c7_83] : memref<150xf32, #tpu.memory_space<smem>>
    %149 = vector.broadcast %148 : f32 to vector<16x16xf32>
    %150 = arith.mulf %149, %73 : vector<16x16xf32>
    %151 = arith.addf %147, %150 : vector<16x16xf32>
    %c8_84 = arith.constant 8 : index
    %152 = memref.load %arg7[%c8_84] : memref<150xf32, #tpu.memory_space<smem>>
    %153 = vector.broadcast %152 : f32 to vector<16x16xf32>
    %154 = arith.mulf %153, %74 : vector<16x16xf32>
    %155 = arith.addf %151, %154 : vector<16x16xf32>
    %c9 = arith.constant 9 : index
    %156 = memref.load %arg7[%c9] : memref<150xf32, #tpu.memory_space<smem>>
    %157 = vector.broadcast %156 : f32 to vector<16x16xf32>
    %158 = arith.mulf %157, %75 : vector<16x16xf32>
    %159 = arith.addf %155, %158 : vector<16x16xf32>
    %c10 = arith.constant 10 : index
    %160 = memref.load %arg7[%c10] : memref<150xf32, #tpu.memory_space<smem>>
    %161 = vector.broadcast %160 : f32 to vector<16x16xf32>
    %162 = arith.mulf %161, %76 : vector<16x16xf32>
    %163 = arith.addf %159, %162 : vector<16x16xf32>
    %c11 = arith.constant 11 : index
    %164 = memref.load %arg7[%c11] : memref<150xf32, #tpu.memory_space<smem>>
    %165 = vector.broadcast %164 : f32 to vector<16x16xf32>
    %166 = arith.mulf %165, %77 : vector<16x16xf32>
    %167 = arith.addf %163, %166 : vector<16x16xf32>
    %c0_85 = arith.constant 0 : index
    %c0_86 = arith.constant 0 : index
    %c1_87 = arith.constant 1 : index
    %168 = vector.load %arg11[%c0_85, %c0_86, %c1_87] : memref<1x20x20xf32, #tpu.memory_space<vmem>>, vector<1x16x16xf32>
    %169 = vector.shape_cast %168 : vector<1x16x16xf32> to vector<16x16xf32>
    %170 = arith.mulf %167, %169 : vector<16x16xf32>
    %171 = arith.addf %141, %170 : vector<16x16xf32>
    %c2_88 = arith.constant 2 : index
    %172 = memref.load %arg8[%c2_88] : memref<25xf32, #tpu.memory_space<smem>>
    %173 = vector.broadcast %172 : f32 to vector<16x16xf32>
    %c12 = arith.constant 12 : index
    %174 = memref.load %arg7[%c12] : memref<150xf32, #tpu.memory_space<smem>>
    %175 = vector.broadcast %174 : f32 to vector<16x16xf32>
    %176 = arith.mulf %175, %72 : vector<16x16xf32>
    %177 = arith.addf %173, %176 : vector<16x16xf32>
    %c13 = arith.constant 13 : index
    %178 = memref.load %arg7[%c13] : memref<150xf32, #tpu.memory_space<smem>>
    %179 = vector.broadcast %178 : f32 to vector<16x16xf32>
    %180 = arith.mulf %179, %73 : vector<16x16xf32>
    %181 = arith.addf %177, %180 : vector<16x16xf32>
    %c14 = arith.constant 14 : index
    %182 = memref.load %arg7[%c14] : memref<150xf32, #tpu.memory_space<smem>>
    %183 = vector.broadcast %182 : f32 to vector<16x16xf32>
    %184 = arith.mulf %183, %74 : vector<16x16xf32>
    %185 = arith.addf %181, %184 : vector<16x16xf32>
    %c15 = arith.constant 15 : index
    %186 = memref.load %arg7[%c15] : memref<150xf32, #tpu.memory_space<smem>>
    %187 = vector.broadcast %186 : f32 to vector<16x16xf32>
    %188 = arith.mulf %187, %75 : vector<16x16xf32>
    %189 = arith.addf %185, %188 : vector<16x16xf32>
    %c16 = arith.constant 16 : index
    %190 = memref.load %arg7[%c16] : memref<150xf32, #tpu.memory_space<smem>>
    %191 = vector.broadcast %190 : f32 to vector<16x16xf32>
    %192 = arith.mulf %191, %76 : vector<16x16xf32>
    %193 = arith.addf %189, %192 : vector<16x16xf32>
    %c17 = arith.constant 17 : index
    %194 = memref.load %arg7[%c17] : memref<150xf32, #tpu.memory_space<smem>>
    %195 = vector.broadcast %194 : f32 to vector<16x16xf32>
    %196 = arith.mulf %195, %77 : vector<16x16xf32>
    %197 = arith.addf %193, %196 : vector<16x16xf32>
    %c0_89 = arith.constant 0 : index
    %c0_90 = arith.constant 0 : index
    %c2_91 = arith.constant 2 : index
    %198 = vector.load %arg11[%c0_89, %c0_90, %c2_91] : memref<1x20x20xf32, #tpu.memory_space<vmem>>, vector<1x16x16xf32>
    %199 = vector.shape_cast %198 : vector<1x16x16xf32> to vector<16x16xf32>
    %200 = arith.mulf %197, %199 : vector<16x16xf32>
    %201 = arith.addf %171, %200 : vector<16x16xf32>
    %c3_92 = arith.constant 3 : index
    %202 = memref.load %arg8[%c3_92] : memref<25xf32, #tpu.memory_space<smem>>
    %203 = vector.broadcast %202 : f32 to vector<16x16xf32>
    %c18 = arith.constant 18 : index
    %204 = memref.load %arg7[%c18] : memref<150xf32, #tpu.memory_space<smem>>
    %205 = vector.broadcast %204 : f32 to vector<16x16xf32>
    %206 = arith.mulf %205, %72 : vector<16x16xf32>
    %207 = arith.addf %203, %206 : vector<16x16xf32>
    %c19 = arith.constant 19 : index
    %208 = memref.load %arg7[%c19] : memref<150xf32, #tpu.memory_space<smem>>
    %209 = vector.broadcast %208 : f32 to vector<16x16xf32>
    %210 = arith.mulf %209, %73 : vector<16x16xf32>
    %211 = arith.addf %207, %210 : vector<16x16xf32>
    %c20 = arith.constant 20 : index
    %212 = memref.load %arg7[%c20] : memref<150xf32, #tpu.memory_space<smem>>
    %213 = vector.broadcast %212 : f32 to vector<16x16xf32>
    %214 = arith.mulf %213, %74 : vector<16x16xf32>
    %215 = arith.addf %211, %214 : vector<16x16xf32>
    %c21 = arith.constant 21 : index
    %216 = memref.load %arg7[%c21] : memref<150xf32, #tpu.memory_space<smem>>
    %217 = vector.broadcast %216 : f32 to vector<16x16xf32>
    %218 = arith.mulf %217, %75 : vector<16x16xf32>
    %219 = arith.addf %215, %218 : vector<16x16xf32>
    %c22 = arith.constant 22 : index
    %220 = memref.load %arg7[%c22] : memref<150xf32, #tpu.memory_space<smem>>
    %221 = vector.broadcast %220 : f32 to vector<16x16xf32>
    %222 = arith.mulf %221, %76 : vector<16x16xf32>
    %223 = arith.addf %219, %222 : vector<16x16xf32>
    %c23 = arith.constant 23 : index
    %224 = memref.load %arg7[%c23] : memref<150xf32, #tpu.memory_space<smem>>
    %225 = vector.broadcast %224 : f32 to vector<16x16xf32>
    %226 = arith.mulf %225, %77 : vector<16x16xf32>
    %227 = arith.addf %223, %226 : vector<16x16xf32>
    %c0_93 = arith.constant 0 : index
    %c0_94 = arith.constant 0 : index
    %c3_95 = arith.constant 3 : index
    %228 = vector.load %arg11[%c0_93, %c0_94, %c3_95] : memref<1x20x20xf32, #tpu.memory_space<vmem>>, vector<1x16x16xf32>
    %229 = vector.shape_cast %228 : vector<1x16x16xf32> to vector<16x16xf32>
    %230 = arith.mulf %227, %229 : vector<16x16xf32>
    %231 = arith.addf %201, %230 : vector<16x16xf32>
    %c4_96 = arith.constant 4 : index
    %232 = memref.load %arg8[%c4_96] : memref<25xf32, #tpu.memory_space<smem>>
    %233 = vector.broadcast %232 : f32 to vector<16x16xf32>
    %c24 = arith.constant 24 : index
    %234 = memref.load %arg7[%c24] : memref<150xf32, #tpu.memory_space<smem>>
    %235 = vector.broadcast %234 : f32 to vector<16x16xf32>
    %236 = arith.mulf %235, %72 : vector<16x16xf32>
    %237 = arith.addf %233, %236 : vector<16x16xf32>
    %c25 = arith.constant 25 : index
    %238 = memref.load %arg7[%c25] : memref<150xf32, #tpu.memory_space<smem>>
    %239 = vector.broadcast %238 : f32 to vector<16x16xf32>
    %240 = arith.mulf %239, %73 : vector<16x16xf32>
    %241 = arith.addf %237, %240 : vector<16x16xf32>
    %c26 = arith.constant 26 : index
    %242 = memref.load %arg7[%c26] : memref<150xf32, #tpu.memory_space<smem>>
    %243 = vector.broadcast %242 : f32 to vector<16x16xf32>
    %244 = arith.mulf %243, %74 : vector<16x16xf32>
    %245 = arith.addf %241, %244 : vector<16x16xf32>
    %c27 = arith.constant 27 : index
    %246 = memref.load %arg7[%c27] : memref<150xf32, #tpu.memory_space<smem>>
    %247 = vector.broadcast %246 : f32 to vector<16x16xf32>
    %248 = arith.mulf %247, %75 : vector<16x16xf32>
    %249 = arith.addf %245, %248 : vector<16x16xf32>
    %c28 = arith.constant 28 : index
    %250 = memref.load %arg7[%c28] : memref<150xf32, #tpu.memory_space<smem>>
    %251 = vector.broadcast %250 : f32 to vector<16x16xf32>
    %252 = arith.mulf %251, %76 : vector<16x16xf32>
    %253 = arith.addf %249, %252 : vector<16x16xf32>
    %c29 = arith.constant 29 : index
    %254 = memref.load %arg7[%c29] : memref<150xf32, #tpu.memory_space<smem>>
    %255 = vector.broadcast %254 : f32 to vector<16x16xf32>
    %256 = arith.mulf %255, %77 : vector<16x16xf32>
    %257 = arith.addf %253, %256 : vector<16x16xf32>
    %c0_97 = arith.constant 0 : index
    %c0_98 = arith.constant 0 : index
    %c4_99 = arith.constant 4 : index
    %258 = vector.load %arg11[%c0_97, %c0_98, %c4_99] : memref<1x20x20xf32, #tpu.memory_space<vmem>>, vector<1x16x16xf32>
    %259 = vector.shape_cast %258 : vector<1x16x16xf32> to vector<16x16xf32>
    %260 = arith.mulf %257, %259 : vector<16x16xf32>
    %261 = arith.addf %231, %260 : vector<16x16xf32>
    %c5_100 = arith.constant 5 : index
    %262 = memref.load %arg8[%c5_100] : memref<25xf32, #tpu.memory_space<smem>>
    %263 = vector.broadcast %262 : f32 to vector<16x16xf32>
    %c30 = arith.constant 30 : index
    %264 = memref.load %arg7[%c30] : memref<150xf32, #tpu.memory_space<smem>>
    %265 = vector.broadcast %264 : f32 to vector<16x16xf32>
    %266 = arith.mulf %265, %72 : vector<16x16xf32>
    %267 = arith.addf %263, %266 : vector<16x16xf32>
    %c31 = arith.constant 31 : index
    %268 = memref.load %arg7[%c31] : memref<150xf32, #tpu.memory_space<smem>>
    %269 = vector.broadcast %268 : f32 to vector<16x16xf32>
    %270 = arith.mulf %269, %73 : vector<16x16xf32>
    %271 = arith.addf %267, %270 : vector<16x16xf32>
    %c32 = arith.constant 32 : index
    %272 = memref.load %arg7[%c32] : memref<150xf32, #tpu.memory_space<smem>>
    %273 = vector.broadcast %272 : f32 to vector<16x16xf32>
    %274 = arith.mulf %273, %74 : vector<16x16xf32>
    %275 = arith.addf %271, %274 : vector<16x16xf32>
    %c33 = arith.constant 33 : index
    %276 = memref.load %arg7[%c33] : memref<150xf32, #tpu.memory_space<smem>>
    %277 = vector.broadcast %276 : f32 to vector<16x16xf32>
    %278 = arith.mulf %277, %75 : vector<16x16xf32>
    %279 = arith.addf %275, %278 : vector<16x16xf32>
    %c34 = arith.constant 34 : index
    %280 = memref.load %arg7[%c34] : memref<150xf32, #tpu.memory_space<smem>>
    %281 = vector.broadcast %280 : f32 to vector<16x16xf32>
    %282 = arith.mulf %281, %76 : vector<16x16xf32>
    %283 = arith.addf %279, %282 : vector<16x16xf32>
    %c35 = arith.constant 35 : index
    %284 = memref.load %arg7[%c35] : memref<150xf32, #tpu.memory_space<smem>>
    %285 = vector.broadcast %284 : f32 to vector<16x16xf32>
    %286 = arith.mulf %285, %77 : vector<16x16xf32>
    %287 = arith.addf %283, %286 : vector<16x16xf32>
    %c0_101 = arith.constant 0 : index
    %c1_102 = arith.constant 1 : index
    %c0_103 = arith.constant 0 : index
    %288 = vector.load %arg11[%c0_101, %c1_102, %c0_103] : memref<1x20x20xf32, #tpu.memory_space<vmem>>, vector<1x16x16xf32>
    %289 = vector.shape_cast %288 : vector<1x16x16xf32> to vector<16x16xf32>
    %290 = arith.mulf %287, %289 : vector<16x16xf32>
    %291 = arith.addf %261, %290 : vector<16x16xf32>
    %c6_104 = arith.constant 6 : index
    %292 = memref.load %arg8[%c6_104] : memref<25xf32, #tpu.memory_space<smem>>
    %293 = vector.broadcast %292 : f32 to vector<16x16xf32>
    %c36 = arith.constant 36 : index
    %294 = memref.load %arg7[%c36] : memref<150xf32, #tpu.memory_space<smem>>
    %295 = vector.broadcast %294 : f32 to vector<16x16xf32>
    %296 = arith.mulf %295, %72 : vector<16x16xf32>
    %297 = arith.addf %293, %296 : vector<16x16xf32>
    %c37 = arith.constant 37 : index
    %298 = memref.load %arg7[%c37] : memref<150xf32, #tpu.memory_space<smem>>
    %299 = vector.broadcast %298 : f32 to vector<16x16xf32>
    %300 = arith.mulf %299, %73 : vector<16x16xf32>
    %301 = arith.addf %297, %300 : vector<16x16xf32>
    %c38 = arith.constant 38 : index
    %302 = memref.load %arg7[%c38] : memref<150xf32, #tpu.memory_space<smem>>
    %303 = vector.broadcast %302 : f32 to vector<16x16xf32>
    %304 = arith.mulf %303, %74 : vector<16x16xf32>
    %305 = arith.addf %301, %304 : vector<16x16xf32>
    %c39 = arith.constant 39 : index
    %306 = memref.load %arg7[%c39] : memref<150xf32, #tpu.memory_space<smem>>
    %307 = vector.broadcast %306 : f32 to vector<16x16xf32>
    %308 = arith.mulf %307, %75 : vector<16x16xf32>
    %309 = arith.addf %305, %308 : vector<16x16xf32>
    %c40 = arith.constant 40 : index
    %310 = memref.load %arg7[%c40] : memref<150xf32, #tpu.memory_space<smem>>
    %311 = vector.broadcast %310 : f32 to vector<16x16xf32>
    %312 = arith.mulf %311, %76 : vector<16x16xf32>
    %313 = arith.addf %309, %312 : vector<16x16xf32>
    %c41 = arith.constant 41 : index
    %314 = memref.load %arg7[%c41] : memref<150xf32, #tpu.memory_space<smem>>
    %315 = vector.broadcast %314 : f32 to vector<16x16xf32>
    %316 = arith.mulf %315, %77 : vector<16x16xf32>
    %317 = arith.addf %313, %316 : vector<16x16xf32>
    %c0_105 = arith.constant 0 : index
    %c1_106 = arith.constant 1 : index
    %c1_107 = arith.constant 1 : index
    %318 = vector.load %arg11[%c0_105, %c1_106, %c1_107] : memref<1x20x20xf32, #tpu.memory_space<vmem>>, vector<1x16x16xf32>
    %319 = vector.shape_cast %318 : vector<1x16x16xf32> to vector<16x16xf32>
    %320 = arith.mulf %317, %319 : vector<16x16xf32>
    %321 = arith.addf %291, %320 : vector<16x16xf32>
    %c7_108 = arith.constant 7 : index
    %322 = memref.load %arg8[%c7_108] : memref<25xf32, #tpu.memory_space<smem>>
    %323 = vector.broadcast %322 : f32 to vector<16x16xf32>
    %c42 = arith.constant 42 : index
    %324 = memref.load %arg7[%c42] : memref<150xf32, #tpu.memory_space<smem>>
    %325 = vector.broadcast %324 : f32 to vector<16x16xf32>
    %326 = arith.mulf %325, %72 : vector<16x16xf32>
    %327 = arith.addf %323, %326 : vector<16x16xf32>
    %c43 = arith.constant 43 : index
    %328 = memref.load %arg7[%c43] : memref<150xf32, #tpu.memory_space<smem>>
    %329 = vector.broadcast %328 : f32 to vector<16x16xf32>
    %330 = arith.mulf %329, %73 : vector<16x16xf32>
    %331 = arith.addf %327, %330 : vector<16x16xf32>
    %c44 = arith.constant 44 : index
    %332 = memref.load %arg7[%c44] : memref<150xf32, #tpu.memory_space<smem>>
    %333 = vector.broadcast %332 : f32 to vector<16x16xf32>
    %334 = arith.mulf %333, %74 : vector<16x16xf32>
    %335 = arith.addf %331, %334 : vector<16x16xf32>
    %c45 = arith.constant 45 : index
    %336 = memref.load %arg7[%c45] : memref<150xf32, #tpu.memory_space<smem>>
    %337 = vector.broadcast %336 : f32 to vector<16x16xf32>
    %338 = arith.mulf %337, %75 : vector<16x16xf32>
    %339 = arith.addf %335, %338 : vector<16x16xf32>
    %c46 = arith.constant 46 : index
    %340 = memref.load %arg7[%c46] : memref<150xf32, #tpu.memory_space<smem>>
    %341 = vector.broadcast %340 : f32 to vector<16x16xf32>
    %342 = arith.mulf %341, %76 : vector<16x16xf32>
    %343 = arith.addf %339, %342 : vector<16x16xf32>
    %c47 = arith.constant 47 : index
    %344 = memref.load %arg7[%c47] : memref<150xf32, #tpu.memory_space<smem>>
    %345 = vector.broadcast %344 : f32 to vector<16x16xf32>
    %346 = arith.mulf %345, %77 : vector<16x16xf32>
    %347 = arith.addf %343, %346 : vector<16x16xf32>
    %c0_109 = arith.constant 0 : index
    %c1_110 = arith.constant 1 : index
    %c2_111 = arith.constant 2 : index
    %348 = vector.load %arg11[%c0_109, %c1_110, %c2_111] : memref<1x20x20xf32, #tpu.memory_space<vmem>>, vector<1x16x16xf32>
    %349 = vector.shape_cast %348 : vector<1x16x16xf32> to vector<16x16xf32>
    %350 = arith.mulf %347, %349 : vector<16x16xf32>
    %351 = arith.addf %321, %350 : vector<16x16xf32>
    %c8_112 = arith.constant 8 : index
    %352 = memref.load %arg8[%c8_112] : memref<25xf32, #tpu.memory_space<smem>>
    %353 = vector.broadcast %352 : f32 to vector<16x16xf32>
    %c48 = arith.constant 48 : index
    %354 = memref.load %arg7[%c48] : memref<150xf32, #tpu.memory_space<smem>>
    %355 = vector.broadcast %354 : f32 to vector<16x16xf32>
    %356 = arith.mulf %355, %72 : vector<16x16xf32>
    %357 = arith.addf %353, %356 : vector<16x16xf32>
    %c49 = arith.constant 49 : index
    %358 = memref.load %arg7[%c49] : memref<150xf32, #tpu.memory_space<smem>>
    %359 = vector.broadcast %358 : f32 to vector<16x16xf32>
    %360 = arith.mulf %359, %73 : vector<16x16xf32>
    %361 = arith.addf %357, %360 : vector<16x16xf32>
    %c50 = arith.constant 50 : index
    %362 = memref.load %arg7[%c50] : memref<150xf32, #tpu.memory_space<smem>>
    %363 = vector.broadcast %362 : f32 to vector<16x16xf32>
    %364 = arith.mulf %363, %74 : vector<16x16xf32>
    %365 = arith.addf %361, %364 : vector<16x16xf32>
    %c51 = arith.constant 51 : index
    %366 = memref.load %arg7[%c51] : memref<150xf32, #tpu.memory_space<smem>>
    %367 = vector.broadcast %366 : f32 to vector<16x16xf32>
    %368 = arith.mulf %367, %75 : vector<16x16xf32>
    %369 = arith.addf %365, %368 : vector<16x16xf32>
    %c52 = arith.constant 52 : index
    %370 = memref.load %arg7[%c52] : memref<150xf32, #tpu.memory_space<smem>>
    %371 = vector.broadcast %370 : f32 to vector<16x16xf32>
    %372 = arith.mulf %371, %76 : vector<16x16xf32>
    %373 = arith.addf %369, %372 : vector<16x16xf32>
    %c53 = arith.constant 53 : index
    %374 = memref.load %arg7[%c53] : memref<150xf32, #tpu.memory_space<smem>>
    %375 = vector.broadcast %374 : f32 to vector<16x16xf32>
    %376 = arith.mulf %375, %77 : vector<16x16xf32>
    %377 = arith.addf %373, %376 : vector<16x16xf32>
    %c0_113 = arith.constant 0 : index
    %c1_114 = arith.constant 1 : index
    %c3_115 = arith.constant 3 : index
    %378 = vector.load %arg11[%c0_113, %c1_114, %c3_115] : memref<1x20x20xf32, #tpu.memory_space<vmem>>, vector<1x16x16xf32>
    %379 = vector.shape_cast %378 : vector<1x16x16xf32> to vector<16x16xf32>
    %380 = arith.mulf %377, %379 : vector<16x16xf32>
    %381 = arith.addf %351, %380 : vector<16x16xf32>
    %c9_116 = arith.constant 9 : index
    %382 = memref.load %arg8[%c9_116] : memref<25xf32, #tpu.memory_space<smem>>
    %383 = vector.broadcast %382 : f32 to vector<16x16xf32>
    %c54 = arith.constant 54 : index
    %384 = memref.load %arg7[%c54] : memref<150xf32, #tpu.memory_space<smem>>
    %385 = vector.broadcast %384 : f32 to vector<16x16xf32>
    %386 = arith.mulf %385, %72 : vector<16x16xf32>
    %387 = arith.addf %383, %386 : vector<16x16xf32>
    %c55 = arith.constant 55 : index
    %388 = memref.load %arg7[%c55] : memref<150xf32, #tpu.memory_space<smem>>
    %389 = vector.broadcast %388 : f32 to vector<16x16xf32>
    %390 = arith.mulf %389, %73 : vector<16x16xf32>
    %391 = arith.addf %387, %390 : vector<16x16xf32>
    %c56 = arith.constant 56 : index
    %392 = memref.load %arg7[%c56] : memref<150xf32, #tpu.memory_space<smem>>
    %393 = vector.broadcast %392 : f32 to vector<16x16xf32>
    %394 = arith.mulf %393, %74 : vector<16x16xf32>
    %395 = arith.addf %391, %394 : vector<16x16xf32>
    %c57 = arith.constant 57 : index
    %396 = memref.load %arg7[%c57] : memref<150xf32, #tpu.memory_space<smem>>
    %397 = vector.broadcast %396 : f32 to vector<16x16xf32>
    %398 = arith.mulf %397, %75 : vector<16x16xf32>
    %399 = arith.addf %395, %398 : vector<16x16xf32>
    %c58 = arith.constant 58 : index
    %400 = memref.load %arg7[%c58] : memref<150xf32, #tpu.memory_space<smem>>
    %401 = vector.broadcast %400 : f32 to vector<16x16xf32>
    %402 = arith.mulf %401, %76 : vector<16x16xf32>
    %403 = arith.addf %399, %402 : vector<16x16xf32>
    %c59 = arith.constant 59 : index
    %404 = memref.load %arg7[%c59] : memref<150xf32, #tpu.memory_space<smem>>
    %405 = vector.broadcast %404 : f32 to vector<16x16xf32>
    %406 = arith.mulf %405, %77 : vector<16x16xf32>
    %407 = arith.addf %403, %406 : vector<16x16xf32>
    %c0_117 = arith.constant 0 : index
    %c1_118 = arith.constant 1 : index
    %c4_119 = arith.constant 4 : index
    %408 = vector.load %arg11[%c0_117, %c1_118, %c4_119] : memref<1x20x20xf32, #tpu.memory_space<vmem>>, vector<1x16x16xf32>
    %409 = vector.shape_cast %408 : vector<1x16x16xf32> to vector<16x16xf32>
    %410 = arith.mulf %407, %409 : vector<16x16xf32>
    %411 = arith.addf %381, %410 : vector<16x16xf32>
    %c10_120 = arith.constant 10 : index
    %412 = memref.load %arg8[%c10_120] : memref<25xf32, #tpu.memory_space<smem>>
    %413 = vector.broadcast %412 : f32 to vector<16x16xf32>
    %c60 = arith.constant 60 : index
    %414 = memref.load %arg7[%c60] : memref<150xf32, #tpu.memory_space<smem>>
    %415 = vector.broadcast %414 : f32 to vector<16x16xf32>
    %416 = arith.mulf %415, %72 : vector<16x16xf32>
    %417 = arith.addf %413, %416 : vector<16x16xf32>
    %c61 = arith.constant 61 : index
    %418 = memref.load %arg7[%c61] : memref<150xf32, #tpu.memory_space<smem>>
    %419 = vector.broadcast %418 : f32 to vector<16x16xf32>
    %420 = arith.mulf %419, %73 : vector<16x16xf32>
    %421 = arith.addf %417, %420 : vector<16x16xf32>
    %c62 = arith.constant 62 : index
    %422 = memref.load %arg7[%c62] : memref<150xf32, #tpu.memory_space<smem>>
    %423 = vector.broadcast %422 : f32 to vector<16x16xf32>
    %424 = arith.mulf %423, %74 : vector<16x16xf32>
    %425 = arith.addf %421, %424 : vector<16x16xf32>
    %c63 = arith.constant 63 : index
    %426 = memref.load %arg7[%c63] : memref<150xf32, #tpu.memory_space<smem>>
    %427 = vector.broadcast %426 : f32 to vector<16x16xf32>
    %428 = arith.mulf %427, %75 : vector<16x16xf32>
    %429 = arith.addf %425, %428 : vector<16x16xf32>
    %c64 = arith.constant 64 : index
    %430 = memref.load %arg7[%c64] : memref<150xf32, #tpu.memory_space<smem>>
    %431 = vector.broadcast %430 : f32 to vector<16x16xf32>
    %432 = arith.mulf %431, %76 : vector<16x16xf32>
    %433 = arith.addf %429, %432 : vector<16x16xf32>
    %c65 = arith.constant 65 : index
    %434 = memref.load %arg7[%c65] : memref<150xf32, #tpu.memory_space<smem>>
    %435 = vector.broadcast %434 : f32 to vector<16x16xf32>
    %436 = arith.mulf %435, %77 : vector<16x16xf32>
    %437 = arith.addf %433, %436 : vector<16x16xf32>
    %c0_121 = arith.constant 0 : index
    %c2_122 = arith.constant 2 : index
    %c0_123 = arith.constant 0 : index
    %438 = vector.load %arg11[%c0_121, %c2_122, %c0_123] : memref<1x20x20xf32, #tpu.memory_space<vmem>>, vector<1x16x16xf32>
    %439 = vector.shape_cast %438 : vector<1x16x16xf32> to vector<16x16xf32>
    %440 = arith.mulf %437, %439 : vector<16x16xf32>
    %441 = arith.addf %411, %440 : vector<16x16xf32>
    %c11_124 = arith.constant 11 : index
    %442 = memref.load %arg8[%c11_124] : memref<25xf32, #tpu.memory_space<smem>>
    %443 = vector.broadcast %442 : f32 to vector<16x16xf32>
    %c66 = arith.constant 66 : index
    %444 = memref.load %arg7[%c66] : memref<150xf32, #tpu.memory_space<smem>>
    %445 = vector.broadcast %444 : f32 to vector<16x16xf32>
    %446 = arith.mulf %445, %72 : vector<16x16xf32>
    %447 = arith.addf %443, %446 : vector<16x16xf32>
    %c67 = arith.constant 67 : index
    %448 = memref.load %arg7[%c67] : memref<150xf32, #tpu.memory_space<smem>>
    %449 = vector.broadcast %448 : f32 to vector<16x16xf32>
    %450 = arith.mulf %449, %73 : vector<16x16xf32>
    %451 = arith.addf %447, %450 : vector<16x16xf32>
    %c68 = arith.constant 68 : index
    %452 = memref.load %arg7[%c68] : memref<150xf32, #tpu.memory_space<smem>>
    %453 = vector.broadcast %452 : f32 to vector<16x16xf32>
    %454 = arith.mulf %453, %74 : vector<16x16xf32>
    %455 = arith.addf %451, %454 : vector<16x16xf32>
    %c69 = arith.constant 69 : index
    %456 = memref.load %arg7[%c69] : memref<150xf32, #tpu.memory_space<smem>>
    %457 = vector.broadcast %456 : f32 to vector<16x16xf32>
    %458 = arith.mulf %457, %75 : vector<16x16xf32>
    %459 = arith.addf %455, %458 : vector<16x16xf32>
    %c70 = arith.constant 70 : index
    %460 = memref.load %arg7[%c70] : memref<150xf32, #tpu.memory_space<smem>>
    %461 = vector.broadcast %460 : f32 to vector<16x16xf32>
    %462 = arith.mulf %461, %76 : vector<16x16xf32>
    %463 = arith.addf %459, %462 : vector<16x16xf32>
    %c71 = arith.constant 71 : index
    %464 = memref.load %arg7[%c71] : memref<150xf32, #tpu.memory_space<smem>>
    %465 = vector.broadcast %464 : f32 to vector<16x16xf32>
    %466 = arith.mulf %465, %77 : vector<16x16xf32>
    %467 = arith.addf %463, %466 : vector<16x16xf32>
    %c0_125 = arith.constant 0 : index
    %c2_126 = arith.constant 2 : index
    %c1_127 = arith.constant 1 : index
    %468 = vector.load %arg11[%c0_125, %c2_126, %c1_127] : memref<1x20x20xf32, #tpu.memory_space<vmem>>, vector<1x16x16xf32>
    %469 = vector.shape_cast %468 : vector<1x16x16xf32> to vector<16x16xf32>
    %470 = arith.mulf %467, %469 : vector<16x16xf32>
    %471 = arith.addf %441, %470 : vector<16x16xf32>
    %c12_128 = arith.constant 12 : index
    %472 = memref.load %arg8[%c12_128] : memref<25xf32, #tpu.memory_space<smem>>
    %473 = vector.broadcast %472 : f32 to vector<16x16xf32>
    %c72 = arith.constant 72 : index
    %474 = memref.load %arg7[%c72] : memref<150xf32, #tpu.memory_space<smem>>
    %475 = vector.broadcast %474 : f32 to vector<16x16xf32>
    %476 = arith.mulf %475, %72 : vector<16x16xf32>
    %477 = arith.addf %473, %476 : vector<16x16xf32>
    %c73 = arith.constant 73 : index
    %478 = memref.load %arg7[%c73] : memref<150xf32, #tpu.memory_space<smem>>
    %479 = vector.broadcast %478 : f32 to vector<16x16xf32>
    %480 = arith.mulf %479, %73 : vector<16x16xf32>
    %481 = arith.addf %477, %480 : vector<16x16xf32>
    %c74 = arith.constant 74 : index
    %482 = memref.load %arg7[%c74] : memref<150xf32, #tpu.memory_space<smem>>
    %483 = vector.broadcast %482 : f32 to vector<16x16xf32>
    %484 = arith.mulf %483, %74 : vector<16x16xf32>
    %485 = arith.addf %481, %484 : vector<16x16xf32>
    %c75 = arith.constant 75 : index
    %486 = memref.load %arg7[%c75] : memref<150xf32, #tpu.memory_space<smem>>
    %487 = vector.broadcast %486 : f32 to vector<16x16xf32>
    %488 = arith.mulf %487, %75 : vector<16x16xf32>
    %489 = arith.addf %485, %488 : vector<16x16xf32>
    %c76 = arith.constant 76 : index
    %490 = memref.load %arg7[%c76] : memref<150xf32, #tpu.memory_space<smem>>
    %491 = vector.broadcast %490 : f32 to vector<16x16xf32>
    %492 = arith.mulf %491, %76 : vector<16x16xf32>
    %493 = arith.addf %489, %492 : vector<16x16xf32>
    %c77 = arith.constant 77 : index
    %494 = memref.load %arg7[%c77] : memref<150xf32, #tpu.memory_space<smem>>
    %495 = vector.broadcast %494 : f32 to vector<16x16xf32>
    %496 = arith.mulf %495, %77 : vector<16x16xf32>
    %497 = arith.addf %493, %496 : vector<16x16xf32>
    %c0_129 = arith.constant 0 : index
    %c2_130 = arith.constant 2 : index
    %c2_131 = arith.constant 2 : index
    %498 = vector.load %arg11[%c0_129, %c2_130, %c2_131] : memref<1x20x20xf32, #tpu.memory_space<vmem>>, vector<1x16x16xf32>
    %499 = vector.shape_cast %498 : vector<1x16x16xf32> to vector<16x16xf32>
    %500 = arith.mulf %497, %499 : vector<16x16xf32>
    %501 = arith.addf %471, %500 : vector<16x16xf32>
    %c13_132 = arith.constant 13 : index
    %502 = memref.load %arg8[%c13_132] : memref<25xf32, #tpu.memory_space<smem>>
    %503 = vector.broadcast %502 : f32 to vector<16x16xf32>
    %c78 = arith.constant 78 : index
    %504 = memref.load %arg7[%c78] : memref<150xf32, #tpu.memory_space<smem>>
    %505 = vector.broadcast %504 : f32 to vector<16x16xf32>
    %506 = arith.mulf %505, %72 : vector<16x16xf32>
    %507 = arith.addf %503, %506 : vector<16x16xf32>
    %c79 = arith.constant 79 : index
    %508 = memref.load %arg7[%c79] : memref<150xf32, #tpu.memory_space<smem>>
    %509 = vector.broadcast %508 : f32 to vector<16x16xf32>
    %510 = arith.mulf %509, %73 : vector<16x16xf32>
    %511 = arith.addf %507, %510 : vector<16x16xf32>
    %c80 = arith.constant 80 : index
    %512 = memref.load %arg7[%c80] : memref<150xf32, #tpu.memory_space<smem>>
    %513 = vector.broadcast %512 : f32 to vector<16x16xf32>
    %514 = arith.mulf %513, %74 : vector<16x16xf32>
    %515 = arith.addf %511, %514 : vector<16x16xf32>
    %c81 = arith.constant 81 : index
    %516 = memref.load %arg7[%c81] : memref<150xf32, #tpu.memory_space<smem>>
    %517 = vector.broadcast %516 : f32 to vector<16x16xf32>
    %518 = arith.mulf %517, %75 : vector<16x16xf32>
    %519 = arith.addf %515, %518 : vector<16x16xf32>
    %c82 = arith.constant 82 : index
    %520 = memref.load %arg7[%c82] : memref<150xf32, #tpu.memory_space<smem>>
    %521 = vector.broadcast %520 : f32 to vector<16x16xf32>
    %522 = arith.mulf %521, %76 : vector<16x16xf32>
    %523 = arith.addf %519, %522 : vector<16x16xf32>
    %c83 = arith.constant 83 : index
    %524 = memref.load %arg7[%c83] : memref<150xf32, #tpu.memory_space<smem>>
    %525 = vector.broadcast %524 : f32 to vector<16x16xf32>
    %526 = arith.mulf %525, %77 : vector<16x16xf32>
    %527 = arith.addf %523, %526 : vector<16x16xf32>
    %c0_133 = arith.constant 0 : index
    %c2_134 = arith.constant 2 : index
    %c3_135 = arith.constant 3 : index
    %528 = vector.load %arg11[%c0_133, %c2_134, %c3_135] : memref<1x20x20xf32, #tpu.memory_space<vmem>>, vector<1x16x16xf32>
    %529 = vector.shape_cast %528 : vector<1x16x16xf32> to vector<16x16xf32>
    %530 = arith.mulf %527, %529 : vector<16x16xf32>
    %531 = arith.addf %501, %530 : vector<16x16xf32>
    %c14_136 = arith.constant 14 : index
    %532 = memref.load %arg8[%c14_136] : memref<25xf32, #tpu.memory_space<smem>>
    %533 = vector.broadcast %532 : f32 to vector<16x16xf32>
    %c84 = arith.constant 84 : index
    %534 = memref.load %arg7[%c84] : memref<150xf32, #tpu.memory_space<smem>>
    %535 = vector.broadcast %534 : f32 to vector<16x16xf32>
    %536 = arith.mulf %535, %72 : vector<16x16xf32>
    %537 = arith.addf %533, %536 : vector<16x16xf32>
    %c85 = arith.constant 85 : index
    %538 = memref.load %arg7[%c85] : memref<150xf32, #tpu.memory_space<smem>>
    %539 = vector.broadcast %538 : f32 to vector<16x16xf32>
    %540 = arith.mulf %539, %73 : vector<16x16xf32>
    %541 = arith.addf %537, %540 : vector<16x16xf32>
    %c86 = arith.constant 86 : index
    %542 = memref.load %arg7[%c86] : memref<150xf32, #tpu.memory_space<smem>>
    %543 = vector.broadcast %542 : f32 to vector<16x16xf32>
    %544 = arith.mulf %543, %74 : vector<16x16xf32>
    %545 = arith.addf %541, %544 : vector<16x16xf32>
    %c87 = arith.constant 87 : index
    %546 = memref.load %arg7[%c87] : memref<150xf32, #tpu.memory_space<smem>>
    %547 = vector.broadcast %546 : f32 to vector<16x16xf32>
    %548 = arith.mulf %547, %75 : vector<16x16xf32>
    %549 = arith.addf %545, %548 : vector<16x16xf32>
    %c88 = arith.constant 88 : index
    %550 = memref.load %arg7[%c88] : memref<150xf32, #tpu.memory_space<smem>>
    %551 = vector.broadcast %550 : f32 to vector<16x16xf32>
    %552 = arith.mulf %551, %76 : vector<16x16xf32>
    %553 = arith.addf %549, %552 : vector<16x16xf32>
    %c89 = arith.constant 89 : index
    %554 = memref.load %arg7[%c89] : memref<150xf32, #tpu.memory_space<smem>>
    %555 = vector.broadcast %554 : f32 to vector<16x16xf32>
    %556 = arith.mulf %555, %77 : vector<16x16xf32>
    %557 = arith.addf %553, %556 : vector<16x16xf32>
    %c0_137 = arith.constant 0 : index
    %c2_138 = arith.constant 2 : index
    %c4_139 = arith.constant 4 : index
    %558 = vector.load %arg11[%c0_137, %c2_138, %c4_139] : memref<1x20x20xf32, #tpu.memory_space<vmem>>, vector<1x16x16xf32>
    %559 = vector.shape_cast %558 : vector<1x16x16xf32> to vector<16x16xf32>
    %560 = arith.mulf %557, %559 : vector<16x16xf32>
    %561 = arith.addf %531, %560 : vector<16x16xf32>
    %c15_140 = arith.constant 15 : index
    %562 = memref.load %arg8[%c15_140] : memref<25xf32, #tpu.memory_space<smem>>
    %563 = vector.broadcast %562 : f32 to vector<16x16xf32>
    %c90 = arith.constant 90 : index
    %564 = memref.load %arg7[%c90] : memref<150xf32, #tpu.memory_space<smem>>
    %565 = vector.broadcast %564 : f32 to vector<16x16xf32>
    %566 = arith.mulf %565, %72 : vector<16x16xf32>
    %567 = arith.addf %563, %566 : vector<16x16xf32>
    %c91 = arith.constant 91 : index
    %568 = memref.load %arg7[%c91] : memref<150xf32, #tpu.memory_space<smem>>
    %569 = vector.broadcast %568 : f32 to vector<16x16xf32>
    %570 = arith.mulf %569, %73 : vector<16x16xf32>
    %571 = arith.addf %567, %570 : vector<16x16xf32>
    %c92 = arith.constant 92 : index
    %572 = memref.load %arg7[%c92] : memref<150xf32, #tpu.memory_space<smem>>
    %573 = vector.broadcast %572 : f32 to vector<16x16xf32>
    %574 = arith.mulf %573, %74 : vector<16x16xf32>
    %575 = arith.addf %571, %574 : vector<16x16xf32>
    %c93 = arith.constant 93 : index
    %576 = memref.load %arg7[%c93] : memref<150xf32, #tpu.memory_space<smem>>
    %577 = vector.broadcast %576 : f32 to vector<16x16xf32>
    %578 = arith.mulf %577, %75 : vector<16x16xf32>
    %579 = arith.addf %575, %578 : vector<16x16xf32>
    %c94 = arith.constant 94 : index
    %580 = memref.load %arg7[%c94] : memref<150xf32, #tpu.memory_space<smem>>
    %581 = vector.broadcast %580 : f32 to vector<16x16xf32>
    %582 = arith.mulf %581, %76 : vector<16x16xf32>
    %583 = arith.addf %579, %582 : vector<16x16xf32>
    %c95 = arith.constant 95 : index
    %584 = memref.load %arg7[%c95] : memref<150xf32, #tpu.memory_space<smem>>
    %585 = vector.broadcast %584 : f32 to vector<16x16xf32>
    %586 = arith.mulf %585, %77 : vector<16x16xf32>
    %587 = arith.addf %583, %586 : vector<16x16xf32>
    %c0_141 = arith.constant 0 : index
    %c3_142 = arith.constant 3 : index
    %c0_143 = arith.constant 0 : index
    %588 = vector.load %arg11[%c0_141, %c3_142, %c0_143] : memref<1x20x20xf32, #tpu.memory_space<vmem>>, vector<1x16x16xf32>
    %589 = vector.shape_cast %588 : vector<1x16x16xf32> to vector<16x16xf32>
    %590 = arith.mulf %587, %589 : vector<16x16xf32>
    %591 = arith.addf %561, %590 : vector<16x16xf32>
    %c16_144 = arith.constant 16 : index
    %592 = memref.load %arg8[%c16_144] : memref<25xf32, #tpu.memory_space<smem>>
    %593 = vector.broadcast %592 : f32 to vector<16x16xf32>
    %c96 = arith.constant 96 : index
    %594 = memref.load %arg7[%c96] : memref<150xf32, #tpu.memory_space<smem>>
    %595 = vector.broadcast %594 : f32 to vector<16x16xf32>
    %596 = arith.mulf %595, %72 : vector<16x16xf32>
    %597 = arith.addf %593, %596 : vector<16x16xf32>
    %c97 = arith.constant 97 : index
    %598 = memref.load %arg7[%c97] : memref<150xf32, #tpu.memory_space<smem>>
    %599 = vector.broadcast %598 : f32 to vector<16x16xf32>
    %600 = arith.mulf %599, %73 : vector<16x16xf32>
    %601 = arith.addf %597, %600 : vector<16x16xf32>
    %c98 = arith.constant 98 : index
    %602 = memref.load %arg7[%c98] : memref<150xf32, #tpu.memory_space<smem>>
    %603 = vector.broadcast %602 : f32 to vector<16x16xf32>
    %604 = arith.mulf %603, %74 : vector<16x16xf32>
    %605 = arith.addf %601, %604 : vector<16x16xf32>
    %c99 = arith.constant 99 : index
    %606 = memref.load %arg7[%c99] : memref<150xf32, #tpu.memory_space<smem>>
    %607 = vector.broadcast %606 : f32 to vector<16x16xf32>
    %608 = arith.mulf %607, %75 : vector<16x16xf32>
    %609 = arith.addf %605, %608 : vector<16x16xf32>
    %c100 = arith.constant 100 : index
    %610 = memref.load %arg7[%c100] : memref<150xf32, #tpu.memory_space<smem>>
    %611 = vector.broadcast %610 : f32 to vector<16x16xf32>
    %612 = arith.mulf %611, %76 : vector<16x16xf32>
    %613 = arith.addf %609, %612 : vector<16x16xf32>
    %c101 = arith.constant 101 : index
    %614 = memref.load %arg7[%c101] : memref<150xf32, #tpu.memory_space<smem>>
    %615 = vector.broadcast %614 : f32 to vector<16x16xf32>
    %616 = arith.mulf %615, %77 : vector<16x16xf32>
    %617 = arith.addf %613, %616 : vector<16x16xf32>
    %c0_145 = arith.constant 0 : index
    %c3_146 = arith.constant 3 : index
    %c1_147 = arith.constant 1 : index
    %618 = vector.load %arg11[%c0_145, %c3_146, %c1_147] : memref<1x20x20xf32, #tpu.memory_space<vmem>>, vector<1x16x16xf32>
    %619 = vector.shape_cast %618 : vector<1x16x16xf32> to vector<16x16xf32>
    %620 = arith.mulf %617, %619 : vector<16x16xf32>
    %621 = arith.addf %591, %620 : vector<16x16xf32>
    %c17_148 = arith.constant 17 : index
    %622 = memref.load %arg8[%c17_148] : memref<25xf32, #tpu.memory_space<smem>>
    %623 = vector.broadcast %622 : f32 to vector<16x16xf32>
    %c102 = arith.constant 102 : index
    %624 = memref.load %arg7[%c102] : memref<150xf32, #tpu.memory_space<smem>>
    %625 = vector.broadcast %624 : f32 to vector<16x16xf32>
    %626 = arith.mulf %625, %72 : vector<16x16xf32>
    %627 = arith.addf %623, %626 : vector<16x16xf32>
    %c103 = arith.constant 103 : index
    %628 = memref.load %arg7[%c103] : memref<150xf32, #tpu.memory_space<smem>>
    %629 = vector.broadcast %628 : f32 to vector<16x16xf32>
    %630 = arith.mulf %629, %73 : vector<16x16xf32>
    %631 = arith.addf %627, %630 : vector<16x16xf32>
    %c104 = arith.constant 104 : index
    %632 = memref.load %arg7[%c104] : memref<150xf32, #tpu.memory_space<smem>>
    %633 = vector.broadcast %632 : f32 to vector<16x16xf32>
    %634 = arith.mulf %633, %74 : vector<16x16xf32>
    %635 = arith.addf %631, %634 : vector<16x16xf32>
    %c105 = arith.constant 105 : index
    %636 = memref.load %arg7[%c105] : memref<150xf32, #tpu.memory_space<smem>>
    %637 = vector.broadcast %636 : f32 to vector<16x16xf32>
    %638 = arith.mulf %637, %75 : vector<16x16xf32>
    %639 = arith.addf %635, %638 : vector<16x16xf32>
    %c106 = arith.constant 106 : index
    %640 = memref.load %arg7[%c106] : memref<150xf32, #tpu.memory_space<smem>>
    %641 = vector.broadcast %640 : f32 to vector<16x16xf32>
    %642 = arith.mulf %641, %76 : vector<16x16xf32>
    %643 = arith.addf %639, %642 : vector<16x16xf32>
    %c107 = arith.constant 107 : index
    %644 = memref.load %arg7[%c107] : memref<150xf32, #tpu.memory_space<smem>>
    %645 = vector.broadcast %644 : f32 to vector<16x16xf32>
    %646 = arith.mulf %645, %77 : vector<16x16xf32>
    %647 = arith.addf %643, %646 : vector<16x16xf32>
    %c0_149 = arith.constant 0 : index
    %c3_150 = arith.constant 3 : index
    %c2_151 = arith.constant 2 : index
    %648 = vector.load %arg11[%c0_149, %c3_150, %c2_151] : memref<1x20x20xf32, #tpu.memory_space<vmem>>, vector<1x16x16xf32>
    %649 = vector.shape_cast %648 : vector<1x16x16xf32> to vector<16x16xf32>
    %650 = arith.mulf %647, %649 : vector<16x16xf32>
    %651 = arith.addf %621, %650 : vector<16x16xf32>
    %c18_152 = arith.constant 18 : index
    %652 = memref.load %arg8[%c18_152] : memref<25xf32, #tpu.memory_space<smem>>
    %653 = vector.broadcast %652 : f32 to vector<16x16xf32>
    %c108 = arith.constant 108 : index
    %654 = memref.load %arg7[%c108] : memref<150xf32, #tpu.memory_space<smem>>
    %655 = vector.broadcast %654 : f32 to vector<16x16xf32>
    %656 = arith.mulf %655, %72 : vector<16x16xf32>
    %657 = arith.addf %653, %656 : vector<16x16xf32>
    %c109 = arith.constant 109 : index
    %658 = memref.load %arg7[%c109] : memref<150xf32, #tpu.memory_space<smem>>
    %659 = vector.broadcast %658 : f32 to vector<16x16xf32>
    %660 = arith.mulf %659, %73 : vector<16x16xf32>
    %661 = arith.addf %657, %660 : vector<16x16xf32>
    %c110 = arith.constant 110 : index
    %662 = memref.load %arg7[%c110] : memref<150xf32, #tpu.memory_space<smem>>
    %663 = vector.broadcast %662 : f32 to vector<16x16xf32>
    %664 = arith.mulf %663, %74 : vector<16x16xf32>
    %665 = arith.addf %661, %664 : vector<16x16xf32>
    %c111 = arith.constant 111 : index
    %666 = memref.load %arg7[%c111] : memref<150xf32, #tpu.memory_space<smem>>
    %667 = vector.broadcast %666 : f32 to vector<16x16xf32>
    %668 = arith.mulf %667, %75 : vector<16x16xf32>
    %669 = arith.addf %665, %668 : vector<16x16xf32>
    %c112 = arith.constant 112 : index
    %670 = memref.load %arg7[%c112] : memref<150xf32, #tpu.memory_space<smem>>
    %671 = vector.broadcast %670 : f32 to vector<16x16xf32>
    %672 = arith.mulf %671, %76 : vector<16x16xf32>
    %673 = arith.addf %669, %672 : vector<16x16xf32>
    %c113 = arith.constant 113 : index
    %674 = memref.load %arg7[%c113] : memref<150xf32, #tpu.memory_space<smem>>
    %675 = vector.broadcast %674 : f32 to vector<16x16xf32>
    %676 = arith.mulf %675, %77 : vector<16x16xf32>
    %677 = arith.addf %673, %676 : vector<16x16xf32>
    %c0_153 = arith.constant 0 : index
    %c3_154 = arith.constant 3 : index
    %c3_155 = arith.constant 3 : index
    %678 = vector.load %arg11[%c0_153, %c3_154, %c3_155] : memref<1x20x20xf32, #tpu.memory_space<vmem>>, vector<1x16x16xf32>
    %679 = vector.shape_cast %678 : vector<1x16x16xf32> to vector<16x16xf32>
    %680 = arith.mulf %677, %679 : vector<16x16xf32>
    %681 = arith.addf %651, %680 : vector<16x16xf32>
    %c19_156 = arith.constant 19 : index
    %682 = memref.load %arg8[%c19_156] : memref<25xf32, #tpu.memory_space<smem>>
    %683 = vector.broadcast %682 : f32 to vector<16x16xf32>
    %c114 = arith.constant 114 : index
    %684 = memref.load %arg7[%c114] : memref<150xf32, #tpu.memory_space<smem>>
    %685 = vector.broadcast %684 : f32 to vector<16x16xf32>
    %686 = arith.mulf %685, %72 : vector<16x16xf32>
    %687 = arith.addf %683, %686 : vector<16x16xf32>
    %c115 = arith.constant 115 : index
    %688 = memref.load %arg7[%c115] : memref<150xf32, #tpu.memory_space<smem>>
    %689 = vector.broadcast %688 : f32 to vector<16x16xf32>
    %690 = arith.mulf %689, %73 : vector<16x16xf32>
    %691 = arith.addf %687, %690 : vector<16x16xf32>
    %c116 = arith.constant 116 : index
    %692 = memref.load %arg7[%c116] : memref<150xf32, #tpu.memory_space<smem>>
    %693 = vector.broadcast %692 : f32 to vector<16x16xf32>
    %694 = arith.mulf %693, %74 : vector<16x16xf32>
    %695 = arith.addf %691, %694 : vector<16x16xf32>
    %c117 = arith.constant 117 : index
    %696 = memref.load %arg7[%c117] : memref<150xf32, #tpu.memory_space<smem>>
    %697 = vector.broadcast %696 : f32 to vector<16x16xf32>
    %698 = arith.mulf %697, %75 : vector<16x16xf32>
    %699 = arith.addf %695, %698 : vector<16x16xf32>
    %c118 = arith.constant 118 : index
    %700 = memref.load %arg7[%c118] : memref<150xf32, #tpu.memory_space<smem>>
    %701 = vector.broadcast %700 : f32 to vector<16x16xf32>
    %702 = arith.mulf %701, %76 : vector<16x16xf32>
    %703 = arith.addf %699, %702 : vector<16x16xf32>
    %c119 = arith.constant 119 : index
    %704 = memref.load %arg7[%c119] : memref<150xf32, #tpu.memory_space<smem>>
    %705 = vector.broadcast %704 : f32 to vector<16x16xf32>
    %706 = arith.mulf %705, %77 : vector<16x16xf32>
    %707 = arith.addf %703, %706 : vector<16x16xf32>
    %c0_157 = arith.constant 0 : index
    %c3_158 = arith.constant 3 : index
    %c4_159 = arith.constant 4 : index
    %708 = vector.load %arg11[%c0_157, %c3_158, %c4_159] : memref<1x20x20xf32, #tpu.memory_space<vmem>>, vector<1x16x16xf32>
    %709 = vector.shape_cast %708 : vector<1x16x16xf32> to vector<16x16xf32>
    %710 = arith.mulf %707, %709 : vector<16x16xf32>
    %711 = arith.addf %681, %710 : vector<16x16xf32>
    %c20_160 = arith.constant 20 : index
    %712 = memref.load %arg8[%c20_160] : memref<25xf32, #tpu.memory_space<smem>>
    %713 = vector.broadcast %712 : f32 to vector<16x16xf32>
    %c120 = arith.constant 120 : index
    %714 = memref.load %arg7[%c120] : memref<150xf32, #tpu.memory_space<smem>>
    %715 = vector.broadcast %714 : f32 to vector<16x16xf32>
    %716 = arith.mulf %715, %72 : vector<16x16xf32>
    %717 = arith.addf %713, %716 : vector<16x16xf32>
    %c121 = arith.constant 121 : index
    %718 = memref.load %arg7[%c121] : memref<150xf32, #tpu.memory_space<smem>>
    %719 = vector.broadcast %718 : f32 to vector<16x16xf32>
    %720 = arith.mulf %719, %73 : vector<16x16xf32>
    %721 = arith.addf %717, %720 : vector<16x16xf32>
    %c122 = arith.constant 122 : index
    %722 = memref.load %arg7[%c122] : memref<150xf32, #tpu.memory_space<smem>>
    %723 = vector.broadcast %722 : f32 to vector<16x16xf32>
    %724 = arith.mulf %723, %74 : vector<16x16xf32>
    %725 = arith.addf %721, %724 : vector<16x16xf32>
    %c123 = arith.constant 123 : index
    %726 = memref.load %arg7[%c123] : memref<150xf32, #tpu.memory_space<smem>>
    %727 = vector.broadcast %726 : f32 to vector<16x16xf32>
    %728 = arith.mulf %727, %75 : vector<16x16xf32>
    %729 = arith.addf %725, %728 : vector<16x16xf32>
    %c124 = arith.constant 124 : index
    %730 = memref.load %arg7[%c124] : memref<150xf32, #tpu.memory_space<smem>>
    %731 = vector.broadcast %730 : f32 to vector<16x16xf32>
    %732 = arith.mulf %731, %76 : vector<16x16xf32>
    %733 = arith.addf %729, %732 : vector<16x16xf32>
    %c125 = arith.constant 125 : index
    %734 = memref.load %arg7[%c125] : memref<150xf32, #tpu.memory_space<smem>>
    %735 = vector.broadcast %734 : f32 to vector<16x16xf32>
    %736 = arith.mulf %735, %77 : vector<16x16xf32>
    %737 = arith.addf %733, %736 : vector<16x16xf32>
    %c0_161 = arith.constant 0 : index
    %c4_162 = arith.constant 4 : index
    %c0_163 = arith.constant 0 : index
    %738 = vector.load %arg11[%c0_161, %c4_162, %c0_163] : memref<1x20x20xf32, #tpu.memory_space<vmem>>, vector<1x16x16xf32>
    %739 = vector.shape_cast %738 : vector<1x16x16xf32> to vector<16x16xf32>
    %740 = arith.mulf %737, %739 : vector<16x16xf32>
    %741 = arith.addf %711, %740 : vector<16x16xf32>
    %c21_164 = arith.constant 21 : index
    %742 = memref.load %arg8[%c21_164] : memref<25xf32, #tpu.memory_space<smem>>
    %743 = vector.broadcast %742 : f32 to vector<16x16xf32>
    %c126 = arith.constant 126 : index
    %744 = memref.load %arg7[%c126] : memref<150xf32, #tpu.memory_space<smem>>
    %745 = vector.broadcast %744 : f32 to vector<16x16xf32>
    %746 = arith.mulf %745, %72 : vector<16x16xf32>
    %747 = arith.addf %743, %746 : vector<16x16xf32>
    %c127 = arith.constant 127 : index
    %748 = memref.load %arg7[%c127] : memref<150xf32, #tpu.memory_space<smem>>
    %749 = vector.broadcast %748 : f32 to vector<16x16xf32>
    %750 = arith.mulf %749, %73 : vector<16x16xf32>
    %751 = arith.addf %747, %750 : vector<16x16xf32>
    %c128 = arith.constant 128 : index
    %752 = memref.load %arg7[%c128] : memref<150xf32, #tpu.memory_space<smem>>
    %753 = vector.broadcast %752 : f32 to vector<16x16xf32>
    %754 = arith.mulf %753, %74 : vector<16x16xf32>
    %755 = arith.addf %751, %754 : vector<16x16xf32>
    %c129 = arith.constant 129 : index
    %756 = memref.load %arg7[%c129] : memref<150xf32, #tpu.memory_space<smem>>
    %757 = vector.broadcast %756 : f32 to vector<16x16xf32>
    %758 = arith.mulf %757, %75 : vector<16x16xf32>
    %759 = arith.addf %755, %758 : vector<16x16xf32>
    %c130 = arith.constant 130 : index
    %760 = memref.load %arg7[%c130] : memref<150xf32, #tpu.memory_space<smem>>
    %761 = vector.broadcast %760 : f32 to vector<16x16xf32>
    %762 = arith.mulf %761, %76 : vector<16x16xf32>
    %763 = arith.addf %759, %762 : vector<16x16xf32>
    %c131 = arith.constant 131 : index
    %764 = memref.load %arg7[%c131] : memref<150xf32, #tpu.memory_space<smem>>
    %765 = vector.broadcast %764 : f32 to vector<16x16xf32>
    %766 = arith.mulf %765, %77 : vector<16x16xf32>
    %767 = arith.addf %763, %766 : vector<16x16xf32>
    %c0_165 = arith.constant 0 : index
    %c4_166 = arith.constant 4 : index
    %c1_167 = arith.constant 1 : index
    %768 = vector.load %arg11[%c0_165, %c4_166, %c1_167] : memref<1x20x20xf32, #tpu.memory_space<vmem>>, vector<1x16x16xf32>
    %769 = vector.shape_cast %768 : vector<1x16x16xf32> to vector<16x16xf32>
    %770 = arith.mulf %767, %769 : vector<16x16xf32>
    %771 = arith.addf %741, %770 : vector<16x16xf32>
    %c22_168 = arith.constant 22 : index
    %772 = memref.load %arg8[%c22_168] : memref<25xf32, #tpu.memory_space<smem>>
    %773 = vector.broadcast %772 : f32 to vector<16x16xf32>
    %c132 = arith.constant 132 : index
    %774 = memref.load %arg7[%c132] : memref<150xf32, #tpu.memory_space<smem>>
    %775 = vector.broadcast %774 : f32 to vector<16x16xf32>
    %776 = arith.mulf %775, %72 : vector<16x16xf32>
    %777 = arith.addf %773, %776 : vector<16x16xf32>
    %c133 = arith.constant 133 : index
    %778 = memref.load %arg7[%c133] : memref<150xf32, #tpu.memory_space<smem>>
    %779 = vector.broadcast %778 : f32 to vector<16x16xf32>
    %780 = arith.mulf %779, %73 : vector<16x16xf32>
    %781 = arith.addf %777, %780 : vector<16x16xf32>
    %c134 = arith.constant 134 : index
    %782 = memref.load %arg7[%c134] : memref<150xf32, #tpu.memory_space<smem>>
    %783 = vector.broadcast %782 : f32 to vector<16x16xf32>
    %784 = arith.mulf %783, %74 : vector<16x16xf32>
    %785 = arith.addf %781, %784 : vector<16x16xf32>
    %c135 = arith.constant 135 : index
    %786 = memref.load %arg7[%c135] : memref<150xf32, #tpu.memory_space<smem>>
    %787 = vector.broadcast %786 : f32 to vector<16x16xf32>
    %788 = arith.mulf %787, %75 : vector<16x16xf32>
    %789 = arith.addf %785, %788 : vector<16x16xf32>
    %c136 = arith.constant 136 : index
    %790 = memref.load %arg7[%c136] : memref<150xf32, #tpu.memory_space<smem>>
    %791 = vector.broadcast %790 : f32 to vector<16x16xf32>
    %792 = arith.mulf %791, %76 : vector<16x16xf32>
    %793 = arith.addf %789, %792 : vector<16x16xf32>
    %c137 = arith.constant 137 : index
    %794 = memref.load %arg7[%c137] : memref<150xf32, #tpu.memory_space<smem>>
    %795 = vector.broadcast %794 : f32 to vector<16x16xf32>
    %796 = arith.mulf %795, %77 : vector<16x16xf32>
    %797 = arith.addf %793, %796 : vector<16x16xf32>
    %c0_169 = arith.constant 0 : index
    %c4_170 = arith.constant 4 : index
    %c2_171 = arith.constant 2 : index
    %798 = vector.load %arg11[%c0_169, %c4_170, %c2_171] : memref<1x20x20xf32, #tpu.memory_space<vmem>>, vector<1x16x16xf32>
    %799 = vector.shape_cast %798 : vector<1x16x16xf32> to vector<16x16xf32>
    %800 = arith.mulf %797, %799 : vector<16x16xf32>
    %801 = arith.addf %771, %800 : vector<16x16xf32>
    %c23_172 = arith.constant 23 : index
    %802 = memref.load %arg8[%c23_172] : memref<25xf32, #tpu.memory_space<smem>>
    %803 = vector.broadcast %802 : f32 to vector<16x16xf32>
    %c138 = arith.constant 138 : index
    %804 = memref.load %arg7[%c138] : memref<150xf32, #tpu.memory_space<smem>>
    %805 = vector.broadcast %804 : f32 to vector<16x16xf32>
    %806 = arith.mulf %805, %72 : vector<16x16xf32>
    %807 = arith.addf %803, %806 : vector<16x16xf32>
    %c139 = arith.constant 139 : index
    %808 = memref.load %arg7[%c139] : memref<150xf32, #tpu.memory_space<smem>>
    %809 = vector.broadcast %808 : f32 to vector<16x16xf32>
    %810 = arith.mulf %809, %73 : vector<16x16xf32>
    %811 = arith.addf %807, %810 : vector<16x16xf32>
    %c140 = arith.constant 140 : index
    %812 = memref.load %arg7[%c140] : memref<150xf32, #tpu.memory_space<smem>>
    %813 = vector.broadcast %812 : f32 to vector<16x16xf32>
    %814 = arith.mulf %813, %74 : vector<16x16xf32>
    %815 = arith.addf %811, %814 : vector<16x16xf32>
    %c141 = arith.constant 141 : index
    %816 = memref.load %arg7[%c141] : memref<150xf32, #tpu.memory_space<smem>>
    %817 = vector.broadcast %816 : f32 to vector<16x16xf32>
    %818 = arith.mulf %817, %75 : vector<16x16xf32>
    %819 = arith.addf %815, %818 : vector<16x16xf32>
    %c142 = arith.constant 142 : index
    %820 = memref.load %arg7[%c142] : memref<150xf32, #tpu.memory_space<smem>>
    %821 = vector.broadcast %820 : f32 to vector<16x16xf32>
    %822 = arith.mulf %821, %76 : vector<16x16xf32>
    %823 = arith.addf %819, %822 : vector<16x16xf32>
    %c143 = arith.constant 143 : index
    %824 = memref.load %arg7[%c143] : memref<150xf32, #tpu.memory_space<smem>>
    %825 = vector.broadcast %824 : f32 to vector<16x16xf32>
    %826 = arith.mulf %825, %77 : vector<16x16xf32>
    %827 = arith.addf %823, %826 : vector<16x16xf32>
    %c0_173 = arith.constant 0 : index
    %c4_174 = arith.constant 4 : index
    %c3_175 = arith.constant 3 : index
    %828 = vector.load %arg11[%c0_173, %c4_174, %c3_175] : memref<1x20x20xf32, #tpu.memory_space<vmem>>, vector<1x16x16xf32>
    %829 = vector.shape_cast %828 : vector<1x16x16xf32> to vector<16x16xf32>
    %830 = arith.mulf %827, %829 : vector<16x16xf32>
    %831 = arith.addf %801, %830 : vector<16x16xf32>
    %c24_176 = arith.constant 24 : index
    %832 = memref.load %arg8[%c24_176] : memref<25xf32, #tpu.memory_space<smem>>
    %833 = vector.broadcast %832 : f32 to vector<16x16xf32>
    %c144 = arith.constant 144 : index
    %834 = memref.load %arg7[%c144] : memref<150xf32, #tpu.memory_space<smem>>
    %835 = vector.broadcast %834 : f32 to vector<16x16xf32>
    %836 = arith.mulf %835, %72 : vector<16x16xf32>
    %837 = arith.addf %833, %836 : vector<16x16xf32>
    %c145 = arith.constant 145 : index
    %838 = memref.load %arg7[%c145] : memref<150xf32, #tpu.memory_space<smem>>
    %839 = vector.broadcast %838 : f32 to vector<16x16xf32>
    %840 = arith.mulf %839, %73 : vector<16x16xf32>
    %841 = arith.addf %837, %840 : vector<16x16xf32>
    %c146 = arith.constant 146 : index
    %842 = memref.load %arg7[%c146] : memref<150xf32, #tpu.memory_space<smem>>
    %843 = vector.broadcast %842 : f32 to vector<16x16xf32>
    %844 = arith.mulf %843, %74 : vector<16x16xf32>
    %845 = arith.addf %841, %844 : vector<16x16xf32>
    %c147 = arith.constant 147 : index
    %846 = memref.load %arg7[%c147] : memref<150xf32, #tpu.memory_space<smem>>
    %847 = vector.broadcast %846 : f32 to vector<16x16xf32>
    %848 = arith.mulf %847, %75 : vector<16x16xf32>
    %849 = arith.addf %845, %848 : vector<16x16xf32>
    %c148 = arith.constant 148 : index
    %850 = memref.load %arg7[%c148] : memref<150xf32, #tpu.memory_space<smem>>
    %851 = vector.broadcast %850 : f32 to vector<16x16xf32>
    %852 = arith.mulf %851, %76 : vector<16x16xf32>
    %853 = arith.addf %849, %852 : vector<16x16xf32>
    %c149 = arith.constant 149 : index
    %854 = memref.load %arg7[%c149] : memref<150xf32, #tpu.memory_space<smem>>
    %855 = vector.broadcast %854 : f32 to vector<16x16xf32>
    %856 = arith.mulf %855, %77 : vector<16x16xf32>
    %857 = arith.addf %853, %856 : vector<16x16xf32>
    %c0_177 = arith.constant 0 : index
    %c4_178 = arith.constant 4 : index
    %c4_179 = arith.constant 4 : index
    %858 = vector.load %arg11[%c0_177, %c4_178, %c4_179] : memref<1x20x20xf32, #tpu.memory_space<vmem>>, vector<1x16x16xf32>
    %859 = vector.shape_cast %858 : vector<1x16x16xf32> to vector<16x16xf32>
    %860 = arith.mulf %857, %859 : vector<16x16xf32>
    %861 = arith.addf %831, %860 : vector<16x16xf32>
    %c0_180 = arith.constant 0 : index
    %c0_181 = arith.constant 0 : index
    %c0_182 = arith.constant 0 : index
    %c0_183 = arith.constant 0 : index
    %862 = vector.load %arg9[%c0_180, %c0_181, %c0_182, %c0_183] : memref<1x1x16x16xf32, #tpu.memory_space<vmem>>, vector<1x1x16x16xf32>
    %863 = vector.shape_cast %862 : vector<1x1x16x16xf32> to vector<16x16xf32>
    %864 = vector.shape_cast %861 : vector<16x16xf32> to vector<1x1x16x16xf32>
    tpu.vector_store %arg9[%c0_180, %c0_181, %c0_182, %c0_183], %864 {strides = array<i32>} : memref<1x1x16x16xf32, #tpu.memory_space<vmem>>, vector<1x1x16x16xf32>,
    return
  }
  func.func @transform_0(%arg0: i32) -> (i32, i32, i32, i32) {
    %c0_i32 = arith.constant 0 : i32
    %c0_i32_0 = arith.constant 0 : i32
    %c0_i32_1 = arith.constant 0 : i32
    %c0_i32_2 = arith.constant 0 : i32
    return %arg0, %c0_i32, %c0_i32_0, %c0_i32_1 : i32, i32, i32, i32
  }
  func.func @transform_1(%arg0: i32) -> (i32, i32, i32, i32) {
    %c0_i32 = arith.constant 0 : i32
    %c0_i32_0 = arith.constant 0 : i32
    %c0_i32_1 = arith.constant 0 : i32
    %c0_i32_2 = arith.constant 0 : i32
    return %arg0, %c0_i32, %c0_i32_0, %c0_i32_1 : i32, i32, i32, i32
  }
  func.func @transform_2(%arg0: i32) -> (i32, i32, i32) {
    %c0_i32 = arith.constant 0 : i32
    %c0_i32_0 = arith.constant 0 : i32
    %c0_i32_1 = arith.constant 0 : i32
    %c0_i32_2 = arith.constant 0 : i32
    return %c0_i32, %c0_i32_0, %c0_i32_1 : i32, i32, i32
  }
  func.func @transform_3(%arg0: i32) -> (i32, i32) {
    %c0_i32 = arith.constant 0 : i32
    %c0_i32_0 = arith.constant 0 : i32
    %c0_i32_1 = arith.constant 0 : i32
    return %c0_i32, %c0_i32_0 : i32, i32
  }
  func.func @transform_4(%arg0: i32) -> (i32, i32, i32) {
    %c0_i32 = arith.constant 0 : i32
    %c0_i32_0 = arith.constant 0 : i32
    %c0_i32_1 = arith.constant 0 : i32
    %c0_i32_2 = arith.constant 0 : i32
    return %c0_i32, %c0_i32_0, %c0_i32_1 : i32, i32, i32
  }
  func.func @transform_5(%arg0: i32) -> (i32, i32) {
    %c0_i32 = arith.constant 0 : i32
    %c0_i32_0 = arith.constant 0 : i32
    %c0_i32_1 = arith.constant 0 : i32
    return %c0_i32, %c0_i32_0 : i32, i32
  }
  func.func @transform_6(%arg0: i32) -> i32 {
    %c0_i32 = arith.constant 0 : i32
    %c0_i32_0 = arith.constant 0 : i32
    return %c0_i32 : i32
  }
  func.func @transform_7(%arg0: i32) -> i32 {
    %c0_i32 = arith.constant 0 : i32
    %c0_i32_0 = arith.constant 0 : i32
    return %c0_i32 : i32
  }
  func.func @transform_8(%arg0: i32) -> (i32, i32, i32, i32) {
    %c0_i32 = arith.constant 0 : i32
    %c0_i32_0 = arith.constant 0 : i32
    %c0_i32_1 = arith.constant 0 : i32
    %c0_i32_2 = arith.constant 0 : i32
    return %arg0, %c0_i32, %c0_i32_0, %c0_i32_1 : i32, i32, i32, i32
  }
  func.func @transform_9(%arg0: i32) -> (i32, i32, i32, i32) {
    %c0_i32 = arith.constant 0 : i32
    %c0_i32_0 = arith.constant 0 : i32
    %c0_i32_1 = arith.constant 0 : i32
    %c0_i32_2 = arith.constant 0 : i32
    return %arg0, %c0_i32, %c0_i32_0, %c0_i32_1 : i32, i32, i32, i32
  }
}

</mosaic_0001>

<bundles_post_ra>
// kernel: tpu_custom_call.1
= control target key start
LH: loop header
LB: loop body
LE: loop exit
PB: predicated region body
PF: predicated region fallthrough
CT: control target
= control target key end

     0   :  { %s15706_s0 = inlined_call_operand.vmem [shape: f32[2,1,20,20], index: 0, kind: input, shape index: {}]   ;;  %s15707_s1 = inlined_call_operand.vmem [shape: f32[2,1,24,24], index: 1, kind: input, shape index: {}]   ;;  %s15708_s2 = inlined_call_operand.vmem [shape: f32[9,24,112], index: 2, kind: input, shape index: {}]   ;;  %s15709_s3 = inlined_call_operand.vmem [shape: f32[1,112], index: 3, kind: input, shape index: {}]   ;;  %s15710_s4 = inlined_call_operand.vmem [shape: f32[5,20,16], index: 4, kind: input, shape index: {}]   ;;  %s15711_s5 = inlined_call_operand.vmem [shape: f32[1,16], index: 5, kind: input, shape index: {}]   ;;  %s15712_s6 = inlined_call_operand.vmem [shape: f32[150], index: 6, kind: input, shape index: {}]   ;;  %s15713_s7 = inlined_call_operand.vmem [shape: f32[25], index: 7, kind: input, shape index: {}]   ;;  %s15714_s8 = inlined_call_operand.hbm [shape: f32[2,1,16,16], index: 8, kind: output, shape index: {0}]   ;;  %s15715_s9 = inlined_call_operand.hbm [shape: f32[2,1,16,16], index: 9, kind: output, shape index: {1}]  }
   0x1   :  { %15746 = sst [smem:[#allocation211_spill]] %s15706_s0 }
   0x2   :  { %15747 = sst [smem:[#allocation212_spill]] %s15707_s1 }
   0x3   :  { %15748 = sst [smem:[#allocation213_spill]] %s15708_s2 }
   0x4   :  { %15749 = sst [smem:[#allocation214_spill]] %s15709_s3 }
   0x5   :  { %15750 = sst [smem:[#allocation215_spill]] %s15710_s4 }
   0x6   :  { %15751 = sst [smem:[#allocation216_spill]] %s15711_s5 }
   0x7   :  { %15752 = sst [smem:[#allocation217_spill]] %s15712_s6 }
   0x8   :  { %15753 = sst [smem:[#allocation218_spill]] %s15713_s7 }
   0x9   :  { %15754 = sst [smem:[#allocation219_spill]] %s15714_s8 }
   0xa   :  { %15 = vsyncpa [#allocation5], 0 }
   0xb   :  { %16 = vsyncpa [#allocation7], 0 }
   0xc   :  { %17 = vsyncpa [#allocation4], 0 }
   0xd   :  { %19 = vsyncpa [#allocation4 + $0x1], 0 }
   0xe   :  { %20 = vsyncpa [#allocation10], 0 }
   0xf   :  { %22 = vsyncpa [#allocation10 + $0x1], 0  ;;  %s11910_s30 = smov 0   ;;  %s11912_s10 = smov 0  }
  0x10   :  { %s11914_s11 = smov 0   ;;  %s11916_s12 = smov 0  }
  0x11 LB: > { %15755 = sst [smem:[#allocation15_spill]] %s11828_s30  ;;  %s11931_s13 = sadd.s32 4294967295, %s11840_s12   ;;  %s11840_s12 = sphi %s11916_s12, %s16266_s12   ;;  %s11836_s11 = sphi %s11914_s11, %s16269_s11   ;;  %s11832_s10 = sphi %s11912_s10, %s16268_s10   ;;  %s11828_s30 = sphi %s11910_s30, %s16267_s30  }
  0x12   : > { %15756 = sst [smem:[#allocation16_spill]] %s11832_s10  ;;  %s10221_s14 = sadd.s32 4294967294, %s11840_s12  }
  0x13   : > { %15757 = sst [smem:[#allocation17_spill]] %s11836_s11  ;;  %s11935_s15 = sadd.s32 1, %s11840_s12  }
  0x14   : > { %15758 = sst [smem:[#allocation18_spill]] %s11840_s12  ;;  %s213_s16 = sadd.s32 1, %s11836_s11 }
  0x15   : > { %15759 = sst [smem:[#allocation19_spill]] %s11931_s13  ;;  %s210_s17 = ssub.s32 %s11840_s12, %s11935_s15 }
  0x16   : > { %15760 = sst [smem:[#allocation20_spill]] %s11935_s15  ;;  %p223_p0 = scmp.ne.s32.totalorder %s11836_s11, %s11832_s10 }
  0x17   : > { %p211_p1 = scmp.eq.s32.totalorder %s210_s17, 0  ;;  %p224_p2 = scmp.eq.s32.totalorder %s11931_s13, 1 }
  0x18   : > { %p229_p3 = scmp.ne.s32.totalorder %s11832_s10, %s11828_s30  ;;  %p230_p4 = scmp.eq.s32.totalorder %s10221_s14, 1 }
  0x19   : > { %s11946_s18 = scalar_select %p211_p1, %s11836_s11, %s213_s16  }
  0x1a   : > { %p11948_p5 = por %p224_p2, %p223_p0  ;;  %p11952_p6 = por %p230_p4, %p229_p3 }
  0x1b   : > { %15761 = sst [smem:[#allocation21_spill]] %s11946_s18  ;;  %p10222_p7 = scmp.ge.s32.totalorder %s11840_s12, 1 }
  0x1c   : > { %s15762_s19 = scalar_select %p11948_p5, 1, 0 }
  0x1d   : > { %s15763_s20 = scalar_select %p11952_p6, 1, 0 }
  0x1e   : > { %p263_p8 = scmp.lt.s32.totalorder %s11840_s12, 3  ;;  %p15716_p9 = scmp.eq.s32.totalorder %s11931_s13, 0 }
  0x1f   : > { %15764 = sst [smem:[#allocation22_spill]] %s15763_s20 }
  0x20   : > { %p11959_p10 = pnand %p10222_p7, %p263_p8  ;;  %s15766_s6 = sld [smem:[#allocation217_spill]] }
  0x21   : > { %s15767_s7 = sld [smem:[#allocation218_spill]] }
  0x22   : > { %s15765_s21 = scalar_select %p11959_p10, 1, 0 }
  0x23   : > { %p11643_p11 = pneg %p11959_p10 }
  0x25   : > { %p11973_p12 = pnand %p15716_p9, %p11643_p11 }
  0x26   : > { %s288_s24 = sshll.u32 %s15766_s6, 4  ;;  %s289_s24 = int_to_ptr.vmem [resolvable:$true] %s288_s24 }
  0x27   : > { %s299_s27 = sshll.u32 %s15767_s7, 4  ;;  %s11712_s29 = scalar_lea.vmem %s289_s24, 32  ;;  %s300_s27 = int_to_ptr.vmem [resolvable:$true] %s299_s27 }
  0x28   : > { %p11713_p13 = scmp.ne.s32.totalorder %s289_s24, %s11712_s29  ;;  %p11714_p0 = pneg %p11973_p12 }
  0x29   : > { %p11720_p3 = scmp.lt.s32.totalorder %s289_s24, %s289_s24  ;;  %p11721_p4 = scmp.lt.s32.totalorder %s11712_s29, %s11712_s29 }
  0x2a   : > { %p11715_p1 = pnand %p11714_p0, %p11713_p13 }
  0x2b   : > { %p11722_p7 = por %p11721_p4, %p11720_p3 }
  0x2c   : > { %p11716_p2 = pneg %p11715_p1 }
  0x2e   : > { %p11723_p8 = pnand %p11722_p7, %p11716_p2 }
  0x30   : > { %11726 = shalt.err (!%p11723_p8)
}
  0x31   : > { %s11842_s14 = smov [#allocation3]   ;;  %s11727_s16 = scalar_lea.vmem %s300_s27, 16 }
  0x32   : > { %11646 = dma.vmem_to_smem (!%p11973_p12), %s289_s24, 32, %s11842_s14, [#allocation5]  }
  0x33   : > { %p11728_p11 = scmp.ne.s32.totalorder %s300_s27, %s11727_s16  ;;  %p11735_p5 = scmp.lt.s32.totalorder %s300_s27, %s300_s27 }
  0x34   : > { %p11736_p10 = scmp.lt.s32.totalorder %s11727_s16, %s11727_s16 }
  0x35   : > { %p11730_p9 = pnand %p11728_p11, %p11714_p0 }
  0x36   : > { %p11737_p13 = por %p11736_p10, %p11735_p5 }
  0x37   : > { %p11731_p6 = pneg %p11730_p9 }
  0x39   : > { %p11738_p1 = pnand %p11737_p13, %p11731_p6 }
  0x3b   : > { %11741 = shalt.err (!%p11738_p1)
}
  0x3c   : > { %s11843_s17 = smov [#allocation6]   ;;  %p15769_p2 = scmp.ne.s32.totalorder %s15765_s21, 0 }
  0x3d   : > { %11649 = dma.vmem_to_smem (!%p11973_p12), %s300_s27, 16, %s11843_s17, [#allocation7]  }
  0x3e   : > { %328 = sbr.rel (%p15769_p2) target bundleno = 1349 (0x545), region = 52 }
  0x43   : > { %p15770_p3 = scmp.eq.s32.totalorder %s11931_s13, 0 }
  0x45   : > { %11811 = dma.done.wait (%p15770_p3), [#allocation5], 32   ;;  %p15771_p4 = pmov %p15770_p3 }
  0x46   : > { %p15772_p9 = pmov %p15770_p3 }
  0x47   : > { %11813 = vsyncadd (%p15771_p4), [#allocation5], 4294967264 }
  0x48   : > { %11815 = dma.done.wait (%p15772_p9), [#allocation7], 16   ;;  %p15773_p5 = pmov %p15770_p3 }
  0x4a   : > { %11817 = vsyncadd (%p15773_p5), [#allocation7], 4294967280 }
  0x4b   : > { %338 = sfence }
  0x4c   : > { %s15774_s2 = sld [smem:[#allocation213_spill]]  ;;  %p379_p6 = scmp.lt.s32.totalorder %s11931_s13, 1  ;;  %vm410_vm0 = vcmask 1046528   ;;  %vm416_vm1 = vcmask 195584   ;;  %vm1990_vm2 = vcmask 1044480   ;;  %vm2521_vm3 = vcmask 1043456  }
  0x4d   : > { %s15775_s1 = sld [smem:[#allocation212_spill]]  ;;  %vm1459_vm4 = vcmask 1045504   ;;  %vm3052_vm5 = vcmask 1042432   ;;  %vm3583_vm6 = vcmask 1041408   ;;  %vm4114_vm7 = vcmask 1040384   ;;  %s11846_s24 = smov 96  }
  0x4e   : > { %s12010_s27 = scalar_select %p379_p6, %s11931_s13, 1  ;;  %vm389_vm8 = vcmask 162816   ;;  %vm5181_vm11 = vcmask 130048   ;;  %vm392_vm12 = vcmask 158720   ;;  %vm7865_vm13 = vcmask 146448  }
  0x4f   : > { %s15809_s4 = sld [smem:[#allocation215_spill]]  ;;  %s11847_s26 = smov 80  }
  0x50   : > { %s11630_s28 = smul.u32 24, %s12010_s27  ;;  %s13079_s23 = sld [smem:[#allocation3 + $0x1]] }
  0x51   : > { %s15811_s0 = sld [smem:[#allocation211_spill]]  ;;  %s15721_s27 = smov 64  }
  0x52   : > { %v10235_v0 = vld [vmem:[%s15774_s2 + $0x28] sm:$0xff]  ;;  %v10234_v1 = vld [vmem:[%s15774_s2 + $0x20] sm:$0xff]  ;;  %v10233_v2 = vld [vmem:[%s15774_s2 + $0x18] sm:$0xff]  ;;  %s15812_s3 = sld [smem:[#allocation214_spill]]  ;;  %s15741_s15 = sshll.u32 %s11931_s13, 8 }
  0x53   : > { %v12003_v3 = vand.u32 4294901760, %v10235_v0  ;;  %v12005_v4 = vand.u32 4294901760, %v10234_v1  ;;  %v12007_v5 = vand.u32 4294901760, %v10233_v2  ;;  %s388_s16 = scalar_lea.vmem %s15775_s1, %s11630_s28  ;;  %v402_v28 = vld [vmem:[%s15774_s2 + $0x10] sm:$0xff]  ;;  %v401_v34 = vld [vmem:[%s15774_s2 + $0x8] sm:$0xff]  ;;  %v400_v38 = vld [vmem:[%s15774_s2] sm:$0xff]  ;;  %s15056_s12 = scalar_lea.hbm %s15715_s9, %s15741_s15 }
  0x54   : > { %v12047_v15 = vld [vmem:[%s388_s16] sm:$0xff]  ;;  %v12049_v16 = vld [vmem:[%s388_s16 + $0x8] sm:$0xff]  ;;  %v12051_v17 = vld [vmem:[%s388_s16 + $0x10] sm:$0xff]  ;;  %v12072_v33 = vand.u32 4294901760, %v402_v28  ;;  %v12079_v37 = vand.u32 4294901760, %v401_v34  ;;  %v12094_v46 = vand.u32 4294901760, %v400_v38 }
  0x55   : > { %10874 = vmatprep.subr.mxu0 %v12003_v3  ;;  %v12014_v6 = vsub.f32 %v10235_v0, %v12003_v3  ;;  %v12017_v7 = vsub.f32 %v10234_v1, %v12005_v4  ;;  %v12020_v8 = vsub.f32 %v10233_v2, %v12007_v5  ;;  %v411_v18 = vrot.slane %v12047_v15, 1  ;;  %s13127_s14 = sld [smem:[#allocation3 + $0x2]]  ;;  %s11844_s16 = smov 32  }
  0x56   : > { %10875 = vmatpush3.msra.mxu0 %v12003_v3  ;;  %v412_v19 = vrot.slane %v12049_v16, 1  ;;  %v414_v20 = vrot.slane %v12051_v17, 1  ;;  %v12086_v41 = vsub.f32 %v402_v28, %v12072_v33  ;;  %v936_v42 = vsel %vm416_vm1, %v12047_v15, 0  ;;  %s13142_s17 = sld [smem:[#allocation3 + $0x3]]  ;;  %s16004_s20 = smov 126  }
  0x57   : > { %v12025_v9 = vand.u32 4294901760, %v12014_v6  ;;  %10876 = vmatprep.subr.mxu0 %v12005_v4  ;;  %v12029_v10 = vand.u32 4294901760, %v12017_v7  ;;  %v12032_v11 = vand.u32 4294901760, %v12020_v8  ;;  %v938_v43 = vsel %vm416_vm1, %v12049_v16, 0  ;;  %s383_s29 = scalar_lea.vmem %s15811_s0, %s11630_s28  ;;  %s13152_s22 = sld [smem:[#allocation3 + $0x4]] }
  0x58   : > { %10877 = vmatpush3.msra.mxu0 %v12005_v4  ;;  %v413_v23 = vsel %vm410_vm0, %v411_v18, %v412_v19  ;;  %v415_v24 = vsel %vm410_vm0, %v412_v19, %v414_v20  ;;  %v12097_v47 = vand.u32 4294901760, %v936_v42  ;;  %v12101_v48 = vand.u32 4294901760, %v12086_v41  ;;  %v10238_v18 = vld [vmem:[%s15774_s2 + $0x40] sm:$0xff]  ;;  %s13161_s21 = sld [smem:[#allocation3 + $0x5]]  ;;  %p16005_p12 = scmp.ne.s32.totalorder %s15762_s19, 0 }
  0x59   : > { %v539_v12 = vsub.f32 %v12014_v6, %v12025_v9  ;;  %v546_v13 = vsub.f32 %v12017_v7, %v12029_v10  ;;  %10878 = vmatprep.subr.mxu0 %v12007_v5  ;;  %v553_v14 = vsub.f32 %v12020_v8, %v12032_v11  ;;  %v417_v26 = vsel %vm416_vm1, %v413_v23, 0  ;;  %s13172_s25 = sld [smem:[#allocation3 + $0x7]] }
  0x5a   : > { %10879 = vmatpush3.msra.mxu0 %v12007_v5  ;;  %v419_v27 = vsel %vm416_vm1, %v415_v24, 0  ;;  %v12065_v29 = vand.u32 4294901760, %v417_v26  ;;  %v12104_v49 = vsub.f32 %v401_v34, %v12079_v37  ;;  %v12106_v50 = vand.u32 4294901760, %v938_v43  ;;  %s13656_s28 = sld [smem:[#allocation3 + $0x23]] }
  0x5b   : > { %v540_v21 = vand.u32 4294901760, %v539_v12  ;;  %v547_v22 = vand.u32 4294901760, %v546_v13  ;;  %10892 = vmatprep.subr.mxu0 %v12014_v6  ;;  %v554_v25 = vand.u32 4294901760, %v553_v14  ;;  %v12067_v30 = vand.u32 4294901760, %v419_v27  ;;  %s15966_s5 = sld [smem:[#allocation216_spill]] }
  0x5c   : > { %v490_v31 = vsub.f32 %v417_v26, %v12065_v29  ;;  %10889 = vmatprep.mubr.f32.mxu1 %v12065_v29  ;;  %v12111_v51 = vsub.f32 %v400_v38, %v12094_v46  ;;  %v1991_v52 = vrot.slane %v12047_v15, 3  ;;  %v1992_v53 = vrot.slane %v12049_v16, 3  ;;  %v10237_v26 = vld [vmem:[%s15774_s2 + $0x38] sm:$0xff]  ;;  %s15005_s0 = sld [smem:[#allocation3 + $0xc]] }
  0x5d   : > { %10883 = vmatprep.subr.mxu1 %v540_v21  ;;  %v500_v32 = vsub.f32 %v419_v27, %v12067_v30  ;;  %v12117_v54 = vsub.f32 %v936_v42, %v12097_v47  ;;  %v1994_v55 = vrot.slane %v12051_v17, 3  ;;  %v1058_v56 = vsub.f32 %v12086_v41, %v12101_v48  ;;  %s15011_s1 = sld [smem:[#allocation6 + $0x3]] }
  0x5e   : > { %10884 = vmatpush3.msra.mxu1 %v540_v21  ;;  %v491_v35 = vand.u32 4294901760, %v490_v31  ;;  %v12125_v57 = vand.u32 4294901760, %v12104_v49  ;;  %v12128_v58 = vsub.f32 %v938_v43, %v12106_v50  ;;  %v1993_v59 = vsel %vm1990_vm2, %v1991_v52, %v1992_v53  ;;  %s15025_s6 = sld [smem:[#allocation3 + $0x1e]] }
  0x5f   : > { %10885 = vmatprep.subr.mxu1 %v547_v22  ;;  %v501_v36 = vand.u32 4294901760, %v500_v32  ;;  %v12134_v60 = vsel %vm416_vm1, %v1993_v59, 0  ;;  %v12139_v61 = vand.u32 4294901760, %v12111_v51  ;;  %v1995_v62 = vsel %vm1990_vm2, %v1992_v53, %v1994_v55  ;;  %s15029_s18 = sld [smem:[#allocation6 + $0x6]] }
  0x60   : > { %10886 = vmatpush3.msra.mxu1 %v547_v22  ;;  %v492_v39 = vsub.f32 %v490_v31, %v491_v35  ;;  %v1010_v63 = vand.u32 4294901760, %v12117_v54  ;;  %v12145_v0 = vsel %vm416_vm1, %v1995_v62, 0  ;;  %v1059_v1 = vand.u32 4294901760, %v1058_v56  ;;  %s15033_s11 = sld [smem:[#allocation3 + $0x24]] }
  0x61   : > { %10887 = vmatprep.subr.mxu1 %v554_v25  ;;  %v502_v40 = vsub.f32 %v500_v32, %v501_v36  ;;  %v1065_v2 = vsub.f32 %v12104_v49, %v12125_v57  ;;  %v1460_v12 = vrot.slane %v12047_v15, 2  ;;  %v1461_v13 = vrot.slane %v12049_v16, 2 }
  0x62   : > { %10888 = vmatpush3.msra.mxu1 %v554_v25  ;;  %v493_v44 = vand.u32 4294901760, %v492_v39  ;;  %v1463_v19 = vrot.slane %v12051_v17, 2  ;;  %v12194_v25 = vand.u32 4294901760, %v10238_v18  ;;  %v3054_v34 = vrot.slane %v12049_v16, 5 }
  0x63   : > { %10901 = vmatprep.subr.mxu1 %v12003_v3  ;;  %10890 = vmatmul.mubr.f32.vlgmr.msra.gmra.mxu1 %v12067_v30  ;;  %v503_v45 = vand.u32 4294901760, %v502_v40  ;;  %v1462_v27 = vsel %vm1459_vm4, %v1460_v12, %v1461_v13  ;;  %v3584_v56 = vrot.slane %v12047_v15, 6  ;;  %v3585_v62 = vrot.slane %v12049_v16, 6 }
  0x64   : > { %10902 = vmatpush3.msra.mxu1 %v12003_v3  ;;  %10907 = vmatprep.mubr.f32.mxu1 %v491_v35  ;;  %v1464_v28 = vsel %vm1459_vm4, %v1461_v13, %v1463_v19  ;;  %v3056_v35 = vrot.slane %v12051_v17, 5  ;;  %v4118_v13 = vrot.slane %v12051_v17, 7 }
  0x65   : > { %10903 = vmatprep.subr.mxu1 %v12005_v4  ;;  %10880 = vmatprep.mubr.f32.mxu0 %v493_v44  ;;  %v1467_v38 = vsel %vm416_vm1, %v1464_v28, 0 }
  0x66   : > { %10904 = vmatpush3.msra.mxu1 %v12005_v4  ;;  %10881 = vmatmul.mubr.f32.vlgmr.msra.gmra.mxu0 %v503_v45  ;;  %v3057_v42 = vsel %vm3052_vm5, %v3054_v34, %v3056_v35  ;;  %v12240_v52 = vand.u32 4294901760, %v1467_v38  ;;  %16001 = sst [smem:[#allocation204_spill]] %s15033_s11 }
  0x67   : > { %10905 = vmatprep.subr.mxu1 %v12007_v5  ;;  %10893 = vmatpush3.msra.mxu0 %v12014_v6  ;;  %v1011_v6 = vsub.f32 %v12117_v54, %v1010_v63  ;;  %v12233_v45 = vsel %vm416_vm1, %v3057_v42, 0 }
  0x68   : > { %10906 = vmatpush3.msra.mxu1 %v12007_v5  ;;  %10898 = vmatprep.mubr.f32.mxu0 %v490_v31  ;;  %v12208_v31 = vand.u32 4294901760, %v10237_v26  ;;  %v12265_v59 = vsub.f32 %v1467_v38, %v12240_v52  ;;  %v12376_v38 = vsel %vm416_vm1, %v12051_v17, 0 }
  0x69   : > { %10919 = vmatprep.subr.mxu1 %v12003_v3  ;;  %10894 = vmatprep.subr.mxu0 %v12017_v7  ;;  %v1012_v21 = vand.u32 4294901760, %v1011_v6 }
  0x6a   : > { %10908 = vmatmul.mubr.f32.vlgmr.msra.gmra.mxu1 %v501_v36  ;;  %10895 = vmatpush3.msra.mxu0 %v12017_v7  ;;  %v2522_v7 = vrot.slane %v12047_v15, 4  ;;  %v12216_v36 = vsub.f32 %v10238_v18, %v12194_v25 }
  0x6b   : > { %10920 = vmatpush3.msra.mxu1 %v12003_v3  ;;  %10896 = vmatprep.subr.mxu0 %v12020_v8  ;;  %v12152_v3 = vand.u32 4294901760, %v12128_v58 }
  0x6c   : > { %10921 = vmatprep.subr.mxu1 %v12005_v4  ;;  %10897 = vmatpush3.msra.mxu0 %v12020_v8  ;;  %v2523_v8 = vrot.slane %v12049_v16, 4  ;;  %v12245_v53 = vand.u32 4294901760, %v12216_v36 }
  0x6d   : > { %10922 = vmatpush3.msra.mxu1 %v12005_v4  ;;  %10899 = vmatmul.mubr.f32.vlgmr.msra.gmra.mxu0 %v500_v32  ;;  %v1072_v4 = vsub.f32 %v12111_v51, %v12139_v61  ;;  %v1465_v32 = vsel %vm416_vm1, %v1462_v27, 0 }
  0x6e   : > { %10910 = vmatprep.subr.mxu0 %v12025_v9  ;;  %10923 = vmatprep.subr.mxu1 %v12007_v5  ;;  %v2524_v14 = vsel %vm2521_vm3, %v2522_v7, %v2523_v8  ;;  %v12227_v43 = vand.u32 4294901760, %v1465_v32  ;;  %v1549_v7 = vand.u32 4294901760, %v12265_v59 }
  0x6f   : > { %10911 = vmatpush3.msra.mxu0 %v12025_v9  ;;  %10916 = vmatprep.mubr.f32.mxu0 %v12065_v29  ;;  %v1021_v9 = vsub.f32 %v12128_v58, %v12152_v3  ;;  %v12183_v20 = vsel %vm416_vm1, %v2524_v14, 0 }
  0x70   : > { %10912 = vmatprep.subr.mxu0 %v12029_v10  ;;  %10924 = vmatpush3.msra.mxu1 %v12007_v5  ;;  %v1066_v5 = vand.u32 4294901760, %v1065_v2  ;;  %v1587_v2 = vsub.f32 %v12216_v36, %v12245_v53  ;;  %v1550_v12 = vsub.f32 %v12265_v59, %v1549_v7 }
  0x71   : > { %10913 = vmatpush3.msra.mxu0 %v12029_v10  ;;  %10925 = vmatprep.mubr.f32.mxu1 %v12065_v29  ;;  %v2525_v10 = vrot.slane %v12051_v17, 4  ;;  %v12188_v23 = vand.u32 4294901760, %v1021_v9  ;;  %v10236_v29 = vld [vmem:[%s15774_s2 + $0x30] sm:$0xff]  ;;  %v4115_v9 = vrot.slane %v12047_v15, 7 }
  0x72   : > { %10914 = vmatprep.subr.mxu0 %v12032_v11  ;;  %10937 = vmatprep.subr.mxu1 %v1059_v1  ;;  %v12221_v39 = vand.u32 4294901760, %v10236_v29  ;;  %v1551_v18 = vand.u32 4294901760, %v1550_v12 }
  0x73   : > { %10915 = vmatpush3.msra.mxu0 %v12032_v11  ;;  %10926 = vmatmul.mubr.f32.vlgmr.msra.gmra.mxu1 %v12067_v30  ;;  %v1073_v11 = vand.u32 4294901760, %v1072_v4  ;;  %v2526_v22 = vsel %vm2521_vm3, %v2523_v8, %v2525_v10  ;;  %v4116_v10 = vrot.slane %v12049_v16, 7  ;;  %v10241_v16 = vld [vmem:[%s15774_s2 + $0x58] sm:$0xff] }
  0x74   : > { %10917 = vmatmul.mubr.f32.vlgmr.msra.gmra.mxu0 %v12067_v30  ;;  %10928 = vmatprep.subr.mxu0 %v12072_v33  ;;  %v12191_v24 = vsel %vm416_vm1, %v2526_v22, 0  ;;  %v3053_v30 = vrot.slane %v12047_v15, 5  ;;  %v12250_v55 = vsub.f32 %v10236_v29, %v12221_v39  ;;  %v12327_v19 = vand.u32 4294901760, %v10241_v16 }
  0x75   : > { %10929 = vmatpush3.msra.mxu0 %v12072_v33  ;;  %10938 = vmatpush3.msra.mxu1 %v1059_v1  ;;  %v3587_v1 = vrot.slane %v12051_v17, 6 }
  0x76   : > { %10930 = vmatprep.subr.mxu0 %v12079_v37  ;;  %10939 = vmatprep.subr.mxu1 %v1066_v5  ;;  %v3055_v40 = vsel %vm3052_vm5, %v3053_v30, %v3054_v34  ;;  %v12345_v28 = vsub.f32 %v10241_v16, %v12327_v19  ;;  %v12354_v30 = vand.u32 4294901760, %v12134_v60  ;;  %v12362_v34 = vand.u32 4294901760, %v12145_v0 }
  0x77   : > { %10931 = vmatpush3.msra.mxu0 %v12079_v37  ;;  %10940 = vmatpush3.msra.mxu1 %v1066_v5  ;;  %v12230_v44 = vsel %vm416_vm1, %v3055_v40, 0  ;;  %v3588_v8 = vsel %vm3583_vm6, %v3585_v62, %v3587_v1 }
  0x78   : > { %10932 = vmatprep.subr.mxu0 %v12094_v46  ;;  %10941 = vmatprep.subr.mxu1 %v1073_v11  ;;  %v12294_v5 = vsel %vm416_vm1, %v3588_v8, 0  ;;  %v12367_v35 = vand.u32 4294901760, %v12345_v28  ;;  %v12382_v40 = vsub.f32 %v12134_v60, %v12354_v30  ;;  %v12392_v17 = vsub.f32 %v12145_v0, %v12362_v34 }
  0x79   : > { %10933 = vmatpush3.msra.mxu0 %v12094_v46  ;;  %10934 = vmatprep.mubr.f32.mxu0 %v1012_v21  ;;  %v10240_v21 = vld [vmem:[%s15774_s2 + $0x50] sm:$0xff]  ;;  %v12469_v8 = vand.u32 4294901760, %v12191_v24 }
  0x7a   : > { %10942 = vmatpush3.msra.mxu1 %v1073_v11  ;;  %10935 = vmatmul.mubr.f32.vlgmr.msra.gmra.mxu0 %v12188_v23  ;;  %v4119_v11 = vsel %vm4114_vm7, %v4116_v10, %v4118_v13  ;;  %v12340_v27 = vand.u32 4294901760, %v10240_v21  ;;  %v2118_v60 = vsub.f32 %v12345_v28, %v12367_v35  ;;  %v2070_v0 = vand.u32 4294901760, %v12382_v40 }
  0x7b   : > { %10943 = vmatprep.mubr.f32.mxu1 %v12097_v47  ;;  %10946 = vmatprep.subr.mxu0 %v12086_v41  ;;  %v12333_v22 = vsel %vm416_vm1, %v4119_v11, 0 }
  0x7c   : > { %10955 = vmatprep.subr.mxu1 %v12072_v33  ;;  %10944 = vmatmul.mubr.f32.vlgmr.msra.gmra.mxu1 %v12106_v50 }
  0x7d   : > { %10947 = vmatpush3.msra.mxu0 %v12086_v41  ;;  %10956 = vmatpush3.msra.mxu1 %v12072_v33  ;;  %v12238_v41 = vsub.f32 %v10237_v26, %v12208_v31  ;;  %v10239_v26 = vld [vmem:[%s15774_s2 + $0x48] sm:$0xff] }
  0x7e   : > { %10948 = vmatprep.subr.mxu0 %v12104_v49  ;;  %10957 = vmatprep.subr.mxu1 %v12079_v37  ;;  %v12349_v29 = vand.u32 4294901760, %v10239_v26 }
  0x7f   : > { %10949 = vmatpush3.msra.mxu0 %v12104_v49  ;;  %10958 = vmatpush3.msra.mxu1 %v12079_v37  ;;  %v12255_v49 = vsub.f32 %v1465_v32, %v12227_v43  ;;  %v12359_v32 = vsub.f32 %v10240_v21, %v12340_v27 }
  0x80   : > { %10950 = vmatprep.subr.mxu0 %v12111_v51  ;;  %10959 = vmatprep.subr.mxu1 %v12094_v46 }
  0x81   : > { %10951 = vmatpush3.msra.mxu0 %v12111_v51  ;;  %10952 = vmatprep.mubr.f32.mxu0 %v12117_v54  ;;  %v12262_v51 = vand.u32 4294901760, %v12238_v41  ;;  %v12276_v54 = vand.u32 4294901760, %v12250_v55  ;;  %v1539_v4 = vand.u32 4294901760, %v12255_v49  ;;  %v12388_v42 = vand.u32 4294901760, %v12359_v32 }
  0x82   : > { %10960 = vmatpush3.msra.mxu1 %v12094_v46  ;;  %10953 = vmatmul.mubr.f32.vlgmr.msra.gmra.mxu0 %v12128_v58 }
  0x83   : > { %10961 = vmatprep.mubr.f32.mxu1 %v1010_v63  ;;  %10964 = vmatprep.subr.mxu0 %v12101_v48  ;;  %v3586_v63 = vsel %vm3583_vm6, %v3584_v56, %v3585_v62  ;;  %v2071_v56 = vsub.f32 %v12382_v40, %v2070_v0 }
  0x84   : > { %10973 = vmatprep.subr.mxu1 %v12072_v33  ;;  %10962 = vmatmul.mubr.f32.vlgmr.msra.gmra.mxu1 %v12152_v3  ;;  %v12283_v6 = vsel %vm416_vm1, %v3586_v63, 0 }
  0x85   : > { %10965 = vmatpush3.msra.mxu0 %v12101_v48  ;;  %10974 = vmatpush3.msra.mxu1 %v12072_v33  ;;  %v1594_v48 = vsub.f32 %v12238_v41, %v12262_v51  ;;  %v1588_v33 = vand.u32 4294901760, %v1587_v2  ;;  %v10242_v2 = vld [vmem:[%s15774_s2 + $0x60] sm:$0xff] }
  0x86   : > { %10966 = vmatprep.subr.mxu0 %v12125_v57  ;;  %10975 = vmatprep.subr.mxu1 %v12079_v37 }
  0x87   : > { %10967 = vmatpush3.msra.mxu0 %v12125_v57  ;;  %10976 = vmatpush3.msra.mxu1 %v12079_v37  ;;  %v1601_v57 = vsub.f32 %v12250_v55, %v12276_v54  ;;  %v1540_v37 = vsub.f32 %v12255_v49, %v1539_v4 }
  0x88   : > { %10968 = vmatprep.subr.mxu0 %v12139_v61  ;;  %10977 = vmatprep.subr.mxu1 %v12094_v46 }
  0x89   : > { %10969 = vmatpush3.msra.mxu0 %v12139_v61  ;;  %10970 = vmatprep.mubr.f32.mxu0 %v12097_v47  ;;  %v1595_v61 = vand.u32 4294901760, %v1594_v48  ;;  %v1602_v15 = vand.u32 4294901760, %v1601_v57  ;;  %v12461_v48 = vand.u32 4294901760, %v12183_v20 }
  0x8a   : > { %10978 = vmatpush3.msra.mxu1 %v12094_v46  ;;  %10971 = vmatmul.mubr.f32.vlgmr.msra.gmra.mxu0 %v12106_v50  ;;  %v4117_v46 = vsel %vm4114_vm7, %v4115_v9, %v4116_v10  ;;  %v12495_v10 = vsub.f32 %v12191_v24, %v12469_v8 }
  0x8b   : > { %10979 = vmatprep.mubr.f32.mxu1 %v12097_v47  ;;  %10982 = vmatprep.subr.mxu0 %v12194_v25  ;;  %v1541_v47 = vand.u32 4294901760, %v1540_v37  ;;  %v12322_v14 = vsel %vm416_vm1, %v4117_v46, 0  ;;  %v12485_v37 = vsub.f32 %v12183_v20, %v12461_v48 }
  0x8c   : > { %10991 = vmatprep.subr.mxu1 %v1588_v33  ;;  %10980 = vmatmul.mubr.f32.vlgmr.msra.gmra.mxu1 %v12106_v50  ;;  %v2611_v46 = vand.u32 4294901760, %v12495_v10 }
  0x8d   : > { %10983 = vmatpush3.msra.mxu0 %v12194_v25  ;;  %10992 = vmatpush3.msra.mxu1 %v1588_v33  ;;  %v2601_v24 = vand.u32 4294901760, %v12485_v37 }
  0x8e   : > { %10984 = vmatprep.subr.mxu0 %v12208_v31  ;;  %10993 = vmatprep.subr.mxu1 %v1595_v61  ;;  %v2612_v11 = vsub.f32 %v12495_v10, %v2611_v46 }
  0x8f   : > { %10985 = vmatpush3.msra.mxu0 %v12208_v31  ;;  %10994 = vmatpush3.msra.mxu1 %v1595_v61  ;;  %v2602_v16 = vsub.f32 %v12485_v37, %v2601_v24 }
  0x90   : > { %10986 = vmatprep.subr.mxu0 %v12221_v39  ;;  %10995 = vmatprep.subr.mxu1 %v1602_v15 }
  0x91   : > { %10987 = vmatpush3.msra.mxu0 %v12221_v39  ;;  %10988 = vmatprep.mubr.f32.mxu0 %v1541_v47  ;;  %v2603_v21 = vand.u32 4294901760, %v2602_v16 }
  0x92   : > { %10996 = vmatpush3.msra.mxu1 %v1602_v15  ;;  %10997 = vmatprep.mubr.f32.mxu1 %v12227_v43 }
  0x93   : > { %10989 = vmatmul.mubr.f32.vlgmr.msra.gmra.mxu0 %v1551_v18  ;;  %10998 = vmatmul.mubr.f32.vlgmr.msra.gmra.mxu1 %v12240_v52 }
  0x94   : > { %11000 = vmatprep.subr.mxu0 %v12216_v36  ;;  %11009 = vmatprep.subr.mxu1 %v12194_v25 }
  0x95   : > { %11001 = vmatpush3.msra.mxu0 %v12216_v36  ;;  %11010 = vmatpush3.msra.mxu1 %v12194_v25  ;;  %v12372_v36 = vsub.f32 %v10239_v26, %v12349_v29  ;;  %v2613_v26 = vand.u32 4294901760, %v2612_v11 }
  0x96   : > { %11002 = vmatprep.subr.mxu0 %v12238_v41  ;;  %11011 = vmatprep.subr.mxu1 %v12208_v31 }
  0x97   : > { %11003 = vmatpush3.msra.mxu0 %v12238_v41  ;;  %11012 = vmatpush3.msra.mxu1 %v12208_v31  ;;  %v12402_v41 = vand.u32 4294901760, %v12372_v36 }
  0x98   : > { %11004 = vmatprep.subr.mxu0 %v12250_v55  ;;  %11013 = vmatprep.subr.mxu1 %v12221_v39 }
  0x99   : > { %11005 = vmatpush3.msra.mxu0 %v12250_v55  ;;  %11006 = vmatprep.mubr.f32.mxu0 %v12255_v49  ;;  %v2125_v55 = vsub.f32 %v12359_v32, %v12388_v42  ;;  %v2080_v49 = vand.u32 4294901760, %v12392_v17 }
  0x9a   : > { %11014 = vmatpush3.msra.mxu1 %v12221_v39  ;;  %11007 = vmatmul.mubr.f32.vlgmr.msra.gmra.mxu0 %v12265_v59  ;;  %v10244_v59 = vld [vmem:[%s15774_s2 + $0x70] sm:$0xff] }
  0x9b   : > { %11015 = vmatprep.mubr.f32.mxu1 %v1539_v4  ;;  %11018 = vmatprep.subr.mxu0 %v12245_v53  ;;  %v12437_v1 = vand.u32 4294901760, %v10244_v59  ;;  %v12456_v4 = vand.u32 4294901760, %v10242_v2 }
  0x9c   : > { %11027 = vmatprep.subr.mxu1 %v12194_v25  ;;  %11016 = vmatmul.mubr.f32.vlgmr.msra.gmra.mxu1 %v1549_v7 }
  0x9d   : > { %11019 = vmatpush3.msra.mxu0 %v12245_v53  ;;  %11028 = vmatpush3.msra.mxu1 %v12194_v25  ;;  %v2119_v53 = vand.u32 4294901760, %v2118_v60  ;;  %v2132_v25 = vsub.f32 %v12372_v36, %v12402_v41  ;;  %v12452_v63 = vsub.f32 %v10244_v59, %v12437_v1  ;;  %v12479_v57 = vsub.f32 %v10242_v2, %v12456_v4  ;;  %v10249_v2 = vld [vmem:[%s15774_s2 + $0x98] sm:$0xff] }
  0x9e   : > { %11020 = vmatprep.subr.mxu0 %v12262_v51  ;;  %11029 = vmatprep.subr.mxu1 %v12208_v31 }
  0x9f   : > { %11021 = vmatpush3.msra.mxu0 %v12262_v51  ;;  %11030 = vmatpush3.msra.mxu1 %v12208_v31  ;;  %v2126_v31 = vand.u32 4294901760, %v2125_v55  ;;  %v2081_v51 = vsub.f32 %v12392_v17, %v2080_v49  ;;  %v12474_v33 = vand.u32 4294901760, %v12452_v63  ;;  %v12505_v61 = vand.u32 4294901760, %v12479_v57 }
  0xa0   : > { %11022 = vmatprep.subr.mxu0 %v12276_v54  ;;  %11031 = vmatprep.subr.mxu1 %v12221_v39 }
  0xa1   : > { %11023 = vmatpush3.msra.mxu0 %v12276_v54  ;;  %11024 = vmatprep.mubr.f32.mxu0 %v12227_v43  ;;  %v2082_v62 = vand.u32 4294901760, %v2081_v51  ;;  %v2649_v20 = vsub.f32 %v12452_v63, %v12474_v33  ;;  %v2663_v15 = vsub.f32 %v12479_v57, %v12505_v61 }
  0xa2   : > { %11032 = vmatpush3.msra.mxu1 %v12221_v39  ;;  %11025 = vmatmul.mubr.f32.vlgmr.msra.gmra.mxu0 %v12240_v52  ;;  %v2133_v39 = vand.u32 4294901760, %v2132_v25 }
  0xa3   : > { %11033 = vmatprep.mubr.f32.mxu1 %v12227_v43  ;;  %11036 = vmatprep.subr.mxu0 %v12327_v19  ;;  %v2072_v43 = vand.u32 4294901760, %v2071_v56  ;;  %v2650_v13 = vand.u32 4294901760, %v2649_v20  ;;  %v2664_v18 = vand.u32 4294901760, %v2663_v15 }
  0xa4   : > { %11045 = vmatprep.subr.mxu1 %v2119_v53  ;;  %11034 = vmatmul.mubr.f32.vlgmr.msra.gmra.mxu1 %v12240_v52  ;;  %v10243_v52 = vld [vmem:[%s15774_s2 + $0x68] sm:$0xff] }
  0xa5   : > { %11037 = vmatpush3.msra.mxu0 %v12327_v19  ;;  %11046 = vmatpush3.msra.mxu1 %v2119_v53  ;;  %v12447_v54 = vand.u32 4294901760, %v10243_v52 }
  0xa6   : > { %11038 = vmatprep.subr.mxu0 %v12340_v27  ;;  %11047 = vmatprep.subr.mxu1 %v2126_v31 }
  0xa7   : > { %11039 = vmatpush3.msra.mxu0 %v12340_v27  ;;  %11048 = vmatpush3.msra.mxu1 %v2126_v31  ;;  %v12466_v7 = vsub.f32 %v10243_v52, %v12447_v54 }
  0xa8   : > { %11040 = vmatprep.subr.mxu0 %v12349_v29  ;;  %11049 = vmatprep.subr.mxu1 %v2133_v39 }
  0xa9   : > { %11041 = vmatpush3.msra.mxu0 %v12349_v29  ;;  %11042 = vmatprep.mubr.f32.mxu0 %v2072_v43  ;;  %v12491_v9 = vand.u32 4294901760, %v12466_v7  ;;  %v10250_v43 = vld [vmem:[%s15774_s2 + $0xa0] sm:$0xff] }
  0xaa   : > { %11050 = vmatpush3.msra.mxu1 %v2133_v39  ;;  %11051 = vmatprep.mubr.f32.mxu1 %v12354_v30  ;;  %v12643_v52 = vand.u32 4294901760, %v10250_v43 }
  0xab   : > { %11043 = vmatmul.mubr.f32.vlgmr.msra.gmra.mxu0 %v2082_v62  ;;  %11052 = vmatmul.mubr.f32.vlgmr.msra.gmra.mxu1 %v12362_v34  ;;  %v2656_v12 = vsub.f32 %v12466_v7, %v12491_v9 }
  0xac   : > { %11054 = vmatprep.subr.mxu0 %v12345_v28  ;;  %11063 = vmatprep.subr.mxu1 %v12327_v19 }
  0xad   : > { %11055 = vmatpush3.msra.mxu0 %v12345_v28  ;;  %11064 = vmatpush3.msra.mxu1 %v12327_v19  ;;  %v2657_v47 = vand.u32 4294901760, %v2656_v12  ;;  %v10246_v28 = vld [vmem:[%s15774_s2 + $0x80] sm:$0xff] }
  0xae   : > { %11056 = vmatprep.subr.mxu0 %v12359_v32  ;;  %11065 = vmatprep.subr.mxu1 %v12340_v27 }
  0xaf   : > { %11057 = vmatpush3.msra.mxu0 %v12359_v32  ;;  %11066 = vmatpush3.msra.mxu1 %v12340_v27 }
  0xb0   : > { %11058 = vmatprep.subr.mxu0 %v12372_v36  ;;  %11067 = vmatprep.subr.mxu1 %v12349_v29 }
  0xb1   : > { %11059 = vmatpush3.msra.mxu0 %v12372_v36  ;;  %11060 = vmatprep.mubr.f32.mxu0 %v12382_v40  ;;  %v12572_v40 = vand.u32 4294901760, %v12233_v45 }
  0xb2   : > { %11068 = vmatpush3.msra.mxu1 %v12349_v29  ;;  %11061 = vmatmul.mubr.f32.vlgmr.msra.gmra.mxu0 %v12392_v17 }
  0xb3   : > { %11069 = vmatprep.mubr.f32.mxu1 %v2070_v0  ;;  %11072 = vmatprep.subr.mxu0 %v12367_v35  ;;  %v12598_v0 = vsub.f32 %v12233_v45, %v12572_v40 }
  0xb4   : > { %11081 = vmatprep.subr.mxu1 %v12327_v19  ;;  %11070 = vmatmul.mubr.f32.vlgmr.msra.gmra.mxu1 %v2080_v49 }
  0xb5   : > { %11073 = vmatpush3.msra.mxu0 %v12367_v35  ;;  %11082 = vmatpush3.msra.mxu1 %v12327_v19  ;;  %v10247_v19 = vld [vmem:[%s15774_s2 + $0x88] sm:$0xff]  ;;  %v12564_v35 = vand.u32 4294901760, %v12230_v44  ;;  %v3142_v53 = vand.u32 4294901760, %v12598_v0 }
  0xb6   : > { %11074 = vmatprep.subr.mxu0 %v12388_v42  ;;  %11083 = vmatprep.subr.mxu1 %v12340_v27 }
  0xb7   : > { %11075 = vmatpush3.msra.mxu0 %v12388_v42  ;;  %11084 = vmatpush3.msra.mxu1 %v12340_v27  ;;  %v12540_v27 = vand.u32 4294901760, %v10247_v19  ;;  %v12588_v60 = vsub.f32 %v12230_v44, %v12564_v35  ;;  %v3143_v39 = vsub.f32 %v12598_v0, %v3142_v53 }
  0xb8   : > { %11076 = vmatprep.subr.mxu0 %v12402_v41  ;;  %11085 = vmatprep.subr.mxu1 %v12349_v29 }
  0xb9   : > { %11077 = vmatpush3.msra.mxu0 %v12402_v41  ;;  %11078 = vmatprep.mubr.f32.mxu0 %v12354_v30  ;;  %v12555_v32 = vsub.f32 %v10247_v19, %v12540_v27  ;;  %v3132_v45 = vand.u32 4294901760, %v12588_v60 }
  0xba   : > { %11086 = vmatpush3.msra.mxu1 %v12349_v29  ;;  %11079 = vmatmul.mubr.f32.vlgmr.msra.gmra.mxu0 %v12362_v34  ;;  %v10245_v29 = vld [vmem:[%s15774_s2 + $0x78] sm:$0xff] }
  0xbb   : > { %11087 = vmatprep.mubr.f32.mxu1 %v12354_v30  ;;  %11090 = vmatprep.subr.mxu0 %v12437_v1  ;;  %v12550_v30 = vand.u32 4294901760, %v10246_v28  ;;  %v12577_v42 = vand.u32 4294901760, %v12555_v32  ;;  %v3133_v31 = vsub.f32 %v12588_v60, %v3132_v45 }
  0xbc   : > { %11099 = vmatprep.subr.mxu1 %v2650_v13  ;;  %11088 = vmatmul.mubr.f32.vlgmr.msra.gmra.mxu1 %v12362_v34  ;;  %v12559_v34 = vand.u32 4294901760, %v10245_v29 }
  0xbd   : > { %11091 = vmatpush3.msra.mxu0 %v12437_v1  ;;  %11100 = vmatpush3.msra.mxu1 %v2650_v13  ;;  %v12569_v36 = vsub.f32 %v10246_v28, %v12550_v30  ;;  %v3180_v44 = vsub.f32 %v12555_v32, %v12577_v42  ;;  %v3134_v62 = vand.u32 4294901760, %v3133_v31  ;;  %v10251_v28 = vld [vmem:[%s15774_s2 + $0xa8] sm:$0xff] }
  0xbe   : > { %11092 = vmatprep.subr.mxu0 %v12447_v54  ;;  %11101 = vmatprep.subr.mxu1 %v2657_v47  ;;  %v12582_v17 = vsub.f32 %v10245_v29, %v12559_v34 }
  0xbf   : > { %11093 = vmatpush3.msra.mxu0 %v12447_v54  ;;  %11102 = vmatpush3.msra.mxu1 %v2657_v47  ;;  %v12594_v41 = vand.u32 4294901760, %v12569_v36  ;;  %v3181_v25 = vand.u32 4294901760, %v3180_v44 }
  0xc0   : > { %11094 = vmatprep.subr.mxu0 %v12456_v4  ;;  %11103 = vmatprep.subr.mxu1 %v2664_v18  ;;  %v12608_v55 = vand.u32 4294901760, %v12582_v17 }
  0xc1   : > { %11095 = vmatpush3.msra.mxu0 %v12456_v4  ;;  %11096 = vmatprep.mubr.f32.mxu0 %v2603_v21  ;;  %v3187_v49 = vsub.f32 %v12569_v36, %v12594_v41 }
  0xc2   : > { %11104 = vmatpush3.msra.mxu1 %v2664_v18  ;;  %11105 = vmatprep.mubr.f32.mxu1 %v12461_v48  ;;  %v3194_v56 = vsub.f32 %v12582_v17, %v12608_v55  ;;  %v10253_v18 = vld [vmem:[%s15774_s2 + $0xb8] sm:$0xff] }
  0xc3   : > { %11097 = vmatmul.mubr.f32.vlgmr.msra.gmra.mxu0 %v2613_v26  ;;  %11106 = vmatmul.mubr.f32.vlgmr.msra.gmra.mxu1 %v12469_v8  ;;  %v3188_v51 = vand.u32 4294901760, %v3187_v49  ;;  %v12746_v26 = vand.u32 4294901760, %v10253_v18 }
  0xc4   : > { %11108 = vmatprep.subr.mxu0 %v12452_v63  ;;  %11117 = vmatprep.subr.mxu1 %v12437_v1  ;;  %v3195_v59 = vand.u32 4294901760, %v3194_v56 }
  0xc5   : > { %11109 = vmatpush3.msra.mxu0 %v12452_v63  ;;  %11118 = vmatpush3.msra.mxu1 %v12437_v1  ;;  %v12653_v63 = vand.u32 4294901760, %v10249_v2 }
  0xc6   : > { %11110 = vmatprep.subr.mxu0 %v12466_v7  ;;  %11119 = vmatprep.subr.mxu1 %v12447_v54 }
  0xc7   : > { %11111 = vmatpush3.msra.mxu0 %v12466_v7  ;;  %11120 = vmatpush3.msra.mxu1 %v12447_v54  ;;  %v12667_v7 = vand.u32 4294901760, %v12283_v6 }
  0xc8   : > { %11112 = vmatprep.subr.mxu0 %v12479_v57  ;;  %11121 = vmatprep.subr.mxu1 %v12456_v4 }
  0xc9   : > { %11113 = vmatpush3.msra.mxu0 %v12479_v57  ;;  %11114 = vmatprep.mubr.f32.mxu0 %v12485_v37 }
  0xca   : > { %11122 = vmatpush3.msra.mxu1 %v12456_v4  ;;  %11115 = vmatmul.mubr.f32.vlgmr.msra.gmra.mxu0 %v12495_v10 }
  0xcb   : > { %11123 = vmatprep.mubr.f32.mxu1 %v2601_v24  ;;  %11126 = vmatprep.subr.mxu0 %v12474_v33 }
  0xcc   : > { %11135 = vmatprep.subr.mxu1 %v12437_v1  ;;  %11124 = vmatmul.mubr.f32.vlgmr.msra.gmra.mxu1 %v2611_v46 }
  0xcd   : > { %11127 = vmatpush3.msra.mxu0 %v12474_v33  ;;  %11136 = vmatpush3.msra.mxu1 %v12437_v1  ;;  %v3144_v1 = vand.u32 4294901760, %v3143_v39  ;;  %v12675_v33 = vand.u32 4294901760, %v12294_v5 }
  0xce   : > { %11128 = vmatprep.subr.mxu0 %v12491_v9  ;;  %11137 = vmatprep.subr.mxu1 %v12447_v54 }
  0xcf   : > { %11129 = vmatpush3.msra.mxu0 %v12491_v9  ;;  %11138 = vmatpush3.msra.mxu1 %v12447_v54  ;;  %v10248_v54 = vld [vmem:[%s15774_s2 + $0x90] sm:$0xff]  ;;  %v12691_v9 = vsub.f32 %v12283_v6, %v12667_v7  ;;  %v12701_v20 = vsub.f32 %v12294_v5, %v12675_v33 }
  0xd0   : > { %11130 = vmatprep.subr.mxu0 %v12505_v61  ;;  %11139 = vmatprep.subr.mxu1 %v12456_v4 }
  0xd1   : > { %11131 = vmatpush3.msra.mxu0 %v12505_v61  ;;  %11132 = vmatprep.mubr.f32.mxu0 %v12461_v48  ;;  %v3663_v5 = vand.u32 4294901760, %v12691_v9  ;;  %v3673_v12 = vand.u32 4294901760, %v12701_v20 }
  0xd2   : > { %11140 = vmatpush3.msra.mxu1 %v12456_v4  ;;  %11133 = vmatmul.mubr.f32.vlgmr.msra.gmra.mxu0 %v12469_v8  ;;  %v12658_v4 = vsub.f32 %v10250_v43, %v12643_v52 }
  0xd3   : > { %11141 = vmatprep.mubr.f32.mxu1 %v12461_v48  ;;  %11144 = vmatprep.subr.mxu0 %v12540_v27  ;;  %v12662_v48 = vand.u32 4294901760, %v10248_v54  ;;  %v3664_v15 = vsub.f32 %v12691_v9, %v3663_v5  ;;  %v3674_v47 = vsub.f32 %v12701_v20, %v3673_v12 }
  0xd4   : > { %11153 = vmatprep.subr.mxu1 %v3181_v25  ;;  %11142 = vmatmul.mubr.f32.vlgmr.msra.gmra.mxu1 %v12469_v8  ;;  %v12672_v8 = vsub.f32 %v10249_v2, %v12653_v63  ;;  %v12680_v57 = vand.u32 4294901760, %v12658_v4 }
  0xd5   : > { %11145 = vmatpush3.msra.mxu0 %v12540_v27  ;;  %11154 = vmatpush3.msra.mxu1 %v3181_v25  ;;  %v12685_v37 = vsub.f32 %v10248_v54, %v12662_v48  ;;  %v3665_v19 = vand.u32 4294901760, %v3664_v15  ;;  %v3675_v21 = vand.u32 4294901760, %v3674_v47 }
  0xd6   : > { %11146 = vmatprep.subr.mxu0 %v12550_v30  ;;  %11155 = vmatprep.subr.mxu1 %v3188_v51  ;;  %v12697_v10 = vand.u32 4294901760, %v12672_v8  ;;  %v3711_v6 = vsub.f32 %v12658_v4, %v12680_v57 }
  0xd7   : > { %11147 = vmatpush3.msra.mxu0 %v12550_v30  ;;  %11156 = vmatpush3.msra.mxu1 %v3188_v51  ;;  %v12711_v61 = vand.u32 4294901760, %v12685_v37  ;;  %v10256_v51 = vld [vmem:[%s15774_s2 + $0xd0] sm:$0xff] }
  0xd8   : > { %11148 = vmatprep.subr.mxu0 %v12559_v34  ;;  %11157 = vmatprep.subr.mxu1 %v3195_v59  ;;  %v3718_v24 = vsub.f32 %v12672_v8, %v12697_v10  ;;  %v3712_v46 = vand.u32 4294901760, %v3711_v6  ;;  %v12847_v43 = vand.u32 4294901760, %v10256_v51 }
  0xd9   : > { %11149 = vmatpush3.msra.mxu0 %v12559_v34  ;;  %11150 = vmatprep.mubr.f32.mxu0 %v3134_v62  ;;  %v3725_v13 = vsub.f32 %v12685_v37, %v12711_v61  ;;  %v10255_v62 = vld [vmem:[%s15774_s2 + $0xc8] sm:$0xff] }
  0xda   : > { %11158 = vmatpush3.msra.mxu1 %v3195_v59  ;;  %11159 = vmatprep.mubr.f32.mxu1 %v12564_v35  ;;  %v3719_v16 = vand.u32 4294901760, %v3718_v24  ;;  %v12862_v2 = vsub.f32 %v10256_v51, %v12847_v43 }
  0xdb   : > { %11151 = vmatmul.mubr.f32.vlgmr.msra.gmra.mxu0 %v3144_v1  ;;  %11160 = vmatmul.mubr.f32.vlgmr.msra.gmra.mxu1 %v12572_v40  ;;  %v3726_v11 = vand.u32 4294901760, %v3725_v13  ;;  %v10254_v1 = vld [vmem:[%s15774_s2 + $0xc0] sm:$0xff] }
  0xdc   : > { %11162 = vmatprep.subr.mxu0 %v12555_v32  ;;  %11171 = vmatprep.subr.mxu1 %v12540_v27  ;;  %v12866_v54 = vand.u32 4294901760, %v10254_v1 }
  0xdd   : > { %11163 = vmatpush3.msra.mxu0 %v12555_v32  ;;  %11172 = vmatpush3.msra.mxu1 %v12540_v27  ;;  %v12765_v32 = vand.u32 4294901760, %v10251_v28 }
  0xde   : > { %11164 = vmatprep.subr.mxu0 %v12569_v36  ;;  %11173 = vmatprep.subr.mxu1 %v12550_v30 }
  0xdf   : > { %11165 = vmatpush3.msra.mxu0 %v12569_v36  ;;  %11174 = vmatpush3.msra.mxu1 %v12550_v30  ;;  %v12778_v36 = vand.u32 4294901760, %v12333_v22 }
  0xe0   : > { %11166 = vmatprep.subr.mxu0 %v12582_v17  ;;  %11175 = vmatprep.subr.mxu1 %v12559_v34 }
  0xe1   : > { %11167 = vmatpush3.msra.mxu0 %v12582_v17  ;;  %11168 = vmatprep.mubr.f32.mxu0 %v12588_v60 }
  0xe2   : > { %11176 = vmatpush3.msra.mxu1 %v12559_v34  ;;  %11169 = vmatmul.mubr.f32.vlgmr.msra.gmra.mxu0 %v12598_v0 }
  0xe3   : > { %11177 = vmatprep.mubr.f32.mxu1 %v3132_v45  ;;  %11180 = vmatprep.subr.mxu0 %v12577_v42 }
  0xe4   : > { %11189 = vmatprep.subr.mxu1 %v12540_v27  ;;  %11178 = vmatmul.mubr.f32.vlgmr.msra.gmra.mxu1 %v3142_v53 }
  0xe5   : > { %11181 = vmatpush3.msra.mxu0 %v12577_v42  ;;  %11190 = vmatpush3.msra.mxu1 %v12540_v27  ;;  %v10252_v27 = vld [vmem:[%s15774_s2 + $0xb0] sm:$0xff]  ;;  %v12788_v42 = vsub.f32 %v10251_v28, %v12765_v32  ;;  %s15016_s2 = sld [smem:[#allocation6 + $0x4]] }
  0xe6   : > { %11182 = vmatprep.subr.mxu0 %v12594_v41  ;;  %11191 = vmatprep.subr.mxu1 %v12550_v30  ;;  %v12756_v29 = vand.u32 4294901760, %v10252_v27 }
  0xe7   : > { %11183 = vmatpush3.msra.mxu0 %v12594_v41  ;;  %11192 = vmatpush3.msra.mxu1 %v12550_v30  ;;  %v12761_v30 = vsub.f32 %v10253_v18, %v12746_v26  ;;  %v12804_v41 = vsub.f32 %v12333_v22, %v12778_v36  ;;  %v12814_v0 = vand.u32 4294901760, %v12788_v42 }
  0xe8   : > { %11184 = vmatprep.subr.mxu0 %v12608_v55  ;;  %11193 = vmatprep.subr.mxu1 %v12559_v34 }
  0xe9   : > { %11185 = vmatpush3.msra.mxu0 %v12608_v55  ;;  %11186 = vmatprep.mubr.f32.mxu0 %v12564_v35  ;;  %v4204_v55 = vand.u32 4294901760, %v12804_v41  ;;  %v4256_v49 = vsub.f32 %v12788_v42, %v12814_v0 }
  0xea   : > { %11194 = vmatpush3.msra.mxu1 %v12559_v34  ;;  %11187 = vmatmul.mubr.f32.vlgmr.msra.gmra.mxu0 %v12572_v40  ;;  %v12770_v34 = vand.u32 4294901760, %v12322_v14 }
  0xeb   : > { %11195 = vmatprep.mubr.f32.mxu1 %v12564_v35  ;;  %11198 = vmatprep.subr.mxu0 %v12643_v52  ;;  %v12775_v35 = vsub.f32 %v10252_v27, %v12756_v29  ;;  %v4205_v56 = vsub.f32 %v12804_v41, %v4204_v55  ;;  %v4257_v31 = vand.u32 4294901760, %v4256_v49 }
  0xec   : > { %11207 = vmatprep.subr.mxu1 %v3712_v46  ;;  %11196 = vmatmul.mubr.f32.vlgmr.msra.gmra.mxu1 %v12572_v40  ;;  %v12783_v40 = vand.u32 4294901760, %v12761_v30  ;;  %v12794_v17 = vsub.f32 %v12322_v14, %v12770_v34 }
  0xed   : > { %11199 = vmatpush3.msra.mxu0 %v12643_v52  ;;  %11208 = vmatpush3.msra.mxu1 %v3712_v46  ;;  %v12800_v60 = vand.u32 4294901760, %v12775_v35  ;;  %v4206_v59 = vand.u32 4294901760, %v4205_v56 }
  0xee   : > { %11200 = vmatprep.subr.mxu0 %v12653_v63  ;;  %11209 = vmatprep.subr.mxu1 %v3719_v16  ;;  %v4242_v14 = vsub.f32 %v12761_v30, %v12783_v40  ;;  %v4194_v22 = vand.u32 4294901760, %v12794_v17 }
  0xef   : > { %11201 = vmatpush3.msra.mxu0 %v12653_v63  ;;  %11210 = vmatpush3.msra.mxu1 %v3719_v16  ;;  %v4249_v44 = vsub.f32 %v12775_v35, %v12800_v60 }
  0xf0   : > { %11202 = vmatprep.subr.mxu0 %v12662_v48  ;;  %11211 = vmatprep.subr.mxu1 %v3726_v11  ;;  %v4243_v45 = vand.u32 4294901760, %v4242_v14  ;;  %v4195_v53 = vsub.f32 %v12794_v17, %v4194_v22 }
  0xf1   : > { %11203 = vmatpush3.msra.mxu0 %v12662_v48  ;;  %11204 = vmatprep.mubr.f32.mxu0 %v3665_v19  ;;  %v4250_v25 = vand.u32 4294901760, %v4249_v44 }
  0xf2   : > { %11212 = vmatpush3.msra.mxu1 %v3726_v11  ;;  %11213 = vmatprep.mubr.f32.mxu1 %v12667_v7  ;;  %v4196_v39 = vand.u32 4294901760, %v4195_v53 }
  0xf3   : > { %11205 = vmatmul.mubr.f32.vlgmr.msra.gmra.mxu0 %v3675_v21  ;;  %11214 = vmatmul.mubr.f32.vlgmr.msra.gmra.mxu1 %v12675_v33 }
  0xf4   : > { %11216 = vmatprep.subr.mxu0 %v12658_v4  ;;  %11225 = vmatprep.subr.mxu1 %v12643_v52 }
  0xf5   : > { %11217 = vmatpush3.msra.mxu0 %v12658_v4  ;;  %11226 = vmatpush3.msra.mxu1 %v12643_v52  ;;  %v12876_v4 = vand.u32 4294901760, %v12376_v38 }
  0xf6   : > { %11218 = vmatprep.subr.mxu0 %v12672_v8  ;;  %11227 = vmatprep.subr.mxu1 %v12653_v63 }
  0xf7   : > { %11219 = vmatpush3.msra.mxu0 %v12672_v8  ;;  %11228 = vmatpush3.msra.mxu1 %v12653_v63 }
  0xf8   : > { %11220 = vmatprep.subr.mxu0 %v12685_v37  ;;  %11229 = vmatprep.subr.mxu1 %v12662_v48 }
  0xf9   : > { %11221 = vmatpush3.msra.mxu0 %v12685_v37  ;;  %11222 = vmatprep.mubr.f32.mxu0 %v12691_v9 }
  0xfa   : > { %11230 = vmatpush3.msra.mxu1 %v12662_v48  ;;  %11223 = vmatmul.mubr.f32.vlgmr.msra.gmra.mxu0 %v12701_v20 }
  0xfb   : > { %11231 = vmatprep.mubr.f32.mxu1 %v3663_v5  ;;  %11234 = vmatprep.subr.mxu0 %v12680_v57 }
  0xfc   : > { %11243 = vmatprep.subr.mxu1 %v12643_v52  ;;  %11232 = vmatmul.mubr.f32.vlgmr.msra.gmra.mxu1 %v3673_v12 }
  0xfd   : > { %11235 = vmatpush3.msra.mxu0 %v12680_v57  ;;  %11244 = vmatpush3.msra.mxu1 %v12643_v52  ;;  %v12857_v52 = vand.u32 4294901760, %v10255_v62 }
  0xfe   : > { %11236 = vmatprep.subr.mxu0 %v12697_v10  ;;  %11245 = vmatprep.subr.mxu1 %v12653_v63 }
  0xff   : > { %11237 = vmatpush3.msra.mxu0 %v12697_v10  ;;  %11246 = vmatpush3.msra.mxu1 %v12653_v63  ;;  %v12873_v63 = vsub.f32 %v10255_v62, %v12857_v52 }
 0x100   : > { %11238 = vmatprep.subr.mxu0 %v12711_v61  ;;  %11247 = vmatprep.subr.mxu1 %v12662_v48 }
 0x101   : > { %11239 = vmatpush3.msra.mxu0 %v12711_v61  ;;  %11240 = vmatprep.mubr.f32.mxu0 %v12667_v7  ;;  %v12890_v8 = vand.u32 4294901760, %v12873_v63 }
 0x102   : > { %11248 = vmatpush3.msra.mxu1 %v12662_v48  ;;  %11241 = vmatmul.mubr.f32.vlgmr.msra.gmra.mxu0 %v12675_v33  ;;  %v12881_v48 = vand.u32 4294901760, %v12862_v2 }
 0x103   : > { %11249 = vmatprep.mubr.f32.mxu1 %v12667_v7  ;;  %11252 = vmatprep.subr.mxu0 %v12746_v26  ;;  %v4777_v7 = vsub.f32 %v10254_v1, %v12866_v54 }
 0x104   : > { %11261 = vmatprep.subr.mxu1 %v4243_v45  ;;  %11250 = vmatmul.mubr.f32.vlgmr.msra.gmra.mxu1 %v12675_v33  ;;  %v12894_v33 = vsub.f32 %v12376_v38, %v12876_v4  ;;  %v4765_v57 = vsub.f32 %v12862_v2, %v12881_v48  ;;  %v4772_v38 = vsub.f32 %v12873_v63, %v12890_v8 }
 0x105   : > { %11253 = vmatpush3.msra.mxu0 %v12746_v26  ;;  %11262 = vmatpush3.msra.mxu1 %v4243_v45  ;;  %v12903_v37 = vand.u32 4294901760, %v4777_v7 }
 0x106   : > { %11254 = vmatprep.subr.mxu0 %v12756_v29  ;;  %11263 = vmatprep.subr.mxu1 %v4250_v25  ;;  %v4727_v9 = vand.u32 4294901760, %v12894_v33  ;;  %v4766_v10 = vand.u32 4294901760, %v4765_v57  ;;  %v4773_v6 = vand.u32 4294901760, %v4772_v38 }
 0x107   : > { %11255 = vmatpush3.msra.mxu0 %v12756_v29  ;;  %11264 = vmatpush3.msra.mxu1 %v4250_v25  ;;  %v4779_v20 = vsub.f32 %v4777_v7, %v12903_v37 }
 0x108   : > { %11256 = vmatprep.subr.mxu0 %v12765_v32  ;;  %11265 = vmatprep.subr.mxu1 %v4257_v31  ;;  %v4728_v61 = vsub.f32 %v12894_v33, %v4727_v9 }
 0x109   : > { %11257 = vmatpush3.msra.mxu0 %v12765_v32  ;;  %11258 = vmatprep.mubr.f32.mxu0 %v4196_v39  ;;  %v4780_v5 = vand.u32 4294901760, %v4779_v20 }
 0x10a   : > { %11266 = vmatpush3.msra.mxu1 %v4257_v31  ;;  %11267 = vmatprep.mubr.f32.mxu1 %v12770_v34  ;;  %v4729_v24 = vand.u32 4294901760, %v4728_v61 }
 0x10b   : > { %11259 = vmatmul.mubr.f32.vlgmr.msra.gmra.mxu0 %v4206_v59  ;;  %11268 = vmatmul.mubr.f32.vlgmr.msra.gmra.mxu1 %v12778_v36 }
 0x10c   : > { %11270 = vmatprep.subr.mxu0 %v12761_v30  ;;  %11279 = vmatprep.subr.mxu1 %v12746_v26 }
 0x10d   : > { %11271 = vmatpush3.msra.mxu0 %v12761_v30  ;;  %11280 = vmatpush3.msra.mxu1 %v12746_v26 }
 0x10e   : > { %11272 = vmatprep.subr.mxu0 %v12775_v35  ;;  %11281 = vmatprep.subr.mxu1 %v12756_v29 }
 0x10f   : > { %11273 = vmatpush3.msra.mxu0 %v12775_v35  ;;  %11282 = vmatpush3.msra.mxu1 %v12756_v29 }
 0x110   : > { %11274 = vmatprep.subr.mxu0 %v12788_v42  ;;  %11283 = vmatprep.subr.mxu1 %v12765_v32 }
 0x111   : > { %11275 = vmatpush3.msra.mxu0 %v12788_v42  ;;  %11276 = vmatprep.mubr.f32.mxu0 %v12794_v17 }
 0x112   : > { %11284 = vmatpush3.msra.mxu1 %v12765_v32  ;;  %11277 = vmatmul.mubr.f32.vlgmr.msra.gmra.mxu0 %v12804_v41 }
 0x113   : > { %11285 = vmatprep.mubr.f32.mxu1 %v4194_v22  ;;  %11288 = vmatprep.subr.mxu0 %v12783_v40 }
 0x114   : > { %11297 = vmatprep.subr.mxu1 %v12746_v26  ;;  %11286 = vmatmul.mubr.f32.vlgmr.msra.gmra.mxu1 %v4204_v55 }
 0x115   : > { %11289 = vmatpush3.msra.mxu0 %v12783_v40  ;;  %11298 = vmatpush3.msra.mxu1 %v12746_v26 }
 0x116   : > { %11290 = vmatprep.subr.mxu0 %v12800_v60  ;;  %11299 = vmatprep.subr.mxu1 %v12756_v29 }
 0x117   : > { %11291 = vmatpush3.msra.mxu0 %v12800_v60  ;;  %11300 = vmatpush3.msra.mxu1 %v12756_v29 }
 0x118   : > { %11292 = vmatprep.subr.mxu0 %v12814_v0  ;;  %11301 = vmatprep.subr.mxu1 %v12765_v32 }
 0x119   : > { %11293 = vmatpush3.msra.mxu0 %v12814_v0  ;;  %11294 = vmatprep.mubr.f32.mxu0 %v12770_v34 }
 0x11a   : > { %11302 = vmatpush3.msra.mxu1 %v12765_v32  ;;  %11295 = vmatmul.mubr.f32.vlgmr.msra.gmra.mxu0 %v12778_v36 }
 0x11b   : > { %11303 = vmatprep.mubr.f32.mxu1 %v12770_v34  ;;  %11306 = vmatprep.subr.mxu0 %v12847_v43 }
 0x11c   : > { %11315 = vmatprep.subr.mxu1 %v4766_v10  ;;  %11304 = vmatmul.mubr.f32.vlgmr.msra.gmra.mxu1 %v12778_v36 }
 0x11d   : > { %11307 = vmatpush3.msra.mxu0 %v12847_v43  ;;  %11316 = vmatpush3.msra.mxu1 %v4766_v10 }
 0x11e   : > { %11308 = vmatprep.subr.mxu0 %v12857_v52  ;;  %11317 = vmatprep.subr.mxu1 %v4773_v6 }
 0x11f   : > { %11309 = vmatpush3.msra.mxu0 %v12857_v52  ;;  %11318 = vmatpush3.msra.mxu1 %v4773_v6 }
 0x120   : > { %11310 = vmatprep.subr.mxu0 %v12866_v54  ;;  %11319 = vmatprep.subr.mxu1 %v4780_v5 }
 0x121   : > { %11311 = vmatpush3.msra.mxu0 %v12866_v54  ;;  %11312 = vmatprep.mubr.f32.mxu0 %v12188_v23 }
 0x122   : > { %11320 = vmatpush3.msra.mxu1 %v4780_v5  ;;  %11321 = vmatprep.mubr.f32.mxu1 %v12106_v50 }
 0x123   : > { %11313 = vmatmul.mubr.f32.vlgmr.msra.gmra.mxu0 %v4729_v24  ;;  %11322 = vmatmul.mubr.f32.vlgmr.msra.gmra.mxu1 %v12876_v4  ;;  %v10891_v12 = vpop.f32.mrf.mxu1 }
 0x124   : > { %11324 = vmatprep.subr.mxu0 %v12862_v2  ;;  %11333 = vmatprep.subr.mxu1 %v12847_v43 }
 0x125   : > { %11325 = vmatpush3.msra.mxu0 %v12862_v2  ;;  %11334 = vmatpush3.msra.mxu1 %v12847_v43  ;;  %v591_v46 = vpop.f32.mrf.mxu1 }
 0x126   : > { %11326 = vmatprep.subr.mxu0 %v12873_v63  ;;  %11335 = vmatprep.subr.mxu1 %v12857_v52  ;;  %v10882_v23 = vpop.f32.mrf.mxu0 }
 0x127   : > { %11327 = vmatpush3.msra.mxu0 %v12873_v63  ;;  %11336 = vmatpush3.msra.mxu1 %v12857_v52  ;;  %v598_v13 = vadd.f32 %v10891_v12, %v10882_v23 }
 0x128   : > { %11328 = vmatprep.subr.mxu0 %v4777_v7  ;;  %11337 = vmatprep.subr.mxu1 %v12866_v54  ;;  %v495_v15 = vpop.f32.mrf.mxu0 }
 0x129   : > { %11329 = vmatpush3.msra.mxu0 %v4777_v7  ;;  %11330 = vmatprep.mubr.f32.mxu0 %v12128_v58  ;;  %v592_v16 = vadd.f32 %v591_v46, %v495_v15 }
 0x12a   : > { %11338 = vmatpush3.msra.mxu1 %v12866_v54  ;;  %11331 = vmatmul.mubr.f32.vlgmr.msra.gmra.mxu0 %v12894_v33  ;;  %v10909_v47 = vpop.f32.mrf.mxu1 }
 0x12b   : > { %11339 = vmatprep.mubr.f32.mxu1 %v12152_v3  ;;  %11342 = vmatprep.subr.mxu0 %v12881_v48 }
 0x12c   : > { %11351 = vmatprep.subr.mxu1 %v12847_v43  ;;  %11340 = vmatmul.mubr.f32.vlgmr.msra.gmra.mxu1 %v4727_v9  ;;  %v758_v18 = vpop.f32.mrf.mxu1 }
 0x12d   : > { %11343 = vmatpush3.msra.mxu0 %v12881_v48  ;;  %11352 = vmatpush3.msra.mxu1 %v12847_v43  ;;  %v10900_v58 = vpop.f32.mrf.mxu0 }
 0x12e   : > { %11344 = vmatprep.subr.mxu0 %v12890_v8  ;;  %11353 = vmatprep.subr.mxu1 %v12857_v52  ;;  %v683_v11 = vadd.f32 %v10900_v58, %v598_v13 }
 0x12f   : > { %11345 = vmatpush3.msra.mxu0 %v12890_v8  ;;  %11354 = vmatpush3.msra.mxu1 %v12857_v52  ;;  %v675_v3 = vpop.f32.mrf.mxu0 }
 0x130   : > { %11346 = vmatprep.subr.mxu0 %v12903_v37  ;;  %11355 = vmatprep.subr.mxu1 %v12866_v54  ;;  %v767_v19 = vadd.f32 %v10909_v47, %v683_v11  ;;  %v676_v21 = vadd.f32 %v675_v3, %v592_v16 }
 0x131   : > { %11347 = vmatpush3.msra.mxu0 %v12903_v37  ;;  %11348 = vmatprep.mubr.f32.mxu0 %v12106_v50 }
 0x132   : > { %11356 = vmatpush3.msra.mxu1 %v12866_v54  ;;  %11357 = vmatprep.mubr.f32.mxu1 %v12106_v50  ;;  %v759_v26 = vadd.f32 %v758_v18, %v676_v21 }
 0x133   : > { %11349 = vmatmul.mubr.f32.vlgmr.msra.gmra.mxu0 %v12876_v4  ;;  %11358 = vmatmul.mubr.f32.vlgmr.msra.gmra.mxu1 %v12876_v4  ;;  %v10927_v29 = vpop.f32.mrf.mxu1 }
 0x134   : > { %v10918_v27 = vpop.f32.mrf.mxu0 }
 0x135   : > { %v853_v28 = vadd.f32 %v10918_v27, %v767_v19  ;;  %v926_v35 = vpop.f32.mrf.mxu1 }
 0x136   : > { %v846_v30 = vpop.f32.mrf.mxu0 }
 0x137   : > { %v933_v32 = vadd.f32 %v10927_v29, %v853_v28  ;;  %v847_v34 = vadd.f32 %v846_v30, %v759_v26 }
 0x139   : > { %v927_v36 = vadd.f32 %v926_v35, %v847_v34 }
 0x13a   : > { %v10936_v40 = vpop.f32.mrf.mxu0 }
 0x13b   : > { %v1025_v42 = vadd.f32 %v10936_v40, %v933_v32 }
 0x13c   : > { %v10945_v17 = vpop.f32.mrf.mxu1  ;;  %v1014_v60 = vpop.f32.mrf.mxu0 }
 0x13d   : > { %v1117_v41 = vadd.f32 %v10945_v17, %v1025_v42  ;;  %v1015_v14 = vadd.f32 %v1014_v60, %v927_v36 }
 0x13e   : > { %v1110_v50 = vpop.f32.mrf.mxu1 }
 0x13f   : > { %v1111_v0 = vadd.f32 %v1110_v50, %v1015_v14 }
 0x142   : > { %v10954_v22 = vpop.f32.mrf.mxu0 }
 0x143   : > { %v1202_v44 = vadd.f32 %v10954_v22, %v1117_v41 }
 0x144   : > { %v10963_v55 = vpop.f32.mrf.mxu1  ;;  %v1194_v45 = vpop.f32.mrf.mxu0 }
 0x145   : > { %v1286_v49 = vadd.f32 %v10963_v55, %v1202_v44  ;;  %v1195_v53 = vadd.f32 %v1194_v45, %v1111_v0 }
 0x146   : > { %v1277_v25 = vpop.f32.mrf.mxu1 }
 0x147   : > { %v1278_v56 = vadd.f32 %v1277_v25, %v1195_v53 }
 0x14a   : > { %v10972_v31 = vpop.f32.mrf.mxu0 }
 0x14b   : > { %v1372_v51 = vadd.f32 %v10972_v31, %v1286_v49 }
 0x14c   : > { %v10981_v39 = vpop.f32.mrf.mxu1  ;;  %v1365_v59 = vpop.f32.mrf.mxu0 }
 0x14d   : > { %v12961_v43 = vadd.f32 %v10981_v39, %v1372_v51  ;;  %v1366_v62 = vadd.f32 %v1365_v59, %v1278_v56 }
 0x14e   : > { %v1445_v1 = vpop.f32.mrf.mxu1 }
 0x14f   : > { %15776 = vst [vmem:[#allocation23_spill] sm:$0xff] %v12961_v43  ;;  %v12963_v52 = vadd.f32 %v1445_v1, %v1366_v62 }
 0x151   : > { %15777 = vst [vmem:[#allocation24_spill] sm:$0xff] %v12963_v52 }
 0x153   : > { %v10999_v2 = vpop.f32.mrf.mxu1  ;;  %v10990_v4 = vpop.f32.mrf.mxu0 }
 0x155   : > { %v12965_v54 = vpop.f32.mrf.mxu1  ;;  %v1543_v8 = vpop.f32.mrf.mxu0 }
 0x15a   : > { %v11008_v33 = vpop.f32.mrf.mxu0 }
 0x15c   : > { %v12967_v63 = vpop.f32.mrf.mxu1  ;;  %v1723_v37 = vpop.f32.mrf.mxu0 }
 0x15e   : > { %v12969_v48 = vpop.f32.mrf.mxu1 }
 0x162   : > { %v12975_v9 = vpop.f32.mrf.mxu0 }
 0x164   : > { %v12971_v7 = vpop.f32.mrf.mxu1  ;;  %v12977_v20 = vpop.f32.mrf.mxu0 }
 0x166   : > { %v12973_v57 = vpop.f32.mrf.mxu1 }
 0x16b   : > { %v11053_v38 = vpop.f32.mrf.mxu1  ;;  %v11044_v61 = vpop.f32.mrf.mxu0 }
 0x16d   : > { %v2170_v10 = vpop.f32.mrf.mxu1  ;;  %v2074_v24 = vpop.f32.mrf.mxu0 }
 0x172   : > { %v11062_v23 = vpop.f32.mrf.mxu0 }
 0x174   : > { %v12979_v6 = vpop.f32.mrf.mxu1  ;;  %v2254_v13 = vpop.f32.mrf.mxu0 }
 0x176   : > { %v12981_v5 = vpop.f32.mrf.mxu1 }
 0x17a   : > { %v12987_v15 = vpop.f32.mrf.mxu0 }
 0x17c   : > { %v12983_v12 = vpop.f32.mrf.mxu1  ;;  %v12989_v47 = vpop.f32.mrf.mxu0 }
 0x17d   : > { %15778 = vst [vmem:[#allocation25_spill] sm:$0xff] %v12983_v12 }
 0x17e   : > { %v12985_v46 = vpop.f32.mrf.mxu1 }
 0x17f   : > { %15779 = vst [vmem:[#allocation26_spill] sm:$0xff] %v12985_v46  ;;  %v2171_v46 = vadd.f32 %v2170_v10, %v2074_v24 }
 0x183   : > { %v11107_v16 = vpop.f32.mrf.mxu1  ;;  %v11098_v11 = vpop.f32.mrf.mxu0 }
 0x185   : > { %v2701_v58 = vpop.f32.mrf.mxu1  ;;  %v2605_v18 = vpop.f32.mrf.mxu0 }
 0x186   : > { %v2702_v12 = vadd.f32 %v2701_v58, %v2605_v18 }
 0x18a   : > { %v11116_v21 = vpop.f32.mrf.mxu0 }
 0x18c   : > { %v12991_v3 = vpop.f32.mrf.mxu1  ;;  %v2785_v27 = vpop.f32.mrf.mxu0 }
 0x18e   : > { %v12993_v19 = vpop.f32.mrf.mxu1 }
 0x192   : > { %v12999_v29 = vpop.f32.mrf.mxu0 }
 0x194   : > { %v12995_v26 = vpop.f32.mrf.mxu1  ;;  %v13001_v32 = vpop.f32.mrf.mxu0 }
 0x195   : > { %15780 = vst [vmem:[#allocation27_spill] sm:$0xff] %v12995_v26 }
 0x196   : > { %v12997_v28 = vpop.f32.mrf.mxu1 }
 0x197   : > { %15781 = vst [vmem:[#allocation28_spill] sm:$0xff] %v12997_v28 }
 0x19b   : > { %v11161_v30 = vpop.f32.mrf.mxu1  ;;  %v11152_v34 = vpop.f32.mrf.mxu0 }
 0x19d   : > { %v3232_v35 = vpop.f32.mrf.mxu1  ;;  %v3136_v40 = vpop.f32.mrf.mxu0 }
 0x1a2   : > { %v11170_v42 = vpop.f32.mrf.mxu0 }
 0x1a4   : > { %v13003_v36 = vpop.f32.mrf.mxu1  ;;  %v3316_v41 = vpop.f32.mrf.mxu0 }
 0x1a6   : > { %v13005_v17 = vpop.f32.mrf.mxu1 }
 0x1a7   : > { %15782 = vst [vmem:[#allocation29_spill] sm:$0xff] %v13005_v17  ;;  %v2177_v17 = vadd.f32 %v11053_v38, %v11044_v61 }
 0x1aa   : > { %v13009_v14 = vpop.f32.mrf.mxu0 }
 0x1ab   : > { %15784 = vst [vmem:[#allocation31_spill] sm:$0xff] %v13009_v14  ;;  %v2708_v14 = vadd.f32 %v11107_v16, %v11098_v11 }
 0x1ac   : > { %v13007_v60 = vpop.f32.mrf.mxu1  ;;  %v13013_v0 = vpop.f32.mrf.mxu0 }
 0x1ad   : > { %15783 = vst [vmem:[#allocation30_spill] sm:$0xff] %v13007_v60  ;;  %15786 = vst [vmem:[#allocation33_spill] sm:$0xff] %v13013_v0 }
 0x1ae   : > { %v13011_v50 = vpop.f32.mrf.mxu1 }
 0x1af   : > { %15785 = vst [vmem:[#allocation32_spill] sm:$0xff] %v13011_v50  ;;  %v1646_v50 = vadd.f32 %v10999_v2, %v10990_v4 }
 0x1b1   : > { %v1731_v28 = vadd.f32 %v11008_v33, %v1646_v50 }
 0x1b3   : > { %v11215_v22 = vpop.f32.mrf.mxu1  ;;  %v11206_v44 = vpop.f32.mrf.mxu0 }
 0x1b5   : > { %v3763_v55 = vpop.f32.mrf.mxu1  ;;  %v3667_v45 = vpop.f32.mrf.mxu0 }
 0x1ba   : > { %v11224_v53 = vpop.f32.mrf.mxu0 }
 0x1bc   : > { %v13015_v49 = vpop.f32.mrf.mxu1  ;;  %v3847_v56 = vpop.f32.mrf.mxu0 }
 0x1bd   : > { %15787 = vst [vmem:[#allocation34_spill] sm:$0xff] %v13015_v49  ;;  %v1640_v49 = vadd.f32 %v12965_v54, %v1543_v8  ;;  %v2793_v54 = vadd.f32 %v11116_v21, %v2708_v14  ;;  %v2786_v8 = vadd.f32 %v2785_v27, %v2702_v12 }
 0x1be   : > { %v13017_v25 = vpop.f32.mrf.mxu1 }
 0x1bf   : > { %15788 = vst [vmem:[#allocation35_spill] sm:$0xff] %v13017_v25  ;;  %v1724_v25 = vadd.f32 %v1723_v37, %v1640_v49  ;;  %v3239_v37 = vadd.f32 %v11161_v30, %v11152_v34  ;;  %v2877_v12 = vadd.f32 %v12991_v3, %v2793_v54  ;;  %v15793_v34 = vld [vmem:[#allocation25_spill] sm:$0xff]  ;;  %v15805_v54 = vld [vmem:[#allocation30_spill] sm:$0xff] }
 0x1c1   : > { %v1807_v50 = vadd.f32 %v12969_v48, %v1724_v25  ;;  %v3324_v61 = vadd.f32 %v11170_v42, %v3239_v37  ;;  %v2963_v21 = vadd.f32 %v12999_v29, %v2877_v12  ;;  %v15795_v42 = vld [vmem:[#allocation23_spill] sm:$0xff] }
 0x1c2   : > { %v13021_v51 = vpop.f32.mrf.mxu0 }
 0x1c3   : > { %15790 = vst [vmem:[#allocation37_spill] sm:$0xff] %v13021_v51  ;;  %v1895_v38 = vadd.f32 %v12977_v20, %v1807_v50  ;;  %v2869_v20 = vadd.f32 %v12993_v19, %v2786_v8 }
 0x1c4   : > { %v13019_v31 = vpop.f32.mrf.mxu1  ;;  %v13025_v59 = vpop.f32.mrf.mxu0 }
 0x1c5   : > { %15789 = vst [vmem:[#allocation36_spill] sm:$0xff] %v13019_v31  ;;  %15792 = vst [vmem:[#allocation39_spill] sm:$0xff] %v13025_v59  ;;  %v1815_v31 = vadd.f32 %v12967_v63, %v1731_v28  ;;  %v2255_v59 = vadd.f32 %v2254_v13, %v2171_v46  ;;  %v3770_v46 = vadd.f32 %v11215_v22, %v11206_v44  ;;  %v15797_v22 = vld [vmem:[#allocation29_spill] sm:$0xff]  ;;  %v15798_v44 = vld [vmem:[#allocation34_spill] sm:$0xff] }
 0x1c6   : > { %v13023_v39 = vpop.f32.mrf.mxu1  ;;  %v2957_v27 = vadd.f32 %v13001_v32, %v2869_v20  ;;  %v3408_v28 = vadd.f32 %v13003_v36, %v3324_v61  ;;  %v15799_v32 = vld [vmem:[#allocation24_spill] sm:$0xff]  ;;  %v15800_v36 = vld [vmem:[#allocation27_spill] sm:$0xff] }
 0x1c7   : > { %15791 = vst [vmem:[#allocation38_spill] sm:$0xff] %v13023_v39  ;;  %v2262_v39 = vadd.f32 %v11062_v23, %v2177_v17  ;;  %v1901_v2 = vadd.f32 %v12975_v9, %v1815_v31  ;;  %v2338_v10 = vadd.f32 %v12981_v5, %v2255_v59  ;;  %v3233_v23 = vadd.f32 %v3232_v35, %v3136_v40  ;;  %v15794_v35 = vld [vmem:[#allocation31_spill] sm:$0xff]  ;;  %v15807_v20 = vld [vmem:[#allocation32_spill] sm:$0xff] }
 0x1c8   : > { %v3855_v11 = vadd.f32 %v11224_v53, %v3770_v46  ;;  %v3494_v19 = vadd.f32 %v15794_v35, %v3408_v28  ;;  %v3043_v49 = vadd.f32 %v15800_v36, %v2963_v21 }
 0x1c9   : > { %v2346_v63 = vadd.f32 %v12979_v6, %v2262_v39  ;;  %v1981_v24 = vadd.f32 %v12971_v7, %v1901_v2  ;;  %v2426_v48 = vadd.f32 %v12989_v47, %v2338_v10  ;;  %v3317_v58 = vadd.f32 %v3316_v41, %v3233_v23  ;;  %v15796_v41 = vld [vmem:[#allocation26_spill] sm:$0xff]  ;;  %v15803_v39 = vld [vmem:[#allocation35_spill] sm:$0xff] }
 0x1ca   : > { %v3764_v6 = vadd.f32 %v3763_v55, %v3667_v45  ;;  %v1975_v7 = vadd.f32 %v12973_v57, %v1895_v38  ;;  %v3939_v29 = vadd.f32 %v15798_v44, %v3855_v11  ;;  %v3574_v8 = vadd.f32 %v15805_v54, %v3494_v19  ;;  %v10260_v11 = vld [vmem:[%s15809_s4 + $0x28] sm:$0xf] }
 0x1cb   : > { %v11260_v62 = vpop.f32.mrf.mxu0  ;;  %v11269_v1 = vpop.f32.mrf.mxu1  ;;  %v2432_v16 = vadd.f32 %v12987_v15, %v2346_v63  ;;  %v1985_v17 = vadd.f32 %v1981_v24, %v15795_v42  ;;  %v2506_v14 = vadd.f32 %v15796_v41, %v2426_v48  ;;  %v3400_v57 = vadd.f32 %v15797_v22, %v3317_v58 }
 0x1cc   : > { %v4301_v5 = vadd.f32 %v11269_v1, %v11260_v62  ;;  %v3848_v15 = vadd.f32 %v3847_v56, %v3764_v6  ;;  %v1984_v45 = vadd.f32 %v1975_v7, %v15799_v32  ;;  %v15802_v56 = vld [vmem:[#allocation33_spill] sm:$0xff]  ;;  %v15806_v63 = vld [vmem:[#allocation39_spill] sm:$0xff]  ;;  %v15808_v58 = vld [vmem:[#allocation36_spill] sm:$0xff]  ;;  %v5210_v21 = vsel %vm2521_vm3, %v10260_v11, 0 }
 0x1cd   : > { %v4198_v60 = vpop.f32.mrf.mxu0  ;;  %v4294_v0 = vpop.f32.mrf.mxu1  ;;  %v2512_v3 = vadd.f32 %v15793_v34, %v2432_v16  ;;  %v3488_v31 = vadd.f32 %v15802_v56, %v3400_v57  ;;  %v13107_v32 = vld [vmem:[%s383_s29] sm:$0xff] }
 0x1ce   : > { %v4295_v40 = vadd.f32 %v4294_v0, %v4198_v60  ;;  %v3931_v60 = vadd.f32 %v15803_v39, %v3848_v15  ;;  %v15804_v0 = vld [vmem:[#allocation37_spill] sm:$0xff]  ;;  %v2515_v38 = vadd.f32 %v2506_v14, %v1984_v45  ;;  %v10257_v56 = vld [vmem:[%s15812_s3] ss:$0 sm:$0xff]  ;;  %s15018_s3 = sld [smem:[#allocation3 + $0x18]] }
 0x1cf   : > { %v4025_v59 = vadd.f32 %v15804_v0, %v3939_v29  ;;  %v2516_v50 = vadd.f32 %v2512_v3, %v1985_v17  ;;  %v13109_v45 = vld [vmem:[%s383_s29 + $0x8] sm:$0xff] }
 0x1d0   : > { %v4019_v10 = vadd.f32 %v15806_v63, %v3931_v60  ;;  %v5201_v0 = vrot.slane %v13109_v45, 1 }
 0x1d1   : > { %v4105_v6 = vadd.f32 %v15808_v58, %v4025_v59 }
 0x1d2   : > { %v11278_v26 = vpop.f32.mrf.mxu0 }
 0x1d3   : > { %v4386_v30 = vadd.f32 %v11278_v26, %v4301_v5  ;;  %v15801_v26 = vld [vmem:[#allocation28_spill] sm:$0xff] }
 0x1d4   : > { %v11287_v52 = vpop.f32.mrf.mxu1  ;;  %v4378_v51 = vpop.f32.mrf.mxu0  ;;  %v3037_v53 = vadd.f32 %v15801_v26, %v2957_v27  ;;  %v15810_v27 = vld [vmem:[#allocation38_spill] sm:$0xff] }
 0x1d5   : > { %v4379_v25 = vadd.f32 %v4378_v51, %v4295_v40  ;;  %v4470_v62 = vadd.f32 %v11287_v52, %v4386_v30  ;;  %v3047_v51 = vadd.f32 %v3043_v49, %v2516_v50  ;;  %v3568_v52 = vadd.f32 %v15807_v20, %v3488_v31 }
 0x1d6   : > { %v13029_v43 = vpop.f32.mrf.mxu1  ;;  %v3046_v12 = vadd.f32 %v3037_v53, %v2515_v38  ;;  %v4099_v28 = vadd.f32 %v15810_v27, %v4019_v10  ;;  %v13075_v30 = vand.u32 4294901760, %v5210_v21  ;;  %v5200_v53 = vrot.slane %v13107_v32, 1 }
 0x1d7   : > { %v4462_v46 = vadd.f32 %v13029_v43, %v4379_v25  ;;  %v3578_v5 = vadd.f32 %v3574_v8, %v3047_v51  ;;  %v10259_v43 = vld [vmem:[%s15809_s4 + $0x20] sm:$0xff]  ;;  %v13116_v25 = vld [vmem:[%s383_s29 + $0x10] sm:$0xf]  ;;  %v7919_v27 = vstv %s13152_s22  ;;  %s13182_s29 = sld [smem:[#allocation3 + $0x8]] }
 0x1d8   : > { %v3577_v3 = vadd.f32 %v3568_v52, %v3046_v12  ;;  %11360 = vmatprep.subr.mxu0 %v13075_v30  ;;  %v13083_v19 = vsub.f32 %v5210_v21, %v13075_v30  ;;  %v5202_v8 = vsel %vm410_vm0, %v5200_v53, %v5201_v0  ;;  %s13316_s22 = sld [smem:[#allocation3 + $0xf]] }
 0x1d9   : > { %11361 = vmatpush3.msra.mxu0 %v13075_v30 }
 0x1da   : > { %v11296_v4 = vpop.f32.mrf.mxu0  ;;  %v4108_v57 = vadd.f32 %v4099_v28, %v3577_v3  ;;  %v7933_v3 = vstv %s13161_s21  ;;  %s15729_s21 = smov 48  }
 0x1db   : > { %v4556_v61 = vadd.f32 %v11296_v4, %v4470_v62 }
 0x1dc   : > { %v13032_v33 = vpop.f32.mrf.mxu1  ;;  %v4549_v9 = vpop.f32.mrf.mxu0 }
 0x1dd   : > { %v4636_v15 = vadd.f32 %v13032_v33, %v4556_v61  ;;  %v10258_v33 = vld [vmem:[%s15809_s4 + $0x18] sm:$0xff]  ;;  %v5205_v61 = vsel %vm389_vm8, %v5202_v8, 0 }
 0x1de   : > { %v13039_v13 = vpop.f32.mrf.mxu1  ;;  %v13093_v22 = vand.u32 4294901760, %v10258_v33 }
 0x1e0   : > { %v13113_v26 = vsub.f32 %v10258_v33, %v13093_v22 }
 0x1e3   : > { %v11314_v18 = vpop.f32.mrf.mxu0  ;;  %v11323_v47 = vpop.f32.mrf.mxu1 }
 0x1e4   : > { %v4824_v37 = vadd.f32 %v11323_v47, %v11314_v18  ;;  %v4550_v18 = vadd.f32 %v4549_v9, %v4462_v46  ;;  %v13077_v47 = vand.u32 4294901760, %v10259_v43  ;;  %v4109_v9 = vadd.f32 %v4105_v6, %v3578_v5 }
 0x1e5   : > { %v4721_v55 = vpop.f32.mrf.mxu0  ;;  %v4817_v1 = vpop.f32.mrf.mxu1  ;;  %v7891_v6 = vstv %s13127_s14  ;;  %s13220_s14 = sld [smem:[#allocation3 + $0xa]] }
 0x1e6   : > { %v4818_v16 = vadd.f32 %v4817_v1, %v4721_v55  ;;  %v13089_v40 = vsub.f32 %v10259_v43, %v13077_v47  ;;  %v4630_v42 = vadd.f32 %v13039_v13, %v4550_v18  ;;  %v4640_v44 = vadd.f32 %v4636_v15, %v4109_v9  ;;  %11362 = vmatprep.subr.mxu0 %v13077_v47 }
 0x1e7   : > { %v13102_v55 = vand.u32 4294901760, %v13083_v19  ;;  %11363 = vmatpush3.msra.mxu0 %v13077_v47 }
 0x1e8   : > { %v13105_v13 = vand.u32 4294901760, %v13089_v40  ;;  %11364 = vmatprep.subr.mxu0 %v13093_v22  ;;  %v4639_v59 = vadd.f32 %v4630_v42, %v4108_v57  ;;  %v5192_v42 = vld [vmem:[%s15809_s4 + $0x10] sm:$0xf] }
 0x1e9   : > { %v5330_v39 = vsub.f32 %v13083_v19, %v13102_v55  ;;  %11365 = vmatpush3.msra.mxu0 %v13093_v22 }
 0x1ea   : > { %v11332_v2 = vpop.f32.mrf.mxu0  ;;  %v5337_v60 = vsub.f32 %v13089_v40, %v13105_v13  ;;  %11378 = vmatprep.subr.mxu0 %v13083_v19 }
 0x1eb   : > { %v4909_v48 = vadd.f32 %v11332_v2, %v4824_v37  ;;  %v13131_v2 = vand.u32 4294901760, %v13113_v26  ;;  %v5331_v50 = vand.u32 4294901760, %v5330_v39  ;;  %v5203_v37 = vrot.slane %v13116_v25, 1 }
 0x1ec   : > { %v11341_v24 = vpop.f32.mrf.mxu1  ;;  %v4901_v23 = vpop.f32.mrf.mxu0  ;;  %v5338_v54 = vand.u32 4294901760, %v5337_v60  ;;  %v5190_v60 = vld [vmem:[%s15809_s4] sm:$0xff] }
 0x1ed   : > { %v4902_v7 = vadd.f32 %v4901_v23, %v4818_v16  ;;  %v4993_v34 = vadd.f32 %v11341_v24, %v4909_v48  ;;  %v5344_v10 = vsub.f32 %v13113_v26, %v13131_v2  ;;  %v7877_v24 = vstv %s13079_s23  ;;  %11369 = vmatprep.subr.mxu1 %v5331_v50  ;;  %s11845_s23 = smov 112  }
 0x1ee   : > { %v4984_v4 = vpop.f32.mrf.mxu1  ;;  %v13140_v23 = vand.u32 4294901760, %v5205_v61  ;;  %11370 = vmatpush3.msra.mxu1 %v5331_v50  ;;  %v5204_v20 = vsel %vm410_vm0, %v5201_v0, %v5203_v37  ;;  %v7973_v0 = vstv %s13182_s29  ;;  %v5729_v37 = vsel %vm389_vm8, %v13109_v45, 0  ;;  %s13249_s29 = sld [smem:[#allocation3 + $0xb]] }
 0x1ef   : > { %v4985_v17 = vadd.f32 %v4984_v4, %v4902_v7  ;;  %v5345_v16 = vand.u32 4294901760, %v5344_v10  ;;  %11371 = vmatprep.subr.mxu1 %v5338_v54  ;;  %v5207_v5 = vsel %vm389_vm8, %v5204_v20, 0  ;;  %v7905_v7 = vstv %s13142_s17  ;;  %s13295_s17 = sld [smem:[#allocation3 + $0xe]] }
 0x1f0   : > { %11375 = vmatprep.mubr.f32.mxu1 %v13140_v23  ;;  %11372 = vmatpush3.msra.mxu1 %v5338_v54  ;;  %v13163_v4 = vand.u32 4294901760, %v5207_v5  ;;  %v5281_v15 = vsub.f32 %v5205_v61, %v13140_v23  ;;  %v13234_v54 = vand.u32 4294901760, %v5190_v60  ;;  %v13245_v10 = vand.u32 4294901760, %v5729_v37 }
 0x1f1   : > { %11373 = vmatprep.subr.mxu1 %v5345_v16  ;;  %v8001_v20 = vstv %s13220_s14  ;;  %s13381_s14 = sld [smem:[#allocation3 + $0x14]] }
 0x1f2   : > { %11374 = vmatpush3.msra.mxu1 %v5345_v16  ;;  %v13187_v33 = vsub.f32 %v5207_v5, %v13163_v4 }
 0x1f3   : > { %v11350_v35 = vpop.f32.mrf.mxu0  ;;  %v11359_v14 = vpop.f32.mrf.mxu1  ;;  %11387 = vmatprep.subr.mxu1 %v13075_v30  ;;  %11376 = vmatmul.mubr.f32.vlgmr.msra.gmra.mxu1 %v13163_v4 }
 0x1f4   : > { %v5079_v41 = vadd.f32 %v11350_v35, %v4993_v34  ;;  %11388 = vmatpush3.msra.mxu1 %v13075_v30  ;;  %v5282_v35 = vand.u32 4294901760, %v5281_v15  ;;  %v5292_v57 = vand.u32 4294901760, %v13187_v33 }
 0x1f5   : > { %v5072_v29 = vpop.f32.mrf.mxu0  ;;  %v5152_v31 = vpop.f32.mrf.mxu1  ;;  %11389 = vmatprep.subr.mxu1 %v13077_v47 }
 0x1f6   : > { %v5159_v36 = vadd.f32 %v11359_v14, %v5079_v41  ;;  %v5073_v49 = vadd.f32 %v5072_v29, %v4985_v17  ;;  %11390 = vmatpush3.msra.mxu1 %v13077_v47  ;;  %v7959_v41 = vstv %s13172_s25  ;;  %v5283_v14 = vsub.f32 %v5281_v15, %v5282_v35  ;;  %11393 = vmatprep.mubr.f32.mxu1 %v5282_v35  ;;  %s13327_s25 = sld [smem:[#allocation3 + $0x10]]  ;;  %v10263_v35 = vld [vmem:[%s15809_s4 + $0x40] sm:$0xf] }
 0x1f7   : > { %11391 = vmatprep.subr.mxu1 %v13093_v22  ;;  %v5732_v29 = vsel %vm2521_vm3, %v5192_v42, 0  ;;  %v5293_v53 = vsub.f32 %v13187_v33, %v5292_v57  ;;  %v8077_v42 = vstv %s13316_s22  ;;  %s13480_s22 = sld [smem:[#allocation3 + $0x19]] }
 0x1f8   : > { %v5163_v62 = vadd.f32 %v5159_v36, %v4640_v44  ;;  %v5153_v1 = vadd.f32 %v5152_v31, %v5073_v49  ;;  %11392 = vmatpush3.msra.mxu1 %v13093_v22  ;;  %v5191_v44 = vld [vmem:[%s15809_s4 + $0x8] sm:$0xff]  ;;  %v5284_v49 = vand.u32 4294901760, %v5283_v14  ;;  %v6263_v14 = vsel %vm2521_vm3, %v10263_v35, 0 }
 0x1f9   : > { %11405 = vmatprep.subr.mxu1 %v13075_v30  ;;  %11394 = vmatmul.mubr.f32.vlgmr.msra.gmra.mxu1 %v5292_v57  ;;  %v13213_v39 = vand.u32 4294901760, %v5191_v44  ;;  %v6256_v57 = vrot.slane %v13116_v25, 2 }
 0x1fa   : > { %v5172_v38 = vadd.f32 %v10257_v56, %v5163_v62  ;;  %v5162_v63 = vadd.f32 %v5153_v1, %v4639_v59  ;;  %11406 = vmatpush3.msra.mxu1 %v13075_v30  ;;  %11411 = vmatprep.mubr.f32.mxu1 %v13140_v23  ;;  %v5294_v59 = vand.u32 4294901760, %v5293_v53  ;;  %v5727_v30 = vsel %vm389_vm8, %v13107_v32, 0  ;;  %v10262_v53 = vld [vmem:[%s15809_s4 + $0x38] sm:$0xff] }
 0x1fb   : > { %11366 = vmatprep.mubr.f32.mxu0 %v5284_v49  ;;  %11407 = vmatprep.subr.mxu1 %v13077_v47  ;;  %v13236_v8 = vand.u32 4294901760, %v5727_v30  ;;  %v13358_v49 = vand.u32 4294901760, %v6263_v14 }
 0x1fc   : > { %vm5185_vm9 = vcmp.gt.f32.partialorder %v5172_v38, 0.0  ;;  %v5187_v51 = vmul.f32 0.01, %v5172_v38  ;;  %v5171_v46 = vadd.f32 %v10257_v56, %v5162_v63  ;;  %5177 = vrot.lane.b32.xlu0 %v5172_v38, %s11844_s16  ;;  %v13208_v56 = vand.u32 4294901760, %v5732_v29  ;;  %11367 = vmatmul.mubr.f32.vlgmr.msra.gmra.mxu0 %v5294_v59 }
 0x1fd   : > { %11408 = vmatpush3.msra.mxu1 %v13077_v47  ;;  %11379 = vmatpush3.msra.mxu0 %v13083_v19  ;;  %v13243_v63 = vsub.f32 %v5191_v44, %v13213_v39 }
 0x1fe   : > { %v13145_v48 = vsel %vm5185_vm9, %v5172_v38, %v5187_v51  ;;  %vm5184_vm10 = vcmp.gt.f32.partialorder %v5171_v46, 0.0  ;;  %v5186_v12 = vmul.f32 0.01, %v5171_v46  ;;  %v13223_v62 = vsub.f32 %v5732_v29, %v13208_v56  ;;  %11384 = vmatprep.mubr.f32.mxu0 %v5281_v15  ;;  %11380 = vmatprep.subr.mxu0 %v13089_v40 }
 0x1ff   : > { %v7879_v52 = vmul.f32 %v7877_v24, %v13145_v48  ;;  %v7893_v18 = vmul.f32 %v7891_v6, %v13145_v48  ;;  %v7907_v43 = vmul.f32 %v7905_v7, %v13145_v48  ;;  %v7921_v34 = vmul.f32 %v7919_v27, %v13145_v48  ;;  %11381 = vmatpush3.msra.mxu0 %v13089_v40 }
 0x200   : > { %v13149_v58 = vsel %vm5184_vm10, %v5171_v46, %v5186_v12  ;;  %5175 = vrot.lane.b32.xlu0 %v5171_v46, %s11844_s16  ;;  %v7935_v17 = vmul.f32 %v7933_v3, %v13145_v48  ;;  %s13197_s16 = sld [smem:[#allocation3 + $0x9]]  ;;  %v7961_v31 = vmul.f32 %v7959_v41, %v13145_v48  ;;  %v13232_v50 = vand.u32 4294901760, %v13223_v62  ;;  %11382 = vmatprep.subr.mxu0 %v13113_v26 }
 0x201   : > { %7884 = vrot.lane.b32.xlu1 %v7879_v52, %s11845_s23  ;;  %v7878_v11 = vmul.f32 %v7877_v24, %v13149_v58  ;;  %v7892_v21 = vmul.f32 %v7891_v6, %v13149_v58  ;;  %v7906_v28 = vmul.f32 %v7905_v7, %v13149_v58  ;;  %v7920_v9 = vmul.f32 %v7919_v27, %v13149_v58 }
 0x202   : > { %v7934_v36 = vmul.f32 %v7933_v3, %v13149_v58  ;;  %v7960_v1 = vmul.f32 %v7959_v41, %v13149_v58  ;;  %v7975_v38 = vmul.f32 %v7973_v0, %v13145_v48  ;;  %v5852_v61 = vsub.f32 %v13223_v62, %v13232_v50  ;;  %11409 = vmatprep.subr.mxu1 %v13093_v22 }
 0x203   : > { %v7974_v19 = vmul.f32 %v7973_v0, %v13149_v58  ;;  %v13260_v24 = vsub.f32 %v5727_v30, %v13236_v8  ;;  %v13263_v51 = vsub.f32 %v5190_v60, %v13234_v54  ;;  %11383 = vmatpush3.msra.mxu0 %v13113_v26  ;;  %11410 = vmatpush3.msra.mxu1 %v13093_v22  ;;  %v13269_v40 = vand.u32 4294901760, %v13243_v63  ;;  %v10261_v30 = vld [vmem:[%s15809_s4 + $0x30] sm:$0xff] }
 0x204   : > { %7882 = vrot.lane.b32.xlu0 %v7878_v11, %s11845_s23  ;;  %v5853_v16 = vand.u32 4294901760, %v5852_v61  ;;  %v13272_v12 = vsub.f32 %v5729_v37, %v13245_v10  ;;  %11396 = vmatprep.subr.mxu0 %v13102_v55  ;;  %v8003_v6 = vmul.f32 %v8001_v20, %v13145_v48  ;;  %v8063_v3 = vstv %s13295_s17  ;;  %s13459_s17 = sld [smem:[#allocation3 + $0x17]] }
 0x205   : > { %7898 = vrot.lane.b32.xlu1 %v7893_v18, %s11846_s24  ;;  %11385 = vmatmul.mubr.f32.vlgmr.msra.gmra.mxu0 %v13187_v33  ;;  %v5804_v26 = vand.u32 4294901760, %v13260_v24  ;;  %v13286_v52 = vand.u32 4294901760, %v13263_v51  ;;  %v5859_v11 = vsub.f32 %v13243_v63, %v13269_v40  ;;  %v8065_v33 = vmul.f32 %v8063_v3, %v13145_v48 }
 0x206   : > { %v7987_v47 = vstv %s13197_s16  ;;  %s13276_s16 = sld [smem:[#allocation3 + $0xd]]  ;;  %11397 = vmatpush3.msra.mxu0 %v13102_v55  ;;  %11402 = vmatprep.mubr.f32.mxu0 %v13140_v23  ;;  %v5814_v5 = vand.u32 4294901760, %v13272_v12  ;;  %v8015_v55 = vstv %s13249_s29  ;;  %v8002_v23 = vmul.f32 %v8001_v20, %v13149_v58 }
 0x207   : > { %v7989_v46 = vmul.f32 %v7987_v47, %v13145_v48  ;;  %v7988_v22 = vmul.f32 %v7987_v47, %v13149_v58  ;;  %11398 = vmatprep.subr.mxu0 %v13105_v13  ;;  %11423 = vmatprep.subr.mxu1 %v5853_v16  ;;  %v5805_v18 = vsub.f32 %v13260_v24, %v5804_v26  ;;  %s13339_s29 = sld [smem:[#allocation3 + $0x11]]  ;;  %v6254_v41 = vrot.slane %v13109_v45, 2 }
 0x208   : > { %7896 = vrot.lane.b32.xlu0 %v7892_v21, %s11846_s24  ;;  %11399 = vmatpush3.msra.mxu0 %v13105_v13  ;;  %v5866_v7 = vsub.f32 %v13263_v51, %v13286_v52  ;;  %v8017_v21 = vmul.f32 %v8015_v55, %v13145_v48  ;;  %v5860_v13 = vand.u32 4294901760, %v5859_v11  ;;  %v8016_v27 = vmul.f32 %v8015_v55, %v13149_v58 }
 0x209   : > { %7912 = vrot.lane.b32.xlu1 %v7907_v43, %s11847_s26  ;;  %11400 = vmatprep.subr.mxu0 %v13131_v2  ;;  %v8064_v44 = vmul.f32 %v8063_v3, %v13149_v58  ;;  %v8079_v29 = vmul.f32 %v8077_v42, %v13145_v48  ;;  %v6257_v60 = vsel %vm1459_vm4, %v6254_v41, %v6256_v57  ;;  %v13393_v61 = vand.u32 4294901760, %v10261_v30 }
 0x20a   : > { %11401 = vmatpush3.msra.mxu0 %v13131_v2  ;;  %11412 = vmatmul.mubr.f32.vlgmr.msra.gmra.mxu1 %v13163_v4  ;;  %v5815_v2 = vsub.f32 %v13272_v12, %v5814_v5  ;;  %v8078_v0 = vmul.f32 %v8077_v42, %v13149_v58  ;;  %v8193_v35 = vstv %s13459_s17  ;;  %s13622_s17 = sld [smem:[#allocation3 + $0x21]] }
 0x20b   : > { %11414 = vmatprep.subr.mxu0 %v13208_v56  ;;  %11403 = vmatmul.mubr.f32.vlgmr.msra.gmra.mxu0 %v13163_v4  ;;  %v5806_v4 = vand.u32 4294901760, %v5805_v18  ;;  %v8195_v42 = vmul.f32 %v8193_v35, %v13145_v48 }
 0x20c   : > { %7910 = vrot.lane.b32.xlu0 %v7906_v28, %s11847_s26  ;;  %v8049_v43 = vstv %s13276_s16  ;;  %11415 = vmatpush3.msra.mxu0 %v13208_v56  ;;  %v5867_v28 = vand.u32 4294901760, %v5866_v7  ;;  %s13355_s16 = sld [smem:[#allocation3 + $0x13]] }
 0x20d   : > { %7926 = vrot.lane.b32.xlu1 %v7921_v34, %s15721_s27  ;;  %11416 = vmatprep.subr.mxu0 %v13213_v39  ;;  %v8051_v15 = vmul.f32 %v8049_v43, %v13145_v48  ;;  %v5816_v34 = vand.u32 4294901760, %v5815_v2  ;;  %v8105_v37 = vstv %s13339_s29  ;;  %s13407_s29 = sld [smem:[#allocation3 + $0x15]] }
 0x20e   : > { %11417 = vmatpush3.msra.mxu0 %v13213_v39  ;;  %11424 = vmatpush3.msra.mxu1 %v5853_v16 }
 0x20f   : > { %11418 = vmatprep.subr.mxu0 %v13234_v54  ;;  %11425 = vmatprep.subr.mxu1 %v5860_v13 }
 0x210   : > { %7924 = vrot.lane.b32.xlu0 %v7920_v9, %s15721_s27  ;;  %11419 = vmatpush3.msra.mxu0 %v13234_v54  ;;  %v8050_v9 = vmul.f32 %v8049_v43, %v13149_v58 }
 0x211   : > { %7940 = vrot.lane.b32.xlu1 %v7935_v17, %s15729_s21  ;;  %11426 = vmatpush3.msra.mxu1 %v5860_v13  ;;  %v6253_v17 = vrot.slane %v13107_v32, 2 }
 0x212   : > { %11420 = vmatprep.mubr.f32.mxu0 %v5806_v4  ;;  %11427 = vmatprep.subr.mxu1 %v5867_v28  ;;  %v8137_v20 = vstv %s13355_s16  ;;  %s13437_s16 = sld [smem:[#allocation3 + $0x16]] }
 0x213   : > { %11432 = vmatprep.subr.mxu0 %v13223_v62  ;;  %11421 = vmatmul.mubr.f32.vlgmr.msra.gmra.mxu0 %v5816_v34 }
 0x214   : > { %7938 = vrot.lane.b32.xlu0 %v7934_v36, %s15729_s21  ;;  %11428 = vmatpush3.msra.mxu1 %v5867_v28  ;;  %v8091_v36 = vstv %s13327_s25  ;;  %s13490_s25 = sld [smem:[#allocation3 + $0x1a]] }
 0x215   : > { %7966 = vrot.lane.b32.xlu1 %v7961_v31, %s11845_s23  ;;  %11433 = vmatpush3.msra.mxu0 %v13223_v62  ;;  %v6255_v31 = vsel %vm1459_vm4, %v6253_v17, %v6254_v41  ;;  %v8093_v59 = vmul.f32 %v8091_v36, %v13145_v48  ;;  %v13373_v62 = vand.u32 4294901760, %v10262_v53  ;;  %v8092_v47 = vmul.f32 %v8091_v36, %v13149_v58 }
 0x216   : > { %11429 = vmatprep.mubr.f32.mxu1 %v13236_v8  ;;  %11434 = vmatprep.subr.mxu0 %v13243_v63  ;;  %v8225_v17 = vstv %s13480_s22  ;;  %v6786_v41 = vrot.slane %v13107_v32, 3  ;;  %s13643_s22 = sld [smem:[#allocation3 + $0x22]] }
 0x217   : > { %11441 = vmatprep.subr.mxu1 %v13208_v56  ;;  %11430 = vmatmul.mubr.f32.vlgmr.msra.gmra.mxu1 %v13245_v10  ;;  %v8227_v36 = vmul.f32 %v8225_v17, %v13145_v48 }
 0x218   : > { %7964 = vrot.lane.b32.xlu0 %v7960_v1, %s11845_s23  ;;  %11435 = vmatpush3.msra.mxu0 %v13243_v63  ;;  %v6258_v1 = vsel %vm389_vm8, %v6255_v31, 0  ;;  %v6260_v63 = vsel %vm389_vm8, %v6257_v60, 0  ;;  %v8179_v28 = vstv %s13437_s16  ;;  %s13518_s16 = sld [smem:[#allocation3 + $0x1c]]  ;;  %v10265_v60 = vld [vmem:[%s15809_s4 + $0x50] sm:$0xff] }
 0x219   : > { %7980 = vrot.lane.b32.xlu1 %v7975_v38, %s11846_s24  ;;  %11442 = vmatpush3.msra.mxu1 %v13208_v56  ;;  %v13385_v38 = vsub.f32 %v6263_v14, %v13358_v49  ;;  %v13403_v16 = vand.u32 4294901760, %v6260_v63  ;;  %v8181_v3 = vmul.f32 %v8179_v28, %v13145_v48  ;;  %v6787_v14 = vrot.slane %v13109_v45, 3 }
 0x21a   : > { %11436 = vmatprep.subr.mxu0 %v13263_v51  ;;  %11443 = vmatprep.subr.mxu1 %v13213_v39 }
 0x21b   : > { %11437 = vmatpush3.msra.mxu0 %v13263_v51  ;;  %11444 = vmatpush3.msra.mxu1 %v13213_v39  ;;  %v8107_v51 = vmul.f32 %v8105_v37, %v13145_v48  ;;  %v13433_v55 = vsub.f32 %v6260_v63, %v13403_v16 }
 0x21c   : > { %7978 = vrot.lane.b32.xlu0 %v7974_v19, %s11846_s24  ;;  %11438 = vmatprep.mubr.f32.mxu0 %v13260_v24  ;;  %v13395_v19 = vand.u32 4294901760, %v6258_v1  ;;  %v13424_v24 = vsub.f32 %v10261_v30, %v13393_v61  ;;  %v8226_v30 = vmul.f32 %v8225_v17, %v13149_v58 }
 0x21d   : > { %7994 = vrot.lane.b32.xlu1 %v7989_v46, %s11847_s26  ;;  %11445 = vmatprep.subr.mxu1 %v13234_v54  ;;  %v13401_v46 = vsub.f32 %v10262_v53, %v13373_v62  ;;  %v8239_v53 = vstv %s13490_s25  ;;  %s13649_s25 = sand.u32 1, %s11832_s10   ;;  %s15038_s10 = sld [smem:[#allocation6 + $0x7]] }
 0x21e   : > { %11450 = vmatprep.subr.mxu0 %v13232_v50  ;;  %11439 = vmatmul.mubr.f32.vlgmr.msra.gmra.mxu0 %v13272_v12  ;;  %v8151_v12 = vstv %s13381_s14  ;;  %s13544_s14 = sld [smem:[#allocation3 + $0x1d]] }
 0x21f   : > { %11446 = vmatpush3.msra.mxu1 %v13234_v54  ;;  %11451 = vmatpush3.msra.mxu0 %v13232_v50  ;;  %v8106_v50 = vmul.f32 %v8105_v37, %v13149_v58  ;;  %v13430_v11 = vand.u32 4294901760, %v13401_v46  ;;  %v8153_v18 = vmul.f32 %v8151_v12, %v13145_v48  ;;  %v8152_v13 = vmul.f32 %v8151_v12, %v13149_v58 }
 0x220   : > { %7992 = vrot.lane.b32.xlu0 %v7988_v22, %s11847_s26  ;;  %11447 = vmatprep.mubr.f32.mxu1 %v5804_v26  ;;  %v13412_v22 = vand.u32 4294901760, %v13385_v38  ;;  %v8139_v26 = vmul.f32 %v8137_v20, %v13145_v48  ;;  %v13536_v37 = vand.u32 4294901760, %v10265_v60 }
 0x221   : > { %8008 = vrot.lane.b32.xlu1 %v8003_v6, %s15721_s27  ;;  %11452 = vmatprep.subr.mxu0 %v13269_v40  ;;  %v13421_v6 = vsub.f32 %v6258_v1, %v13395_v19  ;;  %v6390_v7 = vsub.f32 %v13401_v46, %v13430_v11  ;;  %v8241_v1 = vmul.f32 %v8239_v53, %v13145_v48 }
 0x222   : > { %11459 = vmatprep.subr.mxu1 %v13208_v56  ;;  %11448 = vmatmul.mubr.f32.vlgmr.msra.gmra.mxu1 %v5814_v5  ;;  %v6383_v5 = vsub.f32 %v13385_v38, %v13412_v22  ;;  %v13564_v12 = vsub.f32 %v10265_v60, %v13536_v37  ;;  %v10268_v60 = vld [vmem:[%s15809_s4 + $0x68] sm:$0xff] }
 0x223   : > { %11453 = vmatpush3.msra.mxu0 %v13269_v40  ;;  %11460 = vmatpush3.msra.mxu1 %v13208_v56  ;;  %v8138_v56 = vmul.f32 %v8137_v20, %v13149_v58  ;;  %v6335_v40 = vand.u32 4294901760, %v13421_v6  ;;  %v6391_v4 = vand.u32 4294901760, %v6390_v7  ;;  %v8240_v20 = vmul.f32 %v8239_v53, %v13149_v58  ;;  %16002 = sst [smem:[#allocation205_spill]] %s15038_s10 }
 0x224   : > { %8006 = vrot.lane.b32.xlu0 %v8002_v23, %s15721_s27  ;;  %11454 = vmatprep.subr.mxu0 %v13286_v52  ;;  %v13449_v23 = vand.u32 4294901760, %v13424_v24 }
 0x225   : > { %8022 = vrot.lane.b32.xlu1 %v8017_v21, %s15729_s21  ;;  %11461 = vmatprep.subr.mxu1 %v13213_v39  ;;  %v6345_v21 = vand.u32 4294901760, %v13433_v55  ;;  %v6336_v2 = vsub.f32 %v13421_v6, %v6335_v40 }
 0x226   : > { %11455 = vmatpush3.msra.mxu0 %v13286_v52  ;;  %11462 = vmatpush3.msra.mxu1 %v13213_v39  ;;  %v8165_v52 = vstv %s13407_s29  ;;  %v6384_v39 = vand.u32 4294901760, %v6383_v5  ;;  %v6397_v43 = vsub.f32 %v13424_v24, %v13449_v23  ;;  %s13502_s29 = sld [smem:[#allocation3 + $0x1b]] }
 0x227   : > { %11456 = vmatprep.mubr.f32.mxu0 %v13236_v8  ;;  %11463 = vmatprep.subr.mxu1 %v13234_v54 }
 0x228   : > { %8020 = vrot.lane.b32.xlu0 %v8016_v27, %s15729_s21  ;;  %11468 = vmatprep.subr.mxu0 %v13358_v49  ;;  %v8167_v27 = vmul.f32 %v8165_v52, %v13145_v48  ;;  %v6398_v34 = vand.u32 4294901760, %v6397_v43 }
 0x229   : > { %8056 = vrot.lane.b32.xlu1 %v8051_v15, %s11845_s23  ;;  %11457 = vmatmul.mubr.f32.vlgmr.msra.gmra.mxu0 %v13245_v10  ;;  %v6337_v15 = vand.u32 4294901760, %v6336_v2 }
 0x22a   : > { %11464 = vmatpush3.msra.mxu1 %v13234_v54  ;;  %11469 = vmatpush3.msra.mxu0 %v13358_v49  ;;  %v6346_v54 = vsub.f32 %v13433_v55, %v6345_v21 }
 0x22b   : > { %11465 = vmatprep.mubr.f32.mxu1 %v13236_v8  ;;  %11470 = vmatprep.subr.mxu0 %v13373_v62  ;;  %v8166_v8 = vmul.f32 %v8165_v52, %v13149_v58  ;;  %v13593_v52 = vand.u32 4294901760, %v13564_v12 }
 0x22c   : > { %8054 = vrot.lane.b32.xlu0 %v8050_v9, %s11845_s23  ;;  %11477 = vmatprep.subr.mxu1 %v6384_v39  ;;  %v6347_v9 = vand.u32 4294901760, %v6346_v54 }
 0x22d   : > { %8070 = vrot.lane.b32.xlu1 %v8065_v33, %s11846_s24  ;;  %11466 = vmatmul.mubr.f32.vlgmr.msra.gmra.mxu1 %v13245_v10  ;;  %v8180_v10 = vmul.f32 %v8179_v28, %v13149_v58  ;;  %v10266_v33 = vld [vmem:[%s15809_s4 + $0x58] sm:$0xf]  ;;  %v6923_v43 = vsub.f32 %v13564_v12, %v13593_v52 }
 0x22e   : > { %11471 = vmatpush3.msra.mxu0 %v13373_v62  ;;  %11478 = vmatpush3.msra.mxu1 %v6384_v39  ;;  %v6796_v57 = vsel %vm2521_vm3, %v10266_v33, 0 }
 0x22f   : > { %11472 = vmatprep.subr.mxu0 %v13393_v61  ;;  %11479 = vmatprep.subr.mxu1 %v6391_v4  ;;  %v13521_v31 = vand.u32 4294901760, %v6796_v57 }
 0x230   : > { %8068 = vrot.lane.b32.xlu0 %v8064_v44, %s11846_s24  ;;  %11473 = vmatpush3.msra.mxu0 %v13393_v61  ;;  %v6789_v44 = vrot.slane %v13116_v25, 3 }
 0x231   : > { %8084 = vrot.lane.b32.xlu1 %v8079_v29, %s11847_s26  ;;  %11480 = vmatpush3.msra.mxu1 %v6391_v4  ;;  %v8194_v29 = vmul.f32 %v8193_v35, %v13149_v58 }
 0x232   : > { %11474 = vmatprep.mubr.f32.mxu0 %v6337_v15  ;;  %11481 = vmatprep.subr.mxu1 %v6398_v34  ;;  %v6924_v15 = vand.u32 4294901760, %v6923_v43 }
 0x233   : > { %11486 = vmatprep.subr.mxu0 %v13385_v38  ;;  %11475 = vmatmul.mubr.f32.vlgmr.msra.gmra.mxu0 %v6347_v9 }
 0x234   : > { %8082 = vrot.lane.b32.xlu0 %v8078_v0, %s11847_s26  ;;  %11482 = vmatpush3.msra.mxu1 %v6398_v34  ;;  %v6788_v0 = vsel %vm1990_vm2, %v6786_v41, %v6787_v14  ;;  %v8355_v41 = vstv %s13643_s22 }
 0x235   : > { %8098 = vrot.lane.b32.xlu1 %v8093_v59, %s15721_s27  ;;  %11487 = vmatpush3.msra.mxu0 %v13385_v38  ;;  %v6790_v59 = vsel %vm1990_vm2, %v6787_v14, %v6789_v44  ;;  %v10264_v38 = vld [vmem:[%s15809_s4 + $0x48] sm:$0xff]  ;;  %v6791_v63 = vsel %vm389_vm8, %v6788_v0, 0  ;;  %v7319_v14 = vrot.slane %v13107_v32, 4  ;;  %v8357_v32 = vmul.f32 %v8355_v41, %v13145_v48 }
 0x236   : > { %11483 = vmatprep.mubr.f32.mxu1 %v13395_v19  ;;  %11488 = vmatprep.subr.mxu0 %v13401_v46 }
 0x237   : > { %11495 = vmatprep.subr.mxu1 %v13358_v49  ;;  %11484 = vmatmul.mubr.f32.vlgmr.msra.gmra.mxu1 %v13403_v16 }
 0x238   : > { %8096 = vrot.lane.b32.xlu0 %v8092_v47, %s15721_s27  ;;  %11489 = vmatpush3.msra.mxu0 %v13401_v46  ;;  %v8253_v47 = vstv %s13502_s29  ;;  %v6793_v46 = vsel %vm389_vm8, %v6790_v59, 0  ;;  %s13570_s29 = sld [smem:[#allocation3 + $0x1f]] }
 0x239   : > { %8112 = vrot.lane.b32.xlu1 %v8107_v51, %s15729_s21  ;;  %11496 = vmatpush3.msra.mxu1 %v13358_v49  ;;  %v13548_v51 = vsub.f32 %v6796_v57, %v13521_v31  ;;  %v13566_v5 = vand.u32 4294901760, %v6793_v46  ;;  %v7320_v57 = vrot.slane %v13109_v45, 4  ;;  %v8369_v45 = vstv %s13656_s28  ;;  %s13811_s28 = sld [smem:[#allocation3 + $0x2b]] }
 0x23a   : > { %11490 = vmatprep.subr.mxu0 %v13424_v24  ;;  %11497 = vmatprep.subr.mxu1 %v13373_v62 }
 0x23b   : > { %11491 = vmatpush3.msra.mxu0 %v13424_v24  ;;  %11498 = vmatpush3.msra.mxu1 %v13373_v62  ;;  %v13558_v24 = vand.u32 4294901760, %v6791_v63  ;;  %v13596_v39 = vsub.f32 %v6793_v46, %v13566_v5  ;;  %v7321_v0 = vsel %vm2521_vm3, %v7319_v14, %v7320_v57 }
 0x23c   : > { %8110 = vrot.lane.b32.xlu0 %v8106_v50, %s15729_s21  ;;  %11492 = vmatprep.mubr.f32.mxu0 %v13421_v6  ;;  %v13556_v50 = vand.u32 4294901760, %v10264_v38  ;;  %v7324_v46 = vsel %vm389_vm8, %v7321_v0, 0 }
 0x23d   : > { %8144 = vrot.lane.b32.xlu1 %v8139_v26, %s11845_s23  ;;  %11499 = vmatprep.subr.mxu1 %v13393_v61  ;;  %v8255_v26 = vmul.f32 %v8253_v47, %v13145_v48  ;;  %v13584_v7 = vsub.f32 %v6791_v63, %v13558_v24  ;;  %v8371_v63 = vmul.f32 %v8369_v45, %v13145_v48 }
 0x23e   : > { %11504 = vmatprep.subr.mxu0 %v13412_v22  ;;  %11493 = vmatmul.mubr.f32.vlgmr.msra.gmra.mxu0 %v13433_v55  ;;  %v13587_v6 = vsub.f32 %v10264_v38, %v13556_v50  ;;  %v8281_v55 = vstv %s13544_s14  ;;  %s15719_s14 = sshll.u32 %s13649_s25, 4 }
 0x23f   : > { %11500 = vmatpush3.msra.mxu1 %v13393_v61  ;;  %11505 = vmatpush3.msra.mxu0 %v13412_v22  ;;  %v8254_v22 = vmul.f32 %v8253_v47, %v13149_v58  ;;  %v8283_v2 = vmul.f32 %v8281_v55, %v13145_v48  ;;  %v8282_v4 = vmul.f32 %v8281_v55, %v13149_v58  ;;  %s13682_s22 = scalar_lea.vmem [#allocation9], %s15719_s14  ;;  %v13713_v47 = vand.u32 4294901760, %v10268_v60  ;;  %s13836_s14 = sld [smem:[#allocation3 + $0x2c]] }
 0x240   : > { %8142 = vrot.lane.b32.xlu0 %v8138_v56, %s11845_s23  ;;  %v8267_v56 = vstv %s13518_s16  ;;  %11501 = vmatprep.mubr.f32.mxu1 %v6335_v40  ;;  %s13600_s16 = sld [smem:[#allocation3 + $0x20]]  ;;  %s10093_s7 = sshll.u32 %s13682_s22, 4  ;;  %s15040_s7 = int_to_ptr.vmem [resolvable:$true] %s10093_s7 }
 0x241   : > { %8158 = vrot.lane.b32.xlu1 %v8153_v18, %s11846_s24  ;;  %v13575_v18 = vand.u32 4294901760, %v13548_v51  ;;  %11506 = vmatprep.subr.mxu0 %v13430_v11  ;;  %v8269_v40 = vmul.f32 %v8267_v56, %v13145_v48  ;;  %s11742_s10 = scalar_lea.vmem %s15040_s7, 256 }
 0x242   : > { %11513 = vmatprep.subr.mxu1 %v13358_v49  ;;  %11502 = vmatmul.mubr.f32.vlgmr.msra.gmra.mxu1 %v6345_v21  ;;  %p11743_p10 = scmp.ne.s32.totalorder %s15040_s7, %s11742_s10 }
 0x243   : > { %11507 = vmatpush3.msra.mxu0 %v13430_v11  ;;  %11514 = vmatpush3.msra.mxu1 %v13358_v49  ;;  %v6916_v21 = vsub.f32 %v13548_v51, %v13575_v18  ;;  %v8268_v49 = vmul.f32 %v8267_v56, %v13149_v58  ;;  %v6868_v11 = vand.u32 4294901760, %v13584_v7 }
 0x244   : > { %8156 = vrot.lane.b32.xlu0 %v8152_v13, %s11846_s24  ;;  %11508 = vmatprep.subr.mxu0 %v13449_v23  ;;  %v13612_v13 = vand.u32 4294901760, %v13587_v6  ;;  %p11744_p0 = pnand %p11743_p10, %p16005_p12 }
 0x245   : > { %8172 = vrot.lane.b32.xlu1 %v8167_v27, %s11847_s26  ;;  %11515 = vmatprep.subr.mxu1 %v13373_v62  ;;  %v6878_v27 = vand.u32 4294901760, %v13596_v39  ;;  %v6869_v54 = vsub.f32 %v13584_v7, %v6868_v11 }
 0x246   : > { %11509 = vmatpush3.msra.mxu0 %v13449_v23  ;;  %11516 = vmatpush3.msra.mxu1 %v13373_v62  ;;  %v8313_v23 = vstv %s13570_s29  ;;  %v6917_v62 = vand.u32 4294901760, %v6916_v21  ;;  %v6930_v28 = vsub.f32 %v13587_v6, %v13612_v13  ;;  %v8327_v34 = vstv %s13600_s16  ;;  %s13691_s29 = sld [smem:[#allocation3 + $0x26]]  ;;  %p11745_p7 = pneg %p11744_p0 }
 0x247   : > { %11510 = vmatprep.mubr.f32.mxu0 %v13395_v19  ;;  %11517 = vmatprep.subr.mxu1 %v13393_v61  ;;  %v8329_v35 = vmul.f32 %v8327_v34, %v13145_v48  ;;  %v8328_v33 = vmul.f32 %v8327_v34, %v13149_v58  ;;  %s13721_s16 = sld [smem:[#allocation3 + $0x27]] }
 0x248   : > { %8170 = vrot.lane.b32.xlu0 %v8166_v8, %s11847_s26  ;;  %11522 = vmatprep.subr.mxu0 %v13521_v31  ;;  %v8315_v8 = vmul.f32 %v8313_v23, %v13145_v48  ;;  %v6931_v9 = vand.u32 4294901760, %v6930_v28 }
 0x249   : > { %8186 = vrot.lane.b32.xlu1 %v8181_v3, %s15721_s27  ;;  %11511 = vmatmul.mubr.f32.vlgmr.msra.gmra.mxu0 %v13403_v16  ;;  %v6870_v3 = vand.u32 4294901760, %v6869_v54 }
 0x24a   : > { %11518 = vmatpush3.msra.mxu1 %v13393_v61  ;;  %11523 = vmatpush3.msra.mxu0 %v13521_v31  ;;  %v6879_v61 = vsub.f32 %v13596_v39, %v6878_v27 }
 0x24b   : > { %11519 = vmatprep.mubr.f32.mxu1 %v13395_v19  ;;  %11524 = vmatprep.subr.mxu0 %v13536_v37  ;;  %v8314_v19 = vmul.f32 %v8313_v23, %v13149_v58 }
 0x24c   : > { %8184 = vrot.lane.b32.xlu0 %v8180_v10, %s15721_s27  ;;  %11531 = vmatprep.subr.mxu1 %v6917_v62  ;;  %v6880_v10 = vand.u32 4294901760, %v6879_v61  ;;  %v8411_v43 = vstv %s13691_s29  ;;  %s13785_s29 = sld [smem:[#allocation3 + $0x29]] }
 0x24d   : > { %8200 = vrot.lane.b32.xlu1 %v8195_v42, %s15729_s21  ;;  %11520 = vmatmul.mubr.f32.vlgmr.msra.gmra.mxu1 %v13403_v16  ;;  %v8341_v16 = vstv %s13622_s17  ;;  %v10269_v42 = vld [vmem:[%s15809_s4 + $0x70] sm:$0xf]  ;;  %s13669_s17 = sld [smem:[#allocation3 + $0x25]]  ;;  %v8413_v54 = vmul.f32 %v8411_v43, %v13145_v48 }
 0x24e   : > { %11525 = vmatpush3.msra.mxu0 %v13536_v37  ;;  %11532 = vmatpush3.msra.mxu1 %v6917_v62  ;;  %v8343_v17 = vmul.f32 %v8341_v16, %v13145_v48  ;;  %v7329_v44 = vsel %vm2521_vm3, %v10269_v42, 0  ;;  %v8342_v53 = vmul.f32 %v8341_v16, %v13149_v58 }
 0x24f   : > { %11526 = vmatprep.subr.mxu0 %v13556_v50  ;;  %11533 = vmatprep.subr.mxu1 %v6924_v15 }
 0x250   : > { %8198 = vrot.lane.b32.xlu0 %v8194_v29, %s15729_s21  ;;  %11527 = vmatpush3.msra.mxu0 %v13556_v50  ;;  %v7322_v29 = vrot.slane %v13116_v25, 4  ;;  %v13694_v25 = vand.u32 4294901760, %v7329_v44 }
 0x251   : > { %8232 = vrot.lane.b32.xlu1 %v8227_v36, %s11845_s23  ;;  %11534 = vmatpush3.msra.mxu1 %v6924_v15 }
 0x252   : > { %11528 = vmatprep.mubr.f32.mxu0 %v6870_v3  ;;  %11535 = vmatprep.subr.mxu1 %v6931_v9  ;;  %v7323_v59 = vsel %vm2521_vm3, %v7320_v57, %v7322_v29  ;;  %v8453_v14 = vstv %s13785_s29  ;;  %s13879_s29 = sld [smem:[#allocation3 + $0x2f]] }
 0x253   : > { %11540 = vmatprep.subr.mxu0 %v13548_v51  ;;  %11529 = vmatmul.mubr.f32.vlgmr.msra.gmra.mxu0 %v6880_v10 }
 0x254   : > { %8230 = vrot.lane.b32.xlu0 %v8226_v30, %s11845_s23  ;;  %11536 = vmatpush3.msra.mxu1 %v6931_v9 }
 0x255   : > { %8246 = vrot.lane.b32.xlu1 %v8241_v1, %s11846_s24  ;;  %11541 = vmatpush3.msra.mxu0 %v13548_v51  ;;  %v8356_v1 = vmul.f32 %v8355_v41, %v13149_v58  ;;  %v10267_v51 = vld [vmem:[%s15809_s4 + $0x60] sm:$0xff]  ;;  %s15998_s4 = smov 48  }
 0x256   : > { %11537 = vmatprep.mubr.f32.mxu1 %v13558_v24  ;;  %11542 = vmatprep.subr.mxu0 %v13564_v12 }
 0x257   : > { %11549 = vmatprep.subr.mxu1 %v13521_v31  ;;  %11538 = vmatmul.mubr.f32.vlgmr.msra.gmra.mxu1 %v13566_v5 }
 0x258   : > { %8244 = vrot.lane.b32.xlu0 %v8240_v20, %s11846_s24  ;;  %11543 = vmatpush3.msra.mxu0 %v13564_v12  ;;  %v8397_v20 = vstv %s13669_s17  ;;  %v7326_v12 = vsel %vm389_vm8, %v7323_v59, 0  ;;  %s13751_s17 = sld [smem:[#allocation3 + $0x28]] }
 0x259   : > { %8260 = vrot.lane.b32.xlu1 %v8255_v26, %s11847_s26  ;;  %11550 = vmatpush3.msra.mxu1 %v13521_v31  ;;  %v13725_v26 = vsub.f32 %v7329_v44, %v13694_v25  ;;  %v8399_v21 = vmul.f32 %v8397_v20, %v13145_v48  ;;  %v8398_v62 = vmul.f32 %v8397_v20, %v13149_v58 }
 0x25a   : > { %11544 = vmatprep.subr.mxu0 %v13587_v6  ;;  %11551 = vmatprep.subr.mxu1 %v13536_v37 }
 0x25b   : > { %11545 = vmatpush3.msra.mxu0 %v13587_v6  ;;  %11552 = vmatpush3.msra.mxu1 %v13536_v37  ;;  %v13735_v6 = vand.u32 4294901760, %v10267_v51  ;;  %v13756_v23 = vand.u32 4294901760, %v13725_v26 }
 0x25c   : > { %8258 = vrot.lane.b32.xlu0 %v8254_v22, %s11847_s26  ;;  %11546 = vmatprep.mubr.f32.mxu0 %v13584_v7  ;;  %v8370_v22 = vmul.f32 %v8369_v45, %v13149_v58 }
 0x25d   : > { %8274 = vrot.lane.b32.xlu1 %v8269_v40, %s15721_s27  ;;  %11553 = vmatprep.subr.mxu1 %v13556_v50  ;;  %v13737_v40 = vand.u32 4294901760, %v7324_v46 }
 0x25e   : > { %11558 = vmatprep.subr.mxu0 %v13575_v18  ;;  %11547 = vmatmul.mubr.f32.vlgmr.msra.gmra.mxu0 %v13596_v39 }
 0x25f   : > { %11554 = vmatpush3.msra.mxu1 %v13556_v50  ;;  %11559 = vmatpush3.msra.mxu0 %v13575_v18  ;;  %v13767_v7 = vsub.f32 %v7324_v46, %v13737_v40 }
 0x260   : > { %8272 = vrot.lane.b32.xlu0 %v8268_v49, %s15721_s27  ;;  %v13745_v49 = vsub.f32 %v10268_v60, %v13713_v47  ;;  %11555 = vmatprep.mubr.f32.mxu1 %v6868_v11  ;;  %v13770_v11 = vsub.f32 %v10267_v51, %v13735_v6  ;;  %v8454_v60 = vmul.f32 %v8453_v14, %v13149_v58 }
 0x261   : > { %8288 = vrot.lane.b32.xlu1 %v8283_v2, %s15729_s21  ;;  %v13747_v2 = vand.u32 4294901760, %v7326_v12  ;;  %11560 = vmatprep.subr.mxu0 %v13593_v52  ;;  %v7401_v15 = vand.u32 4294901760, %v13767_v7 }
 0x262   : > { %11567 = vmatprep.subr.mxu1 %v13521_v31  ;;  %11556 = vmatmul.mubr.f32.vlgmr.msra.gmra.mxu1 %v6878_v27  ;;  %v13778_v28 = vand.u32 4294901760, %v13745_v49  ;;  %v8425_v27 = vstv %s13721_s16  ;;  %v13799_v61 = vand.u32 4294901760, %v13770_v11  ;;  %s13850_s16 = sld [smem:[#allocation3 + $0x2d]] }
 0x263   : > { %11561 = vmatpush3.msra.mxu0 %v13593_v52  ;;  %11568 = vmatpush3.msra.mxu1 %v13521_v31  ;;  %v13781_v39 = vsub.f32 %v7326_v12, %v13747_v2  ;;  %v8412_v52 = vmul.f32 %v8411_v43, %v13149_v58  ;;  %v8426_v10 = vmul.f32 %v8425_v27, %v13149_v58 }
 0x264   : > { %8286 = vrot.lane.b32.xlu0 %v8282_v4, %s15729_s21  ;;  %11562 = vmatprep.subr.mxu0 %v13612_v13  ;;  %v7456_v3 = vsub.f32 %v13745_v49, %v13778_v28  ;;  %v7402_v16 = vsub.f32 %v13767_v7, %v7401_v15 }
 0x265   : > { %8320 = vrot.lane.b32.xlu1 %v8315_v8, %s11845_s23  ;;  %v7449_v8 = vsub.f32 %v13725_v26, %v13756_v23  ;;  %11569 = vmatprep.subr.mxu1 %v13536_v37 }
 0x266   : > { %11563 = vmatpush3.msra.mxu0 %v13612_v13  ;;  %11570 = vmatpush3.msra.mxu1 %v13536_v37  ;;  %v7411_v13 = vand.u32 4294901760, %v13781_v39  ;;  %v8439_v37 = vstv %s13751_s17  ;;  %v7457_v41 = vand.u32 4294901760, %v7456_v3  ;;  %v7403_v44 = vand.u32 4294901760, %v7402_v16  ;;  %s13863_s17 = sld [smem:[#allocation3 + $0x2e]] }
 0x267   : > { %11564 = vmatprep.mubr.f32.mxu0 %v13558_v24  ;;  %11571 = vmatprep.subr.mxu1 %v13556_v50  ;;  %v7450_v9 = vand.u32 4294901760, %v7449_v8 }
 0x268   : > { %8318 = vrot.lane.b32.xlu0 %v8314_v19, %s11845_s23  ;;  %v8427_v19 = vmul.f32 %v8425_v27, %v13145_v48  ;;  %11576 = vmatprep.subr.mxu0 %v13694_v25  ;;  %v8515_v20 = vstv %s13850_s16  ;;  %v8543_v27 = vstv %s13879_s29  ;;  %s13932_s16 = sld [smem:[#allocation3 + $0x33]] }
 0x269   : > { %8334 = vrot.lane.b32.xlu1 %v8329_v35, %s11846_s24  ;;  %11565 = vmatmul.mubr.f32.vlgmr.msra.gmra.mxu0 %v13566_v5  ;;  %s10331_s29 = sld [smem:[#allocation3 + $0x35]] }
 0x26a   : > { %11572 = vmatpush3.msra.mxu1 %v13556_v50  ;;  %11577 = vmatpush3.msra.mxu0 %v13694_v25  ;;  %v7412_v50 = vsub.f32 %v13781_v39, %v7411_v13 }
 0x26b   : > { %11573 = vmatprep.mubr.f32.mxu1 %v13558_v24  ;;  %11578 = vmatprep.subr.mxu0 %v13713_v47  ;;  %v8440_v24 = vmul.f32 %v8439_v37, %v13149_v58 }
 0x26c   : > { %8332 = vrot.lane.b32.xlu0 %v8328_v33, %s11846_s24  ;;  %v7463_v33 = vsub.f32 %v13770_v11, %v13799_v61  ;;  %11585 = vmatprep.subr.mxu1 %v7450_v9 }
 0x26d   : > { %8348 = vrot.lane.b32.xlu1 %v8343_v17, %s11847_s26  ;;  %v8441_v17 = vmul.f32 %v8439_v37, %v13145_v48  ;;  %11574 = vmatmul.mubr.f32.vlgmr.msra.gmra.mxu1 %v13566_v5  ;;  %v8487_v5 = vstv %s13811_s28  ;;  %s13896_s28 = sld [smem:[#allocation3 + $0x31]] }
 0x26e   : > { %v5178_v36 = vpop.permute.xlu0 %5177  ;;  %11579 = vmatpush3.msra.mxu0 %v13713_v47  ;;  %11586 = vmatpush3.msra.mxu1 %v7450_v9  ;;  %v7464_v29 = vand.u32 4294901760, %v7463_v33  ;;  %v8489_v59 = vmul.f32 %v8487_v5, %v13145_v48  ;;  %v8603_v9 = vstv %s13932_s16  ;;  %s10336_s16 = sld [smem:[#allocation3 + $0x39]] }
 0x26f   : > { %5183 = vst.msk [vmem:[%s13682_s22 + $0x8] sm:$0xff] %vm5181_vm11, %v5178_v36  ;;  %11580 = vmatprep.subr.mxu0 %v13735_v6  ;;  %11587 = vmatprep.subr.mxu1 %v7457_v41 }
 0x270   : > { %8346 = vrot.lane.b32.xlu0 %v8342_v53, %s11847_s26  ;;  %v8455_v53 = vmul.f32 %v8453_v14, %v13145_v48  ;;  %11581 = vmatpush3.msra.mxu0 %v13735_v6  ;;  %v8631_v14 = vstv %s10331_s29  ;;  %s10338_s29 = sld [smem:[#allocation3 + $0x3b]] }
 0x271   : > { %8362 = vrot.lane.b32.xlu1 %v8357_v32, %s15721_s27  ;;  %v7413_v32 = vand.u32 4294901760, %v7412_v50  ;;  %11588 = vmatpush3.msra.mxu1 %v7457_v41 }
 0x272   : > { %v5176_v30 = vpop.permute.xlu0 %5175  ;;  %11582 = vmatprep.mubr.f32.mxu0 %v7403_v44  ;;  %11589 = vmatprep.subr.mxu1 %v7464_v29 }
 0x273   : > { %5182 = vst.msk [vmem:[%s13682_s22] sm:$0xff] %vm5181_vm11, %v5176_v30  ;;  %v13708_v38 = vpop.permute.xlu1 %7884  ;;  %11594 = vmatprep.subr.mxu0 %v13725_v26  ;;  %11583 = vmatmul.mubr.f32.vlgmr.msra.gmra.mxu0 %v7413_v32  ;;  %v8501_v30 = vstv %s13836_s14  ;;  %s13913_s14 = sld [smem:[#allocation3 + $0x32]] }
 0x274   : > { %15813 = vst [vmem:[#allocation25_spill] sm:$0xff] %v13708_v38  ;;  %8360 = vrot.lane.b32.xlu0 %v8356_v1, %s15721_s27  ;;  %11590 = vmatpush3.msra.mxu1 %v7464_v29  ;;  %v8503_v46 = vmul.f32 %v8501_v30, %v13145_v48  ;;  %v8502_v12 = vmul.f32 %v8501_v30, %v13149_v58  ;;  %s15043_s22 = sld [smem:[#allocation3 + $0x2a]] }
 0x275   : > { %8376 = vrot.lane.b32.xlu1 %v8371_v63, %s15729_s21  ;;  %11595 = vmatpush3.msra.mxu0 %v13725_v26  ;;  %v8488_v63 = vmul.f32 %v8487_v5, %v13149_v58 }
 0x276   : > { %v13730_v56 = vpop.permute.xlu0 %7882  ;;  %11591 = vmatprep.mubr.f32.mxu1 %v13737_v40  ;;  %11596 = vmatprep.subr.mxu0 %v13745_v49 }
 0x277   : > { %v13739_v55 = vpop.permute.xlu1 %7898  ;;  %11603 = vmatprep.subr.mxu1 %v13694_v25  ;;  %11592 = vmatmul.mubr.f32.vlgmr.msra.gmra.mxu1 %v13747_v2 }
 0x278   : > { %15814 = vst [vmem:[#allocation31_spill] sm:$0xff] %v13739_v55  ;;  %8374 = vrot.lane.b32.xlu0 %v8370_v22, %s15729_s21  ;;  %11597 = vmatpush3.msra.mxu0 %v13745_v49  ;;  %v8529_v49 = vstv %s13863_s17  ;;  %s13949_s17 = sld [smem:[#allocation3 + $0x34]] }
 0x279   : > { %8404 = vrot.lane.b32.xlu1 %v8399_v21, %s11845_s23  ;;  %11604 = vmatpush3.msra.mxu1 %v13694_v25  ;;  %v8517_v21 = vmul.f32 %v8515_v20, %v13145_v48  ;;  %v8589_v3 = vstv %s13913_s14  ;;  %s10335_s14 = sld [smem:[#allocation3 + $0x38]] }
 0x27a   : > { %v13760_v18 = vpop.permute.xlu0 %7896  ;;  %11598 = vmatprep.subr.mxu0 %v13770_v11  ;;  %11605 = vmatprep.subr.mxu1 %v13713_v47  ;;  %v8591_v37 = vmul.f32 %v8589_v3, %v13145_v48  ;;  %16003 = sst [smem:[#allocation206_spill]] %s15043_s22  ;;  %s11856_s22 = smov [#allocation9]  }
 0x27b   : > { %v13772_v4 = vpop.permute.xlu1 %7912  ;;  %11599 = vmatpush3.msra.mxu0 %v13770_v11  ;;  %11606 = vmatpush3.msra.mxu1 %v13713_v47  ;;  %s11746_s11 = sshll.u32 %s11856_s22, 4  ;;  %s11747_s11 = int_to_ptr.vmem [resolvable:$false] %s11746_s11 }
 0x27c   : > { %15815 = vst [vmem:[#allocation23_spill] sm:$0xff] %v13772_v4  ;;  %8402 = vrot.lane.b32.xlu0 %v8398_v62, %s11845_s23  ;;  %11600 = vmatprep.mubr.f32.mxu0 %v13767_v7  ;;  %v8516_v62 = vmul.f32 %v8515_v20, %v13149_v58  ;;  %v8575_v7 = vstv %s13896_s28  ;;  %s10334_s28 = sld [smem:[#allocation3 + $0x37]]  ;;  %p11749_p8 = scmp.lt.s32.totalorder %s15040_s7, %s11747_s11 }
 0x27d   : > { %8418 = vrot.lane.b32.xlu1 %v8413_v54, %s11846_s24  ;;  %11607 = vmatprep.subr.mxu1 %v13735_v6  ;;  %v8531_v54 = vmul.f32 %v8529_v49, %v13145_v48 }
 0x27e   : > { %v13792_v31 = vpop.permute.xlu0 %7910  ;;  %11612 = vmatprep.subr.mxu0 %v13756_v23  ;;  %11601 = vmatmul.mubr.f32.vlgmr.msra.gmra.mxu0 %v13781_v39  ;;  %v8617_v33 = vstv %s13949_s17  ;;  %s10337_s17 = sld [smem:[#allocation3 + $0x3a]] }
 0x27f   : > { %v13801_v34 = vpop.permute.xlu1 %7926  ;;  %11608 = vmatpush3.msra.mxu1 %v13735_v6  ;;  %11613 = vmatpush3.msra.mxu0 %v13756_v23  ;;  %v8619_v50 = vmul.f32 %v8617_v33, %v13145_v48  ;;  %v8618_v44 = vmul.f32 %v8617_v33, %v13149_v58 }
 0x280   : > { %15816 = vst [vmem:[#allocation26_spill] sm:$0xff] %v13801_v34  ;;  %8416 = vrot.lane.b32.xlu0 %v8412_v52, %s11846_s24  ;;  %11609 = vmatprep.mubr.f32.mxu1 %v7401_v15  ;;  %v8530_v52 = vmul.f32 %v8529_v49, %v13149_v58  ;;  %v8544_v15 = vmul.f32 %v8543_v27, %v13149_v58  ;;  %v8691_v49 = vstv %s10336_s16  ;;  %s10343_s16 = sld [smem:[#allocation3 + $0x3f]] }
 0x281   : > { %8432 = vrot.lane.b32.xlu1 %v8427_v19, %s11847_s26  ;;  %11614 = vmatprep.subr.mxu0 %v13778_v28  ;;  %v8545_v19 = vmul.f32 %v8543_v27, %v13145_v48 }
 0x282   : > { %v13816_v35 = vpop.permute.xlu0 %7924  ;;  %11621 = vmatprep.subr.mxu1 %v13694_v25  ;;  %11610 = vmatmul.mubr.f32.vlgmr.msra.gmra.mxu1 %v7411_v13  ;;  %v8576_v13 = vmul.f32 %v8575_v7, %v13149_v58  ;;  %v8663_v32 = vstv %s10334_s28  ;;  %s10341_s28 = sld [smem:[#allocation3 + $0x3d]] }
 0x283   : > { %v13826_v42 = vpop.permute.xlu1 %7940  ;;  %11615 = vmatpush3.msra.mxu0 %v13778_v28  ;;  %11622 = vmatpush3.msra.mxu1 %v13694_v25  ;;  %v8577_v28 = vmul.f32 %v8575_v7, %v13145_v48  ;;  %v8665_v30 = vmul.f32 %v8663_v32, %v13145_v48  ;;  %v8664_v20 = vmul.f32 %v8663_v32, %v13149_v58 }
 0x284   : > { %15817 = vst [vmem:[#allocation29_spill] sm:$0xff] %v13826_v42  ;;  %8430 = vrot.lane.b32.xlu0 %v8426_v10, %s11847_s26  ;;  %11616 = vmatprep.subr.mxu0 %v13799_v61  ;;  %v8590_v10 = vmul.f32 %v8589_v3, %v13149_v58  ;;  %v8692_v7 = vmul.f32 %v8691_v49, %v13149_v58 }
 0x285   : > { %8446 = vrot.lane.b32.xlu1 %v8441_v17, %s15721_s27  ;;  %11623 = vmatprep.subr.mxu1 %v13713_v47  ;;  %v8604_v17 = vmul.f32 %v8603_v9, %v13149_v58 }
 0x286   : > { %v13840_v57 = vpop.permute.xlu0 %7938  ;;  %11617 = vmatpush3.msra.mxu0 %v13799_v61  ;;  %11618 = vmatprep.mubr.f32.mxu0 %v13737_v40 }
 0x287   : > { %15818 = vst [vmem:[#allocation34_spill] sm:$0xff] %v13840_v57  ;;  %v13844_v36 = vpop.permute.xlu1 %7966  ;;  %11624 = vmatpush3.msra.mxu1 %v13713_v47  ;;  %11619 = vmatmul.mubr.f32.vlgmr.msra.gmra.mxu0 %v13747_v2 }
 0x288   : > { %15819 = vst [vmem:[#allocation24_spill] sm:$0xff] %v13844_v36  ;;  %8444 = vrot.lane.b32.xlu0 %v8440_v24, %s15721_s27  ;;  %11625 = vmatprep.subr.mxu1 %v13735_v6  ;;  %v8751_v33 = vstv %s10341_s28  ;;  %s10348_s28 = sld [smem:[#allocation3 + $0x43]] }
 0x289   : > { %8460 = vrot.lane.b32.xlu1 %v8455_v53, %s15729_s21  ;;  %11626 = vmatpush3.msra.mxu1 %v13735_v6  ;;  %v8633_v53 = vmul.f32 %v8631_v14, %v13145_v48 }
 0x28a   : > { %v13854_v45 = vpop.permute.xlu0 %7964  ;;  %11627 = vmatprep.mubr.f32.mxu1 %v13737_v40  ;;  %v8605_v40 = vmul.f32 %v8603_v9, %v13145_v48 }
 0x28b   : > { %v13857_v0 = vpop.permute.xlu1 %7980  ;;  %11628 = vmatmul.mubr.f32.vlgmr.msra.gmra.mxu1 %v13747_v2 }
 0x28c   : > { %15820 = vst [vmem:[#allocation27_spill] sm:$0xff] %v13857_v0  ;;  %8458 = vrot.lane.b32.xlu0 %v8454_v60, %s15729_s21  ;;  %v8632_v60 = vmul.f32 %v8631_v14, %v13149_v58 }
 0x28d   : > { %8494 = vrot.lane.b32.xlu1 %v8489_v59, %s11845_s23 }
 0x28e   : > { %v13867_v1 = vpop.permute.xlu0 %7978 }
 0x28f   : > { %v13872_v51 = vpop.permute.xlu1 %7994 }
 0x290   : > { %15821 = vst [vmem:[#allocation28_spill] sm:$0xff] %v13872_v51  ;;  %8492 = vrot.lane.b32.xlu0 %v8488_v63, %s11845_s23  ;;  %v8677_v63 = vstv %s10335_s14  ;;  %s10342_s14 = sld [smem:[#allocation3 + $0x3e]] }
 0x291   : > { %8508 = vrot.lane.b32.xlu1 %v8503_v46, %s11846_s24 }
 0x292   : > { %v13884_v26 = vpop.permute.xlu0 %7992 }
 0x293   : > { %v13889_v22 = vpop.permute.xlu1 %8008 }
 0x294   : > { %15822 = vst [vmem:[#allocation33_spill] sm:$0xff] %v13889_v22  ;;  %8506 = vrot.lane.b32.xlu0 %v8502_v12, %s11846_s24 }
 0x295   : > { %8522 = vrot.lane.b32.xlu1 %v8517_v21, %s11847_s26  ;;  %v8679_v21 = vmul.f32 %v8677_v63, %v13145_v48 }
 0x296   : > { %v13901_v43 = vpop.permute.xlu0 %8006 }
 0x297   : > { %v13906_v11 = vpop.permute.xlu1 %8022 }
 0x298   : > { %15823 = vst [vmem:[#allocation35_spill] sm:$0xff] %v13906_v11  ;;  %8520 = vrot.lane.b32.xlu0 %v8516_v62, %s11847_s26 }
 0x299   : > { %8536 = vrot.lane.b32.xlu1 %v8531_v54, %s15721_s27  ;;  %v8678_v54 = vmul.f32 %v8677_v63, %v13149_v58 }
 0x29a   : > { %v13919_v8 = vpop.permute.xlu0 %8020 }
 0x29b   : > { %15824 = vst [vmem:[#allocation37_spill] sm:$0xff] %v13919_v8  ;;  %v13925_v23 = vpop.permute.xlu1 %8056 }
 0x29c   : > { %15825 = vst [vmem:[#allocation30_spill] sm:$0xff] %v13925_v23  ;;  %8534 = vrot.lane.b32.xlu0 %v8530_v52, %s15721_s27  ;;  %v8693_v52 = vmul.f32 %v8691_v49, %v13145_v48 }
 0x29d   : > { %8550 = vrot.lane.b32.xlu1 %v8545_v19, %s15729_s21  ;;  %v8705_v19 = vstv %s10337_s17  ;;  %s10344_s17 = sld [smem:[#allocation3 + $0x40]] }
 0x29e   : > { %v13937_v39 = vpop.permute.xlu0 %8054  ;;  %v8707_v3 = vmul.f32 %v8705_v19, %v13145_v48 }
 0x29f   : > { %v13942_v25 = vpop.permute.xlu1 %8070 }
 0x2a0   : > { %15826 = vst [vmem:[#allocation39_spill] sm:$0xff] %v13942_v25  ;;  %8548 = vrot.lane.b32.xlu0 %v8544_v15, %s15729_s21 }
 0x2a1   : > { %8582 = vrot.lane.b32.xlu1 %v8577_v28, %s11845_s23 }
 0x2a2   : > { %v13954_v61 = vpop.permute.xlu0 %8068 }
 0x2a3   : > { %v13958_v47 = vpop.permute.xlu1 %8084 }
 0x2a4   : > { %15827 = vst [vmem:[#allocation32_spill] sm:$0xff] %v13958_v47  ;;  %8580 = vrot.lane.b32.xlu0 %v8576_v13, %s11845_s23  ;;  %v8719_v13 = vstv %s10338_s29  ;;  %s10345_s29 = sld [smem:[#allocation3 + $0x41]] }
 0x2a5   : > { %8596 = vrot.lane.b32.xlu1 %v8591_v37, %s11846_s24  ;;  %v8706_v37 = vmul.f32 %v8705_v19, %v13149_v58  ;;  %v8793_v19 = vstv %s10344_s17  ;;  %s10351_s17 = sld [smem:[#allocation3 + $0x46]] }
 0x2a6   : > { %v13965_v6 = vpop.permute.xlu0 %8082 }
 0x2a7   : > { %v13968_v16 = vpop.permute.xlu1 %8098 }
 0x2a8   : > { %15828 = vst [vmem:[#allocation36_spill] sm:$0xff] %v13968_v16  ;;  %8594 = vrot.lane.b32.xlu0 %v8590_v10, %s11846_s24 }
 0x2a9   : > { %8610 = vrot.lane.b32.xlu1 %v8605_v40, %s11847_s26  ;;  %v8721_v40 = vmul.f32 %v8719_v13, %v13145_v48 }
 0x2aa   : > { %v13974_v2 = vpop.permute.xlu0 %8096 }
 0x2ab   : > { %15829 = vst [vmem:[#allocation38_spill] sm:$0xff] %v13974_v2  ;;  %v13977_v41 = vpop.permute.xlu1 %8112 }
 0x2ac   : > { %15830 = vst [vmem:[#allocation40_spill] sm:$0xff] %v13977_v41  ;;  %8608 = vrot.lane.b32.xlu0 %v8604_v17, %s11847_s26 }
 0x2ad   : > { %8624 = vrot.lane.b32.xlu1 %v8619_v50, %s15721_s27  ;;  %v8720_v50 = vmul.f32 %v8719_v13, %v13149_v58 }
 0x2ae   : > { %v13982_v24 = vpop.permute.xlu0 %8110 }
 0x2af   : > { %15831 = vst [vmem:[#allocation41_spill] sm:$0xff] %v13982_v24  ;;  %v13985_v29 = vpop.permute.xlu1 %8144 }
 0x2b0   : > { %15832 = vst [vmem:[#allocation42_spill] sm:$0xff] %v13985_v29  ;;  %8622 = vrot.lane.b32.xlu0 %v8618_v44, %s15721_s27  ;;  %v8753_v44 = vmul.f32 %v8751_v33, %v13145_v48 }
 0x2b1   : > { %8638 = vrot.lane.b32.xlu1 %v8633_v53, %s15729_s21  ;;  %v8765_v53 = vstv %s10342_s14  ;;  %s10349_s14 = sld [smem:[#allocation3 + $0x44]] }
 0x2b2   : > { %v13990_v5 = vpop.permute.xlu0 %8142  ;;  %v8767_v63 = vmul.f32 %v8765_v53, %v13145_v48  ;;  %v8766_v49 = vmul.f32 %v8765_v53, %v13149_v58 }
 0x2b3   : > { %v13993_v59 = vpop.permute.xlu1 %8158 }
 0x2b4   : > { %15833 = vst [vmem:[#allocation43_spill] sm:$0xff] %v13993_v59  ;;  %8636 = vrot.lane.b32.xlu0 %v8632_v60, %s15729_s21  ;;  %v8752_v60 = vmul.f32 %v8751_v33, %v13149_v58 }
 0x2b5   : > { %8670 = vrot.lane.b32.xlu1 %v8665_v30, %s11845_s23 }
 0x2b6   : > { %v13998_v46 = vpop.permute.xlu0 %8156 }
 0x2b7   : > { %v14001_v12 = vpop.permute.xlu1 %8172 }
 0x2b8   : > { %15834 = vst [vmem:[#allocation44_spill] sm:$0xff] %v14001_v12  ;;  %8668 = vrot.lane.b32.xlu0 %v8664_v20, %s11845_s23  ;;  %v8779_v20 = vstv %s10343_s16  ;;  %s10350_s16 = sld [smem:[#allocation3 + $0x45]] }
 0x2b9   : > { %8684 = vrot.lane.b32.xlu1 %v8679_v21, %s11846_s24 }
 0x2ba   : > { %v14006_v62 = vpop.permute.xlu0 %8170 }
 0x2bb   : > { %v14009_v27 = vpop.permute.xlu1 %8186 }
 0x2bc   : > { %15835 = vst [vmem:[#allocation45_spill] sm:$0xff] %v14009_v27  ;;  %8682 = vrot.lane.b32.xlu0 %v8678_v54, %s11846_s24 }
 0x2bd   : > { %8698 = vrot.lane.b32.xlu1 %v8693_v52, %s11847_s26  ;;  %v8781_v52 = vmul.f32 %v8779_v20, %v13145_v48 }
 0x2be   : > { %v14015_v15 = vpop.permute.xlu0 %8184 }
 0x2bf   : > { %15836 = vst [vmem:[#allocation46_spill] sm:$0xff] %v14015_v15  ;;  %v14017_v28 = vpop.permute.xlu1 %8200 }
 0x2c0   : > { %15837 = vst [vmem:[#allocation47_spill] sm:$0xff] %v14017_v28  ;;  %8696 = vrot.lane.b32.xlu0 %v8692_v7, %s11847_s26 }
 0x2c1   : > { %8712 = vrot.lane.b32.xlu1 %v8707_v3, %s15721_s27  ;;  %v8780_v3 = vmul.f32 %v8779_v20, %v13149_v58 }
 0x2c2   : > { %v14023_v9 = vpop.permute.xlu0 %8198 }
 0x2c3   : > { %15838 = vst [vmem:[#allocation48_spill] sm:$0xff] %v14023_v9  ;;  %v14025_v10 = vpop.permute.xlu1 %8232 }
 0x2c4   : > { %15839 = vst [vmem:[#allocation49_spill] sm:$0xff] %v14025_v10  ;;  %8710 = vrot.lane.b32.xlu0 %v8706_v37, %s15721_s27  ;;  %v8795_v37 = vmul.f32 %v8793_v19, %v13145_v48 }
 0x2c5   : > { %8726 = vrot.lane.b32.xlu1 %v8721_v40, %s15729_s21  ;;  %v8807_v40 = vstv %s10345_s29  ;;  %s10352_s29 = sld [smem:[#allocation3 + $0x47]] }
 0x2c6   : > { %v14030_v17 = vpop.permute.xlu0 %8230  ;;  %v8809_v53 = vmul.f32 %v8807_v40, %v13145_v48  ;;  %v8808_v20 = vmul.f32 %v8807_v40, %v13149_v58  ;;  %v8863_v40 = vstv %s10350_s16  ;;  %s10357_s16 = sld [smem:[#allocation3 + $0x4b]] }
 0x2c7   : > { %15840 = vst [vmem:[#allocation50_spill] sm:$0xff] %v14030_v17  ;;  %v14033_v14 = vpop.permute.xlu1 %8246 }
 0x2c8   : > { %15841 = vst [vmem:[#allocation51_spill] sm:$0xff] %v14033_v14  ;;  %8724 = vrot.lane.b32.xlu0 %v8720_v50, %s15729_s21  ;;  %v8794_v50 = vmul.f32 %v8793_v19, %v13149_v58  ;;  %v8849_v19 = vstv %s10349_s14  ;;  %s10356_s14 = sld [smem:[#allocation3 + $0x4a]] }
 0x2c9   : > { %8758 = vrot.lane.b32.xlu1 %v8753_v44, %s11845_s23 }
 0x2ca   : > { %v14038_v32 = vpop.permute.xlu0 %8244 }
 0x2cb   : > { %15842 = vst [vmem:[#allocation52_spill] sm:$0xff] %v14038_v32  ;;  %v14041_v30 = vpop.permute.xlu1 %8260 }
 0x2cc   : > { %15843 = vst [vmem:[#allocation53_spill] sm:$0xff] %v14041_v30  ;;  %8756 = vrot.lane.b32.xlu0 %v8752_v60, %s11845_s23  ;;  %v8835_v60 = vstv %s10348_s28  ;;  %s10355_s28 = sld [smem:[#allocation3 + $0x49]] }
 0x2cd   : > { %8772 = vrot.lane.b32.xlu1 %v8767_v63, %s11846_s24 }
 0x2ce   : > { %v14046_v21 = vpop.permute.xlu0 %8258 }
 0x2cf   : > { %15844 = vst [vmem:[#allocation54_spill] sm:$0xff] %v14046_v21  ;;  %v14049_v54 = vpop.permute.xlu1 %8274 }
 0x2d0   : > { %15845 = vst [vmem:[#allocation55_spill] sm:$0xff] %v14049_v54  ;;  %8770 = vrot.lane.b32.xlu0 %v8766_v49, %s11846_s24 }
 0x2d1   : > { %8786 = vrot.lane.b32.xlu1 %v8781_v52, %s11847_s26  ;;  %v8837_v52 = vmul.f32 %v8835_v60, %v13145_v48 }
 0x2d2   : > { %v14054_v7 = vpop.permute.xlu0 %8272 }
 0x2d3   : > { %15846 = vst [vmem:[#allocation56_spill] sm:$0xff] %v14054_v7  ;;  %v14057_v13 = vpop.permute.xlu1 %8288 }
 0x2d4   : > { %15847 = vst [vmem:[#allocation57_spill] sm:$0xff] %v14057_v13  ;;  %8784 = vrot.lane.b32.xlu0 %v8780_v3, %s11847_s26 }
 0x2d5   : > { %8800 = vrot.lane.b32.xlu1 %v8795_v37, %s15721_s27  ;;  %v8836_v37 = vmul.f32 %v8835_v60, %v13149_v58  ;;  %v8877_v60 = vstv %s10351_s17  ;;  %s10358_s17 = sld [smem:[#allocation3 + $0x4c]] }
 0x2d6   : > { %v14062_v33 = vpop.permute.xlu0 %8286 }
 0x2d7   : > { %15848 = vst [vmem:[#allocation58_spill] sm:$0xff] %v14062_v33  ;;  %v14065_v44 = vpop.permute.xlu1 %8320 }
 0x2d8   : > { %15849 = vst [vmem:[#allocation59_spill] sm:$0xff] %v14065_v44  ;;  %8798 = vrot.lane.b32.xlu0 %v8794_v50, %s15721_s27 }
 0x2d9   : > { %8814 = vrot.lane.b32.xlu1 %v8809_v53, %s15729_s21  ;;  %v8851_v53 = vmul.f32 %v8849_v19, %v13145_v48 }
 0x2da   : > { %v14070_v63 = vpop.permute.xlu0 %8318 }
 0x2db   : > { %15850 = vst [vmem:[#allocation60_spill] sm:$0xff] %v14070_v63  ;;  %v14073_v49 = vpop.permute.xlu1 %8334 }
 0x2dc   : > { %15851 = vst [vmem:[#allocation61_spill] sm:$0xff] %v14073_v49  ;;  %8812 = vrot.lane.b32.xlu0 %v8808_v20, %s15729_s21  ;;  %v8850_v20 = vmul.f32 %v8849_v19, %v13149_v58  ;;  %v8891_v19 = vstv %s10352_s29  ;;  %s10359_s29 = sld [smem:[#allocation3 + $0x4d]] }
 0x2dd   : > { %8842 = vrot.lane.b32.xlu1 %v8837_v52, %s11845_s23  ;;  %v8865_v52 = vmul.f32 %v8863_v40, %v13145_v48 }
 0x2de   : > { %v14078_v3 = vpop.permute.xlu0 %8332 }
 0x2df   : > { %15852 = vst [vmem:[#allocation62_spill] sm:$0xff] %v14078_v3  ;;  %v14081_v50 = vpop.permute.xlu1 %8348 }
 0x2e0   : > { %15853 = vst [vmem:[#allocation63_spill] sm:$0xff] %v14081_v50  ;;  %8840 = vrot.lane.b32.xlu0 %v8836_v37, %s11845_s23  ;;  %v8864_v37 = vmul.f32 %v8863_v40, %v13149_v58  ;;  %v8925_v40 = vstv %s10355_s28  ;;  %s10362_s28 = sld [smem:[#allocation3 + $0x4f]] }
 0x2e1   : > { %8856 = vrot.lane.b32.xlu1 %v8851_v53, %s11846_s24  ;;  %v8879_v53 = vmul.f32 %v8877_v60, %v13145_v48 }
 0x2e2   : > { %v14086_v13 = vpop.permute.xlu0 %8346 }
 0x2e3   : > { %15854 = vst [vmem:[#allocation64_spill] sm:$0xff] %v14086_v13  ;;  %v14089_v28 = vpop.permute.xlu1 %8362 }
 0x2e4   : > { %15855 = vst [vmem:[#allocation65_spill] sm:$0xff] %v14089_v28  ;;  %8854 = vrot.lane.b32.xlu0 %v8850_v20, %s11846_s24  ;;  %v8878_v20 = vmul.f32 %v8877_v60, %v13149_v58  ;;  %v8939_v60 = vstv %s10356_s14  ;;  %s10363_s14 = sld [smem:[#allocation3 + $0x50]] }
 0x2e5   : > { %8870 = vrot.lane.b32.xlu1 %v8865_v52, %s11847_s26  ;;  %v8893_v52 = vmul.f32 %v8891_v19, %v13145_v48 }
 0x2e6   : > { %v14094_v41 = vpop.permute.xlu0 %8360 }
 0x2e7   : > { %15856 = vst [vmem:[#allocation66_spill] sm:$0xff] %v14094_v41  ;;  %v14097_v50 = vpop.permute.xlu1 %8376 }
 0x2e8   : > { %15857 = vst [vmem:[#allocation67_spill] sm:$0xff] %v14097_v50  ;;  %8868 = vrot.lane.b32.xlu0 %v8864_v37, %s11847_s26  ;;  %v8892_v37 = vmul.f32 %v8891_v19, %v13149_v58  ;;  %v8953_v19 = vstv %s10357_s16  ;;  %s10364_s16 = sld [smem:[#allocation3 + $0x51]] }
 0x2e9   : > { %8884 = vrot.lane.b32.xlu1 %v8879_v53, %s15721_s27  ;;  %v8927_v53 = vmul.f32 %v8925_v40, %v13145_v48 }
 0x2ea   : > { %v14102_v28 = vpop.permute.xlu0 %8374 }
 0x2eb   : > { %15858 = vst [vmem:[#allocation68_spill] sm:$0xff] %v14102_v28  ;;  %v14105_v54 = vpop.permute.xlu1 %8404 }
 0x2ec   : > { %15859 = vst [vmem:[#allocation69_spill] sm:$0xff] %v14105_v54  ;;  %8882 = vrot.lane.b32.xlu0 %v8878_v20, %s15721_s27  ;;  %v8926_v20 = vmul.f32 %v8925_v40, %v13149_v58  ;;  %v8967_v40 = vstv %s10358_s17  ;;  %s10365_s17 = sld [smem:[#allocation3 + $0x52]] }
 0x2ed   : > { %8898 = vrot.lane.b32.xlu1 %v8893_v52, %s15729_s21  ;;  %v8941_v52 = vmul.f32 %v8939_v60, %v13145_v48 }
 0x2ee   : > { %v14110_v50 = vpop.permute.xlu0 %8402 }
 0x2ef   : > { %15860 = vst [vmem:[#allocation70_spill] sm:$0xff] %v14110_v50  ;;  %v14113_v27 = vpop.permute.xlu1 %8418 }
 0x2f0   : > { %15861 = vst [vmem:[#allocation71_spill] sm:$0xff] %v14113_v27  ;;  %8896 = vrot.lane.b32.xlu0 %v8892_v37, %s15729_s21  ;;  %v8940_v37 = vmul.f32 %v8939_v60, %v13149_v58  ;;  %v8981_v60 = vstv %s10359_s29  ;;  %s10366_s29 = sld [smem:[#allocation3 + $0x53]] }
 0x2f1   : > { %8932 = vrot.lane.b32.xlu1 %v8927_v53, %s11845_s23  ;;  %v8955_v53 = vmul.f32 %v8953_v19, %v13145_v48 }
 0x2f2   : > { %v14118_v16 = vpop.permute.xlu0 %8416 }
 0x2f3   : > { %15862 = vst [vmem:[#allocation72_spill] sm:$0xff] %v14118_v16  ;;  %v14121_v11 = vpop.permute.xlu1 %8432 }
 0x2f4   : > { %15863 = vst [vmem:[#allocation73_spill] sm:$0xff] %v14121_v11  ;;  %8930 = vrot.lane.b32.xlu0 %v8926_v20, %s11845_s23  ;;  %v8954_v20 = vmul.f32 %v8953_v19, %v13149_v58  ;;  %v9013_v19 = vstv %s10362_s28  ;;  %s10369_s28 = sld [smem:[#allocation3 + $0x55]] }
 0x2f5   : > { %8946 = vrot.lane.b32.xlu1 %v8941_v52, %s11846_s24  ;;  %v8969_v52 = vmul.f32 %v8967_v40, %v13145_v48 }
 0x2f6   : > { %v14126_v27 = vpop.permute.xlu0 %8430 }
 0x2f7   : > { %15864 = vst [vmem:[#allocation74_spill] sm:$0xff] %v14126_v27  ;;  %v14129_v54 = vpop.permute.xlu1 %8446 }
 0x2f8   : > { %15865 = vst [vmem:[#allocation75_spill] sm:$0xff] %v14129_v54  ;;  %8944 = vrot.lane.b32.xlu0 %v8940_v37, %s11846_s24  ;;  %v8968_v37 = vmul.f32 %v8967_v40, %v13149_v58  ;;  %v9027_v40 = vstv %s10363_s14  ;;  %s10370_s14 = sld [smem:[#allocation3 + $0x56]] }
 0x2f9   : > { %8960 = vrot.lane.b32.xlu1 %v8955_v53, %s11847_s26  ;;  %v8983_v53 = vmul.f32 %v8981_v60, %v13145_v48 }
 0x2fa   : > { %v14134_v11 = vpop.permute.xlu0 %8444 }
 0x2fb   : > { %15866 = vst [vmem:[#allocation76_spill] sm:$0xff] %v14134_v11  ;;  %v14137_v49 = vpop.permute.xlu1 %8460 }
 0x2fc   : > { %15867 = vst [vmem:[#allocation77_spill] sm:$0xff] %v14137_v49  ;;  %8958 = vrot.lane.b32.xlu0 %v8954_v20, %s11847_s26  ;;  %v8982_v20 = vmul.f32 %v8981_v60, %v13149_v58  ;;  %v9041_v60 = vstv %s10364_s16  ;;  %s10371_s16 = sld [smem:[#allocation3 + $0x57]] }
 0x2fd   : > { %8974 = vrot.lane.b32.xlu1 %v8969_v52, %s15721_s27  ;;  %v9015_v52 = vmul.f32 %v9013_v19, %v13145_v48 }
 0x2fe   : > { %v14142_v54 = vpop.permute.xlu0 %8458 }
 0x2ff   : > { %15868 = vst [vmem:[#allocation78_spill] sm:$0xff] %v14142_v54  ;;  %v14145_v30 = vpop.permute.xlu1 %8494 }
 0x300   : > { %15869 = vst [vmem:[#allocation79_spill] sm:$0xff] %v14145_v30  ;;  %8972 = vrot.lane.b32.xlu0 %v8968_v37, %s15721_s27  ;;  %v9014_v37 = vmul.f32 %v9013_v19, %v13149_v58  ;;  %v9055_v19 = vstv %s10365_s17  ;;  %s10372_s17 = sld [smem:[#allocation3 + $0x58]] }
 0x301   : > { %8988 = vrot.lane.b32.xlu1 %v8983_v53, %s15729_s21  ;;  %v9029_v53 = vmul.f32 %v9027_v40, %v13145_v48 }
 0x302   : > { %v14150_v49 = vpop.permute.xlu0 %8492 }
 0x303   : > { %15870 = vst [vmem:[#allocation80_spill] sm:$0xff] %v14150_v49  ;;  %v14153_v42 = vpop.permute.xlu1 %8508 }
 0x304   : > { %15871 = vst [vmem:[#allocation81_spill] sm:$0xff] %v14153_v42  ;;  %8986 = vrot.lane.b32.xlu0 %v8982_v20, %s15729_s21  ;;  %v9028_v20 = vmul.f32 %v9027_v40, %v13149_v58  ;;  %v9069_v40 = vstv %s10366_s29  ;;  %s10373_s29 = sld [smem:[#allocation3 + $0x59]] }
 0x305   : > { %9020 = vrot.lane.b32.xlu1 %v9015_v52, %s11845_s23  ;;  %v9043_v52 = vmul.f32 %v9041_v60, %v13145_v48 }
 0x306   : > { %v14158_v30 = vpop.permute.xlu0 %8506 }
 0x307   : > { %15872 = vst [vmem:[#allocation82_spill] sm:$0xff] %v14158_v30  ;;  %v14161_v12 = vpop.permute.xlu1 %8522 }
 0x308   : > { %15873 = vst [vmem:[#allocation83_spill] sm:$0xff] %v14161_v12  ;;  %9018 = vrot.lane.b32.xlu0 %v9014_v37, %s11845_s23  ;;  %v9042_v37 = vmul.f32 %v9041_v60, %v13149_v58  ;;  %v9101_v60 = vstv %s10369_s28  ;;  %s10376_s28 = sld [smem:[#allocation3 + $0x5b]] }
 0x309   : > { %9034 = vrot.lane.b32.xlu1 %v9029_v53, %s11846_s24  ;;  %v9057_v53 = vmul.f32 %v9055_v19, %v13145_v48 }
 0x30a   : > { %v14166_v42 = vpop.permute.xlu0 %8520 }
 0x30b   : > { %15874 = vst [vmem:[#allocation84_spill] sm:$0xff] %v14166_v42  ;;  %v14169_v47 = vpop.permute.xlu1 %8536 }
 0x30c   : > { %15875 = vst [vmem:[#allocation85_spill] sm:$0xff] %v14169_v47  ;;  %9032 = vrot.lane.b32.xlu0 %v9028_v20, %s11846_s24  ;;  %v9056_v20 = vmul.f32 %v9055_v19, %v13149_v58  ;;  %v9115_v19 = vstv %s10370_s14  ;;  %s10377_s14 = sld [smem:[#allocation3 + $0x5c]] }
 0x30d   : > { %9048 = vrot.lane.b32.xlu1 %v9043_v52, %s11847_s26  ;;  %v9071_v52 = vmul.f32 %v9069_v40, %v13145_v48 }
 0x30e   : > { %v14174_v12 = vpop.permute.xlu0 %8534 }
 0x30f   : > { %15876 = vst [vmem:[#allocation86_spill] sm:$0xff] %v14174_v12  ;;  %v14177_v22 = vpop.permute.xlu1 %8550 }
 0x310   : > { %15877 = vst [vmem:[#allocation87_spill] sm:$0xff] %v14177_v22  ;;  %9046 = vrot.lane.b32.xlu0 %v9042_v37, %s11847_s26  ;;  %v9070_v37 = vmul.f32 %v9069_v40, %v13149_v58  ;;  %v9129_v40 = vstv %s10371_s16  ;;  %s10378_s16 = sld [smem:[#allocation3 + $0x5d]] }
 0x311   : > { %9062 = vrot.lane.b32.xlu1 %v9057_v53, %s15721_s27  ;;  %v9103_v53 = vmul.f32 %v9101_v60, %v13145_v48 }
 0x312   : > { %v14182_v47 = vpop.permute.xlu0 %8548 }
 0x313   : > { %15878 = vst [vmem:[#allocation88_spill] sm:$0xff] %v14182_v47  ;;  %v14185_v44 = vpop.permute.xlu1 %8582 }
 0x314   : > { %15879 = vst [vmem:[#allocation89_spill] sm:$0xff] %v14185_v44  ;;  %9060 = vrot.lane.b32.xlu0 %v9056_v20, %s15721_s27  ;;  %v9102_v20 = vmul.f32 %v9101_v60, %v13149_v58  ;;  %v9143_v60 = vstv %s10372_s17  ;;  %s10379_s17 = sld [smem:[#allocation3 + $0x5e]] }
 0x315   : > { %9076 = vrot.lane.b32.xlu1 %v9071_v52, %s15729_s21  ;;  %v9117_v52 = vmul.f32 %v9115_v19, %v13145_v48 }
 0x316   : > { %v14190_v22 = vpop.permute.xlu0 %8580 }
 0x317   : > { %15880 = vst [vmem:[#allocation90_spill] sm:$0xff] %v14190_v22  ;;  %v14193_v14 = vpop.permute.xlu1 %8596 }
 0x318   : > { %15881 = vst [vmem:[#allocation91_spill] sm:$0xff] %v14193_v14  ;;  %9074 = vrot.lane.b32.xlu0 %v9070_v37, %s15729_s21  ;;  %v9116_v37 = vmul.f32 %v9115_v19, %v13149_v58  ;;  %v9157_v19 = vstv %s10373_s29  ;;  %s10380_s29 = sld [smem:[#allocation3 + $0x5f]] }
 0x319   : > { %9108 = vrot.lane.b32.xlu1 %v9103_v53, %s11845_s23  ;;  %v9131_v53 = vmul.f32 %v9129_v40, %v13145_v48 }
 0x31a   : > { %v14198_v44 = vpop.permute.xlu0 %8594 }
 0x31b   : > { %15882 = vst [vmem:[#allocation92_spill] sm:$0xff] %v14198_v44  ;;  %v14201_v59 = vpop.permute.xlu1 %8610 }
 0x31c   : > { %15883 = vst [vmem:[#allocation93_spill] sm:$0xff] %v14201_v59  ;;  %9106 = vrot.lane.b32.xlu0 %v9102_v20, %s11845_s23  ;;  %v9130_v20 = vmul.f32 %v9129_v40, %v13149_v58  ;;  %v9189_v40 = vstv %s10376_s28  ;;  %s10383_s28 = sld [smem:[#allocation3 + $0x61]] }
 0x31d   : > { %9122 = vrot.lane.b32.xlu1 %v9117_v52, %s11846_s24  ;;  %v9145_v52 = vmul.f32 %v9143_v60, %v13145_v48 }
 0x31e   : > { %v14206_v14 = vpop.permute.xlu0 %8608 }
 0x31f   : > { %15884 = vst [vmem:[#allocation94_spill] sm:$0xff] %v14206_v14  ;;  %v14209_v25 = vpop.permute.xlu1 %8624 }
 0x320   : > { %15885 = vst [vmem:[#allocation95_spill] sm:$0xff] %v14209_v25  ;;  %9120 = vrot.lane.b32.xlu0 %v9116_v37, %s11846_s24  ;;  %v9144_v37 = vmul.f32 %v9143_v60, %v13149_v58  ;;  %v9203_v60 = vstv %s10377_s14  ;;  %s10384_s14 = sld [smem:[#allocation3 + $0x62]] }
 0x321   : > { %9136 = vrot.lane.b32.xlu1 %v9131_v53, %s11847_s26  ;;  %v9159_v53 = vmul.f32 %v9157_v19, %v13145_v48 }
 0x322   : > { %v14214_v59 = vpop.permute.xlu0 %8622 }
 0x323   : > { %15886 = vst [vmem:[#allocation96_spill] sm:$0xff] %v14214_v59  ;;  %v14217_v10 = vpop.permute.xlu1 %8638 }
 0x324   : > { %15887 = vst [vmem:[#allocation97_spill] sm:$0xff] %v14217_v10  ;;  %9134 = vrot.lane.b32.xlu0 %v9130_v20, %s11847_s26  ;;  %v9158_v20 = vmul.f32 %v9157_v19, %v13149_v58  ;;  %v9217_v19 = vstv %s10378_s16  ;;  %s10385_s16 = sld [smem:[#allocation3 + $0x63]] }
 0x325   : > { %9150 = vrot.lane.b32.xlu1 %v9145_v52, %s15721_s27  ;;  %v9191_v52 = vmul.f32 %v9189_v40, %v13145_v48 }
 0x326   : > { %v14222_v25 = vpop.permute.xlu0 %8636 }
 0x327   : > { %15888 = vst [vmem:[#allocation98_spill] sm:$0xff] %v14222_v25  ;;  %v14225_v51 = vpop.permute.xlu1 %8670 }
 0x328   : > { %15889 = vst [vmem:[#allocation99_spill] sm:$0xff] %v14225_v51  ;;  %9148 = vrot.lane.b32.xlu0 %v9144_v37, %s15721_s27  ;;  %v9190_v37 = vmul.f32 %v9189_v40, %v13149_v58  ;;  %v9231_v40 = vstv %s10379_s17  ;;  %s10386_s17 = sld [smem:[#allocation3 + $0x64]] }
 0x329   : > { %9164 = vrot.lane.b32.xlu1 %v9159_v53, %s15729_s21  ;;  %v9205_v53 = vmul.f32 %v9203_v60, %v13145_v48 }
 0x32a   : > { %v14230_v10 = vpop.permute.xlu0 %8668 }
 0x32b   : > { %15890 = vst [vmem:[#allocation100_spill] sm:$0xff] %v14230_v10  ;;  %v14233_v34 = vpop.permute.xlu1 %8684 }
 0x32c   : > { %15891 = vst [vmem:[#allocation101_spill] sm:$0xff] %v14233_v34  ;;  %9162 = vrot.lane.b32.xlu0 %v9158_v20, %s15729_s21  ;;  %v9204_v20 = vmul.f32 %v9203_v60, %v13149_v58  ;;  %v9245_v60 = vstv %s10380_s29  ;;  %s10387_s29 = sld [smem:[#allocation3 + $0x65]] }
 0x32d   : > { %9196 = vrot.lane.b32.xlu1 %v9191_v52, %s11845_s23  ;;  %v9219_v52 = vmul.f32 %v9217_v19, %v13145_v48 }
 0x32e   : > { %v14238_v51 = vpop.permute.xlu0 %8682 }
 0x32f   : > { %15892 = vst [vmem:[#allocation102_spill] sm:$0xff] %v14238_v51  ;;  %v14241_v29 = vpop.permute.xlu1 %8698 }
 0x330   : > { %15893 = vst [vmem:[#allocation103_spill] sm:$0xff] %v14241_v29  ;;  %9194 = vrot.lane.b32.xlu0 %v9190_v37, %s11845_s23  ;;  %v9218_v37 = vmul.f32 %v9217_v19, %v13149_v58  ;;  %v9273_v19 = vstv %s10383_s28  ;;  %s10390_s28 = sld [smem:[#allocation3 + $0x67]] }
 0x331   : > { %9210 = vrot.lane.b32.xlu1 %v9205_v53, %s11846_s24  ;;  %v9233_v53 = vmul.f32 %v9231_v40, %v13145_v48 }
 0x332   : > { %v14246_v34 = vpop.permute.xlu0 %8696 }
 0x333   : > { %15894 = vst [vmem:[#allocation104_spill] sm:$0xff] %v14246_v34  ;;  %v14249_v23 = vpop.permute.xlu1 %8712 }
 0x334   : > { %15895 = vst [vmem:[#allocation105_spill] sm:$0xff] %v14249_v23  ;;  %9208 = vrot.lane.b32.xlu0 %v9204_v20, %s11846_s24  ;;  %v9232_v20 = vmul.f32 %v9231_v40, %v13149_v58  ;;  %v9287_v40 = vstv %s10384_s14  ;;  %s14301_s14 = sld [smem:[#allocation3 + $0x68]] }
 0x335   : > { %9224 = vrot.lane.b32.xlu1 %v9219_v52, %s11847_s26  ;;  %v9247_v52 = vmul.f32 %v9245_v60, %v13145_v48 }
 0x336   : > { %v14254_v29 = vpop.permute.xlu0 %8710 }
 0x337   : > { %15896 = vst [vmem:[#allocation106_spill] sm:$0xff] %v14254_v29  ;;  %v14257_v0 = vpop.permute.xlu1 %8726 }
 0x338   : > { %15897 = vst [vmem:[#allocation107_spill] sm:$0xff] %v14257_v0  ;;  %9222 = vrot.lane.b32.xlu0 %v9218_v37, %s11847_s26  ;;  %v9246_v37 = vmul.f32 %v9245_v60, %v13149_v58  ;;  %v9301_v60 = vstv %s10385_s16  ;;  %s14313_s16 = sld [smem:[#allocation3 + $0x69]] }
 0x339   : > { %9238 = vrot.lane.b32.xlu1 %v9233_v53, %s15721_s27  ;;  %v9275_v53 = vmul.f32 %v9273_v19, %v13145_v48 }
 0x33a   : > { %v14262_v23 = vpop.permute.xlu0 %8724 }
 0x33b   : > { %15898 = vst [vmem:[#allocation108_spill] sm:$0xff] %v14262_v23  ;;  %v14265_v4 = vpop.permute.xlu1 %8758 }
 0x33c   : > { %15899 = vst [vmem:[#allocation109_spill] sm:$0xff] %v14265_v4  ;;  %9236 = vrot.lane.b32.xlu0 %v9232_v20, %s15721_s27  ;;  %v9274_v20 = vmul.f32 %v9273_v19, %v13149_v58  ;;  %v9315_v19 = vstv %s10386_s17  ;;  %s14328_s17 = sld [smem:[#allocation3 + $0x6a]] }
 0x33d   : > { %9252 = vrot.lane.b32.xlu1 %v9247_v52, %s15729_s21  ;;  %v9289_v52 = vmul.f32 %v9287_v40, %v13145_v48 }
 0x33e   : > { %v14270_v0 = vpop.permute.xlu0 %8756 }
 0x33f   : > { %15900 = vst [vmem:[#allocation110_spill] sm:$0xff] %v14270_v0  ;;  %v14273_v36 = vpop.permute.xlu1 %8772 }
 0x340   : > { %15901 = vst [vmem:[#allocation111_spill] sm:$0xff] %v14273_v36  ;;  %9250 = vrot.lane.b32.xlu0 %v9246_v37, %s15729_s21  ;;  %v9288_v37 = vmul.f32 %v9287_v40, %v13149_v58  ;;  %v9329_v40 = vstv %s10387_s29  ;;  %s14343_s29 = sld [smem:[#allocation3 + $0x6b]] }
 0x341   : > { %9280 = vrot.lane.b32.xlu1 %v9275_v53, %s11845_s23  ;;  %v9303_v53 = vmul.f32 %v9301_v60, %v13145_v48 }
 0x342   : > { %v14278_v4 = vpop.permute.xlu0 %8770 }
 0x343   : > { %15902 = vst [vmem:[#allocation112_spill] sm:$0xff] %v14278_v4  ;;  %v14281_v23 = vpop.permute.xlu1 %8786 }
 0x344   : > { %15903 = vst [vmem:[#allocation113_spill] sm:$0xff] %v14281_v23  ;;  %9278 = vrot.lane.b32.xlu0 %v9274_v20, %s11845_s23  ;;  %v9302_v20 = vmul.f32 %v9301_v60, %v13149_v58  ;;  %v9331_v60 = vmul.f32 %v9329_v40, %v13145_v48 }
 0x345   : > { %9294 = vrot.lane.b32.xlu1 %v9289_v52, %s11846_s24  ;;  %v9317_v52 = vmul.f32 %v9315_v19, %v13145_v48 }
 0x346   : > { %v14286_v36 = vpop.permute.xlu0 %8784 }
 0x347   : > { %15904 = vst [vmem:[#allocation114_spill] sm:$0xff] %v14286_v36  ;;  %v14289_v29 = vpop.permute.xlu1 %8800  ;;  %v14324_v36 = vpop.f32.mrf.mxu1 }
 0x348   : > { %15905 = vst [vmem:[#allocation115_spill] sm:$0xff] %v14289_v29  ;;  %9292 = vrot.lane.b32.xlu0 %v9288_v37, %s11846_s24 }
 0x349   : > { %9308 = vrot.lane.b32.xlu1 %v9303_v53, %s11847_s26  ;;  %v9316_v53 = vmul.f32 %v9315_v19, %v13149_v58  ;;  %v14337_v4 = vpop.f32.mrf.mxu1 }
 0x34a   : > { %v14294_v23 = vpop.permute.xlu0 %8798 }
 0x34b   : > { %15906 = vst [vmem:[#allocation116_spill] sm:$0xff] %v14294_v23  ;;  %v14297_v55 = vpop.permute.xlu1 %8814  ;;  %v9363_v23 = vstv %s10390_s28  ;;  %v14354_v38 = vpop.f32.mrf.mxu1  ;;  %s14358_s28 = sld [smem:[#allocation3 + $0x6d]] }
 0x34c   : > { %15907 = vst [vmem:[#allocation117_spill] sm:$0xff] %v14297_v55  ;;  %9306 = vrot.lane.b32.xlu0 %v9302_v20, %s11847_s26  ;;  %v14311_v55 = vpop.f32.mrf.mxu0  ;;  %v9365_v19 = vmul.f32 %v9363_v23, %v13145_v48 }
 0x34d   : > { %9322 = vrot.lane.b32.xlu1 %v9317_v52, %s15721_s27  ;;  %v9330_v52 = vmul.f32 %v9329_v40, %v13149_v58  ;;  %v9364_v40 = vmul.f32 %v9363_v23, %v13149_v58  ;;  %v14367_v0 = vpop.f32.mrf.mxu1 }
 0x34e   : > { %v14304_v37 = vpop.permute.xlu0 %8812 }
 0x34f   : > { %15908 = vst [vmem:[#allocation118_spill] sm:$0xff] %v14304_v37  ;;  %v14307_v29 = vpop.permute.xlu1 %8842  ;;  %v14384_v47 = vpop.f32.mrf.mxu1 }
 0x350   : > { %15909 = vst [vmem:[#allocation119_spill] sm:$0xff] %v14307_v29  ;;  %9320 = vrot.lane.b32.xlu0 %v9316_v53, %s15721_s27  ;;  %v14322_v29 = vpop.f32.mrf.mxu0  ;;  %v9377_v53 = vstv %s14301_s14  ;;  %s14373_s14 = sld [smem:[#allocation3 + $0x6e]] }
 0x351   : > { %9336 = vrot.lane.b32.xlu1 %v9331_v60, %s15729_s21  ;;  %v9378_v23 = vmul.f32 %v9377_v53, %v13149_v58  ;;  %v14397_v10 = vpop.f32.mrf.mxu1 }
 0x352   : > { %v14316_v20 = vpop.permute.xlu0 %8840  ;;  %v14339_v34 = vpop.f32.mrf.mxu0 }
 0x353   : > { %15910 = vst [vmem:[#allocation120_spill] sm:$0xff] %v14316_v20  ;;  %v14319_v37 = vpop.permute.xlu1 %8856  ;;  %v14414_v12 = vpop.f32.mrf.mxu1 }
 0x354   : > { %15911 = vst [vmem:[#allocation121_spill] sm:$0xff] %v14319_v37  ;;  %9334 = vrot.lane.b32.xlu0 %v9330_v52, %s15729_s21  ;;  %v9379_v37 = vmul.f32 %v9377_v53, %v13145_v48  ;;  %v9391_v52 = vstv %s14313_s16  ;;  %v14352_v25 = vpop.f32.mrf.mxu0  ;;  %s14388_s16 = sld [smem:[#allocation3 + $0x6f]] }
 0x355   : > { %9370 = vrot.lane.b32.xlu1 %v9365_v19, %s11845_s23  ;;  %v9392_v53 = vmul.f32 %v9391_v52, %v13149_v58  ;;  %v14427_v44 = vpop.f32.mrf.mxu1 }
 0x356   : > { %v14331_v60 = vpop.permute.xlu0 %8854  ;;  %v14369_v51 = vpop.f32.mrf.mxu0 }
 0x357   : > { %15912 = vst [vmem:[#allocation122_spill] sm:$0xff] %v14331_v60  ;;  %v14334_v20 = vpop.permute.xlu1 %8870  ;;  %v14444_v22 = vpop.f32.mrf.mxu1 }
 0x358   : > { %15913 = vst [vmem:[#allocation123_spill] sm:$0xff] %v14334_v20  ;;  %9368 = vrot.lane.b32.xlu0 %v9364_v40, %s11845_s23  ;;  %v9393_v20 = vmul.f32 %v9391_v52, %v13145_v48  ;;  %v9405_v40 = vstv %s14328_s17  ;;  %v14382_v59 = vpop.f32.mrf.mxu0  ;;  %s14403_s17 = sld [smem:[#allocation3 + $0x70]] }
 0x359   : > { %9384 = vrot.lane.b32.xlu1 %v9379_v37, %s11846_s24  ;;  %v9406_v52 = vmul.f32 %v9405_v40, %v13149_v58  ;;  %v14457_v27 = vpop.f32.mrf.mxu1 }
 0x35a   : > { %v14346_v19 = vpop.permute.xlu0 %8868  ;;  %v14399_v14 = vpop.f32.mrf.mxu0 }
 0x35b   : > { %15914 = vst [vmem:[#allocation124_spill] sm:$0xff] %v14346_v19  ;;  %v14349_v60 = vpop.permute.xlu1 %8884  ;;  %v14474_v28 = vpop.f32.mrf.mxu1 }
 0x35c   : > { %15915 = vst [vmem:[#allocation125_spill] sm:$0xff] %v14349_v60  ;;  %9382 = vrot.lane.b32.xlu0 %v9378_v23, %s11846_s24  ;;  %v9407_v60 = vmul.f32 %v9405_v40, %v13145_v48  ;;  %v9419_v23 = vstv %s14343_s29  ;;  %v14412_v54 = vpop.f32.mrf.mxu0  ;;  %s14418_s29 = sld [smem:[#allocation3 + $0x71]] }
 0x35d   : > { %9398 = vrot.lane.b32.xlu1 %v9393_v20, %s11847_s26  ;;  %v9420_v40 = vmul.f32 %v9419_v23, %v13149_v58  ;;  %v14487_v49 = vpop.f32.mrf.mxu1 }
 0x35e   : > { %v14361_v37 = vpop.permute.xlu0 %8882  ;;  %v14429_v11 = vpop.f32.mrf.mxu0 }
 0x35f   : > { %15916 = vst [vmem:[#allocation126_spill] sm:$0xff] %v14361_v37  ;;  %v14364_v19 = vpop.permute.xlu1 %8898  ;;  %v14504_v33 = vpop.f32.mrf.mxu1 }
 0x360   : > { %15917 = vst [vmem:[#allocation127_spill] sm:$0xff] %v14364_v19  ;;  %9396 = vrot.lane.b32.xlu0 %v9392_v53, %s11847_s26  ;;  %v9421_v19 = vmul.f32 %v9419_v23, %v13145_v48  ;;  %v9451_v53 = vstv %s14358_s28  ;;  %s14433_s28 = sld [smem:[#allocation3 + $0x73]]  ;;  %v14442_v42 = vpop.f32.mrf.mxu0 }
 0x361   : > { %9412 = vrot.lane.b32.xlu1 %v9407_v60, %s15721_s27  ;;  %v9452_v23 = vmul.f32 %v9451_v53, %v13149_v58  ;;  %v14517_v13 = vpop.f32.mrf.mxu1 }
 0x362   : > { %v14376_v20 = vpop.permute.xlu0 %8896  ;;  %v14459_v30 = vpop.f32.mrf.mxu0 }
 0x363   : > { %15918 = vst [vmem:[#allocation128_spill] sm:$0xff] %v14376_v20  ;;  %v14379_v37 = vpop.permute.xlu1 %8932  ;;  %v14534_v21 = vpop.f32.mrf.mxu1 }
 0x364   : > { %15919 = vst [vmem:[#allocation129_spill] sm:$0xff] %v14379_v37  ;;  %9410 = vrot.lane.b32.xlu0 %v9406_v52, %s15721_s27  ;;  %v9453_v37 = vmul.f32 %v9451_v53, %v13145_v48  ;;  %v9465_v52 = vstv %s14373_s14  ;;  %s14448_s14 = sld [smem:[#allocation3 + $0x74]]  ;;  %v14472_v16 = vpop.f32.mrf.mxu0 }
 0x365   : > { %9426 = vrot.lane.b32.xlu1 %v9421_v19, %s15729_s21  ;;  %v9466_v53 = vmul.f32 %v9465_v52, %v13149_v58  ;;  %v14547_v9 = vpop.f32.mrf.mxu1 }
 0x366   : > { %v14391_v60 = vpop.permute.xlu0 %8930  ;;  %v14489_v50 = vpop.f32.mrf.mxu0 }
 0x367   : > { %15920 = vst [vmem:[#allocation130_spill] sm:$0xff] %v14391_v60  ;;  %v14394_v20 = vpop.permute.xlu1 %8946  ;;  %v14564_v24 = vpop.f32.mrf.mxu1 }
 0x368   : > { %15921 = vst [vmem:[#allocation131_spill] sm:$0xff] %v14394_v20  ;;  %9424 = vrot.lane.b32.xlu0 %v9420_v40, %s15729_s21  ;;  %v9467_v20 = vmul.f32 %v9465_v52, %v13145_v48  ;;  %v9479_v40 = vstv %s14388_s16  ;;  %s14463_s16 = sld [smem:[#allocation3 + $0x75]]  ;;  %v14502_v41 = vpop.f32.mrf.mxu0 }
 0x369   : > { %9458 = vrot.lane.b32.xlu1 %v9453_v37, %s11845_s23  ;;  %v9480_v52 = vmul.f32 %v9479_v40, %v13149_v58  ;;  %v14579_v57 = vpop.f32.mrf.mxu1 }
 0x36a   : > { %v14406_v19 = vpop.permute.xlu0 %8944  ;;  %v14519_v7 = vpop.f32.mrf.mxu0 }
 0x36b   : > { %15922 = vst [vmem:[#allocation132_spill] sm:$0xff] %v14406_v19  ;;  %v14409_v60 = vpop.permute.xlu1 %8960  ;;  %v14599_v2 = vpop.f32.mrf.mxu1 }
 0x36c   : > { %15923 = vst [vmem:[#allocation133_spill] sm:$0xff] %v14409_v60  ;;  %9456 = vrot.lane.b32.xlu0 %v9452_v23, %s11845_s23  ;;  %v9481_v60 = vmul.f32 %v9479_v40, %v13145_v48  ;;  %v9493_v23 = vstv %s14403_s17  ;;  %s14478_s17 = sld [smem:[#allocation3 + $0x76]]  ;;  %v14532_v3 = vpop.f32.mrf.mxu0 }
 0x36d   : > { %9472 = vrot.lane.b32.xlu1 %v9467_v20, %s11846_s24  ;;  %v9494_v40 = vmul.f32 %v9493_v23, %v13149_v58 }
 0x36e   : > { %v14421_v37 = vpop.permute.xlu0 %8958  ;;  %v14549_v63 = vpop.f32.mrf.mxu0 }
 0x36f   : > { %15924 = vst [vmem:[#allocation134_spill] sm:$0xff] %v14421_v37  ;;  %v14424_v19 = vpop.permute.xlu1 %8974 }
 0x370   : > { %15925 = vst [vmem:[#allocation135_spill] sm:$0xff] %v14424_v19  ;;  %9470 = vrot.lane.b32.xlu0 %v9466_v53, %s11846_s24  ;;  %v9495_v19 = vmul.f32 %v9493_v23, %v13145_v48  ;;  %v9507_v53 = vstv %s14418_s29  ;;  %s14493_s29 = sld [smem:[#allocation3 + $0x77]]  ;;  %v14562_v32 = vpop.f32.mrf.mxu0 }
 0x371   : > { %9486 = vrot.lane.b32.xlu1 %v9481_v60, %s11847_s26  ;;  %v9508_v23 = vmul.f32 %v9507_v53, %v13149_v58 }
 0x372   : > { %v14436_v20 = vpop.permute.xlu0 %8972 }
 0x373   : > { %15926 = vst [vmem:[#allocation136_spill] sm:$0xff] %v14436_v20  ;;  %v14439_v37 = vpop.permute.xlu1 %8988 }
 0x374   : > { %15927 = vst [vmem:[#allocation137_spill] sm:$0xff] %v14439_v37  ;;  %9484 = vrot.lane.b32.xlu0 %v9480_v52, %s11847_s26  ;;  %v9509_v37 = vmul.f32 %v9507_v53, %v13145_v48  ;;  %v9539_v52 = vstv %s14433_s28  ;;  %s14508_s28 = sld [smem:[#allocation3 + $0x79]] }
 0x375   : > { %9500 = vrot.lane.b32.xlu1 %v9495_v19, %s15721_s27  ;;  %v9540_v53 = vmul.f32 %v9539_v52, %v13149_v58 }
 0x376   : > { %v14451_v60 = vpop.permute.xlu0 %8986 }
 0x377   : > { %15928 = vst [vmem:[#allocation138_spill] sm:$0xff] %v14451_v60  ;;  %v14454_v20 = vpop.permute.xlu1 %9020 }
 0x378   : > { %15929 = vst [vmem:[#allocation139_spill] sm:$0xff] %v14454_v20  ;;  %9498 = vrot.lane.b32.xlu0 %v9494_v40, %s15721_s27  ;;  %v9541_v20 = vmul.f32 %v9539_v52, %v13145_v48  ;;  %v9553_v40 = vstv %s14448_s14  ;;  %s14523_s14 = sld [smem:[#allocation3 + $0x7a]] }
 0x379   : > { %9514 = vrot.lane.b32.xlu1 %v9509_v37, %s15729_s21  ;;  %v9554_v52 = vmul.f32 %v9553_v40, %v13149_v58 }
 0x37a   : > { %v14466_v19 = vpop.permute.xlu0 %9018 }
 0x37b   : > { %15930 = vst [vmem:[#allocation140_spill] sm:$0xff] %v14466_v19  ;;  %v14469_v60 = vpop.permute.xlu1 %9034 }
 0x37c   : > { %15931 = vst [vmem:[#allocation141_spill] sm:$0xff] %v14469_v60  ;;  %9512 = vrot.lane.b32.xlu0 %v9508_v23, %s15729_s21  ;;  %v9555_v60 = vmul.f32 %v9553_v40, %v13145_v48  ;;  %v9567_v23 = vstv %s14463_s16  ;;  %s14538_s16 = sld [smem:[#allocation3 + $0x7b]] }
 0x37d   : > { %9546 = vrot.lane.b32.xlu1 %v9541_v20, %s11845_s23  ;;  %v9568_v40 = vmul.f32 %v9567_v23, %v13149_v58 }
 0x37e   : > { %v14481_v37 = vpop.permute.xlu0 %9032 }
 0x37f   : > { %15932 = vst [vmem:[#allocation142_spill] sm:$0xff] %v14481_v37  ;;  %v14484_v19 = vpop.permute.xlu1 %9048 }
 0x380   : > { %15933 = vst [vmem:[#allocation143_spill] sm:$0xff] %v14484_v19  ;;  %9544 = vrot.lane.b32.xlu0 %v9540_v53, %s11845_s23  ;;  %v9569_v19 = vmul.f32 %v9567_v23, %v13145_v48  ;;  %v9581_v53 = vstv %s14478_s17  ;;  %s14553_s17 = sld [smem:[#allocation3 + $0x7c]] }
 0x381   : > { %9560 = vrot.lane.b32.xlu1 %v9555_v60, %s11846_s24  ;;  %v9582_v23 = vmul.f32 %v9581_v53, %v13149_v58 }
 0x382   : > { %v14496_v20 = vpop.permute.xlu0 %9046 }
 0x383   : > { %15934 = vst [vmem:[#allocation144_spill] sm:$0xff] %v14496_v20  ;;  %v14499_v37 = vpop.permute.xlu1 %9062 }
 0x384   : > { %15935 = vst [vmem:[#allocation145_spill] sm:$0xff] %v14499_v37  ;;  %9558 = vrot.lane.b32.xlu0 %v9554_v52, %s11846_s24  ;;  %v9583_v37 = vmul.f32 %v9581_v53, %v13145_v48  ;;  %v9595_v52 = vstv %s14493_s29  ;;  %s14568_s29 = sld [smem:[#allocation3 + $0x7d]] }
 0x385   : > { %9574 = vrot.lane.b32.xlu1 %v9569_v19, %s11847_s26  ;;  %v9596_v53 = vmul.f32 %v9595_v52, %v13149_v58 }
 0x386   : > { %v14511_v60 = vpop.permute.xlu0 %9060  ;;  %v9669_v17 = vstv %s14553_s17  ;;  %s14637_s17 = sld [smem:[#allocation3 + $0x82]] }
 0x387   : > { %15936 = vst [vmem:[#allocation146_spill] sm:$0xff] %v14511_v60  ;;  %v14514_v20 = vpop.permute.xlu1 %9076 }
 0x388   : > { %15937 = vst [vmem:[#allocation147_spill] sm:$0xff] %v14514_v20  ;;  %9572 = vrot.lane.b32.xlu0 %v9568_v40, %s11847_s26  ;;  %v9597_v20 = vmul.f32 %v9595_v52, %v13145_v48  ;;  %v9627_v40 = vstv %s14508_s28  ;;  %s14585_s28 = sld [smem:[#allocation3 + $0x7f]] }
 0x389   : > { %9588 = vrot.lane.b32.xlu1 %v9583_v37, %s15721_s27  ;;  %v9628_v52 = vmul.f32 %v9627_v40, %v13149_v58 }
 0x38a   : > { %v14526_v19 = vpop.permute.xlu0 %9074 }
 0x38b   : > { %15938 = vst [vmem:[#allocation148_spill] sm:$0xff] %v14526_v19  ;;  %v14529_v60 = vpop.permute.xlu1 %9108 }
 0x38c   : > { %15939 = vst [vmem:[#allocation149_spill] sm:$0xff] %v14529_v60  ;;  %9586 = vrot.lane.b32.xlu0 %v9582_v23, %s15721_s27  ;;  %v9629_v60 = vmul.f32 %v9627_v40, %v13145_v48  ;;  %v9641_v23 = vstv %s14523_s14  ;;  %s14603_s14 = sld [smem:[#allocation3 + $0x80]] }
 0x38d   : > { %9602 = vrot.lane.b32.xlu1 %v9597_v20, %s15729_s21 }
 0x38e   : > { %v14541_v37 = vpop.permute.xlu0 %9106 }
 0x38f   : > { %15940 = vst [vmem:[#allocation150_spill] sm:$0xff] %v14541_v37  ;;  %v14544_v19 = vpop.permute.xlu1 %9122 }
 0x390   : > { %15941 = vst [vmem:[#allocation151_spill] sm:$0xff] %v14544_v19  ;;  %9600 = vrot.lane.b32.xlu0 %v9596_v53, %s15729_s21  ;;  %v9643_v19 = vmul.f32 %v9641_v23, %v13145_v48  ;;  %v9655_v53 = vstv %s14538_s16  ;;  %s14620_s16 = sld [smem:[#allocation3 + $0x81]] }
 0x391   : > { %9634 = vrot.lane.b32.xlu1 %v9629_v60, %s11845_s23  ;;  %v5389_v60 = vadd.f32 %v14324_v36, %v14311_v55  ;;  %v9657_v15 = vmul.f32 %v9655_v53, %v13145_v48  ;;  %v5383_v55 = vadd.f32 %v14337_v4, %v14322_v29  ;;  %v9683_v4 = vstv %s14568_s29  ;;  %s14654_s29 = sld [smem:[#allocation3 + $0x83]] }
 0x392   : > { %v14556_v20 = vpop.permute.xlu0 %9120 }
 0x393   : > { %15942 = vst [vmem:[#allocation152_spill] sm:$0xff] %v14556_v20  ;;  %v14559_v37 = vpop.permute.xlu1 %9136  ;;  %v5474_v36 = vadd.f32 %v14339_v34, %v5389_v60  ;;  %v5467_v34 = vadd.f32 %v14352_v25, %v5383_v55  ;;  %v9711_v25 = vstv %s14585_s28  ;;  %v9684_v55 = vmul.f32 %v9683_v4, %v13149_v58  ;;  %s14671_s28 = sld [smem:[#allocation3 + $0x85]] }
 0x394   : > { %15943 = vst [vmem:[#allocation153_spill] sm:$0xff] %v14559_v37  ;;  %9632 = vrot.lane.b32.xlu0 %v9628_v52, %s11845_s23  ;;  %v9642_v37 = vmul.f32 %v9641_v23, %v13149_v58  ;;  %v14581_v52 = vpop.f32.mrf.mxu0  ;;  %v9656_v23 = vmul.f32 %v9655_v53, %v13149_v58  ;;  %v9670_v53 = vmul.f32 %v9669_v17, %v13149_v58 }
 0x395   : > { %9648 = vrot.lane.b32.xlu1 %v9643_v19, %s11846_s24  ;;  %v5558_v29 = vadd.f32 %v14354_v38, %v5474_v36  ;;  %v5550_v38 = vadd.f32 %v14367_v0, %v5467_v34  ;;  %v9725_v0 = vstv %s14603_s14  ;;  %v9712_v34 = vmul.f32 %v9711_v25, %v13149_v58  ;;  %s14688_s14 = sld [smem:[#allocation3 + $0x86]] }
 0x396   : > { %v14573_v40 = vpop.permute.xlu0 %9134 }
 0x397   : > { %15944 = vst [vmem:[#allocation154_spill] sm:$0xff] %v14573_v40  ;;  %v14576_v20 = vpop.permute.xlu1 %9150  ;;  %v9671_v40 = vmul.f32 %v9669_v17, %v13145_v48 }
 0x398   : > { %15945 = vst [vmem:[#allocation155_spill] sm:$0xff] %v14576_v20  ;;  %9646 = vrot.lane.b32.xlu0 %v9642_v37, %s11846_s24  ;;  %v14597_v37 = vpop.f32.mrf.mxu0 }
 0x399   : > { %9662 = vrot.lane.b32.xlu1 %v9657_v15, %s11847_s26 }
 0x39a   : > { %v14591_v19 = vpop.permute.xlu0 %9148 }
 0x39b   : > { %15946 = vst [vmem:[#allocation156_spill] sm:$0xff] %v14591_v19  ;;  %v14594_v20 = vpop.permute.xlu1 %9164  ;;  %v14614_v19 = vpop.f32.mrf.mxu1 }
 0x39c   : > { %15947 = vst [vmem:[#allocation157_spill] sm:$0xff] %v14594_v20  ;;  %9660 = vrot.lane.b32.xlu0 %v9656_v23, %s11847_s26  ;;  %v9685_v20 = vmul.f32 %v9683_v4, %v13145_v48  ;;  %v14616_v23 = vpop.f32.mrf.mxu0 }
 0x39d   : > { %9676 = vrot.lane.b32.xlu1 %v9671_v40, %s15721_s27  ;;  %v5644_v40 = vadd.f32 %v14369_v51, %v5558_v29  ;;  %v5638_v51 = vadd.f32 %v14382_v59, %v5550_v38  ;;  %v9739_v59 = vstv %s14620_s16  ;;  %v9726_v38 = vmul.f32 %v9725_v0, %v13149_v58  ;;  %s14706_s16 = sld [smem:[#allocation3 + $0x8b]] }
 0x39e   : > { %v14608_v15 = vpop.permute.xlu0 %9162 }
 0x39f   : > { %15948 = vst [vmem:[#allocation158_spill] sm:$0xff] %v14608_v15  ;;  %v14611_v60 = vpop.permute.xlu1 %9196  ;;  %v14631_v15 = vpop.f32.mrf.mxu0 }
 0x3a0   : > { %15949 = vst [vmem:[#allocation159_spill] sm:$0xff] %v14611_v60  ;;  %9674 = vrot.lane.b32.xlu0 %v9670_v53, %s15721_s27  ;;  %v9713_v60 = vmul.f32 %v9711_v25, %v13145_v48  ;;  %v14633_v53 = vpop.f32.mrf.mxu1 }
 0x3a1   : > { %9690 = vrot.lane.b32.xlu1 %v9685_v20, %s15729_s21  ;;  %v5724_v20 = vadd.f32 %v14384_v47, %v5644_v40  ;;  %v5718_v47 = vadd.f32 %v14397_v10, %v5638_v51  ;;  %v9753_v10 = vstv %s14637_s17  ;;  %s14712_s17 = sld [smem:[#allocation3 + $0x87]] }
 0x3a2   : > { %v14625_v17 = vpop.permute.xlu0 %9194 }
 0x3a3   : > { %15950 = vst [vmem:[#allocation160_spill] sm:$0xff] %v14625_v17  ;;  %v14628_v36 = vpop.permute.xlu1 %9210  ;;  %v14648_v17 = vpop.f32.mrf.mxu1 }
 0x3a4   : > { %15951 = vst [vmem:[#allocation161_spill] sm:$0xff] %v14628_v36  ;;  %9688 = vrot.lane.b32.xlu0 %v9684_v55, %s15729_s21  ;;  %v9727_v36 = vmul.f32 %v9725_v0, %v13145_v48  ;;  %v14650_v55 = vpop.f32.mrf.mxu0  ;;  %v6442_v0 = vadd.f32 %v14504_v33, %v14489_v50  ;;  %v6436_v50 = vadd.f32 %v14517_v13, %v14502_v41 }
 0x3a5   : > { %9718 = vrot.lane.b32.xlu1 %v9713_v60, %s11845_s23  ;;  %v5819_v60 = vadd.f32 %v14399_v14, %v5724_v20  ;;  %v5809_v14 = vadd.f32 %v14412_v54, %v5718_v47  ;;  %v9740_v20 = vmul.f32 %v9739_v59, %v13149_v58 }
 0x3a6   : > { %v14642_v4 = vpop.permute.xlu0 %9208  ;;  %v6520_v13 = vadd.f32 %v14532_v3, %v6436_v50 }
 0x3a7   : > { %15952 = vst [vmem:[#allocation162_spill] sm:$0xff] %v14642_v4  ;;  %v14645_v29 = vpop.permute.xlu1 %9224  ;;  %v14665_v4 = vpop.f32.mrf.mxu0  ;;  %v5905_v54 = vadd.f32 %v14427_v44, %v5809_v14 }
 0x3a8   : > { %15953 = vst [vmem:[#allocation163_spill] sm:$0xff] %v14645_v29  ;;  %9716 = vrot.lane.b32.xlu0 %v9712_v34, %s11845_s23  ;;  %v9741_v29 = vmul.f32 %v9739_v59, %v13145_v48  ;;  %v14667_v34 = vpop.f32.mrf.mxu1  ;;  %v6975_v59 = vadd.f32 %v14599_v2, %v14581_v52 }
 0x3a9   : > { %9732 = vrot.lane.b32.xlu1 %v9727_v36, %s11846_s24  ;;  %v5911_v36 = vadd.f32 %v14414_v12, %v5819_v60  ;;  %v11584_v8 = vpop.f32.mrf.mxu0  ;;  %v9767_v12 = vstv %s14654_s29  ;;  %v9754_v60 = vmul.f32 %v9753_v10, %v13149_v58  ;;  %v5989_v41 = vadd.f32 %v14442_v42, %v5905_v54  ;;  %s14730_s29 = sld [smem:[#allocation3 + $0x8c]] }
 0x3aa   : > { %v14659_v25 = vpop.permute.xlu0 %9222  ;;  %v9769_v44 = vmul.f32 %v9767_v12, %v13145_v48 }
 0x3ab   : > { %15954 = vst [vmem:[#allocation164_spill] sm:$0xff] %v14659_v25  ;;  %v14662_v40 = vpop.permute.xlu1 %9238  ;;  %v14684_v25 = vpop.f32.mrf.mxu1  ;;  %v5996_v33 = vadd.f32 %v14429_v11, %v5911_v36  ;;  %v9801_v36 = vstv %s14671_s28  ;;  %v6072_v3 = vadd.f32 %v14457_v27, %v5989_v41  ;;  %s14758_s28 = sld [smem:[#allocation3 + $0x91]] }
 0x3ac   : > { %15955 = vst [vmem:[#allocation165_spill] sm:$0xff] %v14662_v40  ;;  %9730 = vrot.lane.b32.xlu0 %v9726_v38, %s11846_s24  ;;  %v9755_v38 = vmul.f32 %v9753_v10, %v13145_v48  ;;  %v7405_v14 = vpop.f32.mrf.mxu0  ;;  %v6969_v10 = vadd.f32 %v14614_v19, %v14597_v37  ;;  %v9802_v19 = vmul.f32 %v9801_v36, %v13149_v58 }
 0x3ad   : > { %9746 = vrot.lane.b32.xlu1 %v9741_v29, %s11847_s26  ;;  %v6527_v29 = vadd.f32 %v14519_v7, %v6442_v0  ;;  %v11593_v11 = vpop.f32.mrf.mxu1  ;;  %v6080_v2 = vadd.f32 %v14444_v22, %v5996_v33  ;;  %v9768_v7 = vmul.f32 %v9767_v12, %v13149_v58  ;;  %v7060_v0 = vadd.f32 %v14616_v23, %v6975_v59 }
 0x3ae   : > { %v14678_v51 = vpop.permute.xlu0 %9236  ;;  %v7508_v42 = vadd.f32 %v11593_v11, %v11584_v8  ;;  %v9803_v22 = vmul.f32 %v9801_v36, %v13145_v48  ;;  %v11602_v12 = vpop.f32.mrf.mxu0  ;;  %v6603_v8 = vadd.f32 %v14547_v9, %v6520_v13  ;;  %v7053_v23 = vadd.f32 %v14631_v15, %v6969_v10 }
 0x3af   : > { %v14681_v40 = vpop.permute.xlu1 %9252  ;;  %v6611_v52 = vadd.f32 %v14534_v21, %v6527_v29  ;;  %v7501_v33 = vpop.f32.mrf.mxu1  ;;  %v6166_v21 = vadd.f32 %v14459_v30, %v6080_v2  ;;  %v7144_v50 = vadd.f32 %v14633_v53, %v7060_v0  ;;  %v9889_v9 = vstv %s14706_s16  ;;  %s10440_s16 = sld [smem:[#allocation3 + $0x92]] }
 0x3b0   : > { %15956 = vst [vmem:[#allocation166_spill] sm:$0xff] %v14681_v40  ;;  %9744 = vrot.lane.b32.xlu0 %v9740_v20, %s11847_s26  ;;  %v7502_v27 = vadd.f32 %v7501_v33, %v7405_v14  ;;  %v7593_v30 = vadd.f32 %v11602_v12, %v7508_v42  ;;  %v7585_v11 = vpop.f32.mrf.mxu0  ;;  %v9829_v53 = vstv %s14712_s17  ;;  %v6691_v14 = vadd.f32 %v14562_v32, %v6603_v8  ;;  %s10429_s17 = sld [smem:[#allocation3 + $0x89]] }
 0x3b1   : > { %9760 = vrot.lane.b32.xlu1 %v9755_v38, %s15721_s27  ;;  %v6697_v37 = vadd.f32 %v14549_v63, %v6611_v52  ;;  %v11611_v36 = vpop.f32.mrf.mxu1  ;;  %v6160_v63 = vadd.f32 %v14472_v16, %v6072_v3  ;;  %v6246_v41 = vadd.f32 %v14474_v28, %v6166_v21  ;;  %v7230_v13 = vadd.f32 %v14650_v55, %v7144_v50 }
 0x3b2   : > { %v14698_v47 = vpop.permute.xlu0 %9250  ;;  %v7586_v10 = vadd.f32 %v7585_v11, %v7502_v27  ;;  %v7677_v16 = vadd.f32 %v11611_v36, %v7593_v30  ;;  %v9891_v28 = vmul.f32 %v9889_v9, %v13145_v48  ;;  %v9890_v32 = vmul.f32 %v9889_v9, %v13149_v58 }
 0x3b3   : > { %v14701_v20 = vpop.permute.xlu1 %9280  ;;  %v6777_v2 = vadd.f32 %v14564_v24, %v6697_v37  ;;  %v7668_v42 = vpop.f32.mrf.mxu1  ;;  %v6240_v24 = vadd.f32 %v14487_v49, %v6160_v63  ;;  %v9903_v55 = vstv %s14730_s29  ;;  %v6771_v12 = vadd.f32 %v14579_v57, %v6691_v14  ;;  %s10434_s29 = sld [smem:[#allocation3 + $0x8d]] }
 0x3b4   : > { %15957 = vst [vmem:[#allocation167_spill] sm:$0xff] %v14701_v20  ;;  %9758 = vrot.lane.b32.xlu0 %v9754_v60, %s15721_s27  ;;  %v9815_v60 = vstv %s14688_s14  ;;  %v7310_v3 = vadd.f32 %v14667_v34, %v7230_v13  ;;  %v11850_v50 = vmov 0.0   ;;  %v9830_v34 = vmul.f32 %v9829_v53, %v13149_v58  ;;  %s14786_s14 = sld [smem:[#allocation3 + $0x88]] }
 0x3b5   : > { %9774 = vrot.lane.b32.xlu1 %v9769_v44, %s15729_s21  ;;  %v9817_v44 = vmul.f32 %v9815_v60, %v13145_v48  ;;  %v9816_v15 = vmul.f32 %v9815_v60, %v13149_v58  ;;  %v6781_v33 = vadd.f32 %v6777_v2, %v6246_v41  ;;  %391 = vst.msk [vmem:[#allocation2 + $0x8] sm:$0xff] %vm389_vm8, %v11850_v50  ;;  %390 = vst.msk [vmem:[#allocation2] sm:$0xff] %vm389_vm8, %v11850_v50 }
 0x3b6   : > { %v14719_v38 = vpop.permute.xlu0 %9278  ;;  %393 = vst.msk [vmem:[#allocation2 + $0x10] sm:$0xf] %vm392_vm12, %v11850_v50  ;;  %v6780_v57 = vadd.f32 %v6771_v12, %v6240_v24  ;;  %v9905_v27 = vmul.f32 %v9903_v55, %v13145_v48  ;;  %v9977_v41 = vstv %s14758_s28  ;;  %s11851_s28 = smov 2  }
 0x3b7   : > { %v14721_v54 = vpop.permute.xlu1 %9294  ;;  %v7314_v30 = vadd.f32 %v7310_v3, %v6781_v33  ;;  %v9979_v13 = vmul.f32 %v9977_v41, %v13145_v48 }
 0x3b8   : > { %15958 = vst [vmem:[#allocation168_spill] sm:$0xff] %v14721_v54  ;;  %9772 = vrot.lane.b32.xlu0 %v9768_v7, %s15729_s21  ;;  %v7136_v7 = vadd.f32 %v14648_v17, %v7053_v23  ;;  %v9831_v17 = vmul.f32 %v9829_v53, %v13145_v48  ;;  %v11629_v23 = vpop.f32.mrf.mxu1  ;;  %v9904_v53 = vmul.f32 %v9903_v55, %v13149_v58 }
 0x3b9   : > { %9808 = vrot.lane.b32.xlu1 %v9803_v22, %s11845_s23  ;;  %v11620_v22 = vpop.f32.mrf.mxu0 }
 0x3ba   : > { %v14736_v29 = vpop.permute.xlu0 %9292  ;;  %v7224_v60 = vadd.f32 %v14665_v4, %v7136_v7  ;;  %v7763_v8 = vadd.f32 %v11620_v22, %v7677_v16  ;;  %v7836_v63 = vpop.f32.mrf.mxu1 }
 0x3bb   : > { %v14738_v59 = vpop.permute.xlu1 %9308  ;;  %v7756_v49 = vpop.f32.mrf.mxu0 }
 0x3bc   : > { %15959 = vst [vmem:[#allocation169_spill] sm:$0xff] %v14738_v59  ;;  %9806 = vrot.lane.b32.xlu0 %v9802_v19, %s11845_s23  ;;  %v7669_v19 = vadd.f32 %v7668_v42, %v7586_v10  ;;  %v7843_v36 = vadd.f32 %v11629_v23, %v7763_v8  ;;  %v10270_v10 = vld [vmem:[%s15966_s5] ss:$0 sm:$0xff]  ;;  %v9991_v23 = vstv %s10440_s16  ;;  %s10417_s16 = sld [smem:[#allocation3 + $0x7e]]  ;;  %s15999_s5 = smov 124  }
 0x3bd   : > { %9822 = vrot.lane.b32.xlu1 %v9817_v44, %s11846_s24  ;;  %v7304_v44 = vadd.f32 %v14684_v25, %v7224_v60  ;;  %v9917_v60 = vstv %s10434_s29  ;;  %s10410_s29 = sld [smem:[#allocation3 + $0x78]] }
 0x3be   : > { %v14752_v52 = vpop.permute.xlu0 %9306  ;;  %v7757_v11 = vadd.f32 %v7756_v49, %v7669_v19  ;;  %v7847_v2 = vadd.f32 %v7843_v36, %v7314_v30  ;;  %v9918_v19 = vmul.f32 %v9917_v60, %v13149_v58  ;;  %v9857_v30 = vstv %s10429_s17  ;;  %s10416_s17 = sld [smem:[#allocation6 + $0x15]] }
 0x3bf   : > { %v14754_v0 = vpop.permute.xlu1 %9322  ;;  %v7313_v14 = vadd.f32 %v7304_v44, %v6780_v57  ;;  %v9992_v57 = vmul.f32 %v9991_v23, %v13149_v58 }
 0x3c0   : > { %15960 = vst [vmem:[#allocation170_spill] sm:$0xff] %v14754_v0  ;;  %9820 = vrot.lane.b32.xlu0 %v9816_v15, %s11846_s24  ;;  %v7837_v25 = vadd.f32 %v7836_v63, %v7757_v11  ;;  %v7856_v42 = vadd.f32 %v10270_v10, %v7847_v2  ;;  %v9858_v11 = vmul.f32 %v9857_v30, %v13149_v58 }
 0x3c1   : > { %9896 = vrot.lane.b32.xlu1 %v9891_v28, %s11845_s23  ;;  %v9978_v28 = vmul.f32 %v9977_v41, %v13149_v58  ;;  %v9993_v63 = vmul.f32 %v9991_v23, %v13145_v48 }
 0x3c2   : > { %v14768_v21 = vpop.permute.xlu0 %9320  ;;  %v7846_v22 = vadd.f32 %v7837_v25, %v7313_v14  ;;  %v9859_v25 = vmul.f32 %v9857_v30, %v13145_v48 }
 0x3c3   : > { %15961 = vst [vmem:[#allocation171_spill] sm:$0xff] %v14768_v21  ;;  %v14770_v37 = vpop.permute.xlu1 %9336 }
 0x3c4   : > { %15962 = vst [vmem:[#allocation172_spill] sm:$0xff] %v14770_v37  ;;  %9894 = vrot.lane.b32.xlu0 %v9890_v32, %s11845_s23  ;;  %v9843_v32 = vstv %s14786_s14  ;;  %v7855_v33 = vadd.f32 %v10270_v10, %v7846_v22  ;;  %s10403_s14 = sld [smem:[#allocation3 + $0x72]] }
 0x3c5   : > { %9836 = vrot.lane.b32.xlu1 %v9831_v17, %s11847_s26  ;;  %v9844_v55 = vmul.f32 %v9843_v32, %v13149_v58  ;;  %v9845_v49 = vmul.f32 %v9843_v32, %v13145_v48 }
 0x3c6   : > { %v14776_v4 = vpop.permute.xlu0 %9334 }
 0x3c7   : > { %15963 = vst [vmem:[#allocation173_spill] sm:$0xff] %v14776_v4  ;;  %v14781_v9 = vpop.permute.xlu1 %9370 }
 0x3c8   : > { %15964 = vst [vmem:[#allocation174_spill] sm:$0xff] %v14781_v9  ;;  %9834 = vrot.lane.b32.xlu0 %v9830_v34, %s11847_s26 }
 0x3c9   : > { %9910 = vrot.lane.b32.xlu1 %v9905_v27, %s11846_s24  ;;  %v9919_v27 = vmul.f32 %v9917_v60, %v13145_v48 }
 0x3ca   : > { %v14788_v15 = vpop.permute.xlu0 %9368  ;;  %v9533_v32 = vstv %s10403_s14  ;;  %s10424_s14 = sld [smem:[#allocation3 + $0x84]] }
 0x3cb   : > { %v14791_v7 = vpop.permute.xlu1 %9384  ;;  %v9535_v60 = vmul.f32 %v9533_v32, %v13145_v48 }
 0x3cc   : > { %15965 = vst [vmem:[#allocation175_spill] sm:$0xff] %v14791_v7  ;;  %9908 = vrot.lane.b32.xlu0 %v9904_v53, %s11846_s24 }
 0x3cd   : > { %9984 = vrot.lane.b32.xlu1 %v9979_v13, %s11845_s23 }
 0x3ce   : > { %v14799_v16 = vpop.permute.xlu0 %9382 }
 0x3cf   : > { %v14802_v24 = vpop.permute.xlu1 %9398 }
 0x3d0   : > { %15967 = vst [vmem:[#allocation176_spill] sm:$0xff] %v14802_v24  ;;  %9982 = vrot.lane.b32.xlu0 %v9978_v28, %s11845_s23  ;;  %s14820_s23 = sld [smem:[#allocation3 + $0x8e]] }
 0x3d1   : > { %7861 = vrot.lane.b32.xlu1 %v7856_v42, %s11851_s28 }
 0x3d2   : > { %v14806_v17 = vpop.permute.xlu0 %9396 }
 0x3d3   : > { %15968 = vst [vmem:[#allocation177_spill] sm:$0xff] %v14806_v17  ;;  %v14809_v12 = vpop.permute.xlu1 %9412 }
 0x3d4   : > { %15969 = vst [vmem:[#allocation178_spill] sm:$0xff] %v14809_v12  ;;  %9848 = vrot.lane.b32.xlu0 %v9844_v55, %s15721_s27  ;;  %v9621_v12 = vstv %s10410_s29  ;;  %s10431_s29 = sld [smem:[#allocation3 + $0x8a]] }
 0x3d5   : > { %7859 = vrot.lane.b32.xlu1 %v7855_v33, %s11851_s28  ;;  %v9534_v33 = vmul.f32 %v9533_v32, %v13149_v58  ;;  %s10409_s28 = sld [smem:[#allocation6 + $0x14]] }
 0x3d6   : > { %v14812_v3 = vpop.permute.xlu0 %9410  ;;  %v15720_v41 = vstv %s14820_s23 }
 0x3d7   : > { %15970 = vst [vmem:[#allocation179_spill] sm:$0xff] %v14812_v3  ;;  %v14815_v8 = vpop.permute.xlu1 %9426  ;;  %v9932_v14 = vmul.f32 %v15720_v41, %v13149_v58 }
 0x3d8   : > { %15971 = vst [vmem:[#allocation180_spill] sm:$0xff] %v14815_v8  ;;  %9922 = vrot.lane.b32.xlu0 %v9918_v19, %s11847_s26 }
 0x3d9   : > { %9850 = vrot.lane.b32.xlu1 %v9845_v49, %s15721_s27 }
 0x3da   : > { %v14822_v50 = vpop.permute.xlu0 %9424 }
 0x3db   : > { %15972 = vst [vmem:[#allocation181_spill] sm:$0xff] %v14822_v50  ;;  %v14825_v34 = vpop.permute.xlu1 %9458 }
 0x3dc   : > { %15973 = vst [vmem:[#allocation182_spill] sm:$0xff] %v14825_v34  ;;  %9996 = vrot.lane.b32.xlu0 %v9992_v57, %s11846_s24 }
 0x3dd   : > { %9924 = vrot.lane.b32.xlu1 %v9919_v27, %s11847_s26 }
 0x3de   : > { %v14830_v44 = vpop.permute.xlu0 %9456 }
 0x3df   : > { %v14833_v36 = vpop.permute.xlu1 %9472 }
 0x3e0   : > { %15974 = vst [vmem:[#allocation183_spill] sm:$0xff] %v14833_v36  ;;  %9862 = vrot.lane.b32.xlu0 %v9858_v11, %s15729_s21 }
 0x3e1   : > { %9998 = vrot.lane.b32.xlu1 %v9993_v63, %s11846_s24  ;;  %s10402_s24 = sld [smem:[#allocation6 + $0x13]] }
 0x3e2   : > { %v14839_v53 = vpop.permute.xlu0 %9470 }
 0x3e3   : > { %15975 = vst [vmem:[#allocation184_spill] sm:$0xff] %v14839_v53  ;;  %v14844_v2 = vpop.permute.xlu1 %9486 }
 0x3e4   : > { %15976 = vst [vmem:[#allocation185_spill] sm:$0xff] %v14844_v2  ;;  %9936 = vrot.lane.b32.xlu0 %v9932_v14, %s15721_s27  ;;  %s14938_s27 = sld [smem:[#allocation3 + $0x94]] }
 0x3e5   : > { %9864 = vrot.lane.b32.xlu1 %v9859_v25, %s15729_s21 }
 0x3e6   : > { %v14849_v13 = vpop.permute.xlu0 %9484 }
 0x3e7   : > { %15977 = vst [vmem:[#allocation186_spill] sm:$0xff] %v14849_v13  ;;  %v14851_v10 = vpop.permute.xlu1 %9500  ;;  %v9531_v49 = vstv %s10402_s24  ;;  %s10423_s24 = sld [smem:[#allocation6 + $0x16]] }
 0x3e8   : > { %15978 = vst [vmem:[#allocation187_spill] sm:$0xff] %v14851_v10  ;;  %v9536_v57 = vadd.f32 %v9534_v33, %v9531_v49  ;;  %v9537_v27 = vadd.f32 %v9535_v60, %v9531_v49  ;;  %v9623_v33 = vmul.f32 %v9621_v12, %v13145_v48  ;;  %v9619_v60 = vstv %s10409_s28  ;;  %s10430_s28 = sld [smem:[#allocation6 + $0x17]] }
 0x3ea   : > { %v14853_v28 = vpop.permute.xlu0 %9498 }
 0x3eb   : > { %15979 = vst [vmem:[#allocation188_spill] sm:$0xff] %v14853_v28  ;;  %v14855_v42 = vpop.permute.xlu1 %9514 }
 0x3ec   : > { %15980 = vst [vmem:[#allocation189_spill] sm:$0xff] %v14855_v42 }
 0x3ee   : > { %v14857_v22 = vpop.permute.xlu0 %9512 }
 0x3ef   : > { %15981 = vst [vmem:[#allocation190_spill] sm:$0xff] %v14857_v22  ;;  %v9547_v55 = vpop.permute.xlu1 %9546 }
 0x3f0   : > { %v9551_v14 = vadd.f32 %v9547_v55, %v9537_v27 }
 0x3f2   : > { %v9545_v19 = vpop.permute.xlu0 %9544 }
 0x3f3   : > { %v9561_v23 = vpop.permute.xlu1 %9560  ;;  %v9550_v11 = vadd.f32 %v9545_v19, %v9536_v57  ;;  %v9625_v57 = vadd.f32 %v9623_v33, %v9619_v60 }
 0x3f4   : > { %v9565_v41 = vadd.f32 %v9561_v23, %v9551_v14  ;;  %v9622_v23 = vmul.f32 %v9621_v12, %v13149_v58 }
 0x3f6   : > { %v9559_v30 = vpop.permute.xlu0 %9558 }
 0x3f7   : > { %v9575_v63 = vpop.permute.xlu1 %9574  ;;  %v9564_v25 = vadd.f32 %v9559_v30, %v9550_v11 }
 0x3f8   : > { %v9579_v2 = vadd.f32 %v9575_v63, %v9565_v41  ;;  %v9624_v41 = vadd.f32 %v9622_v23, %v9619_v60  ;;  %v9703_v23 = vstv %s10416_s17  ;;  %s10437_s17 = sld [smem:[#allocation6 + $0x18]] }
 0x3fa   : > { %v9573_v42 = vpop.permute.xlu0 %9572 }
 0x3fb   : > { %v9578_v8 = vadd.f32 %v9573_v42, %v9564_v25  ;;  %v9589_v10 = vpop.permute.xlu1 %9588 }
 0x3fc   : > { %v9593_v37 = vadd.f32 %v9589_v10, %v9579_v2 }
 0x3fe   : > { %v9587_v32 = vpop.permute.xlu0 %9586 }
 0x3ff   : > { %v9592_v22 = vadd.f32 %v9587_v32, %v9578_v8  ;;  %v9603_v36 = vpop.permute.xlu1 %9602  ;;  %v9705_v32 = vstv %s10417_s16  ;;  %s10438_s16 = sld [smem:[#allocation3 + $0x90]] }
 0x400   : > { %v14861_v24 = vadd.f32 %v9603_v36, %v9593_v37  ;;  %v9707_v60 = vmul.f32 %v9705_v32, %v13145_v48 }
 0x402   : > { %15982 = vst [vmem:[#allocation191_spill] sm:$0xff] %v14861_v24  ;;  %v9601_v19 = vpop.permute.xlu0 %9600 }
 0x403   : > { %v14864_v49 = vadd.f32 %v9601_v19, %v9592_v22  ;;  %v9635_v55 = vpop.permute.xlu1 %9634 }
 0x404   : > { %v9639_v42 = vadd.f32 %v9635_v55, %v9625_v57 }
 0x405   : > { %15983 = vst [vmem:[#allocation192_spill] sm:$0xff] %v14864_v49 }
 0x406   : > { %v9633_v27 = vpop.permute.xlu0 %9632 }
 0x407   : > { %v9649_v30 = vpop.permute.xlu1 %9648  ;;  %v9638_v10 = vadd.f32 %v9633_v27, %v9624_v41  ;;  %v9706_v41 = vmul.f32 %v9705_v32, %v13149_v58 }
 0x408   : > { %v9653_v2 = vadd.f32 %v9649_v30, %v9639_v42  ;;  %v9709_v30 = vadd.f32 %v9707_v60, %v9703_v23 }
 0x40a   : > { %v9647_v8 = vpop.permute.xlu0 %9646 }
 0x40b   : > { %v9652_v37 = vadd.f32 %v9647_v8, %v9638_v10  ;;  %v9663_v36 = vpop.permute.xlu1 %9662  ;;  %v9708_v8 = vadd.f32 %v9706_v41, %v9703_v23  ;;  %v9793_v41 = vstv %s10423_s24  ;;  %s15731_s24 = smov 126  }
 0x40c   : > { %v9667_v11 = vadd.f32 %v9663_v36, %v9653_v2 }
 0x40e   : > { %v9661_v63 = vpop.permute.xlu0 %9660 }
 0x40f   : > { %v9666_v14 = vadd.f32 %v9661_v63, %v9652_v37  ;;  %v9677_v22 = vpop.permute.xlu1 %9676 }
 0x410   : > { %v9681_v25 = vadd.f32 %v9677_v22, %v9667_v11 }
 0x412   : > { %v9675_v19 = vpop.permute.xlu0 %9674 }
 0x413   : > { %v9680_v12 = vadd.f32 %v9675_v19, %v9666_v14  ;;  %v9691_v33 = vpop.permute.xlu1 %9690 }
 0x414   : > { %v14867_v55 = vadd.f32 %v9691_v33, %v9681_v25 }
 0x416   : > { %15984 = vst [vmem:[#allocation193_spill] sm:$0xff] %v14867_v55  ;;  %v9689_v57 = vpop.permute.xlu0 %9688  ;;  %v9795_v55 = vstv %s10424_s14  ;;  %s15725_s14 = smov 127  }
 0x417   : > { %v14870_v42 = vadd.f32 %v9689_v57, %v9680_v12  ;;  %v9719_v27 = vpop.permute.xlu1 %9718  ;;  %v9797_v23 = vmul.f32 %v9795_v55, %v13145_v48 }
 0x418   : > { %v9723_v2 = vadd.f32 %v9719_v27, %v9709_v30 }
 0x419   : > { %15985 = vst [vmem:[#allocation194_spill] sm:$0xff] %v14870_v42 }
 0x41a   : > { %v9717_v10 = vpop.permute.xlu0 %9716 }
 0x41b   : > { %v9733_v37 = vpop.permute.xlu1 %9732  ;;  %v9722_v11 = vadd.f32 %v9717_v10, %v9708_v8  ;;  %v9796_v8 = vmul.f32 %v9795_v55, %v13149_v58 }
 0x41c   : > { %v9737_v36 = vadd.f32 %v9733_v37, %v9723_v2  ;;  %v9799_v37 = vadd.f32 %v9797_v23, %v9793_v41 }
 0x41e   : > { %v9731_v63 = vpop.permute.xlu0 %9730 }
 0x41f   : > { %v9736_v14 = vadd.f32 %v9731_v63, %v9722_v11  ;;  %v9747_v22 = vpop.permute.xlu1 %9746  ;;  %v9798_v63 = vadd.f32 %v9796_v8, %v9793_v41 }
 0x420   : > { %v9751_v25 = vadd.f32 %v9747_v22, %v9737_v36 }
 0x422   : > { %v9745_v19 = vpop.permute.xlu0 %9744 }
 0x423   : > { %v9750_v33 = vadd.f32 %v9745_v19, %v9736_v14  ;;  %v9761_v12 = vpop.permute.xlu1 %9760 }
 0x424   : > { %v9765_v57 = vadd.f32 %v9761_v12, %v9751_v25  ;;  %v9883_v25 = vstv %s10431_s29  ;;  %s15723_s29 = smov 125  }
 0x426   : > { %v9759_v24 = vpop.permute.xlu0 %9758 }
 0x427   : > { %v9764_v32 = vadd.f32 %v9759_v24, %v9750_v33  ;;  %v9775_v60 = vpop.permute.xlu1 %9774 }
 0x428   : > { %v14873_v27 = vadd.f32 %v9775_v60, %v9765_v57  ;;  %v9885_v57 = vmul.f32 %v9883_v25, %v13145_v48  ;;  %v9881_v60 = vstv %s10430_s28  ;;  %s15727_s28 = smov 124  }
 0x42a   : > { %15986 = vst [vmem:[#allocation195_spill] sm:$0xff] %v14873_v27  ;;  %v9773_v30 = vpop.permute.xlu0 %9772  ;;  %v9887_v55 = vadd.f32 %v9885_v57, %v9881_v60 }
 0x42b   : > { %v14876_v2 = vadd.f32 %v9773_v30, %v9764_v32  ;;  %v9809_v10 = vpop.permute.xlu1 %9808  ;;  %v9884_v30 = vmul.f32 %v9883_v25, %v13149_v58  ;;  %v9971_v25 = vstv %s10438_s16  ;;  %s14924_s16 = sld [smem:[#allocation3 + $0x93]] }
 0x42c   : > { %v9813_v36 = vadd.f32 %v9809_v10, %v9799_v37 }
 0x42d   : > { %15987 = vst [vmem:[#allocation196_spill] sm:$0xff] %v14876_v2  ;;  %v9886_v37 = vadd.f32 %v9884_v30, %v9881_v60 }
 0x42e   : > { %v9807_v11 = vpop.permute.xlu0 %9806 }
 0x42f   : > { %v9823_v14 = vpop.permute.xlu1 %9822  ;;  %v9812_v22 = vadd.f32 %v9807_v11, %v9798_v63 }
 0x430   : > { %v9827_v24 = vadd.f32 %v9823_v14, %v9813_v36 }
 0x432   : > { %v9821_v19 = vpop.permute.xlu0 %9820 }
 0x433   : > { %v9826_v33 = vadd.f32 %v9821_v19, %v9812_v22  ;;  %v9897_v12 = vpop.permute.xlu1 %9896 }
 0x434   : > { %v9901_v2 = vadd.f32 %v9897_v12, %v9887_v55  ;;  %v9973_v55 = vmul.f32 %v9971_v25, %v13145_v48 }
 0x436   : > { %v9895_v32 = vpop.permute.xlu0 %9894 }
 0x437   : > { %v9837_v27 = vpop.permute.xlu1 %9836  ;;  %v9900_v11 = vadd.f32 %v9895_v32, %v9886_v37 }
 0x438   : > { %v9841_v23 = vadd.f32 %v9837_v27, %v9827_v24  ;;  %v9972_v27 = vmul.f32 %v9971_v25, %v13149_v58 }
 0x43a   : > { %v9835_v10 = vpop.permute.xlu0 %9834 }
 0x43b   : > { %v9840_v41 = vadd.f32 %v9835_v10, %v9826_v33  ;;  %v9911_v8 = vpop.permute.xlu1 %9910  ;;  %v9969_v33 = vstv %s10437_s17  ;;  %s14929_s17 = sld [smem:[#allocation3 + $0x8f]] }
 0x43c   : > { %v9915_v36 = vadd.f32 %v9911_v8, %v9901_v2  ;;  %v9974_v2 = vadd.f32 %v9972_v27, %v9969_v33 }
 0x43e   : > { %v9909_v63 = vpop.permute.xlu0 %9908 }
 0x43f   : > { %v9914_v14 = vadd.f32 %v9909_v63, %v9900_v11  ;;  %v9985_v22 = vpop.permute.xlu1 %9984  ;;  %v9975_v11 = vadd.f32 %v9973_v55, %v9969_v33  ;;  %v10019_v55 = vstv %s14938_s27  ;;  %s15996_s27 = smov 127  }
 0x442   : > { %v9983_v19 = vpop.permute.xlu0 %9982 }
 0x443   : > { %v7862_v42 = vpop.permute.xlu1 %7861 }
 0x444   : > { %7867 = vst.msk [vmem:[#allocation2 + $0xa] sm:$0xff] %vm7865_vm13, %v7862_v42  ;;  %v9988_v42 = vadd.f32 %v9983_v19, %v9974_v2  ;;  %v9945_v2 = vstv %s14929_s17  ;;  %s14994_s17 = sld [smem:[#allocation3]] }
 0x446   : > { %v9849_v49 = vpop.permute.xlu0 %9848 }
 0x447   : > { %v9854_v24 = vadd.f32 %v9849_v49, %v9840_v41  ;;  %v7860_v12 = vpop.permute.xlu1 %7859 }
 0x448   : > { %7866 = vst.msk [vmem:[#allocation2 + $0x2] sm:$0xff] %vm7865_vm13, %v7860_v12  ;;  %v10005_v12 = vstv %s14924_s16  ;;  %s15994_s16 = smov 125  }
 0x449   : > { %v10006_v33 = vmul.f32 %v10005_v12, %v13149_v58 }
 0x44a   : > { %v9923_v57 = vpop.permute.xlu0 %9922 }
 0x44b   : > { %v14882_v60 = vadd.f32 %v9923_v57, %v9914_v14  ;;  %v9851_v32 = vpop.permute.xlu1 %9850  ;;  %v14884_v30 = vld [vmem:[#allocation2 + $0xa] sm:$0xff] }
 0x44c   : > { %v14887_v10 = vadd.f32 %v9851_v32, %v9841_v23  ;;  %8908 = vrot.lane.b32.xlu1 %v14884_v30, %s15725_s14  ;;  %v9989_v23 = vadd.f32 %v9985_v22, %v9975_v11  ;;  %v9946_v32 = vmul.f32 %v9945_v2, %v13149_v58 }
 0x44d   : > { %15988 = vst [vmem:[#allocation197_spill] sm:$0xff] %v14882_v60 }
 0x44e   : > { %15989 = vst [vmem:[#allocation198_spill] sm:$0xff] %v14887_v10  ;;  %v9997_v49 = vpop.permute.xlu0 %9996 }
 0x44f   : > { %v14891_v37 = vadd.f32 %v9997_v49, %v9988_v42  ;;  %v9925_v41 = vpop.permute.xlu1 %9924  ;;  %v14893_v8 = vld [vmem:[#allocation2] sm:$0xff]  ;;  %v14941_v57 = vld [vmem:[#allocation2 + $0x8] sm:$0xff]  ;;  %v10020_v42 = vmul.f32 %v10019_v55, %v13149_v58 }
 0x450   : > { %v14895_v63 = vadd.f32 %v9925_v41, %v9915_v36  ;;  %8996 = vrot.lane.b32.xlu1 %v14884_v30, %s15731_s24  ;;  %8030 = vrot.lane.b32.xlu0 %v14893_v8, %s15725_s14  ;;  %v9259_v36 = vld [vmem:[#allocation2 + $0xb] sm:$0xff]  ;;  %v14916_v22 = vld [vmem:[#allocation2 + $0x1] sm:$0xff] }
 0x451   : > { %15990 = vst [vmem:[#allocation199_spill] sm:$0xff] %v14891_v37  ;;  %v14963_v11 = vld [vmem:[#allocation2 + $0x9] sm:$0xff] }
 0x452   : > { %15991 = vst [vmem:[#allocation200_spill] sm:$0xff] %v14895_v63  ;;  %v9863_v14 = vpop.permute.xlu0 %9862 }
 0x453   : > { %v14901_v25 = vadd.f32 %v9863_v14, %v9854_v24  ;;  %v9999_v19 = vpop.permute.xlu1 %9998  ;;  %v14931_v24 = vld [vmem:[#allocation2 + $0xc] sm:$0xff]  ;;  %v15997_v14 = vstv %s14820_s23  ;;  %s14999_s23 = sld [smem:[#allocation6 + $0x1]] }
 0x454   : > { %v14903_v27 = vadd.f32 %v9999_v19, %v9989_v23  ;;  %9084 = vrot.lane.b32.xlu1 %v14884_v30, %s15723_s29  ;;  %8118 = vrot.lane.b32.xlu0 %v14893_v8, %s15731_s24  ;;  %v14965_v23 = vld [vmem:[#allocation2 + $0x2] sm:$0xff]  ;;  %v9933_v19 = vmul.f32 %v15997_v14, %v13145_v48 }
 0x455   : > { %15992 = vst [vmem:[#allocation201_spill] sm:$0xff] %v14901_v25 }
 0x456   : > { %15993 = vst [vmem:[#allocation202_spill] sm:$0xff] %v14903_v27 }
 0x458   : > { %9172 = vrot.lane.b32.xlu1 %v14884_v30, %s15727_s28  ;;  %8206 = vrot.lane.b32.xlu0 %v14893_v8, %s15723_s29 }
 0x45c   : > { %9346 = vrot.lane.b32.xlu1 %v9259_v36, %s15725_s14  ;;  %8294 = vrot.lane.b32.xlu0 %v14893_v8, %s15727_s28 }
 0x460   : > { %9434 = vrot.lane.b32.xlu1 %v9259_v36, %s15731_s24  ;;  %8468 = vrot.lane.b32.xlu0 %v14916_v22, %s15725_s14 }
 0x464   : > { %9522 = vrot.lane.b32.xlu1 %v9259_v36, %s15723_s29  ;;  %8556 = vrot.lane.b32.xlu0 %v14916_v22, %s15731_s24 }
 0x468   : > { %9610 = vrot.lane.b32.xlu1 %v9259_v36, %s15727_s28  ;;  %8644 = vrot.lane.b32.xlu0 %v14916_v22, %s15723_s29  ;;  %s14947_s29 = sld [smem:[#allocation3 + $0x95]]  ;;  %v14986_v36 = vld [vmem:[#allocation2 + $0x3] sm:$0xff] }
 0x46c   : > { %9784 = vrot.lane.b32.xlu1 %v14931_v24, %s15725_s14  ;;  %8732 = vrot.lane.b32.xlu0 %v14916_v22, %s15727_s28 }
 0x46e   : > { %v10033_v49 = vstv %s14947_s29  ;;  %s14992_s29 = sld [smem:[#allocation6]] }
 0x46f   : > { %v10034_v41 = vmul.f32 %v10033_v49, %v13149_v58 }
 0x470   : > { %8032 = vrot.lane.b32.xlu1 %v14941_v57, %s15725_s14  ;;  %10010 = vrot.lane.b32.xlu0 %v10006_v33, %s11847_s26  ;;  %s15995_s14 = smov 64   ;;  %v10007_v33 = vmul.f32 %v10005_v12, %v13145_v48  ;;  %v9947_v12 = vmul.f32 %v9945_v2, %v13145_v48  ;;  %v15031_v2 = vld [vmem:[#allocation2 + $0x4] sm:$0xff] }
 0x471   : > { %16000 = vst [vmem:[#allocation203_spill] sm:$0xff] %v15031_v2 }
 0x474   : > { %8120 = vrot.lane.b32.xlu1 %v14941_v57, %s15731_s24  ;;  %9950 = vrot.lane.b32.xlu0 %v9946_v32, %s15729_s21  ;;  %v10021_v32 = vmul.f32 %v10019_v55, %v13145_v48  ;;  %v10035_v55 = vmul.f32 %v10033_v49, %v13145_v48 }
 0x478   : > { %8208 = vrot.lane.b32.xlu1 %v14941_v57, %s15994_s16  ;;  %10024 = vrot.lane.b32.xlu0 %v10020_v42, %s15995_s14 }
 0x47c   : > { %8296 = vrot.lane.b32.xlu1 %v14941_v57, %s15727_s28  ;;  %10038 = vrot.lane.b32.xlu0 %v10034_v41, %s15729_s21  ;;  %s15003_s21 = sld [smem:[#allocation6 + $0x2]] }
 0x480   : > { %8470 = vrot.lane.b32.xlu1 %v14963_v11, %s15996_s27  ;;  %8906 = vrot.lane.b32.xlu0 %v14965_v23, %s15996_s27 }
 0x484   : > { %8558 = vrot.lane.b32.xlu1 %v14963_v11, %s15731_s24  ;;  %8994 = vrot.lane.b32.xlu0 %v14965_v23, %s15731_s24 }
 0x488   : > { %8646 = vrot.lane.b32.xlu1 %v14963_v11, %s15994_s16  ;;  %9082 = vrot.lane.b32.xlu0 %v14965_v23, %s15994_s16 }
 0x48c   : > { %8734 = vrot.lane.b32.xlu1 %v14963_v11, %s15727_s28  ;;  %9170 = vrot.lane.b32.xlu0 %v14965_v23, %s15727_s28  ;;  %s15001_s28 = sld [smem:[#allocation3 + $0x6]] }
 0x490   : > { %9938 = vrot.lane.b32.xlu1 %v9933_v19, %s15995_s14  ;;  %9344 = vrot.lane.b32.xlu0 %v14986_v36, %s15996_s27 }
 0x494   : > { %10012 = vrot.lane.b32.xlu1 %v10007_v33, %s11847_s26  ;;  %9432 = vrot.lane.b32.xlu0 %v14986_v36, %s15731_s24  ;;  %s15013_s26 = sld [smem:[#allocation3 + $0x12]] }
 0x498   : > { %9872 = vrot.lane.b32.xlu1 %v14931_v24, %s15731_s24  ;;  %9520 = vrot.lane.b32.xlu0 %v14986_v36, %s15994_s16  ;;  %s15023_s24 = sld [smem:[#allocation6 + $0x5]] }
 0x49c   : > { %9952 = vrot.lane.b32.xlu1 %v9947_v12, %s15998_s4  ;;  %9608 = vrot.lane.b32.xlu0 %v14986_v36, %s15999_s5 }
 0x4a0   : > { %10026 = vrot.lane.b32.xlu1 %v10021_v32, %s15995_s14  ;;  %9782 = vrot.lane.b32.xlu0 %v15031_v2, %s15996_s27  ;;  %s15049_s14 = sld [smem:[#allocation6 + $0x8]] }
 0x4a4   : > { %9960 = vrot.lane.b32.xlu1 %v14931_v24, %s15994_s16  ;;  %9870 = vrot.lane.b32.xlu0 %v15031_v2, %s16004_s20  ;;  %s11748_s20 = scalar_lea.vmem %s11747_s11, 512 }
 0x4a5   : > { %p11750_p11 = scmp.lt.s32.totalorder %s11748_s20, %s11742_s10 }
 0x4a7   : > { %p11751_p13 = por %p11750_p11, %p11749_p8 }
 0x4a9   : > { %p11752_p1 = pnand %p11751_p13, %p11745_p7 }
 0x4ab   : > { %11755 = shalt.err (!%p11752_p1)
}
 0x4ac   : > { %s11756_s30 = scalar_lea.hbm %s15056_s12, 256  ;;  %s11760_s22 = scalar_lea.hbm %s15715_s9, 512 }
 0x4ad   : > { %p11757_p2 = scmp.ne.s32.totalorder %s15056_s12, %s11756_s30  ;;  %p11761_p9 = scmp.lt.s32.totalorder %s15056_s12, %s15715_s9 }
 0x4ae   : > { %p11762_p5 = scmp.lt.s32.totalorder %s11760_s22, %s11756_s30 }
 0x4af   : > { %p11758_p3 = pnand %p11757_p2, %p16005_p12 }
 0x4b0   : > { %p11763_p6 = por %p11762_p5, %p11761_p9 }
 0x4b1   : > { %p11759_p4 = pneg %p11758_p3 }
 0x4b3   : > { %p11764_p10 = pnand %p11763_p6, %p11759_p4 }
 0x4b5   : > { %11767 = shalt.err (!%p11764_p10)
}
 0x4b6   : > { %s15743_s10 = smov 128   ;;  %s15744_s11 = smov 8   ;;  %10040 = vrot.lane.b32.xlu1 %v10035_v55, %s15998_s4  ;;  %9958 = vrot.lane.b32.xlu0 %v15031_v2, %s15994_s16  ;;  %v7869_v42 = vstv %s14992_s29  ;;  %v7871_v49 = vstv %s14994_s17  ;;  %v16036_v54 = vld [vmem:[#allocation62_spill] sm:$0xff] }
 0x4b7   : > { %s16006_s15 = scalar_lea.sflag [#allocation10], %s13649_s25  ;;  %s15085_s8 = sld [smem:[#allocation3 + $0x30]]  ;;  %v7951_v41 = vstv %s14999_s23  ;;  %v8041_v14 = vstv %s15003_s21  ;;  %v8043_v19 = vstv %s15005_s0  ;;  %v8129_v33 = vstv %s15011_s1 }
 0x4b8   : > { %11640 = dma.vmem_to_hbm [thread:$0]  (%p16005_p12), %s15040_s7, 256, %s15056_s12, %s16006_s15, %s15743_s10, %s15743_s10, %s15744_s11   ;;  %v7873_v28 = vmul.f32 %v7871_v49, %v13145_v48  ;;  %v7872_v59 = vmul.f32 %v7871_v49, %v13149_v58  ;;  %v8045_v40 = vmul.f32 %v8043_v19, %v13145_v48  ;;  %v8044_v34 = vmul.f32 %v8043_v19, %v13149_v58 }
 0x4b9   : > { %s15087_s13 = sld [smem:[#allocation6 + $0x9]]  ;;  %v8131_v12 = vstv %s15013_s26  ;;  %v8217_v32 = vstv %s15016_s2  ;;  %v8219_v55 = vstv %s15018_s3  ;;  %v8305_v27 = vstv %s15023_s24  ;;  %s16257_s23 = sshll.u32 %s13649_s25, 4 }
 0x4ba   : > { %s15092_s20 = sld [smem:[#allocation3 + $0x36]]  ;;  %10048 = vrot.lane.b32.xlu1 %v14931_v24, %s15999_s5  ;;  %10046 = vrot.lane.b32.xlu0 %v15031_v2, %s15999_s5  ;;  %v7953_v24 = vstv %s15001_s28  ;;  %v8307_v37 = vstv %s15025_s6  ;;  %v8133_v50 = vmul.f32 %v8131_v12, %v13145_v48  ;;  %v8132_v13 = vmul.f32 %v8131_v12, %v13149_v58  ;;  %v15163_v12 = vpop.permute.xlu1 %9864  ;;  %s371_s26 = scalar_lea.vmem [#allocation8], %s16257_s23 }
 0x4bb   : > { %s15094_s30 = sld [smem:[#allocation6 + $0xa]]  ;;  %v7955_v10 = vmul.f32 %v7953_v24, %v13145_v48  ;;  %v7954_v2 = vmul.f32 %v7953_v24, %v13149_v58  ;;  %v8221_v4 = vmul.f32 %v8219_v55, %v13145_v48  ;;  %v8220_v49 = vmul.f32 %v8219_v55, %v13149_v58  ;;  %16010 = vst [vmem:[#allocation207_spill] sm:$0xff] %v15163_v12  ;;  %v16048_v12 = vld [vmem:[#allocation70_spill] sm:$0xff] }
 0x4bc   : > { %s15096_s27 = sld [smem:[#allocation3 + $0x3c]]  ;;  %v15153_v9 = vadd.f32 %v7873_v28, %v7869_v42  ;;  %v7874_v53 = vadd.f32 %v7872_v59, %v7869_v42  ;;  %v8309_v19 = vmul.f32 %v8307_v37, %v13145_v48  ;;  %v15165_v7 = vadd.f32 %v8045_v40, %v8041_v14 }
 0x4bd   : > { %s15098_s7 = sld [smem:[#allocation6 + $0xb]]  ;;  %v8569_v0 = vstv %s15085_s8  ;;  %v15158_v17 = vadd.f32 %v7955_v10, %v7951_v41  ;;  %v7956_v21 = vadd.f32 %v7954_v2, %v7951_v41  ;;  %v8046_v55 = vadd.f32 %v8044_v34, %v8041_v14  ;;  %v15186_v14 = vpop.permute.xlu0 %9936  ;;  %v16035_v34 = vld [vmem:[#allocation54_spill] sm:$0xff] }
 0x4be   : > { %s15104_s4 = sld [smem:[#allocation3 + $0x42]]  ;;  %v15167_v28 = vadd.f32 %v8133_v50, %v8129_v33  ;;  %v8308_v25 = vmul.f32 %v8307_v37, %v13149_v58  ;;  %v8134_v59 = vadd.f32 %v8132_v13, %v8129_v33  ;;  %v15172_v10 = vadd.f32 %v8221_v4, %v8217_v32  ;;  %16011 = vst [vmem:[#allocation208_spill] sm:$0xff] %v15186_v14 }
 0x4bf   : > { %s15106_s12 = sld [smem:[#allocation6 + $0xc]]  ;;  %v8222_v2 = vadd.f32 %v8220_v49, %v8217_v32  ;;  %v7970_v41 = vadd.f32 %v13854_v45, %v7956_v21  ;;  %v7888_v50 = vadd.f32 %v13730_v56, %v7874_v53  ;;  %v15182_v37 = vadd.f32 %v8309_v19, %v8305_v27  ;;  %v15188_v45 = vpop.permute.xlu1 %8908 }
 0x4c0   : > { %s15108_s16 = sld [smem:[#allocation3 + $0x48]]  ;;  %16012 = vst [vmem:[#allocation209_spill] sm:$0xff] %v15188_v45  ;;  %v8310_v33 = vadd.f32 %v8308_v25, %v8305_v27  ;;  %v8571_v56 = vmul.f32 %v8569_v0, %v13145_v48  ;;  %v8148_v32 = vadd.f32 %v13990_v5, %v8134_v59  ;;  %v8570_v19 = vmul.f32 %v8569_v0, %v13149_v58 }
 0x4c1   : > { %s16007_s22 = sld [smem:[#allocation204_spill]]  ;;  %v7984_v21 = vadd.f32 %v13867_v1, %v7970_v41  ;;  %v7902_v53 = vadd.f32 %v13760_v18, %v7888_v50 }
 0x4c2   : > { %s16008_s15 = sld [smem:[#allocation205_spill]]  ;;  %v8162_v59 = vadd.f32 %v13998_v46, %v8148_v32  ;;  %v8031_v50 = vpop.permute.xlu0 %8030 }
 0x4c3   : > { %s16009_s10 = sld [smem:[#allocation206_spill]]  ;;  %v7998_v1 = vadd.f32 %v13884_v26, %v7984_v21  ;;  %v7916_v5 = vadd.f32 %v13792_v31, %v7902_v53  ;;  %v16020_v53 = vstv %s15092_s20  ;;  %v16047_v21 = vld [vmem:[#allocation66_spill] sm:$0xff] }
 0x4c4   : > { %s15113_s11 = sld [smem:[#allocation6 + $0xd]]  ;;  %v8176_v46 = vadd.f32 %v14006_v62, %v8162_v59  ;;  %v8659_v32 = vmul.f32 %v16020_v53, %v13145_v48  ;;  %v16025_v62 = vld [vmem:[#allocation46_spill] sm:$0xff] }
 0x4c5   : > { %s15119_s5 = sld [smem:[#allocation3 + $0x4e]]  ;;  %v8012_v26 = vadd.f32 %v13901_v43, %v7998_v1  ;;  %v7930_v31 = vadd.f32 %v13816_v35, %v7916_v5  ;;  %v16021_v43 = vld [vmem:[#allocation37_spill] sm:$0xff]  ;;  %v16022_v1 = vld [vmem:[#allocation38_spill] sm:$0xff] }
 0x4c6   : > { %s15137_s0 = sld [smem:[#allocation6 + $0xe]]  ;;  %v16024_v35 = vld [vmem:[#allocation34_spill] sm:$0xff]  ;;  %v8190_v59 = vadd.f32 %v16025_v62, %v8176_v46 }
 0x4c7   : > { %v8391_v63 = vstv %s16007_s22  ;;  %s15143_s1 = sld [smem:[#allocation3 + $0x54]]  ;;  %v7944_v5 = vadd.f32 %v16024_v35, %v7930_v31  ;;  %v16031_v31 = vld [vmem:[#allocation60_spill] sm:$0xff] }
 0x4c8   : > { %s15161_s2 = sld [smem:[#allocation6 + $0xf]]  ;;  %v8393_v42 = vmul.f32 %v8391_v63, %v13145_v48  ;;  %v8392_v3 = vmul.f32 %v8391_v63, %v13149_v58  ;;  %v8060_v63 = vadd.f32 %v13937_v39, %v8046_v55  ;;  %v16015_v55 = vstv %s16008_s15  ;;  %v16032_v35 = vld [vmem:[#allocation48_spill] sm:$0xff] }
 0x4c9   : > { %v8481_v60 = vstv %s16009_s10  ;;  %s15170_s3 = sld [smem:[#allocation3 + $0x5a]]  ;;  %v8204_v62 = vadd.f32 %v16032_v35, %v8190_v59 }
 0x4ca   : > { %v8483_v40 = vmul.f32 %v8481_v60, %v13145_v48  ;;  %s15179_s6 = sld [smem:[#allocation6 + $0x10]]  ;;  %v8482_v4 = vmul.f32 %v8481_v60, %v13149_v58  ;;  %v16013_v60 = vstv %s15029_s18  ;;  %v8074_v39 = vadd.f32 %v13954_v61, %v8060_v63 }
 0x4cb   : > { %v15197_v49 = vadd.f32 %v8393_v42, %v16013_v60  ;;  %s15200_s21 = sld [smem:[#allocation3 + $0x60]]  ;;  %v16014_v25 = vmov %v16013_v60  ;;  %v16016_v42 = vmov %v16015_v55  ;;  %v15215_v60 = vpop.permute.xlu1 %8996 }
 0x4cc   : > { %v8394_v27 = vadd.f32 %v8392_v3, %v16014_v25  ;;  %v15208_v18 = vadd.f32 %v8483_v40, %v16015_v55  ;;  %v8484_v41 = vadd.f32 %v8482_v4, %v16016_v42  ;;  %16017 = vst [vmem:[#allocation210_spill] sm:$0xff] %v15215_v60  ;;  %v8088_v61 = vadd.f32 %v13965_v6, %v8074_v39  ;;  %s15224_s18 = sld [smem:[#allocation6 + $0x11]]  ;;  %v16023_v39 = vld [vmem:[#allocation50_spill] sm:$0xff] }
 0x4cd   : > { %v16018_v3 = vstv %s15049_s14  ;;  %s15233_s24 = sld [smem:[#allocation3 + $0x66]]  ;;  %v8026_v6 = vadd.f32 %v16021_v43, %v8012_v26  ;;  %v8236_v25 = vadd.f32 %v16023_v39, %v8222_v2  ;;  %v16030_v2 = vld [vmem:[#allocation52_spill] sm:$0xff]  ;;  %v8324_v39 = vadd.f32 %v16031_v31, %v8310_v33  ;;  %v16087_v60 = vld [vmem:[#allocation98_spill] sm:$0xff]  ;;  %s10077_s14 = sshll.u32 %s371_s26, 4  ;;  %s15654_s14 = int_to_ptr.vmem [resolvable:$true] %s10077_s14 }
 0x4ce   : > { %v15221_v40 = vadd.f32 %v8571_v56, %v16018_v3  ;;  %v16019_v4 = vmov %v16018_v3  ;;  %v8102_v56 = vadd.f32 %v16022_v1, %v8088_v61  ;;  %v16027_v3 = vstv %s15096_s27  ;;  %v16029_v61 = vld [vmem:[#allocation41_spill] sm:$0xff]  ;;  %s15262_s28 = sld [smem:[#allocation6 + $0x12]]  ;;  %s11768_s27 = scalar_lea.vmem %s15654_s14, 256 }
 0x4cf   : > { %v8572_v63 = vadd.f32 %v8570_v19, %v16019_v4  ;;  %v16026_v19 = vmov %v16020_v53  ;;  %v8747_v4 = vmul.f32 %v16027_v3, %v13145_v48  ;;  %v8119_v53 = vpop.permute.xlu0 %8118  ;;  %v15247_v26 = vpop.permute.xlu1 %9084  ;;  %v8250_v1 = vadd.f32 %v16030_v2, %v8236_v25  ;;  %s15278_s29 = sld [smem:[#allocation3 + $0x6c]]  ;;  %p11769_p0 = scmp.ne.s32.totalorder %s15654_s14, %s11768_s27 }
 0x4d0   : > { %v8658_v42 = vmul.f32 %v16026_v19, %v13149_v58  ;;  %16028 = vst [vmem:[#allocation37_spill] sm:$0xff] %v15247_v26  ;;  %v8116_v43 = vadd.f32 %v16029_v61, %v8102_v56  ;;  %v8036_v46 = vmul.f32 %v8031_v50, %v8026_v6  ;;  %v16033_v19 = vmov %v16027_v3  ;;  %s16256_s17 = sld [smem:[#allocation19_spill]] }
 0x4d1   : > { %v8746_v55 = vmul.f32 %v16033_v19, %v13149_v58  ;;  %v16034_v3 = vstv %s15104_s4  ;;  %v8264_v13 = vadd.f32 %v16035_v34, %v8250_v1  ;;  %v8338_v56 = vadd.f32 %v16036_v54, %v8324_v39  ;;  %p11770_p7 = pnand %p11769_p0, %p16005_p12 }
 0x4d2   : > { %v8831_v0 = vmul.f32 %v16034_v3, %v13145_v48  ;;  %v7948_v33 = vmul.f32 %v14893_v8, %v7944_v5  ;;  %v8124_v50 = vmul.f32 %v8119_v53, %v8116_v43  ;;  %v16037_v6 = vstv %s15087_s13  ;;  %v16042_v8 = vld [vmem:[#allocation56_spill] sm:$0xff]  ;;  %s16259_s13 = sld [smem:[#allocation219_spill]] }
 0x4d3   : > { %v15267_v25 = vadd.f32 %v8659_v32, %v16037_v6  ;;  %v16038_v59 = vmov %v16037_v6  ;;  %v16039_v2 = vstv %s15094_s30  ;;  %v16040_v34 = vmov %v16034_v3  ;;  %v8207_v54 = vpop.permute.xlu0 %8206  ;;  %v15280_v39 = vpop.permute.xlu1 %9172  ;;  %v16043_v32 = vld [vmem:[#allocation64_spill] sm:$0xff]  ;;  %v16060_v6 = vld [vmem:[#allocation74_spill] sm:$0xff]  ;;  %s10059_s30 = scalar_lea.sflag [#allocation4], %s13649_s25  ;;  %p11771_p8 = pneg %p11770_p7 }
 0x4d4   : > { %v8660_v61 = vadd.f32 %v8658_v42, %v16038_v59  ;;  %v15273_v31 = vadd.f32 %v8747_v4, %v16039_v2  ;;  %v8830_v1 = vmul.f32 %v16040_v34, %v13149_v58  ;;  %16041 = vst [vmem:[#allocation38_spill] sm:$0xff] %v15280_v39  ;;  %v8278_v5 = vadd.f32 %v16042_v8, %v8264_v13 }
 0x4d5   : > { %v8352_v53 = vadd.f32 %v16043_v32, %v8338_v56  ;;  %v8038_v43 = vadd.f32 %v8036_v46, %v7948_v33  ;;  %v8212_v42 = vmul.f32 %v8207_v54, %v8204_v62  ;;  %v16044_v35 = vmov %v16039_v2  ;;  %v16046_v2 = vld [vmem:[#allocation58_spill] sm:$0xff]  ;;  %v16049_v56 = vld [vmem:[#allocation80_spill] sm:$0xff] }
 0x4d6   : > { %v8748_v4 = vadd.f32 %v8746_v55, %v16044_v35  ;;  %v16045_v19 = vstv %s15098_s7  ;;  %v8292_v34 = vadd.f32 %v16046_v2, %v8278_v5  ;;  %v8408_v13 = vadd.f32 %v16048_v12, %v8394_v27  ;;  %v16055_v27 = vld [vmem:[#allocation72_spill] sm:$0xff]  ;;  %s16258_s10 = sshll.u32 %s16256_s17, 8  ;;  %s11859_s7 = smov [#allocation8]  }
 0x4d7   : > { %v15288_v3 = vadd.f32 %v8831_v0, %v16045_v19  ;;  %v8366_v24 = vadd.f32 %v16047_v21, %v8352_v53  ;;  %v8126_v8 = vadd.f32 %v8124_v50, %v8038_v43  ;;  %v8498_v46 = vadd.f32 %v16049_v56, %v8484_v41  ;;  %v8295_v5 = vpop.permute.xlu0 %8294  ;;  %v15306_v35 = vpop.permute.xlu1 %9346  ;;  %v16054_v21 = vld [vmem:[#allocation68_spill] sm:$0xff]  ;;  %s11772_s4 = sshll.u32 %s11859_s7, 4  ;;  %s11773_s4 = int_to_ptr.vmem [resolvable:$false] %s11772_s4 }
 0x4d8   : > { %v16050_v62 = vmov %v16045_v19  ;;  %v16051_v0 = vstv %s15108_s16  ;;  %16053 = vst [vmem:[#allocation50_spill] sm:$0xff] %v15306_v35  ;;  %v8422_v50 = vadd.f32 %v16055_v27, %v8408_v13  ;;  %v8300_v53 = vmul.f32 %v8295_v5, %v8292_v34  ;;  %s15661_s20 = scalar_lea.hbm %s16259_s13, %s16258_s10  ;;  %p11775_p11 = scmp.lt.s32.totalorder %s15654_s14, %s11773_s4 }
 0x4d9   : > { %v15298_v33 = vadd.f32 %v8830_v1, %v16050_v62  ;;  %v8921_v55 = vmul.f32 %v16051_v0, %v13145_v48  ;;  %v16052_v54 = vmov %v16051_v0  ;;  %v8380_v12 = vadd.f32 %v16054_v21, %v8366_v24  ;;  %v16056_v1 = vld [vmem:[#allocation82_spill] sm:$0xff] }
 0x4da   : > { %v8920_v32 = vmul.f32 %v16052_v54, %v13149_v58  ;;  %v8214_v41 = vadd.f32 %v8212_v42, %v8126_v8  ;;  %v8512_v43 = vadd.f32 %v16056_v1, %v8498_v46  ;;  %v16057_v19 = vstv %s15119_s5  ;;  %v16061_v24 = vld [vmem:[#allocation90_spill] sm:$0xff]  ;;  %v16062_v8 = vld [vmem:[#allocation84_spill] sm:$0xff] }
 0x4db   : > { %v9009_v2 = vmul.f32 %v16057_v19, %v13145_v48  ;;  %v16058_v56 = vmov %v16057_v19  ;;  %v16059_v0 = vstv %s15143_s1  ;;  %v8436_v59 = vadd.f32 %v16060_v6, %v8422_v50  ;;  %v8469_v19 = vpop.permute.xlu0 %8468  ;;  %v16065_v6 = vld [vmem:[#allocation76_spill] sm:$0xff] }
 0x4dc   : > { %v9008_v62 = vmul.f32 %v16058_v56, %v13149_v58  ;;  %v9097_v54 = vmul.f32 %v16059_v0, %v13145_v48  ;;  %v8586_v13 = vadd.f32 %v16061_v24, %v8572_v63  ;;  %v8302_v42 = vadd.f32 %v8300_v53, %v8214_v41  ;;  %v15330_v56 = vpop.permute.xlu1 %9434  ;;  %v16066_v50 = vld [vmem:[#allocation92_spill] sm:$0xff] }
 0x4dd   : > { %v8384_v34 = vmul.f32 %v14916_v22, %v8380_v12  ;;  %v8526_v46 = vadd.f32 %v16062_v8, %v8512_v43  ;;  %v16063_v5 = vstv %s15106_s12  ;;  %v9445_v1 = vstv %s15278_s29  ;;  %16064 = vst [vmem:[#allocation34_spill] sm:$0xff] %v15330_v56  ;;  %v16068_v43 = vld [vmem:[#allocation86_spill] sm:$0xff]  ;;  %s11774_s12 = scalar_lea.vmem %s11773_s4, 512 }
 0x4de   : > { %v15326_v21 = vadd.f32 %v8921_v55, %v16063_v5  ;;  %v8450_v63 = vadd.f32 %v16065_v6, %v8436_v59  ;;  %v8600_v41 = vadd.f32 %v16066_v50, %v8586_v13  ;;  %v16067_v53 = vmov %v16063_v5  ;;  %v16072_v56 = vld [vmem:[#allocation78_spill] sm:$0xff]  ;;  %p11776_p13 = scmp.lt.s32.totalorder %s11774_s12, %s11768_s27 }
 0x4df   : > { %v15336_v22 = vadd.f32 %v8920_v32, %v16067_v53  ;;  %v8386_v12 = vadd.f32 %v8384_v34, %v8302_v42  ;;  %v8540_v55 = vadd.f32 %v16068_v43, %v8526_v46  ;;  %v16069_v0 = vstv %s15113_s11  ;;  %v16073_v6 = vld [vmem:[#allocation94_spill] sm:$0xff]  ;;  %v16074_v32 = vld [vmem:[#allocation100_spill] sm:$0xff] }
 0x4e0   : > { %v15341_v24 = vadd.f32 %v9009_v2, %v16069_v0  ;;  %v16070_v8 = vmov %v16069_v0  ;;  %v16071_v27 = vstv %s15143_s1  ;;  %v8464_v59 = vadd.f32 %v16072_v56, %v8450_v63  ;;  %v16076_v2 = vld [vmem:[#allocation88_spill] sm:$0xff]  ;;  %v8557_v63 = vpop.permute.xlu0 %8556  ;;  %p11777_p1 = por %p11776_p13, %p11775_p11 }
 0x4e1   : > { %v15345_v5 = vadd.f32 %v9008_v62, %v16070_v8  ;;  %v9096_v14 = vmul.f32 %v16071_v27, %v13149_v58  ;;  %v8614_v13 = vadd.f32 %v16073_v6, %v8600_v41  ;;  %v8674_v42 = vadd.f32 %v16074_v32, %v8660_v61  ;;  %v15367_v41 = vpop.permute.xlu1 %9522  ;;  %v16081_v61 = vld [vmem:[#allocation96_spill] sm:$0xff]  ;;  %v16082_v8 = vld [vmem:[#allocation102_spill] sm:$0xff] }
 0x4e2   : > { %v16075_v34 = vstv %s15137_s0  ;;  %v8554_v50 = vadd.f32 %v16076_v2, %v8540_v55  ;;  %v16077_v62 = vstv %s15170_s3  ;;  %v16079_v0 = vstv %s15200_s21  ;;  %16080 = vst [vmem:[#allocation46_spill] sm:$0xff] %v15367_v41  ;;  %v16083_v55 = vld [vmem:[#allocation110_spill] sm:$0xff]  ;;  %v16084_v2 = vld [vmem:[#allocation25_spill] sm:$0xff]  ;;  %p11778_p2 = pnand %p11777_p1, %p11771_p8 }
 0x4e3   : > { %v15355_v46 = vadd.f32 %v9097_v54, %v16075_v34  ;;  %v9185_v53 = vmul.f32 %v16077_v62, %v13145_v48  ;;  %v16078_v43 = vmov %v16077_v62  ;;  %v9269_v56 = vmul.f32 %v16079_v0, %v13145_v48 }
 0x4e4   : > { %v9184_v27 = vmul.f32 %v16078_v43, %v13149_v58  ;;  %v8628_v54 = vadd.f32 %v16081_v61, %v8614_v13  ;;  %v8688_v6 = vadd.f32 %v16082_v8, %v8674_v42  ;;  %v8762_v32 = vadd.f32 %v16083_v55, %v8748_v4  ;;  %v16088_v61 = vld [vmem:[#allocation104_spill] sm:$0xff]  ;;  %v8645_v45 = vpop.permute.xlu0 %8644 }
 0x4e5   : > { %v8474_v34 = vmul.f32 %v8469_v19, %v8464_v59  ;;  %v7889_v62 = vadd.f32 %v16084_v2, %v15153_v9  ;;  %v16085_v43 = vstv %s15137_s0  ;;  %v9268_v39 = vmul.f32 %v16079_v0, %v13149_v58  ;;  %v16089_v4 = vld [vmem:[#allocation112_spill] sm:$0xff]  ;;  %v16090_v9 = vld [vmem:[#allocation31_spill] sm:$0xff] }
 0x4e6   : > { %v15376_v35 = vadd.f32 %v9096_v14, %v16085_v43  ;;  %v16086_v26 = vstv %s15233_s24  ;;  %v8642_v13 = vadd.f32 %v16087_v60, %v8628_v54  ;;  %v8702_v42 = vadd.f32 %v16088_v61, %v8688_v6  ;;  %v15400_v60 = vpop.permute.xlu1 %9610  ;;  %v16095_v54 = vld [vmem:[#allocation106_spill] sm:$0xff] }
 0x4e7   : > { %v9359_v41 = vmul.f32 %v16086_v26, %v13145_v48  ;;  %v8776_v19 = vadd.f32 %v16089_v4, %v8762_v32  ;;  %v8562_v59 = vmul.f32 %v8557_v63, %v8554_v50  ;;  %v7903_v8 = vadd.f32 %v16090_v9, %v7889_v62  ;;  %16094 = vst [vmem:[#allocation41_spill] sm:$0xff] %v15400_v60  ;;  %v16096_v61 = vld [vmem:[#allocation114_spill] sm:$0xff]  ;;  %v16097_v63 = vld [vmem:[#allocation24_spill] sm:$0xff] }
 0x4e8   : > { %v16091_v14 = vstv %s15161_s2  ;;  %v16093_v0 = vstv %s15179_s6  ;;  %v8716_v6 = vadd.f32 %v16095_v54, %v8702_v42  ;;  %v8476_v32 = vadd.f32 %v8474_v34, %v8386_v12  ;;  %v16102_v60 = vld [vmem:[#allocation108_spill] sm:$0xff]  ;;  %v16104_v34 = vld [vmem:[#allocation27_spill] sm:$0xff] }
 0x4e9   : > { %v15390_v55 = vadd.f32 %v9185_v53, %v16091_v14  ;;  %v16092_v2 = vmov %v16091_v14  ;;  %v15398_v26 = vadd.f32 %v9269_v56, %v16093_v0  ;;  %v8790_v20 = vadd.f32 %v16096_v61, %v8776_v19  ;;  %v16103_v54 = vld [vmem:[#allocation116_spill] sm:$0xff]  ;;  %v8733_v61 = vpop.permute.xlu0 %8732 }
 0x4ea   : > { %v15394_v43 = vadd.f32 %v9184_v27, %v16092_v2  ;;  %v8650_v50 = vmul.f32 %v8645_v45, %v8642_v13  ;;  %v7971_v62 = vadd.f32 %v16097_v63, %v15158_v17  ;;  %v16098_v53 = vmov %v16093_v0  ;;  %v16101_v2 = vld [vmem:[#allocation23_spill] sm:$0xff]  ;;  %v16105_v17 = vld [vmem:[#allocation30_spill] sm:$0xff]  ;;  %v15425_v63 = vpop.permute.xlu1 %9784 }
 0x4eb   : > { %v15408_v4 = vadd.f32 %v9268_v39, %v16098_v53  ;;  %v16099_v27 = vstv %s15224_s18  ;;  %v16100_v56 = vstv %s15233_s24  ;;  %v7917_v0 = vadd.f32 %v16101_v2, %v7903_v8  ;;  %16106 = vst [vmem:[#allocation52_spill] sm:$0xff] %v15425_v63  ;;  %v16107_v8 = vld [vmem:[#allocation42_spill] sm:$0xff]  ;;  %v16113_v2 = vld [vmem:[#allocation39_spill] sm:$0xff] }
 0x4ec   : > { %v15412_v9 = vadd.f32 %v9359_v41, %v16099_v27  ;;  %v9358_v14 = vmul.f32 %v16100_v56, %v13149_v58  ;;  %v8730_v42 = vadd.f32 %v16102_v60, %v8716_v6  ;;  %v8804_v12 = vadd.f32 %v16103_v54, %v8790_v20  ;;  %v16108_v6 = vld [vmem:[#allocation118_spill] sm:$0xff]  ;;  %v16110_v27 = vld [vmem:[#allocation28_spill] sm:$0xff] }
 0x4ed   : > { %v8564_v45 = vadd.f32 %v8562_v59, %v8476_v32  ;;  %v7985_v13 = vadd.f32 %v16104_v34, %v7971_v62  ;;  %v8061_v39 = vadd.f32 %v16105_v17, %v15165_v7  ;;  %v9447_v19 = vmul.f32 %v9445_v1, %v13145_v48  ;;  %v16109_v62 = vld [vmem:[#allocation26_spill] sm:$0xff]  ;;  %v16111_v48 = vld [vmem:[#allocation49_spill] sm:$0xff]  ;;  %v16114_v34 = vld [vmem:[#allocation43_spill] sm:$0xff] }
 0x4ee   : > { %v9446_v41 = vmul.f32 %v9445_v1, %v13149_v58  ;;  %v8149_v60 = vadd.f32 %v16107_v8, %v15167_v28  ;;  %v8818_v20 = vadd.f32 %v16108_v6, %v8804_v12  ;;  %v8738_v32 = vmul.f32 %v8733_v61, %v8730_v42  ;;  %v16115_v12 = vld [vmem:[#allocation51_spill] sm:$0xff]  ;;  %v8033_v8 = vpop.permute.xlu1 %8032 }
 0x4ef   : > { %v8652_v59 = vadd.f32 %v8650_v50, %v8564_v45  ;;  %v7931_v53 = vadd.f32 %v16109_v62, %v7917_v0  ;;  %v7999_v7 = vadd.f32 %v16110_v27, %v7985_v13  ;;  %v8237_v56 = vadd.f32 %v16111_v48, %v15172_v10  ;;  %v16116_v42 = vld [vmem:[#allocation59_spill] sm:$0xff]  ;;  %v16122_v62 = vld [vmem:[#allocation29_spill] sm:$0xff] }
 0x4f0   : > { %v16112_v58 = vstv %s15224_s18  ;;  %v8075_v54 = vadd.f32 %v16113_v2, %v8061_v39  ;;  %v8163_v17 = vadd.f32 %v16114_v34, %v8149_v60  ;;  %v8822_v28 = vmul.f32 %v14965_v23, %v8818_v20  ;;  %v16119_v39 = vld [vmem:[#allocation33_spill] sm:$0xff]  ;;  %v16120_v60 = vld [vmem:[#allocation32_spill] sm:$0xff]  ;;  %v16126_v2 = vld [vmem:[#allocation35_spill] sm:$0xff] }
 0x4f1   : > { %v15436_v1 = vadd.f32 %v9358_v14, %v16112_v58  ;;  %v8740_v63 = vadd.f32 %v8738_v32, %v8652_v59  ;;  %v8251_v50 = vadd.f32 %v16115_v12, %v8237_v56  ;;  %v8325_v0 = vadd.f32 %v16116_v42, %v15182_v37  ;;  %v15452_v14 = vpop.permute.xlu0 %10010  ;;  %v16121_v32 = vld [vmem:[#allocation44_spill] sm:$0xff]  ;;  %v16123_v37 = vld [vmem:[#allocation53_spill] sm:$0xff] }
 0x4f2   : > { %v16117_v45 = vstv %s15262_s28  ;;  %v8013_v6 = vadd.f32 %v16119_v39, %v7999_v7  ;;  %v8089_v59 = vadd.f32 %v16120_v60, %v8075_v54  ;;  %v8177_v23 = vadd.f32 %v16121_v32, %v8163_v17  ;;  %v16127_v12 = vld [vmem:[#allocation36_spill] sm:$0xff]  ;;  %v16128_v7 = vld [vmem:[#allocation45_spill] sm:$0xff]  ;;  %v16129_v54 = vld [vmem:[#allocation79_spill] sm:$0xff] }
 0x4f3   : > { %v15446_v13 = vadd.f32 %v9447_v19, %v16117_v45  ;;  %v16118_v61 = vmov %v16117_v45  ;;  %v15457_v20 = vadd.f32 %v8822_v28, %v8740_v63  ;;  %v7945_v27 = vadd.f32 %v16122_v62, %v7931_v53  ;;  %v16124_v19 = vld [vmem:[#allocation61_spill] sm:$0xff]  ;;  %v16130_v63 = vld [vmem:[#allocation55_spill] sm:$0xff] }
 0x4f4   : > { %v15450_v10 = vadd.f32 %v9446_v41, %v16118_v61  ;;  %v8265_v48 = vadd.f32 %v16123_v37, %v8251_v50  ;;  %v8339_v56 = vadd.f32 %v16124_v19, %v8325_v0  ;;  %v16125_v41 = vld [vmem:[#allocation69_spill] sm:$0xff]  ;;  %v8027_v34 = vadd.f32 %v16126_v2, %v8013_v6  ;;  %v16131_v61 = vld [vmem:[#allocation63_spill] sm:$0xff]  ;;  %v16134_v6 = vld [vmem:[#allocation40_spill] sm:$0xff] }
 0x4f5   : > { %v8409_v58 = vadd.f32 %v16125_v41, %v15197_v49  ;;  %v8103_v42 = vadd.f32 %v16127_v12, %v8089_v59  ;;  %v8191_v45 = vadd.f32 %v16128_v7, %v8177_v23  ;;  %v8499_v17 = vadd.f32 %v16129_v54, %v15208_v18  ;;  %v16132_v39 = vld [vmem:[#allocation71_spill] sm:$0xff]  ;;  %v16133_v0 = vld [vmem:[#allocation89_spill] sm:$0xff]  ;;  %v15474_v32 = vpop.permute.xlu0 %9950  ;;  %v8121_v49 = vpop.permute.xlu1 %8120 }
 0x4f6   : > { %v8279_v28 = vadd.f32 %v16130_v63, %v8265_v48  ;;  %v8353_v53 = vadd.f32 %v16131_v61, %v8339_v56  ;;  %v8587_v60 = vadd.f32 %v16133_v0, %v15221_v40  ;;  %v16135_v59 = vld [vmem:[#allocation47_spill] sm:$0xff]  ;;  %v16136_v23 = vld [vmem:[#allocation81_spill] sm:$0xff]  ;;  %v8037_v41 = vmul.f32 %v8033_v8, %v8027_v34 }
 0x4f7   : > { %v8423_v50 = vadd.f32 %v16132_v39, %v8409_v58  ;;  %v8117_v62 = vadd.f32 %v16134_v6, %v8103_v42  ;;  %v8205_v37 = vadd.f32 %v16135_v59, %v8191_v45  ;;  %v8513_v19 = vadd.f32 %v16136_v23, %v8499_v17  ;;  %v16137_v18 = vld [vmem:[#allocation57_spill] sm:$0xff]  ;;  %v16140_v58 = vld [vmem:[#allocation91_spill] sm:$0xff] }
 0x4f8   : > { %v8293_v2 = vadd.f32 %v16137_v18, %v8279_v28  ;;  %v16138_v48 = vld [vmem:[#allocation65_spill] sm:$0xff]  ;;  %v8601_v54 = vadd.f32 %v16140_v58, %v8587_v60  ;;  %v16141_v63 = vld [vmem:[#allocation83_spill] sm:$0xff]  ;;  %v7949_v42 = vmul.f32 %v14941_v57, %v7945_v27  ;;  %v16152_v58 = vld [vmem:[#allocation120_spill] sm:$0xff] }
 0x4f9   : > { %v8367_v12 = vadd.f32 %v16138_v48, %v8353_v53  ;;  %v16139_v56 = vld [vmem:[#allocation73_spill] sm:$0xff]  ;;  %v8527_v40 = vadd.f32 %v16141_v63, %v8513_v19  ;;  %v16142_v61 = vld [vmem:[#allocation99_spill] sm:$0xff]  ;;  %v8125_v0 = vmul.f32 %v8121_v49, %v8117_v62  ;;  %v8209_v60 = vpop.permute.xlu1 %8208 }
 0x4fa   : > { %v8437_v7 = vadd.f32 %v16139_v56, %v8423_v50  ;;  %v8675_v39 = vadd.f32 %v16142_v61, %v15267_v25  ;;  %v16143_v45 = vld [vmem:[#allocation67_spill] sm:$0xff]  ;;  %v16145_v34 = vld [vmem:[#allocation93_spill] sm:$0xff]  ;;  %v15492_v50 = vpop.permute.xlu0 %10024  ;;  %v8039_v25 = vadd.f32 %v8037_v41, %v7949_v42  ;;  %v8213_v56 = vmul.f32 %v8209_v60, %v8205_v37 }
 0x4fb   : > { %v8381_v6 = vadd.f32 %v16143_v45, %v8367_v12  ;;  %v16144_v17 = vld [vmem:[#allocation75_spill] sm:$0xff]  ;;  %v8615_v28 = vadd.f32 %v16145_v34, %v8601_v54  ;;  %v16146_v53 = vld [vmem:[#allocation109_spill] sm:$0xff]  ;;  %v8846_v54 = vadd.f32 %v16152_v58, %v15298_v33 }
 0x4fc   : > { %v8451_v8 = vadd.f32 %v16144_v17, %v8437_v7  ;;  %v8763_v59 = vadd.f32 %v16146_v53, %v15273_v31  ;;  %v16147_v23 = vld [vmem:[#allocation85_spill] sm:$0xff]  ;;  %v16149_v57 = vld [vmem:[#allocation95_spill] sm:$0xff]  ;;  %v8127_v34 = vadd.f32 %v8125_v0, %v8039_v25 }
 0x4fd   : > { %v8541_v19 = vadd.f32 %v16147_v23, %v8527_v40  ;;  %v16148_v18 = vld [vmem:[#allocation101_spill] sm:$0xff]  ;;  %v8629_v27 = vadd.f32 %v16149_v57, %v8615_v28  ;;  %v16150_v49 = vld [vmem:[#allocation111_spill] sm:$0xff]  ;;  %v8297_v23 = vpop.permute.xlu1 %8296 }
 0x4fe   : > { %v8689_v48 = vadd.f32 %v16148_v18, %v8675_v39  ;;  %v8777_v62 = vadd.f32 %v16150_v49, %v8763_v59  ;;  %v16151_v12 = vld [vmem:[#allocation119_spill] sm:$0xff]  ;;  %v16153_v31 = vld [vmem:[#allocation77_spill] sm:$0xff]  ;;  %v16159_v59 = vld [vmem:[#allocation122_spill] sm:$0xff]  ;;  %v8215_v57 = vadd.f32 %v8213_v56, %v8127_v34 }
 0x4ff   : > { %v8847_v7 = vadd.f32 %v16151_v12, %v15288_v3  ;;  %v8465_v63 = vadd.f32 %v16153_v31, %v8451_v8  ;;  %v16154_v61 = vld [vmem:[#allocation87_spill] sm:$0xff]  ;;  %v16156_v39 = vld [vmem:[#allocation97_spill] sm:$0xff]  ;;  %v8860_v60 = vadd.f32 %v16159_v59, %v8846_v54  ;;  %v15511_v3 = vpop.permute.xlu0 %10038  ;;  %v16161_v8 = vld [vmem:[#allocation130_spill] sm:$0xff] }
 0x500   : > { %v8555_v45 = vadd.f32 %v16154_v61, %v8541_v19  ;;  %v16155_v17 = vld [vmem:[#allocation103_spill] sm:$0xff]  ;;  %v15506_v41 = vadd.f32 %v16156_v39, %v8629_v27  ;;  %v16157_v37 = vld [vmem:[#allocation113_spill] sm:$0xff]  ;;  %v8936_v19 = vadd.f32 %v16161_v8, %v15336_v22  ;;  %v16164_v12 = vld [vmem:[#allocation124_spill] sm:$0xff]  ;;  %v8385_v39 = vmul.f32 %v14963_v11, %v8381_v6 }
 0x501   : > { %v8703_v40 = vadd.f32 %v16155_v17, %v8689_v48  ;;  %v8791_v42 = vadd.f32 %v16157_v37, %v8777_v62  ;;  %v16158_v28 = vld [vmem:[#allocation121_spill] sm:$0xff]  ;;  %v8301_v48 = vmul.f32 %v8297_v23, %v8293_v2  ;;  %v16162_v0 = vld [vmem:[#allocation115_spill] sm:$0xff]  ;;  %v8874_v62 = vadd.f32 %v16164_v12, %v8860_v60  ;;  %v16166_v54 = vld [vmem:[#allocation132_spill] sm:$0xff] }
 0x502   : > { %v8861_v53 = vadd.f32 %v16158_v28, %v8847_v7  ;;  %v16160_v33 = vld [vmem:[#allocation105_spill] sm:$0xff]  ;;  %v16163_v27 = vld [vmem:[#allocation123_spill] sm:$0xff]  ;;  %v8950_v31 = vadd.f32 %v16166_v54, %v8936_v19  ;;  %v16167_v61 = vld [vmem:[#allocation140_spill] sm:$0xff] }
 0x503   : > { %v8717_v18 = vadd.f32 %v16160_v33, %v8703_v40  ;;  %v8805_v25 = vadd.f32 %v16162_v0, %v8791_v42  ;;  %v16165_v7 = vld [vmem:[#allocation129_spill] sm:$0xff]  ;;  %v9024_v17 = vadd.f32 %v16167_v61, %v15345_v5  ;;  %v8303_v40 = vadd.f32 %v8301_v48, %v8215_v57  ;;  %v16168_v22 = vld [vmem:[#allocation107_spill] sm:$0xff]  ;;  %v16171_v28 = vld [vmem:[#allocation126_spill] sm:$0xff]  ;;  %v8907_v59 = vpop.permute.xlu0 %8906 }
 0x504   : > { %v8875_v49 = vadd.f32 %v16163_v27, %v8861_v53  ;;  %v8937_v58 = vadd.f32 %v16165_v7, %v15326_v21  ;;  %v16169_v2 = vld [vmem:[#allocation117_spill] sm:$0xff]  ;;  %v8888_v53 = vadd.f32 %v16171_v28, %v8874_v62  ;;  %v8471_v21 = vpop.permute.xlu1 %8470  ;;  %v16172_v60 = vld [vmem:[#allocation131_spill] sm:$0xff]  ;;  %v16173_v33 = vld [vmem:[#allocation134_spill] sm:$0xff] }
 0x505   : > { %v15526_v56 = vadd.f32 %v16168_v22, %v8717_v18  ;;  %v15529_v34 = vadd.f32 %v16169_v2, %v8805_v25  ;;  %v16170_v37 = vld [vmem:[#allocation125_spill] sm:$0xff]  ;;  %v8964_v8 = vadd.f32 %v16173_v33, %v8950_v31  ;;  %v16174_v5 = vld [vmem:[#allocation142_spill] sm:$0xff]  ;;  %v8387_v57 = vadd.f32 %v8385_v39, %v8303_v40  ;;  %v16175_v11 = vld [vmem:[#allocation127_spill] sm:$0xff] }
 0x506   : > { %v8889_v42 = vadd.f32 %v16170_v37, %v8875_v49  ;;  %v8951_v23 = vadd.f32 %v16172_v60, %v8937_v58  ;;  %v9038_v19 = vadd.f32 %v16174_v5, %v9024_v17  ;;  %v16176_v18 = vld [vmem:[#allocation139_spill] sm:$0xff]  ;;  %v16177_v0 = vld [vmem:[#allocation149_spill] sm:$0xff]  ;;  %v16178_v27 = vld [vmem:[#allocation150_spill] sm:$0xff] }
 0x507   : > { %v9025_v48 = vadd.f32 %v16176_v18, %v15341_v24  ;;  %v9113_v25 = vadd.f32 %v16177_v0, %v15355_v46  ;;  %v9112_v49 = vadd.f32 %v16178_v27, %v15376_v35  ;;  %v16179_v12 = vld [vmem:[#allocation128_spill] sm:$0xff]  ;;  %v16180_v7 = vld [vmem:[#allocation133_spill] sm:$0xff]  ;;  %v16184_v22 = vld [vmem:[#allocation151_spill] sm:$0xff]  ;;  %v8995_v28 = vpop.permute.xlu0 %8994 }
 0x508   : > { %v15537_v6 = vadd.f32 %v16175_v11, %v8889_v42  ;;  %v8902_v62 = vadd.f32 %v16179_v12, %v8888_v53  ;;  %v8965_v58 = vadd.f32 %v16180_v7, %v8951_v23  ;;  %v16181_v54 = vld [vmem:[#allocation136_spill] sm:$0xff]  ;;  %v16183_v40 = vld [vmem:[#allocation141_spill] sm:$0xff]  ;;  %v8559_v60 = vpop.permute.xlu1 %8558  ;;  %v16187_v35 = vld [vmem:[#allocation138_spill] sm:$0xff]  ;;  %v8475_v11 = vmul.f32 %v8471_v21, %v8465_v63 }
 0x509   : > { %v8978_v31 = vadd.f32 %v16181_v54, %v8964_v8  ;;  %v16182_v61 = vld [vmem:[#allocation144_spill] sm:$0xff]  ;;  %v9039_v39 = vadd.f32 %v16183_v40, %v9025_v48  ;;  %v9127_v2 = vadd.f32 %v16184_v22, %v9113_v25  ;;  %v16188_v53 = vld [vmem:[#allocation146_spill] sm:$0xff]  ;;  %v16189_v8 = vld [vmem:[#allocation143_spill] sm:$0xff]  ;;  %v8563_v40 = vmul.f32 %v8559_v60, %v8555_v45 }
 0x50a   : > { %v9052_v17 = vadd.f32 %v16182_v61, %v9038_v19  ;;  %v16185_v37 = vld [vmem:[#allocation152_spill] sm:$0xff]  ;;  %v8912_v23 = vmul.f32 %v8907_v59, %v8902_v62  ;;  %v16190_v19 = vld [vmem:[#allocation153_spill] sm:$0xff]  ;;  %v16191_v48 = vld [vmem:[#allocation154_spill] sm:$0xff] }
 0x50b   : > { %v9126_v24 = vadd.f32 %v16185_v37, %v9112_v49  ;;  %v16186_v42 = vld [vmem:[#allocation160_spill] sm:$0xff]  ;;  %v8992_v33 = vadd.f32 %v16187_v35, %v8978_v31  ;;  %v9053_v18 = vadd.f32 %v16189_v8, %v9039_v39  ;;  %v9141_v0 = vadd.f32 %v16190_v19, %v9127_v2  ;;  %v16192_v25 = vld [vmem:[#allocation162_spill] sm:$0xff]  ;;  %v16193_v49 = vld [vmem:[#allocation135_spill] sm:$0xff]  ;;  %v9083_v39 = vpop.permute.xlu0 %9082 }
 0x50c   : > { %v9200_v46 = vadd.f32 %v16186_v42, %v15394_v43  ;;  %v9066_v5 = vadd.f32 %v16188_v53, %v9052_v17  ;;  %v8979_v7 = vadd.f32 %v16193_v49, %v8965_v58  ;;  %v16194_v54 = vld [vmem:[#allocation148_spill] sm:$0xff]  ;;  %v16195_v22 = vld [vmem:[#allocation145_spill] sm:$0xff]  ;;  %v16196_v37 = vld [vmem:[#allocation155_spill] sm:$0xff]  ;;  %v8647_v2 = vpop.permute.xlu1 %8646  ;;  %v8477_v42 = vadd.f32 %v8475_v11, %v8387_v57 }
 0x50d   : > { %v9140_v27 = vadd.f32 %v16191_v48, %v9126_v24  ;;  %v9000_v61 = vmul.f32 %v8995_v28, %v8992_v33  ;;  %v9067_v31 = vadd.f32 %v16195_v22, %v9053_v18  ;;  %v9155_v17 = vadd.f32 %v16196_v37, %v9141_v0  ;;  %v16197_v59 = vld [vmem:[#allocation156_spill] sm:$0xff]  ;;  %v16199_v35 = vld [vmem:[#allocation137_spill] sm:$0xff]  ;;  %v16200_v28 = vld [vmem:[#allocation147_spill] sm:$0xff] }
 0x50e   : > { %v9214_v12 = vadd.f32 %v16192_v25, %v9200_v46  ;;  %v9080_v43 = vadd.f32 %v16194_v54, %v9066_v5  ;;  %v16198_v21 = vld [vmem:[#allocation164_spill] sm:$0xff]  ;;  %v8914_v24 = vadd.f32 %v8912_v23, %v15457_v20  ;;  %v8651_v58 = vmul.f32 %v8647_v2, %v15506_v41  ;;  %v16201_v5 = vld [vmem:[#allocation157_spill] sm:$0xff]  ;;  %v16202_v18 = vld [vmem:[#allocation158_spill] sm:$0xff] }
 0x50f   : > { %v9154_v63 = vadd.f32 %v16197_v59, %v9140_v27  ;;  %v8993_v53 = vadd.f32 %v16199_v35, %v8979_v7  ;;  %v9081_v45 = vadd.f32 %v16200_v28, %v9067_v31  ;;  %v9284_v33 = vadd.f32 %v14719_v38, %v15408_v4  ;;  %v16203_v20 = vld [vmem:[#allocation159_spill] sm:$0xff]  ;;  %v16204_v49 = vld [vmem:[#allocation161_spill] sm:$0xff]  ;;  %v16216_v28 = vld [vmem:[#allocation186_spill] sm:$0xff] }
 0x510   : > { %v9228_v62 = vadd.f32 %v16198_v21, %v9214_v12  ;;  %v9088_v46 = vmul.f32 %v9083_v39, %v9080_v43  ;;  %v9169_v8 = vadd.f32 %v16201_v5, %v9155_v17  ;;  %v9002_v0 = vadd.f32 %v9000_v61, %v8914_v24  ;;  %v8735_v27 = vpop.permute.xlu1 %8734  ;;  %v16205_v61 = vld [vmem:[#allocation163_spill] sm:$0xff]  ;;  %v16212_v39 = vld [vmem:[#allocation168_spill] sm:$0xff] }
 0x511   : > { %v9168_v19 = vadd.f32 %v16202_v18, %v9154_v63  ;;  %v8565_v48 = vadd.f32 %v8563_v40, %v8477_v42  ;;  %v9201_v57 = vadd.f32 %v16203_v20, %v15390_v55  ;;  %v9298_v23 = vadd.f32 %v14736_v29, %v9284_v33  ;;  %v16207_v31 = vld [vmem:[#allocation171_spill] sm:$0xff]  ;;  %v16210_v63 = vld [vmem:[#allocation209_spill] sm:$0xff]  ;;  %v16220_v20 = vld [vmem:[#allocation181_spill] sm:$0xff] }
 0x512   : > { %v9242_v60 = vadd.f32 %v14678_v51, %v9228_v62  ;;  %v9374_v11 = vadd.f32 %v14788_v15, %v15436_v1  ;;  %v9171_v51 = vpop.permute.xlu0 %9170  ;;  %v9090_v25 = vadd.f32 %v9088_v46, %v9002_v0  ;;  %v8739_v12 = vmul.f32 %v8735_v27, %v15526_v56  ;;  %v16206_v56 = vld [vmem:[#allocation167_spill] sm:$0xff] }
 0x513   : > { %v8653_v38 = vadd.f32 %v8651_v58, %v8565_v48  ;;  %v9176_v4 = vmul.f32 %v9171_v51, %v9168_v19  ;;  %v9215_v7 = vadd.f32 %v16204_v49, %v9201_v57  ;;  %v9312_v54 = vadd.f32 %v14752_v52, %v9298_v23  ;;  %v16208_v52 = vld [vmem:[#allocation177_spill] sm:$0xff]  ;;  %v16214_v42 = vld [vmem:[#allocation179_spill] sm:$0xff]  ;;  %v16222_v51 = vld [vmem:[#allocation188_spill] sm:$0xff] }
 0x514   : > { %v9256_v41 = vadd.f32 %v14698_v47, %v9242_v60  ;;  %v9388_v55 = vadd.f32 %v14799_v16, %v9374_v11  ;;  %v9462_v47 = vadd.f32 %v14830_v44, %v15450_v10  ;;  %v8823_v15 = vmul.f32 %v14884_v30, %v15529_v34  ;;  %v15595_v59 = vpop.permute.xlu1 %9938  ;;  %v16209_v44 = vld [vmem:[#allocation184_spill] sm:$0xff]  ;;  %v16215_v58 = vld [vmem:[#allocation173_spill] sm:$0xff]  ;;  %v16217_v33 = vld [vmem:[#allocation210_spill] sm:$0xff] }
 0x515   : > { %v9178_v29 = vadd.f32 %v9176_v4, %v9090_v25  ;;  %v8741_v1 = vadd.f32 %v8739_v12, %v8653_v38  ;;  %v9229_v40 = vadd.f32 %v16205_v61, %v9215_v7  ;;  %v9285_v22 = vadd.f32 %v16206_v56, %v15398_v26  ;;  %v16213_v26 = vld [vmem:[#allocation174_spill] sm:$0xff]  ;;  %v16218_v19 = vld [vmem:[#allocation169_spill] sm:$0xff]  ;;  %v16219_v0 = vld [vmem:[#allocation175_spill] sm:$0xff] }
 0x516   : > { %v9260_v43 = vmul.f32 %v14986_v36, %v9256_v41  ;;  %v9326_v37 = vadd.f32 %v16207_v31, %v9312_v54  ;;  %v9402_v17 = vadd.f32 %v16208_v52, %v9388_v55  ;;  %v9345_v16 = vpop.permute.xlu0 %9344  ;;  %v9476_v10 = vadd.f32 %v16209_v44, %v9462_v47  ;;  %v16211_v36 = vld [vmem:[#allocation165_spill] sm:$0xff]  ;;  %v16221_v41 = vld [vmem:[#allocation182_spill] sm:$0xff]  ;;  %v16226_v55 = vld [vmem:[#allocation176_spill] sm:$0xff] }
 0x517   : > { %v8913_v30 = vmul.f32 %v16210_v63, %v15537_v6  ;;  %v8825_v34 = vadd.f32 %v8823_v15, %v8741_v1  ;;  %v9243_v62 = vadd.f32 %v16211_v36, %v9229_v40  ;;  %v9299_v2 = vadd.f32 %v16212_v39, %v9285_v22  ;;  %v16223_v25 = vld [vmem:[#allocation37_spill] sm:$0xff]  ;;  %v16224_v49 = vld [vmem:[#allocation166_spill] sm:$0xff]  ;;  %v16230_v22 = vld [vmem:[#allocation172_spill] sm:$0xff] }
 0x518   : > { %v9262_v21 = vadd.f32 %v9260_v43, %v9178_v29  ;;  %v9375_v24 = vadd.f32 %v16213_v26, %v15412_v9  ;;  %v9416_v46 = vadd.f32 %v16214_v42, %v9402_v17  ;;  %v9340_v35 = vadd.f32 %v16215_v58, %v9326_v37  ;;  %v10013_v9 = vpop.permute.xlu1 %10012  ;;  %v16225_v7 = vld [vmem:[#allocation170_spill] sm:$0xff]  ;;  %v16227_v29 = vld [vmem:[#allocation183_spill] sm:$0xff]  ;;  %v16232_v52 = vld [vmem:[#allocation185_spill] sm:$0xff] }
 0x519   : > { %v9490_v60 = vadd.f32 %v16216_v28, %v9476_v10  ;;  %v9001_v5 = vmul.f32 %v16217_v33, %v8993_v53  ;;  %v8915_v18 = vadd.f32 %v8913_v30, %v8825_v34  ;;  %v9313_v6 = vadd.f32 %v16218_v19, %v9299_v2  ;;  %v16228_v1 = vld [vmem:[#allocation190_spill] sm:$0xff]  ;;  %v16234_v2 = vld [vmem:[#allocation180_spill] sm:$0xff]  ;;  %v16236_v58 = vld [vmem:[#allocation189_spill] sm:$0xff] }
 0x51a   : > { %v9389_v48 = vadd.f32 %v16219_v0, %v9375_v24  ;;  %v9430_v57 = vadd.f32 %v16220_v20, %v9416_v46  ;;  %v9463_v23 = vadd.f32 %v16221_v41, %v15446_v13  ;;  %v9433_v11 = vpop.permute.xlu0 %9432  ;;  %v9089_v38 = vmul.f32 %v16223_v25, %v9081_v45  ;;  %v16229_v61 = vld [vmem:[#allocation38_spill] sm:$0xff]  ;;  %v16242_v25 = vld [vmem:[#allocation191_spill] sm:$0xff] }
 0x51b   : > { %v9504_v27 = vadd.f32 %v16222_v51, %v9490_v60  ;;  %v9003_v4 = vadd.f32 %v9001_v5, %v8915_v18  ;;  %v9350_v12 = vmul.f32 %v9345_v16, %v9340_v35  ;;  %v9257_v53 = vadd.f32 %v16224_v49, %v9243_v62  ;;  %v16231_v37 = vld [vmem:[#allocation178_spill] sm:$0xff]  ;;  %v16233_v62 = vld [vmem:[#allocation187_spill] sm:$0xff] }
 0x51c   : > { %v9327_v54 = vadd.f32 %v16225_v7, %v9313_v6  ;;  %v9403_v47 = vadd.f32 %v16226_v55, %v9389_v48  ;;  %v9477_v15 = vadd.f32 %v16227_v29, %v9463_v23  ;;  %v9177_v13 = vmul.f32 %v16229_v61, %v9169_v8  ;;  %v9873_v44 = vpop.permute.xlu1 %9872  ;;  %v11710_v10 = vld [vmem:[#allocation2 + $0xb] sm:$0xff]  ;;  %v16238_v6 = vld [vmem:[#allocation192_spill] sm:$0xff]  ;;  %v16241_v23 = vld [vmem:[#allocation203_spill] sm:$0xff] }
 0x51d   : > { %v9518_v43 = vadd.f32 %v16228_v1, %v9504_v27  ;;  %v9091_v40 = vadd.f32 %v9089_v38, %v9003_v4  ;;  %v9438_v56 = vmul.f32 %v9433_v11, %v9430_v57  ;;  %v9261_v63 = vmul.f32 %v11710_v10, %v9257_v53  ;;  %v16235_v8 = vld [vmem:[#allocation50_spill] sm:$0xff]  ;;  %v16243_v38 = vld [vmem:[#allocation41_spill] sm:$0xff]  ;;  %v16244_v53 = vld [vmem:[#allocation196_spill] sm:$0xff] }
 0x51e   : > { %v9341_v31 = vadd.f32 %v16230_v22, %v9327_v54  ;;  %v9417_v45 = vadd.f32 %v16231_v37, %v9403_v47  ;;  %v9491_v17 = vadd.f32 %v16232_v52, %v9477_v15  ;;  %v9521_v16 = vpop.permute.xlu0 %9520  ;;  %v9352_v34 = vadd.f32 %v9350_v12, %v9262_v21  ;;  %v16237_v33 = vld [vmem:[#allocation34_spill] sm:$0xff]  ;;  %v16245_v47 = vld [vmem:[#allocation193_spill] sm:$0xff]  ;;  %v16250_v37 = vld [vmem:[#allocation195_spill] sm:$0xff] }
 0x51f   : > { %v9179_v30 = vadd.f32 %v9177_v13, %v9091_v40  ;;  %v9526_v36 = vmul.f32 %v9521_v16, %v9518_v43  ;;  %v16239_v21 = vld [vmem:[#allocation46_spill] sm:$0xff]  ;;  %v9615_v4 = vmul.f32 %v16243_v38, %v16242_v25  ;;  %v16246_v1 = vld [vmem:[#allocation197_spill] sm:$0xff]  ;;  %v16249_v40 = vld [vmem:[#allocation207_spill] sm:$0xff] }
 0x520   : > { %v9505_v39 = vadd.f32 %v16233_v62, %v9491_v17  ;;  %v9431_v26 = vadd.f32 %v16234_v2, %v9417_v45  ;;  %v9351_v24 = vmul.f32 %v16235_v8, %v9341_v31  ;;  %v9440_v46 = vadd.f32 %v9438_v56, %v9352_v34  ;;  %v9953_v60 = vpop.permute.xlu1 %9952  ;;  %v16240_v41 = vld [vmem:[#allocation194_spill] sm:$0xff]  ;;  %v16247_v43 = vld [vmem:[#allocation208_spill] sm:$0xff]  ;;  %v16251_v45 = vld [vmem:[#allocation52_spill] sm:$0xff] }
 0x521   : > { %v9263_v42 = vadd.f32 %v9261_v63, %v9179_v30  ;;  %v9698_v11 = vmul.f32 %v16241_v23, %v16240_v41  ;;  %v11711_v55 = vld [vmem:[#allocation2 + $0xc] sm:$0xff]  ;;  %v9942_v61 = vadd.f32 %v16247_v43, %v16246_v1  ;;  %v9789_v52 = vmul.f32 %v16251_v45, %v16250_v37  ;;  %v16252_v17 = vld [vmem:[#allocation200_spill] sm:$0xff]  ;;  %v16254_v34 = vld [vmem:[#allocation199_spill] sm:$0xff] }
 0x522   : > { %v9519_v35 = vadd.f32 %v16236_v58, %v9505_v39  ;;  %v9609_v28 = vpop.permute.xlu0 %9608  ;;  %v9439_v5 = vmul.f32 %v16237_v33, %v9431_v26  ;;  %v9528_v18 = vadd.f32 %v9526_v36, %v9440_v46  ;;  %v9699_v29 = vmul.f32 %v11711_v55, %v16245_v47  ;;  %v16248_v13 = vld [vmem:[#allocation198_spill] sm:$0xff]  ;;  %v16253_v63 = vld [vmem:[#allocation201_spill] sm:$0xff] }
 0x523   : > { %v9353_v19 = vadd.f32 %v9351_v24, %v9263_v42  ;;  %v9614_v0 = vmul.f32 %v9609_v28, %v16238_v6  ;;  %v9869_v56 = vadd.f32 %v16249_v40, %v16248_v13  ;;  %v9943_v16 = vadd.f32 %v15595_v59, %v16252_v17  ;;  %v16255_v39 = vld [vmem:[#allocation202_spill] sm:$0xff] }
 0x524   : > { %v9527_v48 = vmul.f32 %v16239_v21, %v9519_v35  ;;  %v10027_v27 = vpop.permute.xlu1 %10026  ;;  %v10016_v36 = vadd.f32 %v15452_v14, %v16254_v34  ;;  %v9956_v62 = vadd.f32 %v15474_v32, %v9942_v61  ;;  %v10017_v2 = vadd.f32 %v10013_v9, %v16255_v39 }
 0x525   : > { %v9441_v20 = vadd.f32 %v9439_v5, %v9353_v19  ;;  %v9616_v57 = vadd.f32 %v9614_v0, %v9528_v18  ;;  %v9877_v8 = vmul.f32 %v9873_v44, %v9869_v56  ;;  %v9957_v24 = vadd.f32 %v9953_v60, %v9943_v16 }
 0x526   : > { %v9783_v51 = vpop.permute.xlu0 %9782  ;;  %v10030_v46 = vadd.f32 %v15492_v50, %v10016_v36  ;;  %v10031_v28 = vadd.f32 %v10027_v27, %v10017_v2 }
 0x527   : > { %v9529_v12 = vadd.f32 %v9527_v48, %v9441_v20  ;;  %v9700_v49 = vadd.f32 %v9698_v11, %v9616_v57  ;;  %v9788_v7 = vmul.f32 %v9783_v51, %v16244_v53 }
 0x528   : > { %v9961_v31 = vpop.permute.xlu1 %9960  ;;  %v10044_v14 = vadd.f32 %v15511_v3, %v10030_v46 }
 0x529   : > { %v9617_v54 = vadd.f32 %v9615_v4, %v9529_v12  ;;  %v9790_v15 = vadd.f32 %v9788_v7, %v9700_v49  ;;  %v9965_v33 = vmul.f32 %v9961_v31, %v9957_v24 }
 0x52a   : > { %v9871_v22 = vpop.permute.xlu0 %9870 }
 0x52b   : > { %v9701_v10 = vadd.f32 %v9699_v29, %v9617_v54  ;;  %v9876_v30 = vmul.f32 %v9871_v22, %v16253_v63 }
 0x52c   : > { %v10041_v35 = vpop.permute.xlu1 %10040 }
 0x52d   : > { %v9791_v26 = vadd.f32 %v9789_v52, %v9701_v10  ;;  %v9878_v42 = vadd.f32 %v9876_v30, %v9790_v15  ;;  %v10045_v9 = vadd.f32 %v10041_v35, %v10031_v28 }
 0x52e   : > { %v9959_v58 = vpop.permute.xlu0 %9958 }
 0x52f   : > { %v9879_v59 = vadd.f32 %v9877_v8, %v9791_v26  ;;  %v9964_v5 = vmul.f32 %v9959_v58, %v9956_v62 }
 0x530   : > { %v10049_v60 = vpop.permute.xlu1 %10048 }
 0x531   : > { %v9967_v32 = vadd.f32 %v9965_v33, %v9879_v59  ;;  %v9966_v18 = vadd.f32 %v9964_v5, %v9878_v42  ;;  %v10053_v19 = vmul.f32 %v10049_v60, %v10045_v9 }
 0x532   : > { %v10047_v44 = vpop.permute.xlu0 %10046 }
 0x533   : > { %v10052_v50 = vmul.f32 %v10047_v44, %v10044_v14  ;;  %v10055_v0 = vadd.f32 %v10053_v19, %v9967_v32 }
 0x535   : > { %v10054_v6 = vadd.f32 %v10052_v50, %v9966_v18  ;;  %10057 = vst.msk [vmem:[%s371_s26 + $0x8] sm:$0xff] %vm5181_vm11, %v10055_v0 }
 0x537   : > { %10056 = vst.msk [vmem:[%s371_s26] sm:$0xff] %vm5181_vm11, %v10054_v6 }
 0x538   : > { %11781 = shalt.err (!%p11778_p2)
}
 0x539   : > { %s11782_s16 = scalar_lea.hbm %s15661_s20, 256  ;;  %s11786_s15 = scalar_lea.hbm %s16259_s13, 512 }
 0x53a   : > { %p11783_p3 = scmp.ne.s32.totalorder %s15661_s20, %s11782_s16  ;;  %p11787_p5 = scmp.lt.s32.totalorder %s15661_s20, %s16259_s13 }
 0x53b   : > { %p11788_p6 = scmp.lt.s32.totalorder %s11786_s15, %s11782_s16 }
 0x53c   : > { %p11784_p4 = pnand %p11783_p3, %p16005_p12 }
 0x53d   : > { %p11789_p10 = por %p11788_p6, %p11787_p5 }
 0x53e   : > { %p11785_p9 = pneg %p11784_p4 }
 0x540   : > { %p11790_p0 = pnand %p11789_p10, %p11785_p9 }
 0x542   : > { %11793 = shalt.err (!%p11790_p0)
}
 0x543   : > { %s16260_s1 = smov 8   ;;  %s16261_s2 = smov 128  }
 0x544   : > { %11639 = dma.vmem_to_hbm [thread:$0]  (%p16005_p12), %s15654_s14, 256, %s15661_s20, %s10059_s30, %s16261_s2, %s16261_s2, %s16260_s1  }
 0x545 PF: > { %s16262_s3 = sld [smem:[#allocation18_spill]] }
 0x546   : > { %s16263_s6 = sld [smem:[#allocation15_spill]] }
 0x547   : > { %s16264_s21 = sld [smem:[#allocation22_spill]] }
 0x54b   : > { %p11661_p7 = scmp.ge.s32.totalorder %s16262_s3, 2 }
 0x54c   : > { %s10108_s18 = sand.u32 1, %s16263_s6  }
 0x54d   : > { %p16265_p8 = scmp.ne.s32.totalorder %s16264_s21, 0  ;;  %s10109_s24 = scalar_lea.sflag [#allocation4], %s10108_s18 }
 0x54f   : > { %p11651_p11 = pnand %p11661_p7, %p16265_p8 }
 0x551   : > { %p11652_p13 = pneg %p11651_p11 }
 0x553   : > { %11819 = dma.done.wait (%p11652_p13), %s10109_s24, 256  }
 0x554   : > { %11821 = vsyncadd (%p11652_p13), %s10109_s24, 4294967040  ;;  %s10118_s28 = scalar_lea.sflag [#allocation10], %s10108_s18 }
 0x555   : > { %11823 = dma.done.wait (%p11652_p13), %s10118_s28, 256  }
 0x556   : > { %11825 = vsyncadd (%p11652_p13), %s10118_s28, 4294967040  ;;  %s16266_s12 = sld [smem:[#allocation20_spill]] }
 0x557   : > { %s16267_s30 = sld [smem:[#allocation16_spill]] }
 0x558   : > { %s16268_s10 = sld [smem:[#allocation17_spill]] }
 0x559   : > { %s16269_s11 = sld [smem:[#allocation21_spill]] }
 0x55c   : > { %p25_p12 = scmp.ge.s32.totalorder %s16266_s12, 4  }
 0x55e   :  { %27 = sbr.rel (!%p25_p12) target bundleno = 17 (0x11), region = 128 }
 0x563   :  { %10123 = vsyncpa [#allocation4], 1 }
 0x564   :  { %10125 = vsyncpa [#allocation4 + $0x1], 1 }
 0x565   :  { %10126 = vsyncpa [#allocation10], 1 }
 0x566   :  { %10128 = vsyncpa [#allocation10 + $0x1], 1 }
 0x567   :  { %10129 = vsyncpa [#allocation5], 1 }
 0x568   :  { %10131 = vsyncpa [#allocation5 + $0x1], 1 }
 0x569   :  { %10132 = vsyncpa [#allocation7], 1 }

</bundles_post_ra>
